<compile_context>
chip_gen: v7x
topology: tpu7x:2x2x1
jax: 0.10.0
libtpu: 0.0.40
codegen_flags: <defaults>
</compile_context>

<pallas_src>
import functools
import math

import numpy as np
import jax
import jax.numpy as jnp
from jax import lax
from jax.experimental import pallas as pl

EPS = 1e-5


# ----------------------------------------------------------------------------
# Kernel 1: generic fused layer   o = act(BN(A @ W_bd + bias))
#   A is either a row-grouped im2col matrix (plain conv) or the 4-phase
#   concatenation of a ConvTranspose(k=4,s=2,p=1) decomposition; in both cases
#   the output is a lane-dense (rows, 128) slab and BN stats are pooled over
#   rows AND the 4 lane blocks with the constant POOL matrix.
# ----------------------------------------------------------------------------
def _layer_kernel(*refs, bn, act, pre_relu, eps):
    if bn:
        a_ref, w_ref, b_ref, pool_ref, g_ref, be_ref, o_ref = refs
    else:
        a_ref, w_ref, b_ref, o_ref = refs

    a = a_ref[...]
    if pre_relu:
        # relu commutes with the zero-padded window gather (relu(0) == 0)
        a = jnp.maximum(a, 0.0)
    y = jnp.dot(a, w_ref[...], preferred_element_type=jnp.float32) + b_ref[...]

    if bn:
        pool = pool_ref[...]                              # (N, Nc), N = nblk*Nc
        nblk = pool.shape[0] // pool.shape[1]
        count = float(y.shape[0] * nblk)
        # per-channel sums pooled over rows and lane blocks (single pass, f32)
        psum = jnp.sum(jnp.dot(y, pool, preferred_element_type=jnp.float32),
                       axis=0, keepdims=True)             # (1, Nc)
        psq = jnp.sum(jnp.dot(y * y, pool, preferred_element_type=jnp.float32),
                      axis=0, keepdims=True)              # (1, Nc)
        mean_c = psum / count
        var_c = jnp.maximum(psq / count - mean_c * mean_c, 0.0)
        scale_c = lax.rsqrt(var_c + eps) * g_ref[...]
        shift_c = be_ref[...] - mean_c * scale_c
        # expand per-channel (1, Nc) scale/shift back to the (1, N) lane layout
        expand = lambda v: lax.dot_general(v, pool, (((1,), (1,)), ((), ())),
                                           preferred_element_type=jnp.float32)
        y = y * expand(scale_c) + expand(shift_c)

    if act == "relu":
        y = jnp.maximum(y, 0.0)
    elif act == "tanh":
        y = jnp.tanh(y)
    o_ref[...] = y.astype(o_ref.dtype)


# ----------------------------------------------------------------------------
# Kernel 2: fused bottleneck stage
#   enc conv3 (matmul on prebuilt im2col) -> ResBlock x2 -> VQ -> ResBlock x2.
#   3x3 convs use a constant (9M, M) 0/1 gather matrix P_v; all slices are
#   static and sublane-aligned.
# ----------------------------------------------------------------------------
def _bottleneck_kernel(a3_ref, w3_ref, b3_ref, pv_ref, emb_ref, esq_ref,
                       *rest, eps):
    rb = rest[:32]                                  # 4 resblocks x 8 params
    ze_ref, zq_ref, d_ref = rest[32:]
    M, C = ze_ref.shape
    pv = pv_ref[...]                                # (9M, M)

    def resblock(x, base):
        w3x3 = rb[base + 0][...]                    # (9C, C), tap-major rows
        b1, g1, bb1 = rb[base + 1][...], rb[base + 2][...], rb[base + 3][...]
        w1x1 = rb[base + 4][...]                    # (C, C)
        b2, g2, bb2 = rb[base + 5][...], rb[base + 6][...], rb[base + 7][...]

        h = jnp.maximum(x, 0.0)                     # inplace-ReLU semantics: residual = relu(x)
        # conv3x3(pad=1): gather all 9 shifted copies with ONE constant matmul,
        # then 9 small tap matmuls on static sublane-aligned slices.
        s = jnp.dot(pv, h, preferred_element_type=jnp.float32)        # (9M, C)
        t = jnp.dot(s[0:M, :], w3x3[0:C, :], preferred_element_type=jnp.float32)
        for tap in range(1, 9):
            t = t + jnp.dot(s[tap * M:(tap + 1) * M, :],
                            w3x3[tap * C:(tap + 1) * C, :],
                            preferred_element_type=jnp.float32)
        t = t + b1
        mean = jnp.sum(t, axis=0, keepdims=True) / M
        var = jnp.maximum(jnp.sum(t * t, axis=0, keepdims=True) / M - mean * mean, 0.0)
        t = (t - mean) * lax.rsqrt(var + eps) * g1 + bb1
        t = jnp.maximum(t, 0.0)
        t = jnp.dot(t, w1x1, preferred_element_type=jnp.float32) + b2
        mean = jnp.sum(t, axis=0, keepdims=True) / M
        var = jnp.maximum(jnp.sum(t * t, axis=0, keepdims=True) / M - mean * mean, 0.0)
        t = (t - mean) * lax.rsqrt(var + eps) * g2 + bb2
        return h + t

    # encoder conv3 (k=4, s=2, p=1; no BN, no activation)
    x = jnp.dot(a3_ref[...], w3_ref[...], preferred_element_type=jnp.float32) + b3_ref[...]
    x = resblock(x, 0)
    x = resblock(x, 8)
    ze_ref[...] = x.astype(ze_ref.dtype)

    # vector quantization (straight-through forward values), all in f32,
    # first-index tie-break to match torch.min.
    e = emb_ref[...]                                 # (K, C)
    dots = lax.dot_general(x, e, (((1,), (1,)), ((), ())),
                           preferred_element_type=jnp.float32)        # (M, K)
    dist = esq_ref[...] - 2.0 * dots                 # ||z||^2 dropped (constant per row)
    min_d = jnp.min(dist, axis=1, keepdims=True)
    K = e.shape[0]
    iota = lax.broadcasted_iota(jnp.int32, dist.shape, 1)
    idx = jnp.min(jnp.where(dist <= min_d, iota, K), axis=1, keepdims=True)
    onehot = (iota == idx).astype(jnp.float32)
    zq = jnp.dot(onehot, e, preferred_element_type=jnp.float32)
    zq_ref[...] = zq.astype(zq_ref.dtype)

    # decoder resblocks
    d = resblock(zq, 16)
    d = resblock(d, 24)
    d_ref[...] = d.astype(d_ref.dtype)


# ----------------------------------------------------------------------------
# pallas_call wrappers + layer glue
# ----------------------------------------------------------------------------
def _fused_layer_call(a, w_bd, bias_t, pool=None, gamma=None, beta=None,
                      act="none", pre_relu=False):
    M = a.shape[0]
    N = w_bd.shape[1]
    bn = gamma is not None
    args = [a, w_bd, bias_t.reshape(1, N)]
    if bn:
        args += [pool, gamma.reshape(1, -1), beta.reshape(1, -1)]
    kernel = functools.partial(_layer_kernel, bn=bn, act=act,
                               pre_relu=pre_relu, eps=EPS)
    return pl.pallas_call(
        kernel,
        out_shape=jax.ShapeDtypeStruct((M, N), jnp.float32),
    )(*args)


def _im2col(x, k, stride, pad):
    B, H, W, C = x.shape
    xp = jnp.pad(x, ((0, 0), (pad, pad), (pad, pad), (0, 0)))
    Hp, Wp = H + 2 * pad, W + 2 * pad
    Ho = (Hp - k) // stride + 1
    Wo = (Wp - k) // stride + 1
    cols = []
    for i in range(k):
        for j in range(k):
            cols.append(xp[:, i:i + (Ho - 1) * stride + 1:stride,
                              j:j + (Wo - 1) * stride + 1:stride, :])
    patches = jnp.stack(cols, axis=3)                # (B, Ho, Wo, k*k, C)
    return patches.reshape(B * Ho * Wo, k * k * C), Ho, Wo


def _block_diag(blocks):
    n = len(blocks)
    cols = blocks[0].shape[1]
    padded = [jnp.pad(blk, ((0, 0), (i * cols, (n - 1 - i) * cols)))
              for i, blk in enumerate(blocks)]
    return jnp.concatenate(padded, axis=0)


def conv2d_layer(x, w, b, stride, pad, bn=None, act="none"):
    """Conv2d -> (BN) -> act, one fused pallas_call with a lane-dense output:
    4 consecutive output rows are folded into the lane axis (free reshapes)."""
    # TODO(synk): in-kernel strided window gather; at these sizes it is cheap XLA glue.
    Cout, Cin, k, _ = w.shape
    B = x.shape[0]
    a, Ho, Wo = _im2col(x, k, stride, pad)
    M = a.shape[0]
    wm = jnp.transpose(w, (2, 3, 1, 0)).reshape(k * k * Cin, Cout)
    group = 128 // Cout if (Cout <= 128 and 128 % Cout == 0
                            and M % (128 // Cout) == 0) else 1
    a_g = a.reshape(M // group, group * k * k * Cin)          # free row-major regroup
    w_bd = _block_diag([wm] * group) if group > 1 else wm
    bias_t = jnp.tile(b, group)
    if bn is not None:
        gamma, beta = bn
        pool = jnp.tile(jnp.eye(Cout, dtype=jnp.float32), (group, 1))
        out = _fused_layer_call(a_g, w_bd, bias_t, pool, gamma, beta, act=act)
    else:
        out = _fused_layer_call(a_g, w_bd, bias_t, act=act)
    return out.reshape(B, Ho, Wo, Cout)


def conv_transpose2d_layer(x, w, b, bn=None, act="none", pre_relu=False):
    """ConvTranspose2d(k=4,s=2,p=1) -> (BN) -> act, one fused pallas_call.

    Output-phase decomposition:
      o[b,2u+dy,2v+dx,co] = sum_{wy,wx,ci} xp[b,u+dy+wy,v+dx+wx,ci] * w[ci,co,3-2wy-dy,3-2wx-dx]
    All four phases go through ONE matmul against a block-diagonal weight, so the
    kernel writes a single lane-dense (M, 128) slab; the phase interleave back to
    (B, 2H, 2W, C) is a free wrapper reshape/transpose."""
    B, H, W, Cin = x.shape
    Cout = w.shape[1]
    Np = max(Cout, 32)        # pad output channels so each phase block is a 32-lane slab
    xp = jnp.pad(x, ((0, 0), (1, 1), (1, 1), (0, 0)))
    wt = jnp.transpose(w, (2, 3, 0, 1))              # (kH, kW, Cin, Cout)
    bb = b
    if Np != Cout:
        wt = jnp.pad(wt, ((0, 0), (0, 0), (0, 0), (0, Np - Cout)))
        bb = jnp.pad(b, (0, Np - Cout))

    M = B * H * W
    a_list, w_list = [], []
    for dy in (0, 1):
        for dx in (0, 1):
            wins, rows = [], []
            for wy in (0, 1):
                for wx in (0, 1):
                    wins.append(xp[:, dy + wy:dy + wy + H, dx + wx:dx + wx + W, :])
                    rows.append(wt[3 - 2 * wy - dy, 3 - 2 * wx - dx])      # (Cin, Np)
            a_list.append(jnp.concatenate(wins, axis=-1).reshape(M, 4 * Cin))
            w_list.append(jnp.concatenate(rows, axis=0))                   # (4*Cin, Np)

    a_cat = jnp.concatenate(a_list, axis=1)                                # (M, 16*Cin)
    w_bd = _block_diag(w_list)                                             # (16*Cin, 4*Np)
    bias_t = jnp.tile(bb, 4)
    if bn is not None:
        gamma, beta = bn
        pool = jnp.tile(jnp.eye(Np, dtype=jnp.float32), (4, 1))
        out = _fused_layer_call(a_cat, w_bd, bias_t, pool, gamma, beta,
                                act=act, pre_relu=pre_relu)
    else:
        out = _fused_layer_call(a_cat, w_bd, bias_t, act=act, pre_relu=pre_relu)

    out = out.reshape(B, H, W, 2, 2, Np)             # (b, u, v, dy, dx, c)
    out = jnp.transpose(out, (0, 1, 3, 2, 4, 5)).reshape(B, 2 * H, 2 * W, Np)
    return out[..., :Cout]


def _make_pv(B, H, W):
    """Constant (9*M, M) 0/1 gather matrix for a 3x3/pad-1 conv on (B, H, W)."""
    M = B * H * W
    pv = np.zeros((9 * M, M), np.float32)
    for b in range(B):
        for i in range(H):
            for j in range(W):
                mo = (b * H + i) * W + j
                for dy in range(3):
                    for dx in range(3):
                        ii, jj = i + dy - 1, j + dx - 1
                        if 0 <= ii < H and 0 <= jj < W:
                            pv[(dy * 3 + dx) * M + mo, (b * H + ii) * W + jj] = 1.0
    return jnp.asarray(pv)


def bottleneck_stage(h, params):
    """enc conv3 + enc ResBlock x2 + VQ + dec ResBlock x2 in ONE pallas_call."""
    B = h.shape[0]
    w3, b3 = params["enc_conv3"]
    C = w3.shape[0]
    a3, Ho, Wo = _im2col(h, 4, 2, 1)                 # (B*Ho*Wo, 16*C)
    M = a3.shape[0]
    w3m = jnp.transpose(w3, (2, 3, 1, 0)).reshape(16 * C, C)
    pv = _make_pv(B, Ho, Wo)
    emb = params["embedding"]
    K = emb.shape[0]
    esq = jnp.sum(emb * emb, axis=1).reshape(1, K)   # tiny, outside the kernel

    def rb_args(p):
        w3x3 = jnp.transpose(p["w1"], (2, 3, 1, 0)).reshape(9 * C, C)
        w1x1 = jnp.transpose(p["w2"], (2, 3, 1, 0)).reshape(C, C)
        return [w3x3, p["b1"].reshape(1, C), p["g1"].reshape(1, C), p["bb1"].reshape(1, C),
                w1x1, p["b2"].reshape(1, C), p["g2"].reshape(1, C), p["bb2"].reshape(1, C)]

    args = [a3, w3m, b3.reshape(1, C), pv, emb, esq]
    for name in ("enc_res1", "enc_res2", "dec_res1", "dec_res2"):
        args += rb_args(params[name])

    ze, zq, d = pl.pallas_call(
        functools.partial(_bottleneck_kernel, eps=EPS),
        out_shape=(jax.ShapeDtypeStruct((M, C), jnp.float32),) * 3,
    )(*args)
    shp = (B, Ho, Wo, C)
    return ze.reshape(shp), zq.reshape(shp), d.reshape(shp)


# ----------------------------------------------------------------------------
# Full VQVAE8 forward (6 pallas_calls total)
# ----------------------------------------------------------------------------
def vqvae8_forward(x_nchw, params):
    x = jnp.transpose(x_nchw, (0, 2, 3, 1))          # NCHW -> NHWC

    # ---- encoder ----
    h = conv2d_layer(x, *params["enc_conv1"], 2, 1, bn=params["enc_bn1"], act="relu")
    h = conv2d_layer(h, *params["enc_conv2"], 2, 1, bn=params["enc_bn2"], act="relu")

    # ---- fused bottleneck: enc conv3 + resblocks + VQ + resblocks ----
    z_e_x, z_q, d = bottleneck_stage(h, params)

    # ---- decoder (the standalone ReLU is folded into the first deconv kernel) ----
    d = conv_transpose2d_layer(d, *params["dec_convt1"], bn=params["dec_bn1"],
                               act="relu", pre_relu=True)
    d = conv_transpose2d_layer(d, *params["dec_convt2"], bn=params["dec_bn2"], act="relu")
    x_tilde = conv_transpose2d_layer(d, *params["dec_convt3"], act="tanh")

    to_nchw = lambda t: jnp.transpose(t, (0, 3, 1, 2))
    return to_nchw(x_tilde), to_nchw(z_e_x), to_nchw(z_q)


# ----------------------------------------------------------------------------
# Deterministic parameter init (mirrors weights_init / module defaults)
# ----------------------------------------------------------------------------
def init_params(key, input_dim, dim, K):
    keys = iter(jax.random.split(key, 16))

    def xavier(k, shape, fan_in, fan_out):
        bound = math.sqrt(6.0 / (fan_in + fan_out))
        return jax.random.uniform(k, shape, jnp.float32, -bound, bound)

    def conv(cin, cout, ksz):
        w = xavier(next(keys), (cout, cin, ksz, ksz), cin * ksz * ksz, cout * ksz * ksz)
        return (w, jnp.zeros((cout,), jnp.float32))

    def convt(cin, cout, ksz):
        w = xavier(next(keys), (cin, cout, ksz, ksz), cout * ksz * ksz, cin * ksz * ksz)
        return (w, jnp.zeros((cout,), jnp.float32))

    def bn(c):
        return (jnp.ones((c,), jnp.float32), jnp.zeros((c,), jnp.float32))

    def resblock():
        w1, b1 = conv(dim, dim, 3)
        g1, bb1 = bn(dim)
        w2, b2 = conv(dim, dim, 1)
        g2, bb2 = bn(dim)
        return dict(w1=w1, b1=b1, g1=g1, bb1=bb1, w2=w2, b2=b2, g2=g2, bb2=bb2)

    return dict(
        enc_conv1=conv(input_dim, dim, 4), enc_bn1=bn(dim),
        enc_conv2=conv(dim, dim, 4),       enc_bn2=bn(dim),
        enc_conv3=conv(dim, dim, 4),
        enc_res1=resblock(), enc_res2=resblock(),
        embedding=jax.random.uniform(next(keys), (K, dim), jnp.float32, -1.0 / K, 1.0 / K),
        dec_res1=resblock(), dec_res2=resblock(),
        dec_convt1=convt(dim, dim, 4),       dec_bn1=bn(dim),
        dec_convt2=convt(dim, dim, 4),       dec_bn2=bn(dim),
        dec_convt3=convt(dim, input_dim, 4),
    )


if __name__ == "__main__":
    input_dim, dim, K = 3, 32, 64
    root = jax.random.PRNGKey(0)
    k_params, k_x = jax.random.split(root)
    params = init_params(k_params, input_dim, dim, K)
    x = jax.random.normal(k_x, (2, input_dim, 32, 32), jnp.float32)

    fwd = jax.jit(vqvae8_forward)
    x_tilde, z_e_x, z_q_x = fwd(x, params)
    jax.block_until_ready((x_tilde, z_e_x, z_q_x))

    assert x_tilde.shape == (2, input_dim, 32, 32)
    assert z_e_x.shape == (2, dim, 4, 4)
    assert z_q_x.shape == (2, dim, 4, 4)
    assert bool(jnp.all(jnp.isfinite(x_tilde)))
    assert bool(jnp.all(jnp.isfinite(z_e_x)))
    assert bool(jnp.all(jnp.isfinite(z_q_x)))
    print("KERNEL_OK")
</pallas_src>

<mosaic_0001>
module attributes {stable_mosaic.version = 11 : i64} {
  func.func @_layer_kernel(%arg0: memref<128x192xf32, #tpu.memory_space<vmem>>, %arg1: memref<192x128xf32, #tpu.memory_space<vmem>>, %arg2: memref<1x128xf32, #tpu.memory_space<vmem>>, %arg3: memref<128x32xf32, #tpu.memory_space<vmem>>, %arg4: memref<1x32xf32, #tpu.memory_space<vmem>>, %arg5: memref<1x32xf32, #tpu.memory_space<vmem>>, %arg6: memref<128x128xf32, #tpu.memory_space<vmem>>) attributes {dimension_semantics = [], scalar_prefetch = 0 : i64, scratch_operands = 0 : i64, tpu.core_type = #tpu.core_type<tc>} {
    %c0 = arith.constant 0 : index
    %c0_0 = arith.constant 0 : index
    %0 = vector.load %arg0[%c0, %c0_0] : memref<128x192xf32, #tpu.memory_space<vmem>>, vector<128x192xf32>
    %c0_1 = arith.constant 0 : index
    %c0_2 = arith.constant 0 : index
    %1 = vector.load %arg1[%c0_1, %c0_2] : memref<192x128xf32, #tpu.memory_space<vmem>>, vector<192x128xf32>
    %cst = arith.constant dense<0.000000e+00> : vector<128x128xf32>
    %2 = tpu.matmul %0, %1, %cst {dimension_numbers = #tpu.dot_dimension_numbers<[1], [0], [0], [1], [0, 0, 1, 1], [], []>} : vector<128x192xf32>, vector<192x128xf32>, vector<128x128xf32> -> vector<128x128xf32>
    %c0_3 = arith.constant 0 : index
    %c0_4 = arith.constant 0 : index
    %3 = vector.load %arg2[%c0_3, %c0_4] : memref<1x128xf32, #tpu.memory_space<vmem>>, vector<1x128xf32>
    %4 = vector.broadcast %3 : vector<1x128xf32> to vector<128x128xf32>
    %5 = arith.addf %2, %4 : vector<128x128xf32>
    %c0_5 = arith.constant 0 : index
    %c0_6 = arith.constant 0 : index
    %6 = vector.load %arg3[%c0_5, %c0_6] : memref<128x32xf32, #tpu.memory_space<vmem>>, vector<128x32xf32>
    %cst_7 = arith.constant dense<0.000000e+00> : vector<128x32xf32>
    %7 = tpu.matmul %5, %6, %cst_7 {dimension_numbers = #tpu.dot_dimension_numbers<[1], [0], [0], [1], [0, 0, 1, 1], [], []>} : vector<128x128xf32>, vector<128x32xf32>, vector<128x32xf32> -> vector<128x32xf32>
    %cst_8 = arith.constant dense<0.000000e+00> : vector<32xf32>
    %8 = vector.multi_reduction <add>, %7, %cst_8 [0] : vector<128x32xf32> to vector<32xf32>
    %9 = vector.shape_cast %8 : vector<32xf32> to vector<1x32xf32>
    %10 = arith.mulf %5, %5 : vector<128x128xf32>
    %cst_9 = arith.constant dense<0.000000e+00> : vector<128x32xf32>
    %11 = tpu.matmul %10, %6, %cst_9 {dimension_numbers = #tpu.dot_dimension_numbers<[1], [0], [0], [1], [0, 0, 1, 1], [], []>} : vector<128x128xf32>, vector<128x32xf32>, vector<128x32xf32> -> vector<128x32xf32>
    %cst_10 = arith.constant dense<0.000000e+00> : vector<32xf32>
    %12 = vector.multi_reduction <add>, %11, %cst_10 [0] : vector<128x32xf32> to vector<32xf32>
    %13 = vector.shape_cast %12 : vector<32xf32> to vector<1x32xf32>
    %cst_11 = arith.constant 5.120000e+02 : f32
    %14 = vector.broadcast %cst_11 : f32 to vector<1x32xf32>
    %15 = arith.divf %9, %14 : vector<1x32xf32>
    %cst_12 = arith.constant 5.120000e+02 : f32
    %16 = vector.broadcast %cst_12 : f32 to vector<1x32xf32>
    %17 = arith.divf %13, %16 : vector<1x32xf32>
    %18 = arith.mulf %15, %15 : vector<1x32xf32>
    %19 = arith.subf %17, %18 : vector<1x32xf32>
    %cst_13 = arith.constant 0.000000e+00 : f32
    %20 = vector.broadcast %cst_13 : f32 to vector<1x32xf32>
    %21 = arith.maximumf %19, %20 : vector<1x32xf32>
    %cst_14 = arith.constant 9.99999974E-6 : f32
    %22 = vector.broadcast %cst_14 : f32 to vector<1x32xf32>
    %23 = arith.addf %21, %22 : vector<1x32xf32>
    %24 = math.rsqrt %23 : vector<1x32xf32>
    %c0_15 = arith.constant 0 : index
    %c0_16 = arith.constant 0 : index
    %25 = vector.load %arg4[%c0_15, %c0_16] : memref<1x32xf32, #tpu.memory_space<vmem>>, vector<1x32xf32>
    %26 = arith.mulf %24, %25 : vector<1x32xf32>
    %c0_17 = arith.constant 0 : index
    %c0_18 = arith.constant 0 : index
    %27 = vector.load %arg5[%c0_17, %c0_18] : memref<1x32xf32, #tpu.memory_space<vmem>>, vector<1x32xf32>
    %28 = arith.mulf %15, %26 : vector<1x32xf32>
    %29 = arith.subf %27, %28 : vector<1x32xf32>
    %cst_19 = arith.constant dense<0.000000e+00> : vector<1x128xf32>
    %30 = tpu.matmul %26, %6, %cst_19 {dimension_numbers = #tpu.dot_dimension_numbers<[1], [1], [0], [0], [0, 0, 1, 0], [], []>} : vector<1x32xf32>, vector<128x32xf32>, vector<1x128xf32> -> vector<1x128xf32>
    %31 = vector.broadcast %30 : vector<1x128xf32> to vector<128x128xf32>
    %32 = arith.mulf %5, %31 : vector<128x128xf32>
    %cst_20 = arith.constant dense<0.000000e+00> : vector<1x128xf32>
    %33 = tpu.matmul %29, %6, %cst_20 {dimension_numbers = #tpu.dot_dimension_numbers<[1], [1], [0], [0], [0, 0, 1, 0], [], []>} : vector<1x32xf32>, vector<128x32xf32>, vector<1x128xf32> -> vector<1x128xf32>
    %34 = vector.broadcast %33 : vector<1x128xf32> to vector<128x128xf32>
    %35 = arith.addf %32, %34 : vector<128x128xf32>
    %cst_21 = arith.constant 0.000000e+00 : f32
    %36 = vector.broadcast %cst_21 : f32 to vector<128x128xf32>
    %37 = arith.maximumf %35, %36 : vector<128x128xf32>
    %c0_22 = arith.constant 0 : index
    %c0_23 = arith.constant 0 : index
    %38 = vector.load %arg6[%c0_22, %c0_23] : memref<128x128xf32, #tpu.memory_space<vmem>>, vector<128x128xf32>
    tpu.vector_store %arg6[%c0_22, %c0_23], %37 {strides = array<i32>} : memref<128x128xf32, #tpu.memory_space<vmem>>, vector<128x128xf32>,
    return
  }
}

module attributes {stable_mosaic.version = 11 : i64} {
  func.func @_layer_kernel(%arg0: memref<32x2048xf32, #tpu.memory_space<vmem>>, %arg1: memref<2048x128xf32, #tpu.memory_space<vmem>>, %arg2: memref<1x128xf32, #tpu.memory_space<vmem>>, %arg3: memref<128x32xf32, #tpu.memory_space<vmem>>, %arg4: memref<1x32xf32, #tpu.memory_space<vmem>>, %arg5: memref<1x32xf32, #tpu.memory_space<vmem>>, %arg6: memref<32x128xf32, #tpu.memory_space<vmem>>) attributes {dimension_semantics = [], scalar_prefetch = 0 : i64, scratch_operands = 0 : i64, tpu.core_type = #tpu.core_type<tc>} {
    %c0 = arith.constant 0 : index
    %c0_0 = arith.constant 0 : index
    %0 = vector.load %arg0[%c0, %c0_0] : memref<32x2048xf32, #tpu.memory_space<vmem>>, vector<32x2048xf32>
    %c0_1 = arith.constant 0 : index
    %c0_2 = arith.constant 0 : index
    %1 = vector.load %arg1[%c0_1, %c0_2] : memref<2048x128xf32, #tpu.memory_space<vmem>>, vector<2048x128xf32>
    %cst = arith.constant dense<0.000000e+00> : vector<32x128xf32>
    %2 = tpu.matmul %0, %1, %cst {dimension_numbers = #tpu.dot_dimension_numbers<[1], [0], [0], [1], [0, 0, 1, 1], [], []>} : vector<32x2048xf32>, vector<2048x128xf32>, vector<32x128xf32> -> vector<32x128xf32>
    %c0_3 = arith.constant 0 : index
    %c0_4 = arith.constant 0 : index
    %3 = vector.load %arg2[%c0_3, %c0_4] : memref<1x128xf32, #tpu.memory_space<vmem>>, vector<1x128xf32>
    %4 = vector.broadcast %3 : vector<1x128xf32> to vector<32x128xf32>
    %5 = arith.addf %2, %4 : vector<32x128xf32>
    %c0_5 = arith.constant 0 : index
    %c0_6 = arith.constant 0 : index
    %6 = vector.load %arg3[%c0_5, %c0_6] : memref<128x32xf32, #tpu.memory_space<vmem>>, vector<128x32xf32>
    %cst_7 = arith.constant dense<0.000000e+00> : vector<32x32xf32>
    %7 = tpu.matmul %5, %6, %cst_7 {dimension_numbers = #tpu.dot_dimension_numbers<[1], [0], [0], [1], [0, 0, 1, 1], [], []>} : vector<32x128xf32>, vector<128x32xf32>, vector<32x32xf32> -> vector<32x32xf32>
    %cst_8 = arith.constant dense<0.000000e+00> : vector<32xf32>
    %8 = vector.multi_reduction <add>, %7, %cst_8 [0] : vector<32x32xf32> to vector<32xf32>
    %9 = vector.shape_cast %8 : vector<32xf32> to vector<1x32xf32>
    %10 = arith.mulf %5, %5 : vector<32x128xf32>
    %cst_9 = arith.constant dense<0.000000e+00> : vector<32x32xf32>
    %11 = tpu.matmul %10, %6, %cst_9 {dimension_numbers = #tpu.dot_dimension_numbers<[1], [0], [0], [1], [0, 0, 1, 1], [], []>} : vector<32x128xf32>, vector<128x32xf32>, vector<32x32xf32> -> vector<32x32xf32>
    %cst_10 = arith.constant dense<0.000000e+00> : vector<32xf32>
    %12 = vector.multi_reduction <add>, %11, %cst_10 [0] : vector<32x32xf32> to vector<32xf32>
    %13 = vector.shape_cast %12 : vector<32xf32> to vector<1x32xf32>
    %cst_11 = arith.constant 1.280000e+02 : f32
    %14 = vector.broadcast %cst_11 : f32 to vector<1x32xf32>
    %15 = arith.divf %9, %14 : vector<1x32xf32>
    %cst_12 = arith.constant 1.280000e+02 : f32
    %16 = vector.broadcast %cst_12 : f32 to vector<1x32xf32>
    %17 = arith.divf %13, %16 : vector<1x32xf32>
    %18 = arith.mulf %15, %15 : vector<1x32xf32>
    %19 = arith.subf %17, %18 : vector<1x32xf32>
    %cst_13 = arith.constant 0.000000e+00 : f32
    %20 = vector.broadcast %cst_13 : f32 to vector<1x32xf32>
    %21 = arith.maximumf %19, %20 : vector<1x32xf32>
    %cst_14 = arith.constant 9.99999974E-6 : f32
    %22 = vector.broadcast %cst_14 : f32 to vector<1x32xf32>
    %23 = arith.addf %21, %22 : vector<1x32xf32>
    %24 = math.rsqrt %23 : vector<1x32xf32>
    %c0_15 = arith.constant 0 : index
    %c0_16 = arith.constant 0 : index
    %25 = vector.load %arg4[%c0_15, %c0_16] : memref<1x32xf32, #tpu.memory_space<vmem>>, vector<1x32xf32>
    %26 = arith.mulf %24, %25 : vector<1x32xf32>
    %c0_17 = arith.constant 0 : index
    %c0_18 = arith.constant 0 : index
    %27 = vector.load %arg5[%c0_17, %c0_18] : memref<1x32xf32, #tpu.memory_space<vmem>>, vector<1x32xf32>
    %28 = arith.mulf %15, %26 : vector<1x32xf32>
    %29 = arith.subf %27, %28 : vector<1x32xf32>
    %cst_19 = arith.constant dense<0.000000e+00> : vector<1x128xf32>
    %30 = tpu.matmul %26, %6, %cst_19 {dimension_numbers = #tpu.dot_dimension_numbers<[1], [1], [0], [0], [0, 0, 1, 0], [], []>} : vector<1x32xf32>, vector<128x32xf32>, vector<1x128xf32> -> vector<1x128xf32>
    %31 = vector.broadcast %30 : vector<1x128xf32> to vector<32x128xf32>
    %32 = arith.mulf %5, %31 : vector<32x128xf32>
    %cst_20 = arith.constant dense<0.000000e+00> : vector<1x128xf32>
    %33 = tpu.matmul %29, %6, %cst_20 {dimension_numbers = #tpu.dot_dimension_numbers<[1], [1], [0], [0], [0, 0, 1, 0], [], []>} : vector<1x32xf32>, vector<128x32xf32>, vector<1x128xf32> -> vector<1x128xf32>
    %34 = vector.broadcast %33 : vector<1x128xf32> to vector<32x128xf32>
    %35 = arith.addf %32, %34 : vector<32x128xf32>
    %cst_21 = arith.constant 0.000000e+00 : f32
    %36 = vector.broadcast %cst_21 : f32 to vector<32x128xf32>
    %37 = arith.maximumf %35, %36 : vector<32x128xf32>
    %c0_22 = arith.constant 0 : index
    %c0_23 = arith.constant 0 : index
    %38 = vector.load %arg6[%c0_22, %c0_23] : memref<32x128xf32, #tpu.memory_space<vmem>>, vector<32x128xf32>
    tpu.vector_store %arg6[%c0_22, %c0_23], %37 {strides = array<i32>} : memref<32x128xf32, #tpu.memory_space<vmem>>, vector<32x128xf32>,
    return
  }
}

module attributes {stable_mosaic.version = 11 : i64} {
  func.func @_bottleneck_kernel(%arg0: memref<32x512xf32, #tpu.memory_space<vmem>>, %arg1: memref<512x32xf32, #tpu.memory_space<vmem>>, %arg2: memref<1x32xf32, #tpu.memory_space<vmem>>, %arg3: memref<288x32xf32, #tpu.memory_space<vmem>>, %arg4: memref<64x32xf32, #tpu.memory_space<vmem>>, %arg5: memref<1x64xf32, #tpu.memory_space<vmem>>, %arg6: memref<288x32xf32, #tpu.memory_space<vmem>>, %arg7: memref<1x32xf32, #tpu.memory_space<vmem>>, %arg8: memref<1x32xf32, #tpu.memory_space<vmem>>, %arg9: memref<1x32xf32, #tpu.memory_space<vmem>>, %arg10: memref<32x32xf32, #tpu.memory_space<vmem>>, %arg11: memref<1x32xf32, #tpu.memory_space<vmem>>, %arg12: memref<1x32xf32, #tpu.memory_space<vmem>>, %arg13: memref<1x32xf32, #tpu.memory_space<vmem>>, %arg14: memref<288x32xf32, #tpu.memory_space<vmem>>, %arg15: memref<1x32xf32, #tpu.memory_space<vmem>>, %arg16: memref<1x32xf32, #tpu.memory_space<vmem>>, %arg17: memref<1x32xf32, #tpu.memory_space<vmem>>, %arg18: memref<32x32xf32, #tpu.memory_space<vmem>>, %arg19: memref<1x32xf32, #tpu.memory_space<vmem>>, %arg20: memref<1x32xf32, #tpu.memory_space<vmem>>, %arg21: memref<1x32xf32, #tpu.memory_space<vmem>>, %arg22: memref<288x32xf32, #tpu.memory_space<vmem>>, %arg23: memref<1x32xf32, #tpu.memory_space<vmem>>, %arg24: memref<1x32xf32, #tpu.memory_space<vmem>>, %arg25: memref<1x32xf32, #tpu.memory_space<vmem>>, %arg26: memref<32x32xf32, #tpu.memory_space<vmem>>, %arg27: memref<1x32xf32, #tpu.memory_space<vmem>>, %arg28: memref<1x32xf32, #tpu.memory_space<vmem>>, %arg29: memref<1x32xf32, #tpu.memory_space<vmem>>, %arg30: memref<288x32xf32, #tpu.memory_space<vmem>>, %arg31: memref<1x32xf32, #tpu.memory_space<vmem>>, %arg32: memref<1x32xf32, #tpu.memory_space<vmem>>, %arg33: memref<1x32xf32, #tpu.memory_space<vmem>>, %arg34: memref<32x32xf32, #tpu.memory_space<vmem>>, %arg35: memref<1x32xf32, #tpu.memory_space<vmem>>, %arg36: memref<1x32xf32, #tpu.memory_space<vmem>>, %arg37: memref<1x32xf32, #tpu.memory_space<vmem>>, %arg38: memref<32x32xf32, #tpu.memory_space<vmem>>, %arg39: memref<32x32xf32, #tpu.memory_space<vmem>>, %arg40: memref<32x32xf32, #tpu.memory_space<vmem>>) attributes {dimension_semantics = [], scalar_prefetch = 0 : i64, scratch_operands = 0 : i64, tpu.core_type = #tpu.core_type<tc>} {
    %c0 = arith.constant 0 : index
    %c0_0 = arith.constant 0 : index
    %0 = vector.load %arg3[%c0, %c0_0] : memref<288x32xf32, #tpu.memory_space<vmem>>, vector<288x32xf32>
    %c0_1 = arith.constant 0 : index
    %c0_2 = arith.constant 0 : index
    %1 = vector.load %arg0[%c0_1, %c0_2] : memref<32x512xf32, #tpu.memory_space<vmem>>, vector<32x512xf32>
    %c0_3 = arith.constant 0 : index
    %c0_4 = arith.constant 0 : index
    %2 = vector.load %arg1[%c0_3, %c0_4] : memref<512x32xf32, #tpu.memory_space<vmem>>, vector<512x32xf32>
    %cst = arith.constant dense<0.000000e+00> : vector<32x32xf32>
    %3 = tpu.matmul %1, %2, %cst {dimension_numbers = #tpu.dot_dimension_numbers<[1], [0], [0], [1], [0, 0, 1, 1], [], []>} : vector<32x512xf32>, vector<512x32xf32>, vector<32x32xf32> -> vector<32x32xf32>
    %c0_5 = arith.constant 0 : index
    %c0_6 = arith.constant 0 : index
    %4 = vector.load %arg2[%c0_5, %c0_6] : memref<1x32xf32, #tpu.memory_space<vmem>>, vector<1x32xf32>
    %5 = vector.broadcast %4 : vector<1x32xf32> to vector<32x32xf32>
    %6 = arith.addf %3, %5 : vector<32x32xf32>
    %c0_7 = arith.constant 0 : index
    %c0_8 = arith.constant 0 : index
    %7 = vector.load %arg6[%c0_7, %c0_8] : memref<288x32xf32, #tpu.memory_space<vmem>>, vector<288x32xf32>
    %c0_9 = arith.constant 0 : index
    %c0_10 = arith.constant 0 : index
    %8 = vector.load %arg7[%c0_9, %c0_10] : memref<1x32xf32, #tpu.memory_space<vmem>>, vector<1x32xf32>
    %c0_11 = arith.constant 0 : index
    %c0_12 = arith.constant 0 : index
    %9 = vector.load %arg8[%c0_11, %c0_12] : memref<1x32xf32, #tpu.memory_space<vmem>>, vector<1x32xf32>
    %c0_13 = arith.constant 0 : index
    %c0_14 = arith.constant 0 : index
    %10 = vector.load %arg9[%c0_13, %c0_14] : memref<1x32xf32, #tpu.memory_space<vmem>>, vector<1x32xf32>
    %c0_15 = arith.constant 0 : index
    %c0_16 = arith.constant 0 : index
    %11 = vector.load %arg10[%c0_15, %c0_16] : memref<32x32xf32, #tpu.memory_space<vmem>>, vector<32x32xf32>
    %c0_17 = arith.constant 0 : index
    %c0_18 = arith.constant 0 : index
    %12 = vector.load %arg11[%c0_17, %c0_18] : memref<1x32xf32, #tpu.memory_space<vmem>>, vector<1x32xf32>
    %c0_19 = arith.constant 0 : index
    %c0_20 = arith.constant 0 : index
    %13 = vector.load %arg12[%c0_19, %c0_20] : memref<1x32xf32, #tpu.memory_space<vmem>>, vector<1x32xf32>
    %c0_21 = arith.constant 0 : index
    %c0_22 = arith.constant 0 : index
    %14 = vector.load %arg13[%c0_21, %c0_22] : memref<1x32xf32, #tpu.memory_space<vmem>>, vector<1x32xf32>
    %cst_23 = arith.constant 0.000000e+00 : f32
    %15 = vector.broadcast %cst_23 : f32 to vector<32x32xf32>
    %16 = arith.maximumf %6, %15 : vector<32x32xf32>
    %cst_24 = arith.constant dense<0.000000e+00> : vector<288x32xf32>
    %17 = tpu.matmul %0, %16, %cst_24 {dimension_numbers = #tpu.dot_dimension_numbers<[1], [0], [0], [1], [0, 0, 1, 1], [], []>} : vector<288x32xf32>, vector<32x32xf32>, vector<288x32xf32> -> vector<288x32xf32>
    %18 = vector.extract_strided_slice %17 {offsets = [0, 0], sizes = [32, 32], strides = [1, 1]} : vector<288x32xf32> to vector<32x32xf32>
    %19 = vector.extract_strided_slice %7 {offsets = [0, 0], sizes = [32, 32], strides = [1, 1]} : vector<288x32xf32> to vector<32x32xf32>
    %cst_25 = arith.constant dense<0.000000e+00> : vector<32x32xf32>
    %20 = tpu.matmul %18, %19, %cst_25 {dimension_numbers = #tpu.dot_dimension_numbers<[1], [0], [0], [1], [0, 0, 1, 1], [], []>} : vector<32x32xf32>, vector<32x32xf32>, vector<32x32xf32> -> vector<32x32xf32>
    %21 = vector.extract_strided_slice %17 {offsets = [32, 0], sizes = [32, 32], strides = [1, 1]} : vector<288x32xf32> to vector<32x32xf32>
    %22 = vector.extract_strided_slice %7 {offsets = [32, 0], sizes = [32, 32], strides = [1, 1]} : vector<288x32xf32> to vector<32x32xf32>
    %cst_26 = arith.constant dense<0.000000e+00> : vector<32x32xf32>
    %23 = tpu.matmul %21, %22, %cst_26 {dimension_numbers = #tpu.dot_dimension_numbers<[1], [0], [0], [1], [0, 0, 1, 1], [], []>} : vector<32x32xf32>, vector<32x32xf32>, vector<32x32xf32> -> vector<32x32xf32>
    %24 = arith.addf %20, %23 : vector<32x32xf32>
    %25 = vector.extract_strided_slice %17 {offsets = [64, 0], sizes = [32, 32], strides = [1, 1]} : vector<288x32xf32> to vector<32x32xf32>
    %26 = vector.extract_strided_slice %7 {offsets = [64, 0], sizes = [32, 32], strides = [1, 1]} : vector<288x32xf32> to vector<32x32xf32>
    %cst_27 = arith.constant dense<0.000000e+00> : vector<32x32xf32>
    %27 = tpu.matmul %25, %26, %cst_27 {dimension_numbers = #tpu.dot_dimension_numbers<[1], [0], [0], [1], [0, 0, 1, 1], [], []>} : vector<32x32xf32>, vector<32x32xf32>, vector<32x32xf32> -> vector<32x32xf32>
    %28 = arith.addf %24, %27 : vector<32x32xf32>
    %29 = vector.extract_strided_slice %17 {offsets = [96, 0], sizes = [32, 32], strides = [1, 1]} : vector<288x32xf32> to vector<32x32xf32>
    %30 = vector.extract_strided_slice %7 {offsets = [96, 0], sizes = [32, 32], strides = [1, 1]} : vector<288x32xf32> to vector<32x32xf32>
    %cst_28 = arith.constant dense<0.000000e+00> : vector<32x32xf32>
    %31 = tpu.matmul %29, %30, %cst_28 {dimension_numbers = #tpu.dot_dimension_numbers<[1], [0], [0], [1], [0, 0, 1, 1], [], []>} : vector<32x32xf32>, vector<32x32xf32>, vector<32x32xf32> -> vector<32x32xf32>
    %32 = arith.addf %28, %31 : vector<32x32xf32>
    %33 = vector.extract_strided_slice %17 {offsets = [128, 0], sizes = [32, 32], strides = [1, 1]} : vector<288x32xf32> to vector<32x32xf32>
    %34 = vector.extract_strided_slice %7 {offsets = [128, 0], sizes = [32, 32], strides = [1, 1]} : vector<288x32xf32> to vector<32x32xf32>
    %cst_29 = arith.constant dense<0.000000e+00> : vector<32x32xf32>
    %35 = tpu.matmul %33, %34, %cst_29 {dimension_numbers = #tpu.dot_dimension_numbers<[1], [0], [0], [1], [0, 0, 1, 1], [], []>} : vector<32x32xf32>, vector<32x32xf32>, vector<32x32xf32> -> vector<32x32xf32>
    %36 = arith.addf %32, %35 : vector<32x32xf32>
    %37 = vector.extract_strided_slice %17 {offsets = [160, 0], sizes = [32, 32], strides = [1, 1]} : vector<288x32xf32> to vector<32x32xf32>
    %38 = vector.extract_strided_slice %7 {offsets = [160, 0], sizes = [32, 32], strides = [1, 1]} : vector<288x32xf32> to vector<32x32xf32>
    %cst_30 = arith.constant dense<0.000000e+00> : vector<32x32xf32>
    %39 = tpu.matmul %37, %38, %cst_30 {dimension_numbers = #tpu.dot_dimension_numbers<[1], [0], [0], [1], [0, 0, 1, 1], [], []>} : vector<32x32xf32>, vector<32x32xf32>, vector<32x32xf32> -> vector<32x32xf32>
    %40 = arith.addf %36, %39 : vector<32x32xf32>
    %41 = vector.extract_strided_slice %17 {offsets = [192, 0], sizes = [32, 32], strides = [1, 1]} : vector<288x32xf32> to vector<32x32xf32>
    %42 = vector.extract_strided_slice %7 {offsets = [192, 0], sizes = [32, 32], strides = [1, 1]} : vector<288x32xf32> to vector<32x32xf32>
    %cst_31 = arith.constant dense<0.000000e+00> : vector<32x32xf32>
    %43 = tpu.matmul %41, %42, %cst_31 {dimension_numbers = #tpu.dot_dimension_numbers<[1], [0], [0], [1], [0, 0, 1, 1], [], []>} : vector<32x32xf32>, vector<32x32xf32>, vector<32x32xf32> -> vector<32x32xf32>
    %44 = arith.addf %40, %43 : vector<32x32xf32>
    %45 = vector.extract_strided_slice %17 {offsets = [224, 0], sizes = [32, 32], strides = [1, 1]} : vector<288x32xf32> to vector<32x32xf32>
    %46 = vector.extract_strided_slice %7 {offsets = [224, 0], sizes = [32, 32], strides = [1, 1]} : vector<288x32xf32> to vector<32x32xf32>
    %cst_32 = arith.constant dense<0.000000e+00> : vector<32x32xf32>
    %47 = tpu.matmul %45, %46, %cst_32 {dimension_numbers = #tpu.dot_dimension_numbers<[1], [0], [0], [1], [0, 0, 1, 1], [], []>} : vector<32x32xf32>, vector<32x32xf32>, vector<32x32xf32> -> vector<32x32xf32>
    %48 = arith.addf %44, %47 : vector<32x32xf32>
    %49 = vector.extract_strided_slice %17 {offsets = [256, 0], sizes = [32, 32], strides = [1, 1]} : vector<288x32xf32> to vector<32x32xf32>
    %50 = vector.extract_strided_slice %7 {offsets = [256, 0], sizes = [32, 32], strides = [1, 1]} : vector<288x32xf32> to vector<32x32xf32>
    %cst_33 = arith.constant dense<0.000000e+00> : vector<32x32xf32>
    %51 = tpu.matmul %49, %50, %cst_33 {dimension_numbers = #tpu.dot_dimension_numbers<[1], [0], [0], [1], [0, 0, 1, 1], [], []>} : vector<32x32xf32>, vector<32x32xf32>, vector<32x32xf32> -> vector<32x32xf32>
    %52 = arith.addf %48, %51 : vector<32x32xf32>
    %53 = vector.broadcast %8 : vector<1x32xf32> to vector<32x32xf32>
    %54 = arith.addf %52, %53 : vector<32x32xf32>
    %cst_34 = arith.constant dense<0.000000e+00> : vector<32xf32>
    %55 = vector.multi_reduction <add>, %54, %cst_34 [0] : vector<32x32xf32> to vector<32xf32>
    %56 = vector.shape_cast %55 : vector<32xf32> to vector<1x32xf32>
    %cst_35 = arith.constant 3.200000e+01 : f32
    %57 = vector.broadcast %cst_35 : f32 to vector<1x32xf32>
    %58 = arith.divf %56, %57 : vector<1x32xf32>
    %59 = arith.mulf %54, %54 : vector<32x32xf32>
    %cst_36 = arith.constant dense<0.000000e+00> : vector<32xf32>
    %60 = vector.multi_reduction <add>, %59, %cst_36 [0] : vector<32x32xf32> to vector<32xf32>
    %61 = vector.shape_cast %60 : vector<32xf32> to vector<1x32xf32>
    %cst_37 = arith.constant 3.200000e+01 : f32
    %62 = vector.broadcast %cst_37 : f32 to vector<1x32xf32>
    %63 = arith.divf %61, %62 : vector<1x32xf32>
    %64 = arith.mulf %58, %58 : vector<1x32xf32>
    %65 = arith.subf %63, %64 : vector<1x32xf32>
    %cst_38 = arith.constant 0.000000e+00 : f32
    %66 = vector.broadcast %cst_38 : f32 to vector<1x32xf32>
    %67 = arith.maximumf %65, %66 : vector<1x32xf32>
    %68 = vector.broadcast %58 : vector<1x32xf32> to vector<32x32xf32>
    %69 = arith.subf %54, %68 : vector<32x32xf32>
    %cst_39 = arith.constant 9.99999974E-6 : f32
    %70 = vector.broadcast %cst_39 : f32 to vector<1x32xf32>
    %71 = arith.addf %67, %70 : vector<1x32xf32>
    %72 = math.rsqrt %71 : vector<1x32xf32>
    %73 = vector.broadcast %72 : vector<1x32xf32> to vector<32x32xf32>
    %74 = arith.mulf %69, %73 : vector<32x32xf32>
    %75 = vector.broadcast %9 : vector<1x32xf32> to vector<32x32xf32>
    %76 = arith.mulf %74, %75 : vector<32x32xf32>
    %77 = vector.broadcast %10 : vector<1x32xf32> to vector<32x32xf32>
    %78 = arith.addf %76, %77 : vector<32x32xf32>
    %cst_40 = arith.constant 0.000000e+00 : f32
    %79 = vector.broadcast %cst_40 : f32 to vector<32x32xf32>
    %80 = arith.maximumf %78, %79 : vector<32x32xf32>
    %cst_41 = arith.constant dense<0.000000e+00> : vector<32x32xf32>
    %81 = tpu.matmul %80, %11, %cst_41 {dimension_numbers = #tpu.dot_dimension_numbers<[1], [0], [0], [1], [0, 0, 1, 1], [], []>} : vector<32x32xf32>, vector<32x32xf32>, vector<32x32xf32> -> vector<32x32xf32>
    %82 = vector.broadcast %12 : vector<1x32xf32> to vector<32x32xf32>
    %83 = arith.addf %81, %82 : vector<32x32xf32>
    %cst_42 = arith.constant dense<0.000000e+00> : vector<32xf32>
    %84 = vector.multi_reduction <add>, %83, %cst_42 [0] : vector<32x32xf32> to vector<32xf32>
    %85 = vector.shape_cast %84 : vector<32xf32> to vector<1x32xf32>
    %cst_43 = arith.constant 3.200000e+01 : f32
    %86 = vector.broadcast %cst_43 : f32 to vector<1x32xf32>
    %87 = arith.divf %85, %86 : vector<1x32xf32>
    %88 = arith.mulf %83, %83 : vector<32x32xf32>
    %cst_44 = arith.constant dense<0.000000e+00> : vector<32xf32>
    %89 = vector.multi_reduction <add>, %88, %cst_44 [0] : vector<32x32xf32> to vector<32xf32>
    %90 = vector.shape_cast %89 : vector<32xf32> to vector<1x32xf32>
    %cst_45 = arith.constant 3.200000e+01 : f32
    %91 = vector.broadcast %cst_45 : f32 to vector<1x32xf32>
    %92 = arith.divf %90, %91 : vector<1x32xf32>
    %93 = arith.mulf %87, %87 : vector<1x32xf32>
    %94 = arith.subf %92, %93 : vector<1x32xf32>
    %cst_46 = arith.constant 0.000000e+00 : f32
    %95 = vector.broadcast %cst_46 : f32 to vector<1x32xf32>
    %96 = arith.maximumf %94, %95 : vector<1x32xf32>
    %97 = vector.broadcast %87 : vector<1x32xf32> to vector<32x32xf32>
    %98 = arith.subf %83, %97 : vector<32x32xf32>
    %cst_47 = arith.constant 9.99999974E-6 : f32
    %99 = vector.broadcast %cst_47 : f32 to vector<1x32xf32>
    %100 = arith.addf %96, %99 : vector<1x32xf32>
    %101 = math.rsqrt %100 : vector<1x32xf32>
    %102 = vector.broadcast %101 : vector<1x32xf32> to vector<32x32xf32>
    %103 = arith.mulf %98, %102 : vector<32x32xf32>
    %104 = vector.broadcast %13 : vector<1x32xf32> to vector<32x32xf32>
    %105 = arith.mulf %103, %104 : vector<32x32xf32>
    %106 = vector.broadcast %14 : vector<1x32xf32> to vector<32x32xf32>
    %107 = arith.addf %105, %106 : vector<32x32xf32>
    %108 = arith.addf %16, %107 : vector<32x32xf32>
    %c0_48 = arith.constant 0 : index
    %c0_49 = arith.constant 0 : index
    %109 = vector.load %arg14[%c0_48, %c0_49] : memref<288x32xf32, #tpu.memory_space<vmem>>, vector<288x32xf32>
    %c0_50 = arith.constant 0 : index
    %c0_51 = arith.constant 0 : index
    %110 = vector.load %arg15[%c0_50, %c0_51] : memref<1x32xf32, #tpu.memory_space<vmem>>, vector<1x32xf32>
    %c0_52 = arith.constant 0 : index
    %c0_53 = arith.constant 0 : index
    %111 = vector.load %arg16[%c0_52, %c0_53] : memref<1x32xf32, #tpu.memory_space<vmem>>, vector<1x32xf32>
    %c0_54 = arith.constant 0 : index
    %c0_55 = arith.constant 0 : index
    %112 = vector.load %arg17[%c0_54, %c0_55] : memref<1x32xf32, #tpu.memory_space<vmem>>, vector<1x32xf32>
    %c0_56 = arith.constant 0 : index
    %c0_57 = arith.constant 0 : index
    %113 = vector.load %arg18[%c0_56, %c0_57] : memref<32x32xf32, #tpu.memory_space<vmem>>, vector<32x32xf32>
    %c0_58 = arith.constant 0 : index
    %c0_59 = arith.constant 0 : index
    %114 = vector.load %arg19[%c0_58, %c0_59] : memref<1x32xf32, #tpu.memory_space<vmem>>, vector<1x32xf32>
    %c0_60 = arith.constant 0 : index
    %c0_61 = arith.constant 0 : index
    %115 = vector.load %arg20[%c0_60, %c0_61] : memref<1x32xf32, #tpu.memory_space<vmem>>, vector<1x32xf32>
    %c0_62 = arith.constant 0 : index
    %c0_63 = arith.constant 0 : index
    %116 = vector.load %arg21[%c0_62, %c0_63] : memref<1x32xf32, #tpu.memory_space<vmem>>, vector<1x32xf32>
    %cst_64 = arith.constant 0.000000e+00 : f32
    %117 = vector.broadcast %cst_64 : f32 to vector<32x32xf32>
    %118 = arith.maximumf %108, %117 : vector<32x32xf32>
    %cst_65 = arith.constant dense<0.000000e+00> : vector<288x32xf32>
    %119 = tpu.matmul %0, %118, %cst_65 {dimension_numbers = #tpu.dot_dimension_numbers<[1], [0], [0], [1], [0, 0, 1, 1], [], []>} : vector<288x32xf32>, vector<32x32xf32>, vector<288x32xf32> -> vector<288x32xf32>
    %120 = vector.extract_strided_slice %119 {offsets = [0, 0], sizes = [32, 32], strides = [1, 1]} : vector<288x32xf32> to vector<32x32xf32>
    %121 = vector.extract_strided_slice %109 {offsets = [0, 0], sizes = [32, 32], strides = [1, 1]} : vector<288x32xf32> to vector<32x32xf32>
    %cst_66 = arith.constant dense<0.000000e+00> : vector<32x32xf32>
    %122 = tpu.matmul %120, %121, %cst_66 {dimension_numbers = #tpu.dot_dimension_numbers<[1], [0], [0], [1], [0, 0, 1, 1], [], []>} : vector<32x32xf32>, vector<32x32xf32>, vector<32x32xf32> -> vector<32x32xf32>
    %123 = vector.extract_strided_slice %119 {offsets = [32, 0], sizes = [32, 32], strides = [1, 1]} : vector<288x32xf32> to vector<32x32xf32>
    %124 = vector.extract_strided_slice %109 {offsets = [32, 0], sizes = [32, 32], strides = [1, 1]} : vector<288x32xf32> to vector<32x32xf32>
    %cst_67 = arith.constant dense<0.000000e+00> : vector<32x32xf32>
    %125 = tpu.matmul %123, %124, %cst_67 {dimension_numbers = #tpu.dot_dimension_numbers<[1], [0], [0], [1], [0, 0, 1, 1], [], []>} : vector<32x32xf32>, vector<32x32xf32>, vector<32x32xf32> -> vector<32x32xf32>
    %126 = arith.addf %122, %125 : vector<32x32xf32>
    %127 = vector.extract_strided_slice %119 {offsets = [64, 0], sizes = [32, 32], strides = [1, 1]} : vector<288x32xf32> to vector<32x32xf32>
    %128 = vector.extract_strided_slice %109 {offsets = [64, 0], sizes = [32, 32], strides = [1, 1]} : vector<288x32xf32> to vector<32x32xf32>
    %cst_68 = arith.constant dense<0.000000e+00> : vector<32x32xf32>
    %129 = tpu.matmul %127, %128, %cst_68 {dimension_numbers = #tpu.dot_dimension_numbers<[1], [0], [0], [1], [0, 0, 1, 1], [], []>} : vector<32x32xf32>, vector<32x32xf32>, vector<32x32xf32> -> vector<32x32xf32>
    %130 = arith.addf %126, %129 : vector<32x32xf32>
    %131 = vector.extract_strided_slice %119 {offsets = [96, 0], sizes = [32, 32], strides = [1, 1]} : vector<288x32xf32> to vector<32x32xf32>
    %132 = vector.extract_strided_slice %109 {offsets = [96, 0], sizes = [32, 32], strides = [1, 1]} : vector<288x32xf32> to vector<32x32xf32>
    %cst_69 = arith.constant dense<0.000000e+00> : vector<32x32xf32>
    %133 = tpu.matmul %131, %132, %cst_69 {dimension_numbers = #tpu.dot_dimension_numbers<[1], [0], [0], [1], [0, 0, 1, 1], [], []>} : vector<32x32xf32>, vector<32x32xf32>, vector<32x32xf32> -> vector<32x32xf32>
    %134 = arith.addf %130, %133 : vector<32x32xf32>
    %135 = vector.extract_strided_slice %119 {offsets = [128, 0], sizes = [32, 32], strides = [1, 1]} : vector<288x32xf32> to vector<32x32xf32>
    %136 = vector.extract_strided_slice %109 {offsets = [128, 0], sizes = [32, 32], strides = [1, 1]} : vector<288x32xf32> to vector<32x32xf32>
    %cst_70 = arith.constant dense<0.000000e+00> : vector<32x32xf32>
    %137 = tpu.matmul %135, %136, %cst_70 {dimension_numbers = #tpu.dot_dimension_numbers<[1], [0], [0], [1], [0, 0, 1, 1], [], []>} : vector<32x32xf32>, vector<32x32xf32>, vector<32x32xf32> -> vector<32x32xf32>
    %138 = arith.addf %134, %137 : vector<32x32xf32>
    %139 = vector.extract_strided_slice %119 {offsets = [160, 0], sizes = [32, 32], strides = [1, 1]} : vector<288x32xf32> to vector<32x32xf32>
    %140 = vector.extract_strided_slice %109 {offsets = [160, 0], sizes = [32, 32], strides = [1, 1]} : vector<288x32xf32> to vector<32x32xf32>
    %cst_71 = arith.constant dense<0.000000e+00> : vector<32x32xf32>
    %141 = tpu.matmul %139, %140, %cst_71 {dimension_numbers = #tpu.dot_dimension_numbers<[1], [0], [0], [1], [0, 0, 1, 1], [], []>} : vector<32x32xf32>, vector<32x32xf32>, vector<32x32xf32> -> vector<32x32xf32>
    %142 = arith.addf %138, %141 : vector<32x32xf32>
    %143 = vector.extract_strided_slice %119 {offsets = [192, 0], sizes = [32, 32], strides = [1, 1]} : vector<288x32xf32> to vector<32x32xf32>
    %144 = vector.extract_strided_slice %109 {offsets = [192, 0], sizes = [32, 32], strides = [1, 1]} : vector<288x32xf32> to vector<32x32xf32>
    %cst_72 = arith.constant dense<0.000000e+00> : vector<32x32xf32>
    %145 = tpu.matmul %143, %144, %cst_72 {dimension_numbers = #tpu.dot_dimension_numbers<[1], [0], [0], [1], [0, 0, 1, 1], [], []>} : vector<32x32xf32>, vector<32x32xf32>, vector<32x32xf32> -> vector<32x32xf32>
    %146 = arith.addf %142, %145 : vector<32x32xf32>
    %147 = vector.extract_strided_slice %119 {offsets = [224, 0], sizes = [32, 32], strides = [1, 1]} : vector<288x32xf32> to vector<32x32xf32>
    %148 = vector.extract_strided_slice %109 {offsets = [224, 0], sizes = [32, 32], strides = [1, 1]} : vector<288x32xf32> to vector<32x32xf32>
    %cst_73 = arith.constant dense<0.000000e+00> : vector<32x32xf32>
    %149 = tpu.matmul %147, %148, %cst_73 {dimension_numbers = #tpu.dot_dimension_numbers<[1], [0], [0], [1], [0, 0, 1, 1], [], []>} : vector<32x32xf32>, vector<32x32xf32>, vector<32x32xf32> -> vector<32x32xf32>
    %150 = arith.addf %146, %149 : vector<32x32xf32>
    %151 = vector.extract_strided_slice %119 {offsets = [256, 0], sizes = [32, 32], strides = [1, 1]} : vector<288x32xf32> to vector<32x32xf32>
    %152 = vector.extract_strided_slice %109 {offsets = [256, 0], sizes = [32, 32], strides = [1, 1]} : vector<288x32xf32> to vector<32x32xf32>
    %cst_74 = arith.constant dense<0.000000e+00> : vector<32x32xf32>
    %153 = tpu.matmul %151, %152, %cst_74 {dimension_numbers = #tpu.dot_dimension_numbers<[1], [0], [0], [1], [0, 0, 1, 1], [], []>} : vector<32x32xf32>, vector<32x32xf32>, vector<32x32xf32> -> vector<32x32xf32>
    %154 = arith.addf %150, %153 : vector<32x32xf32>
    %155 = vector.broadcast %110 : vector<1x32xf32> to vector<32x32xf32>
    %156 = arith.addf %154, %155 : vector<32x32xf32>
    %cst_75 = arith.constant dense<0.000000e+00> : vector<32xf32>
    %157 = vector.multi_reduction <add>, %156, %cst_75 [0] : vector<32x32xf32> to vector<32xf32>
    %158 = vector.shape_cast %157 : vector<32xf32> to vector<1x32xf32>
    %cst_76 = arith.constant 3.200000e+01 : f32
    %159 = vector.broadcast %cst_76 : f32 to vector<1x32xf32>
    %160 = arith.divf %158, %159 : vector<1x32xf32>
    %161 = arith.mulf %156, %156 : vector<32x32xf32>
    %cst_77 = arith.constant dense<0.000000e+00> : vector<32xf32>
    %162 = vector.multi_reduction <add>, %161, %cst_77 [0] : vector<32x32xf32> to vector<32xf32>
    %163 = vector.shape_cast %162 : vector<32xf32> to vector<1x32xf32>
    %cst_78 = arith.constant 3.200000e+01 : f32
    %164 = vector.broadcast %cst_78 : f32 to vector<1x32xf32>
    %165 = arith.divf %163, %164 : vector<1x32xf32>
    %166 = arith.mulf %160, %160 : vector<1x32xf32>
    %167 = arith.subf %165, %166 : vector<1x32xf32>
    %cst_79 = arith.constant 0.000000e+00 : f32
    %168 = vector.broadcast %cst_79 : f32 to vector<1x32xf32>
    %169 = arith.maximumf %167, %168 : vector<1x32xf32>
    %170 = vector.broadcast %160 : vector<1x32xf32> to vector<32x32xf32>
    %171 = arith.subf %156, %170 : vector<32x32xf32>
    %cst_80 = arith.constant 9.99999974E-6 : f32
    %172 = vector.broadcast %cst_80 : f32 to vector<1x32xf32>
    %173 = arith.addf %169, %172 : vector<1x32xf32>
    %174 = math.rsqrt %173 : vector<1x32xf32>
    %175 = vector.broadcast %174 : vector<1x32xf32> to vector<32x32xf32>
    %176 = arith.mulf %171, %175 : vector<32x32xf32>
    %177 = vector.broadcast %111 : vector<1x32xf32> to vector<32x32xf32>
    %178 = arith.mulf %176, %177 : vector<32x32xf32>
    %179 = vector.broadcast %112 : vector<1x32xf32> to vector<32x32xf32>
    %180 = arith.addf %178, %179 : vector<32x32xf32>
    %cst_81 = arith.constant 0.000000e+00 : f32
    %181 = vector.broadcast %cst_81 : f32 to vector<32x32xf32>
    %182 = arith.maximumf %180, %181 : vector<32x32xf32>
    %cst_82 = arith.constant dense<0.000000e+00> : vector<32x32xf32>
    %183 = tpu.matmul %182, %113, %cst_82 {dimension_numbers = #tpu.dot_dimension_numbers<[1], [0], [0], [1], [0, 0, 1, 1], [], []>} : vector<32x32xf32>, vector<32x32xf32>, vector<32x32xf32> -> vector<32x32xf32>
    %184 = vector.broadcast %114 : vector<1x32xf32> to vector<32x32xf32>
    %185 = arith.addf %183, %184 : vector<32x32xf32>
    %cst_83 = arith.constant dense<0.000000e+00> : vector<32xf32>
    %186 = vector.multi_reduction <add>, %185, %cst_83 [0] : vector<32x32xf32> to vector<32xf32>
    %187 = vector.shape_cast %186 : vector<32xf32> to vector<1x32xf32>
    %cst_84 = arith.constant 3.200000e+01 : f32
    %188 = vector.broadcast %cst_84 : f32 to vector<1x32xf32>
    %189 = arith.divf %187, %188 : vector<1x32xf32>
    %190 = arith.mulf %185, %185 : vector<32x32xf32>
    %cst_85 = arith.constant dense<0.000000e+00> : vector<32xf32>
    %191 = vector.multi_reduction <add>, %190, %cst_85 [0] : vector<32x32xf32> to vector<32xf32>
    %192 = vector.shape_cast %191 : vector<32xf32> to vector<1x32xf32>
    %cst_86 = arith.constant 3.200000e+01 : f32
    %193 = vector.broadcast %cst_86 : f32 to vector<1x32xf32>
    %194 = arith.divf %192, %193 : vector<1x32xf32>
    %195 = arith.mulf %189, %189 : vector<1x32xf32>
    %196 = arith.subf %194, %195 : vector<1x32xf32>
    %cst_87 = arith.constant 0.000000e+00 : f32
    %197 = vector.broadcast %cst_87 : f32 to vector<1x32xf32>
    %198 = arith.maximumf %196, %197 : vector<1x32xf32>
    %199 = vector.broadcast %189 : vector<1x32xf32> to vector<32x32xf32>
    %200 = arith.subf %185, %199 : vector<32x32xf32>
    %cst_88 = arith.constant 9.99999974E-6 : f32
    %201 = vector.broadcast %cst_88 : f32 to vector<1x32xf32>
    %202 = arith.addf %198, %201 : vector<1x32xf32>
    %203 = math.rsqrt %202 : vector<1x32xf32>
    %204 = vector.broadcast %203 : vector<1x32xf32> to vector<32x32xf32>
    %205 = arith.mulf %200, %204 : vector<32x32xf32>
    %206 = vector.broadcast %115 : vector<1x32xf32> to vector<32x32xf32>
    %207 = arith.mulf %205, %206 : vector<32x32xf32>
    %208 = vector.broadcast %116 : vector<1x32xf32> to vector<32x32xf32>
    %209 = arith.addf %207, %208 : vector<32x32xf32>
    %210 = arith.addf %118, %209 : vector<32x32xf32>
    %c0_89 = arith.constant 0 : index
    %c0_90 = arith.constant 0 : index
    %211 = vector.load %arg38[%c0_89, %c0_90] : memref<32x32xf32, #tpu.memory_space<vmem>>, vector<32x32xf32>
    tpu.vector_store %arg38[%c0_89, %c0_90], %210 {strides = array<i32>} : memref<32x32xf32, #tpu.memory_space<vmem>>, vector<32x32xf32>,
    %c0_91 = arith.constant 0 : index
    %c0_92 = arith.constant 0 : index
    %212 = vector.load %arg4[%c0_91, %c0_92] : memref<64x32xf32, #tpu.memory_space<vmem>>, vector<64x32xf32>
    %cst_93 = arith.constant dense<0.000000e+00> : vector<32x64xf32>
    %213 = tpu.matmul %210, %212, %cst_93 {dimension_numbers = #tpu.dot_dimension_numbers<[1], [1], [0], [0], [0, 0, 1, 0], [], []>} : vector<32x32xf32>, vector<64x32xf32>, vector<32x64xf32> -> vector<32x64xf32>
    %c0_94 = arith.constant 0 : index
    %c0_95 = arith.constant 0 : index
    %214 = vector.load %arg5[%c0_94, %c0_95] : memref<1x64xf32, #tpu.memory_space<vmem>>, vector<1x64xf32>
    %cst_96 = arith.constant 2.000000e+00 : f32
    %215 = vector.broadcast %cst_96 : f32 to vector<32x64xf32>
    %216 = arith.mulf %215, %213 : vector<32x64xf32>
    %217 = vector.broadcast %214 : vector<1x64xf32> to vector<32x64xf32>
    %218 = arith.subf %217, %216 : vector<32x64xf32>
    %cst_97 = arith.constant dense<0x7F800000> : vector<32xf32>
    %219 = vector.multi_reduction <minimumf>, %218, %cst_97 [1] : vector<32x64xf32> to vector<32xf32>
    %220 = vector.shape_cast %219 : vector<32xf32> to vector<32x1xf32>
    %221 = tpu.iota {dimensions = array<i32: 1>} : vector<32x64xi32>
    %222 = vector.broadcast %220 : vector<32x1xf32> to vector<32x64xf32>
    %223 = arith.cmpf ole, %218, %222 : vector<32x64xf32>
    %c64_i32 = arith.constant 64 : i32
    %224 = vector.broadcast %c64_i32 : i32 to vector<32x64xi32>
    %225 = arith.select %223, %221, %224 : vector<32x64xi1>, vector<32x64xi32>
    %cst_98 = arith.constant dense<2147483647> : vector<32xi32>
    %226 = vector.multi_reduction <minsi>, %225, %cst_98 [1] : vector<32x64xi32> to vector<32xi32>
    %227 = vector.shape_cast %226 : vector<32xi32> to vector<32x1xi32>
    %228 = vector.broadcast %227 : vector<32x1xi32> to vector<32x64xi32>
    %229 = arith.cmpi eq, %221, %228 : vector<32x64xi32>
    %230 = arith.extui %229 : vector<32x64xi1> to vector<32x64xi32>
    %231 = arith.sitofp %230 : vector<32x64xi32> to vector<32x64xf32>
    %cst_99 = arith.constant dense<0.000000e+00> : vector<32x32xf32>
    %232 = tpu.matmul %231, %212, %cst_99 {dimension_numbers = #tpu.dot_dimension_numbers<[1], [0], [0], [1], [0, 0, 1, 1], [], []>} : vector<32x64xf32>, vector<64x32xf32>, vector<32x32xf32> -> vector<32x32xf32>
    %c0_100 = arith.constant 0 : index
    %c0_101 = arith.constant 0 : index
    %233 = vector.load %arg39[%c0_100, %c0_101] : memref<32x32xf32, #tpu.memory_space<vmem>>, vector<32x32xf32>
    tpu.vector_store %arg39[%c0_100, %c0_101], %232 {strides = array<i32>} : memref<32x32xf32, #tpu.memory_space<vmem>>, vector<32x32xf32>,
    %c0_102 = arith.constant 0 : index
    %c0_103 = arith.constant 0 : index
    %234 = vector.load %arg22[%c0_102, %c0_103] : memref<288x32xf32, #tpu.memory_space<vmem>>, vector<288x32xf32>
    %c0_104 = arith.constant 0 : index
    %c0_105 = arith.constant 0 : index
    %235 = vector.load %arg23[%c0_104, %c0_105] : memref<1x32xf32, #tpu.memory_space<vmem>>, vector<1x32xf32>
    %c0_106 = arith.constant 0 : index
    %c0_107 = arith.constant 0 : index
    %236 = vector.load %arg24[%c0_106, %c0_107] : memref<1x32xf32, #tpu.memory_space<vmem>>, vector<1x32xf32>
    %c0_108 = arith.constant 0 : index
    %c0_109 = arith.constant 0 : index
    %237 = vector.load %arg25[%c0_108, %c0_109] : memref<1x32xf32, #tpu.memory_space<vmem>>, vector<1x32xf32>
    %c0_110 = arith.constant 0 : index
    %c0_111 = arith.constant 0 : index
    %238 = vector.load %arg26[%c0_110, %c0_111] : memref<32x32xf32, #tpu.memory_space<vmem>>, vector<32x32xf32>
    %c0_112 = arith.constant 0 : index
    %c0_113 = arith.constant 0 : index
    %239 = vector.load %arg27[%c0_112, %c0_113] : memref<1x32xf32, #tpu.memory_space<vmem>>, vector<1x32xf32>
    %c0_114 = arith.constant 0 : index
    %c0_115 = arith.constant 0 : index
    %240 = vector.load %arg28[%c0_114, %c0_115] : memref<1x32xf32, #tpu.memory_space<vmem>>, vector<1x32xf32>
    %c0_116 = arith.constant 0 : index
    %c0_117 = arith.constant 0 : index
    %241 = vector.load %arg29[%c0_116, %c0_117] : memref<1x32xf32, #tpu.memory_space<vmem>>, vector<1x32xf32>
    %cst_118 = arith.constant 0.000000e+00 : f32
    %242 = vector.broadcast %cst_118 : f32 to vector<32x32xf32>
    %243 = arith.maximumf %232, %242 : vector<32x32xf32>
    %cst_119 = arith.constant dense<0.000000e+00> : vector<288x32xf32>
    %244 = tpu.matmul %0, %243, %cst_119 {dimension_numbers = #tpu.dot_dimension_numbers<[1], [0], [0], [1], [0, 0, 1, 1], [], []>} : vector<288x32xf32>, vector<32x32xf32>, vector<288x32xf32> -> vector<288x32xf32>
    %245 = vector.extract_strided_slice %244 {offsets = [0, 0], sizes = [32, 32], strides = [1, 1]} : vector<288x32xf32> to vector<32x32xf32>
    %246 = vector.extract_strided_slice %234 {offsets = [0, 0], sizes = [32, 32], strides = [1, 1]} : vector<288x32xf32> to vector<32x32xf32>
    %cst_120 = arith.constant dense<0.000000e+00> : vector<32x32xf32>
    %247 = tpu.matmul %245, %246, %cst_120 {dimension_numbers = #tpu.dot_dimension_numbers<[1], [0], [0], [1], [0, 0, 1, 1], [], []>} : vector<32x32xf32>, vector<32x32xf32>, vector<32x32xf32> -> vector<32x32xf32>
    %248 = vector.extract_strided_slice %244 {offsets = [32, 0], sizes = [32, 32], strides = [1, 1]} : vector<288x32xf32> to vector<32x32xf32>
    %249 = vector.extract_strided_slice %234 {offsets = [32, 0], sizes = [32, 32], strides = [1, 1]} : vector<288x32xf32> to vector<32x32xf32>
    %cst_121 = arith.constant dense<0.000000e+00> : vector<32x32xf32>
    %250 = tpu.matmul %248, %249, %cst_121 {dimension_numbers = #tpu.dot_dimension_numbers<[1], [0], [0], [1], [0, 0, 1, 1], [], []>} : vector<32x32xf32>, vector<32x32xf32>, vector<32x32xf32> -> vector<32x32xf32>
    %251 = arith.addf %247, %250 : vector<32x32xf32>
    %252 = vector.extract_strided_slice %244 {offsets = [64, 0], sizes = [32, 32], strides = [1, 1]} : vector<288x32xf32> to vector<32x32xf32>
    %253 = vector.extract_strided_slice %234 {offsets = [64, 0], sizes = [32, 32], strides = [1, 1]} : vector<288x32xf32> to vector<32x32xf32>
    %cst_122 = arith.constant dense<0.000000e+00> : vector<32x32xf32>
    %254 = tpu.matmul %252, %253, %cst_122 {dimension_numbers = #tpu.dot_dimension_numbers<[1], [0], [0], [1], [0, 0, 1, 1], [], []>} : vector<32x32xf32>, vector<32x32xf32>, vector<32x32xf32> -> vector<32x32xf32>
    %255 = arith.addf %251, %254 : vector<32x32xf32>
    %256 = vector.extract_strided_slice %244 {offsets = [96, 0], sizes = [32, 32], strides = [1, 1]} : vector<288x32xf32> to vector<32x32xf32>
    %257 = vector.extract_strided_slice %234 {offsets = [96, 0], sizes = [32, 32], strides = [1, 1]} : vector<288x32xf32> to vector<32x32xf32>
    %cst_123 = arith.constant dense<0.000000e+00> : vector<32x32xf32>
    %258 = tpu.matmul %256, %257, %cst_123 {dimension_numbers = #tpu.dot_dimension_numbers<[1], [0], [0], [1], [0, 0, 1, 1], [], []>} : vector<32x32xf32>, vector<32x32xf32>, vector<32x32xf32> -> vector<32x32xf32>
    %259 = arith.addf %255, %258 : vector<32x32xf32>
    %260 = vector.extract_strided_slice %244 {offsets = [128, 0], sizes = [32, 32], strides = [1, 1]} : vector<288x32xf32> to vector<32x32xf32>
    %261 = vector.extract_strided_slice %234 {offsets = [128, 0], sizes = [32, 32], strides = [1, 1]} : vector<288x32xf32> to vector<32x32xf32>
    %cst_124 = arith.constant dense<0.000000e+00> : vector<32x32xf32>
    %262 = tpu.matmul %260, %261, %cst_124 {dimension_numbers = #tpu.dot_dimension_numbers<[1], [0], [0], [1], [0, 0, 1, 1], [], []>} : vector<32x32xf32>, vector<32x32xf32>, vector<32x32xf32> -> vector<32x32xf32>
    %263 = arith.addf %259, %262 : vector<32x32xf32>
    %264 = vector.extract_strided_slice %244 {offsets = [160, 0], sizes = [32, 32], strides = [1, 1]} : vector<288x32xf32> to vector<32x32xf32>
    %265 = vector.extract_strided_slice %234 {offsets = [160, 0], sizes = [32, 32], strides = [1, 1]} : vector<288x32xf32> to vector<32x32xf32>
    %cst_125 = arith.constant dense<0.000000e+00> : vector<32x32xf32>
    %266 = tpu.matmul %264, %265, %cst_125 {dimension_numbers = #tpu.dot_dimension_numbers<[1], [0], [0], [1], [0, 0, 1, 1], [], []>} : vector<32x32xf32>, vector<32x32xf32>, vector<32x32xf32> -> vector<32x32xf32>
    %267 = arith.addf %263, %266 : vector<32x32xf32>
    %268 = vector.extract_strided_slice %244 {offsets = [192, 0], sizes = [32, 32], strides = [1, 1]} : vector<288x32xf32> to vector<32x32xf32>
    %269 = vector.extract_strided_slice %234 {offsets = [192, 0], sizes = [32, 32], strides = [1, 1]} : vector<288x32xf32> to vector<32x32xf32>
    %cst_126 = arith.constant dense<0.000000e+00> : vector<32x32xf32>
    %270 = tpu.matmul %268, %269, %cst_126 {dimension_numbers = #tpu.dot_dimension_numbers<[1], [0], [0], [1], [0, 0, 1, 1], [], []>} : vector<32x32xf32>, vector<32x32xf32>, vector<32x32xf32> -> vector<32x32xf32>
    %271 = arith.addf %267, %270 : vector<32x32xf32>
    %272 = vector.extract_strided_slice %244 {offsets = [224, 0], sizes = [32, 32], strides = [1, 1]} : vector<288x32xf32> to vector<32x32xf32>
    %273 = vector.extract_strided_slice %234 {offsets = [224, 0], sizes = [32, 32], strides = [1, 1]} : vector<288x32xf32> to vector<32x32xf32>
    %cst_127 = arith.constant dense<0.000000e+00> : vector<32x32xf32>
    %274 = tpu.matmul %272, %273, %cst_127 {dimension_numbers = #tpu.dot_dimension_numbers<[1], [0], [0], [1], [0, 0, 1, 1], [], []>} : vector<32x32xf32>, vector<32x32xf32>, vector<32x32xf32> -> vector<32x32xf32>
    %275 = arith.addf %271, %274 : vector<32x32xf32>
    %276 = vector.extract_strided_slice %244 {offsets = [256, 0], sizes = [32, 32], strides = [1, 1]} : vector<288x32xf32> to vector<32x32xf32>
    %277 = vector.extract_strided_slice %234 {offsets = [256, 0], sizes = [32, 32], strides = [1, 1]} : vector<288x32xf32> to vector<32x32xf32>
    %cst_128 = arith.constant dense<0.000000e+00> : vector<32x32xf32>
    %278 = tpu.matmul %276, %277, %cst_128 {dimension_numbers = #tpu.dot_dimension_numbers<[1], [0], [0], [1], [0, 0, 1, 1], [], []>} : vector<32x32xf32>, vector<32x32xf32>, vector<32x32xf32> -> vector<32x32xf32>
    %279 = arith.addf %275, %278 : vector<32x32xf32>
    %280 = vector.broadcast %235 : vector<1x32xf32> to vector<32x32xf32>
    %281 = arith.addf %279, %280 : vector<32x32xf32>
    %cst_129 = arith.constant dense<0.000000e+00> : vector<32xf32>
    %282 = vector.multi_reduction <add>, %281, %cst_129 [0] : vector<32x32xf32> to vector<32xf32>
    %283 = vector.shape_cast %282 : vector<32xf32> to vector<1x32xf32>
    %cst_130 = arith.constant 3.200000e+01 : f32
    %284 = vector.broadcast %cst_130 : f32 to vector<1x32xf32>
    %285 = arith.divf %283, %284 : vector<1x32xf32>
    %286 = arith.mulf %281, %281 : vector<32x32xf32>
    %cst_131 = arith.constant dense<0.000000e+00> : vector<32xf32>
    %287 = vector.multi_reduction <add>, %286, %cst_131 [0] : vector<32x32xf32> to vector<32xf32>
    %288 = vector.shape_cast %287 : vector<32xf32> to vector<1x32xf32>
    %cst_132 = arith.constant 3.200000e+01 : f32
    %289 = vector.broadcast %cst_132 : f32 to vector<1x32xf32>
    %290 = arith.divf %288, %289 : vector<1x32xf32>
    %291 = arith.mulf %285, %285 : vector<1x32xf32>
    %292 = arith.subf %290, %291 : vector<1x32xf32>
    %cst_133 = arith.constant 0.000000e+00 : f32
    %293 = vector.broadcast %cst_133 : f32 to vector<1x32xf32>
    %294 = arith.maximumf %292, %293 : vector<1x32xf32>
    %295 = vector.broadcast %285 : vector<1x32xf32> to vector<32x32xf32>
    %296 = arith.subf %281, %295 : vector<32x32xf32>
    %cst_134 = arith.constant 9.99999974E-6 : f32
    %297 = vector.broadcast %cst_134 : f32 to vector<1x32xf32>
    %298 = arith.addf %294, %297 : vector<1x32xf32>
    %299 = math.rsqrt %298 : vector<1x32xf32>
    %300 = vector.broadcast %299 : vector<1x32xf32> to vector<32x32xf32>
    %301 = arith.mulf %296, %300 : vector<32x32xf32>
    %302 = vector.broadcast %236 : vector<1x32xf32> to vector<32x32xf32>
    %303 = arith.mulf %301, %302 : vector<32x32xf32>
    %304 = vector.broadcast %237 : vector<1x32xf32> to vector<32x32xf32>
    %305 = arith.addf %303, %304 : vector<32x32xf32>
    %cst_135 = arith.constant 0.000000e+00 : f32
    %306 = vector.broadcast %cst_135 : f32 to vector<32x32xf32>
    %307 = arith.maximumf %305, %306 : vector<32x32xf32>
    %cst_136 = arith.constant dense<0.000000e+00> : vector<32x32xf32>
    %308 = tpu.matmul %307, %238, %cst_136 {dimension_numbers = #tpu.dot_dimension_numbers<[1], [0], [0], [1], [0, 0, 1, 1], [], []>} : vector<32x32xf32>, vector<32x32xf32>, vector<32x32xf32> -> vector<32x32xf32>
    %309 = vector.broadcast %239 : vector<1x32xf32> to vector<32x32xf32>
    %310 = arith.addf %308, %309 : vector<32x32xf32>
    %cst_137 = arith.constant dense<0.000000e+00> : vector<32xf32>
    %311 = vector.multi_reduction <add>, %310, %cst_137 [0] : vector<32x32xf32> to vector<32xf32>
    %312 = vector.shape_cast %311 : vector<32xf32> to vector<1x32xf32>
    %cst_138 = arith.constant 3.200000e+01 : f32
    %313 = vector.broadcast %cst_138 : f32 to vector<1x32xf32>
    %314 = arith.divf %312, %313 : vector<1x32xf32>
    %315 = arith.mulf %310, %310 : vector<32x32xf32>
    %cst_139 = arith.constant dense<0.000000e+00> : vector<32xf32>
    %316 = vector.multi_reduction <add>, %315, %cst_139 [0] : vector<32x32xf32> to vector<32xf32>
    %317 = vector.shape_cast %316 : vector<32xf32> to vector<1x32xf32>
    %cst_140 = arith.constant 3.200000e+01 : f32
    %318 = vector.broadcast %cst_140 : f32 to vector<1x32xf32>
    %319 = arith.divf %317, %318 : vector<1x32xf32>
    %320 = arith.mulf %314, %314 : vector<1x32xf32>
    %321 = arith.subf %319, %320 : vector<1x32xf32>
    %cst_141 = arith.constant 0.000000e+00 : f32
    %322 = vector.broadcast %cst_141 : f32 to vector<1x32xf32>
    %323 = arith.maximumf %321, %322 : vector<1x32xf32>
    %324 = vector.broadcast %314 : vector<1x32xf32> to vector<32x32xf32>
    %325 = arith.subf %310, %324 : vector<32x32xf32>
    %cst_142 = arith.constant 9.99999974E-6 : f32
    %326 = vector.broadcast %cst_142 : f32 to vector<1x32xf32>
    %327 = arith.addf %323, %326 : vector<1x32xf32>
    %328 = math.rsqrt %327 : vector<1x32xf32>
    %329 = vector.broadcast %328 : vector<1x32xf32> to vector<32x32xf32>
    %330 = arith.mulf %325, %329 : vector<32x32xf32>
    %331 = vector.broadcast %240 : vector<1x32xf32> to vector<32x32xf32>
    %332 = arith.mulf %330, %331 : vector<32x32xf32>
    %333 = vector.broadcast %241 : vector<1x32xf32> to vector<32x32xf32>
    %334 = arith.addf %332, %333 : vector<32x32xf32>
    %335 = arith.addf %243, %334 : vector<32x32xf32>
    %c0_143 = arith.constant 0 : index
    %c0_144 = arith.constant 0 : index
    %336 = vector.load %arg30[%c0_143, %c0_144] : memref<288x32xf32, #tpu.memory_space<vmem>>, vector<288x32xf32>
    %c0_145 = arith.constant 0 : index
    %c0_146 = arith.constant 0 : index
    %337 = vector.load %arg31[%c0_145, %c0_146] : memref<1x32xf32, #tpu.memory_space<vmem>>, vector<1x32xf32>
    %c0_147 = arith.constant 0 : index
    %c0_148 = arith.constant 0 : index
    %338 = vector.load %arg32[%c0_147, %c0_148] : memref<1x32xf32, #tpu.memory_space<vmem>>, vector<1x32xf32>
    %c0_149 = arith.constant 0 : index
    %c0_150 = arith.constant 0 : index
    %339 = vector.load %arg33[%c0_149, %c0_150] : memref<1x32xf32, #tpu.memory_space<vmem>>, vector<1x32xf32>
    %c0_151 = arith.constant 0 : index
    %c0_152 = arith.constant 0 : index
    %340 = vector.load %arg34[%c0_151, %c0_152] : memref<32x32xf32, #tpu.memory_space<vmem>>, vector<32x32xf32>
    %c0_153 = arith.constant 0 : index
    %c0_154 = arith.constant 0 : index
    %341 = vector.load %arg35[%c0_153, %c0_154] : memref<1x32xf32, #tpu.memory_space<vmem>>, vector<1x32xf32>
    %c0_155 = arith.constant 0 : index
    %c0_156 = arith.constant 0 : index
    %342 = vector.load %arg36[%c0_155, %c0_156] : memref<1x32xf32, #tpu.memory_space<vmem>>, vector<1x32xf32>
    %c0_157 = arith.constant 0 : index
    %c0_158 = arith.constant 0 : index
    %343 = vector.load %arg37[%c0_157, %c0_158] : memref<1x32xf32, #tpu.memory_space<vmem>>, vector<1x32xf32>
    %cst_159 = arith.constant 0.000000e+00 : f32
    %344 = vector.broadcast %cst_159 : f32 to vector<32x32xf32>
    %345 = arith.maximumf %335, %344 : vector<32x32xf32>
    %cst_160 = arith.constant dense<0.000000e+00> : vector<288x32xf32>
    %346 = tpu.matmul %0, %345, %cst_160 {dimension_numbers = #tpu.dot_dimension_numbers<[1], [0], [0], [1], [0, 0, 1, 1], [], []>} : vector<288x32xf32>, vector<32x32xf32>, vector<288x32xf32> -> vector<288x32xf32>
    %347 = vector.extract_strided_slice %346 {offsets = [0, 0], sizes = [32, 32], strides = [1, 1]} : vector<288x32xf32> to vector<32x32xf32>
    %348 = vector.extract_strided_slice %336 {offsets = [0, 0], sizes = [32, 32], strides = [1, 1]} : vector<288x32xf32> to vector<32x32xf32>
    %cst_161 = arith.constant dense<0.000000e+00> : vector<32x32xf32>
    %349 = tpu.matmul %347, %348, %cst_161 {dimension_numbers = #tpu.dot_dimension_numbers<[1], [0], [0], [1], [0, 0, 1, 1], [], []>} : vector<32x32xf32>, vector<32x32xf32>, vector<32x32xf32> -> vector<32x32xf32>
    %350 = vector.extract_strided_slice %346 {offsets = [32, 0], sizes = [32, 32], strides = [1, 1]} : vector<288x32xf32> to vector<32x32xf32>
    %351 = vector.extract_strided_slice %336 {offsets = [32, 0], sizes = [32, 32], strides = [1, 1]} : vector<288x32xf32> to vector<32x32xf32>
    %cst_162 = arith.constant dense<0.000000e+00> : vector<32x32xf32>
    %352 = tpu.matmul %350, %351, %cst_162 {dimension_numbers = #tpu.dot_dimension_numbers<[1], [0], [0], [1], [0, 0, 1, 1], [], []>} : vector<32x32xf32>, vector<32x32xf32>, vector<32x32xf32> -> vector<32x32xf32>
    %353 = arith.addf %349, %352 : vector<32x32xf32>
    %354 = vector.extract_strided_slice %346 {offsets = [64, 0], sizes = [32, 32], strides = [1, 1]} : vector<288x32xf32> to vector<32x32xf32>
    %355 = vector.extract_strided_slice %336 {offsets = [64, 0], sizes = [32, 32], strides = [1, 1]} : vector<288x32xf32> to vector<32x32xf32>
    %cst_163 = arith.constant dense<0.000000e+00> : vector<32x32xf32>
    %356 = tpu.matmul %354, %355, %cst_163 {dimension_numbers = #tpu.dot_dimension_numbers<[1], [0], [0], [1], [0, 0, 1, 1], [], []>} : vector<32x32xf32>, vector<32x32xf32>, vector<32x32xf32> -> vector<32x32xf32>
    %357 = arith.addf %353, %356 : vector<32x32xf32>
    %358 = vector.extract_strided_slice %346 {offsets = [96, 0], sizes = [32, 32], strides = [1, 1]} : vector<288x32xf32> to vector<32x32xf32>
    %359 = vector.extract_strided_slice %336 {offsets = [96, 0], sizes = [32, 32], strides = [1, 1]} : vector<288x32xf32> to vector<32x32xf32>
    %cst_164 = arith.constant dense<0.000000e+00> : vector<32x32xf32>
    %360 = tpu.matmul %358, %359, %cst_164 {dimension_numbers = #tpu.dot_dimension_numbers<[1], [0], [0], [1], [0, 0, 1, 1], [], []>} : vector<32x32xf32>, vector<32x32xf32>, vector<32x32xf32> -> vector<32x32xf32>
    %361 = arith.addf %357, %360 : vector<32x32xf32>
    %362 = vector.extract_strided_slice %346 {offsets = [128, 0], sizes = [32, 32], strides = [1, 1]} : vector<288x32xf32> to vector<32x32xf32>
    %363 = vector.extract_strided_slice %336 {offsets = [128, 0], sizes = [32, 32], strides = [1, 1]} : vector<288x32xf32> to vector<32x32xf32>
    %cst_165 = arith.constant dense<0.000000e+00> : vector<32x32xf32>
    %364 = tpu.matmul %362, %363, %cst_165 {dimension_numbers = #tpu.dot_dimension_numbers<[1], [0], [0], [1], [0, 0, 1, 1], [], []>} : vector<32x32xf32>, vector<32x32xf32>, vector<32x32xf32> -> vector<32x32xf32>
    %365 = arith.addf %361, %364 : vector<32x32xf32>
    %366 = vector.extract_strided_slice %346 {offsets = [160, 0], sizes = [32, 32], strides = [1, 1]} : vector<288x32xf32> to vector<32x32xf32>
    %367 = vector.extract_strided_slice %336 {offsets = [160, 0], sizes = [32, 32], strides = [1, 1]} : vector<288x32xf32> to vector<32x32xf32>
    %cst_166 = arith.constant dense<0.000000e+00> : vector<32x32xf32>
    %368 = tpu.matmul %366, %367, %cst_166 {dimension_numbers = #tpu.dot_dimension_numbers<[1], [0], [0], [1], [0, 0, 1, 1], [], []>} : vector<32x32xf32>, vector<32x32xf32>, vector<32x32xf32> -> vector<32x32xf32>
    %369 = arith.addf %365, %368 : vector<32x32xf32>
    %370 = vector.extract_strided_slice %346 {offsets = [192, 0], sizes = [32, 32], strides = [1, 1]} : vector<288x32xf32> to vector<32x32xf32>
    %371 = vector.extract_strided_slice %336 {offsets = [192, 0], sizes = [32, 32], strides = [1, 1]} : vector<288x32xf32> to vector<32x32xf32>
    %cst_167 = arith.constant dense<0.000000e+00> : vector<32x32xf32>
    %372 = tpu.matmul %370, %371, %cst_167 {dimension_numbers = #tpu.dot_dimension_numbers<[1], [0], [0], [1], [0, 0, 1, 1], [], []>} : vector<32x32xf32>, vector<32x32xf32>, vector<32x32xf32> -> vector<32x32xf32>
    %373 = arith.addf %369, %372 : vector<32x32xf32>
    %374 = vector.extract_strided_slice %346 {offsets = [224, 0], sizes = [32, 32], strides = [1, 1]} : vector<288x32xf32> to vector<32x32xf32>
    %375 = vector.extract_strided_slice %336 {offsets = [224, 0], sizes = [32, 32], strides = [1, 1]} : vector<288x32xf32> to vector<32x32xf32>
    %cst_168 = arith.constant dense<0.000000e+00> : vector<32x32xf32>
    %376 = tpu.matmul %374, %375, %cst_168 {dimension_numbers = #tpu.dot_dimension_numbers<[1], [0], [0], [1], [0, 0, 1, 1], [], []>} : vector<32x32xf32>, vector<32x32xf32>, vector<32x32xf32> -> vector<32x32xf32>
    %377 = arith.addf %373, %376 : vector<32x32xf32>
    %378 = vector.extract_strided_slice %346 {offsets = [256, 0], sizes = [32, 32], strides = [1, 1]} : vector<288x32xf32> to vector<32x32xf32>
    %379 = vector.extract_strided_slice %336 {offsets = [256, 0], sizes = [32, 32], strides = [1, 1]} : vector<288x32xf32> to vector<32x32xf32>
    %cst_169 = arith.constant dense<0.000000e+00> : vector<32x32xf32>
    %380 = tpu.matmul %378, %379, %cst_169 {dimension_numbers = #tpu.dot_dimension_numbers<[1], [0], [0], [1], [0, 0, 1, 1], [], []>} : vector<32x32xf32>, vector<32x32xf32>, vector<32x32xf32> -> vector<32x32xf32>
    %381 = arith.addf %377, %380 : vector<32x32xf32>
    %382 = vector.broadcast %337 : vector<1x32xf32> to vector<32x32xf32>
    %383 = arith.addf %381, %382 : vector<32x32xf32>
    %cst_170 = arith.constant dense<0.000000e+00> : vector<32xf32>
    %384 = vector.multi_reduction <add>, %383, %cst_170 [0] : vector<32x32xf32> to vector<32xf32>
    %385 = vector.shape_cast %384 : vector<32xf32> to vector<1x32xf32>
    %cst_171 = arith.constant 3.200000e+01 : f32
    %386 = vector.broadcast %cst_171 : f32 to vector<1x32xf32>
    %387 = arith.divf %385, %386 : vector<1x32xf32>
    %388 = arith.mulf %383, %383 : vector<32x32xf32>
    %cst_172 = arith.constant dense<0.000000e+00> : vector<32xf32>
    %389 = vector.multi_reduction <add>, %388, %cst_172 [0] : vector<32x32xf32> to vector<32xf32>
    %390 = vector.shape_cast %389 : vector<32xf32> to vector<1x32xf32>
    %cst_173 = arith.constant 3.200000e+01 : f32
    %391 = vector.broadcast %cst_173 : f32 to vector<1x32xf32>
    %392 = arith.divf %390, %391 : vector<1x32xf32>
    %393 = arith.mulf %387, %387 : vector<1x32xf32>
    %394 = arith.subf %392, %393 : vector<1x32xf32>
    %cst_174 = arith.constant 0.000000e+00 : f32
    %395 = vector.broadcast %cst_174 : f32 to vector<1x32xf32>
    %396 = arith.maximumf %394, %395 : vector<1x32xf32>
    %397 = vector.broadcast %387 : vector<1x32xf32> to vector<32x32xf32>
    %398 = arith.subf %383, %397 : vector<32x32xf32>
    %cst_175 = arith.constant 9.99999974E-6 : f32
    %399 = vector.broadcast %cst_175 : f32 to vector<1x32xf32>
    %400 = arith.addf %396, %399 : vector<1x32xf32>
    %401 = math.rsqrt %400 : vector<1x32xf32>
    %402 = vector.broadcast %401 : vector<1x32xf32> to vector<32x32xf32>
    %403 = arith.mulf %398, %402 : vector<32x32xf32>
    %404 = vector.broadcast %338 : vector<1x32xf32> to vector<32x32xf32>
    %405 = arith.mulf %403, %404 : vector<32x32xf32>
    %406 = vector.broadcast %339 : vector<1x32xf32> to vector<32x32xf32>
    %407 = arith.addf %405, %406 : vector<32x32xf32>
    %cst_176 = arith.constant 0.000000e+00 : f32
    %408 = vector.broadcast %cst_176 : f32 to vector<32x32xf32>
    %409 = arith.maximumf %407, %408 : vector<32x32xf32>
    %cst_177 = arith.constant dense<0.000000e+00> : vector<32x32xf32>
    %410 = tpu.matmul %409, %340, %cst_177 {dimension_numbers = #tpu.dot_dimension_numbers<[1], [0], [0], [1], [0, 0, 1, 1], [], []>} : vector<32x32xf32>, vector<32x32xf32>, vector<32x32xf32> -> vector<32x32xf32>
    %411 = vector.broadcast %341 : vector<1x32xf32> to vector<32x32xf32>
    %412 = arith.addf %410, %411 : vector<32x32xf32>
    %cst_178 = arith.constant dense<0.000000e+00> : vector<32xf32>
    %413 = vector.multi_reduction <add>, %412, %cst_178 [0] : vector<32x32xf32> to vector<32xf32>
    %414 = vector.shape_cast %413 : vector<32xf32> to vector<1x32xf32>
    %cst_179 = arith.constant 3.200000e+01 : f32
    %415 = vector.broadcast %cst_179 : f32 to vector<1x32xf32>
    %416 = arith.divf %414, %415 : vector<1x32xf32>
    %417 = arith.mulf %412, %412 : vector<32x32xf32>
    %cst_180 = arith.constant dense<0.000000e+00> : vector<32xf32>
    %418 = vector.multi_reduction <add>, %417, %cst_180 [0] : vector<32x32xf32> to vector<32xf32>
    %419 = vector.shape_cast %418 : vector<32xf32> to vector<1x32xf32>
    %cst_181 = arith.constant 3.200000e+01 : f32
    %420 = vector.broadcast %cst_181 : f32 to vector<1x32xf32>
    %421 = arith.divf %419, %420 : vector<1x32xf32>
    %422 = arith.mulf %416, %416 : vector<1x32xf32>
    %423 = arith.subf %421, %422 : vector<1x32xf32>
    %cst_182 = arith.constant 0.000000e+00 : f32
    %424 = vector.broadcast %cst_182 : f32 to vector<1x32xf32>
    %425 = arith.maximumf %423, %424 : vector<1x32xf32>
    %426 = vector.broadcast %416 : vector<1x32xf32> to vector<32x32xf32>
    %427 = arith.subf %412, %426 : vector<32x32xf32>
    %cst_183 = arith.constant 9.99999974E-6 : f32
    %428 = vector.broadcast %cst_183 : f32 to vector<1x32xf32>
    %429 = arith.addf %425, %428 : vector<1x32xf32>
    %430 = math.rsqrt %429 : vector<1x32xf32>
    %431 = vector.broadcast %430 : vector<1x32xf32> to vector<32x32xf32>
    %432 = arith.mulf %427, %431 : vector<32x32xf32>
    %433 = vector.broadcast %342 : vector<1x32xf32> to vector<32x32xf32>
    %434 = arith.mulf %432, %433 : vector<32x32xf32>
    %435 = vector.broadcast %343 : vector<1x32xf32> to vector<32x32xf32>
    %436 = arith.addf %434, %435 : vector<32x32xf32>
    %437 = arith.addf %345, %436 : vector<32x32xf32>
    %c0_184 = arith.constant 0 : index
    %c0_185 = arith.constant 0 : index
    %438 = vector.load %arg40[%c0_184, %c0_185] : memref<32x32xf32, #tpu.memory_space<vmem>>, vector<32x32xf32>
    tpu.vector_store %arg40[%c0_184, %c0_185], %437 {strides = array<i32>} : memref<32x32xf32, #tpu.memory_space<vmem>>, vector<32x32xf32>,
    return
  }
}

module attributes {stable_mosaic.version = 11 : i64} {
  func.func @_layer_kernel(%arg0: memref<32x512xf32, #tpu.memory_space<vmem>>, %arg1: memref<512x128xf32, #tpu.memory_space<vmem>>, %arg2: memref<1x128xf32, #tpu.memory_space<vmem>>, %arg3: memref<128x32xf32, #tpu.memory_space<vmem>>, %arg4: memref<1x32xf32, #tpu.memory_space<vmem>>, %arg5: memref<1x32xf32, #tpu.memory_space<vmem>>, %arg6: memref<32x128xf32, #tpu.memory_space<vmem>>) attributes {dimension_semantics = [], scalar_prefetch = 0 : i64, scratch_operands = 0 : i64, tpu.core_type = #tpu.core_type<tc>} {
    %c0 = arith.constant 0 : index
    %c0_0 = arith.constant 0 : index
    %0 = vector.load %arg0[%c0, %c0_0] : memref<32x512xf32, #tpu.memory_space<vmem>>, vector<32x512xf32>
    %cst = arith.constant 0.000000e+00 : f32
    %1 = vector.broadcast %cst : f32 to vector<32x512xf32>
    %2 = arith.maximumf %0, %1 : vector<32x512xf32>
    %c0_1 = arith.constant 0 : index
    %c0_2 = arith.constant 0 : index
    %3 = vector.load %arg1[%c0_1, %c0_2] : memref<512x128xf32, #tpu.memory_space<vmem>>, vector<512x128xf32>
    %cst_3 = arith.constant dense<0.000000e+00> : vector<32x128xf32>
    %4 = tpu.matmul %2, %3, %cst_3 {dimension_numbers = #tpu.dot_dimension_numbers<[1], [0], [0], [1], [0, 0, 1, 1], [], []>} : vector<32x512xf32>, vector<512x128xf32>, vector<32x128xf32> -> vector<32x128xf32>
    %c0_4 = arith.constant 0 : index
    %c0_5 = arith.constant 0 : index
    %5 = vector.load %arg2[%c0_4, %c0_5] : memref<1x128xf32, #tpu.memory_space<vmem>>, vector<1x128xf32>
    %6 = vector.broadcast %5 : vector<1x128xf32> to vector<32x128xf32>
    %7 = arith.addf %4, %6 : vector<32x128xf32>
    %c0_6 = arith.constant 0 : index
    %c0_7 = arith.constant 0 : index
    %8 = vector.load %arg3[%c0_6, %c0_7] : memref<128x32xf32, #tpu.memory_space<vmem>>, vector<128x32xf32>
    %cst_8 = arith.constant dense<0.000000e+00> : vector<32x32xf32>
    %9 = tpu.matmul %7, %8, %cst_8 {dimension_numbers = #tpu.dot_dimension_numbers<[1], [0], [0], [1], [0, 0, 1, 1], [], []>} : vector<32x128xf32>, vector<128x32xf32>, vector<32x32xf32> -> vector<32x32xf32>
    %cst_9 = arith.constant dense<0.000000e+00> : vector<32xf32>
    %10 = vector.multi_reduction <add>, %9, %cst_9 [0] : vector<32x32xf32> to vector<32xf32>
    %11 = vector.shape_cast %10 : vector<32xf32> to vector<1x32xf32>
    %12 = arith.mulf %7, %7 : vector<32x128xf32>
    %cst_10 = arith.constant dense<0.000000e+00> : vector<32x32xf32>
    %13 = tpu.matmul %12, %8, %cst_10 {dimension_numbers = #tpu.dot_dimension_numbers<[1], [0], [0], [1], [0, 0, 1, 1], [], []>} : vector<32x128xf32>, vector<128x32xf32>, vector<32x32xf32> -> vector<32x32xf32>
    %cst_11 = arith.constant dense<0.000000e+00> : vector<32xf32>
    %14 = vector.multi_reduction <add>, %13, %cst_11 [0] : vector<32x32xf32> to vector<32xf32>
    %15 = vector.shape_cast %14 : vector<32xf32> to vector<1x32xf32>
    %cst_12 = arith.constant 1.280000e+02 : f32
    %16 = vector.broadcast %cst_12 : f32 to vector<1x32xf32>
    %17 = arith.divf %11, %16 : vector<1x32xf32>
    %cst_13 = arith.constant 1.280000e+02 : f32
    %18 = vector.broadcast %cst_13 : f32 to vector<1x32xf32>
    %19 = arith.divf %15, %18 : vector<1x32xf32>
    %20 = arith.mulf %17, %17 : vector<1x32xf32>
    %21 = arith.subf %19, %20 : vector<1x32xf32>
    %cst_14 = arith.constant 0.000000e+00 : f32
    %22 = vector.broadcast %cst_14 : f32 to vector<1x32xf32>
    %23 = arith.maximumf %21, %22 : vector<1x32xf32>
    %cst_15 = arith.constant 9.99999974E-6 : f32
    %24 = vector.broadcast %cst_15 : f32 to vector<1x32xf32>
    %25 = arith.addf %23, %24 : vector<1x32xf32>
    %26 = math.rsqrt %25 : vector<1x32xf32>
    %c0_16 = arith.constant 0 : index
    %c0_17 = arith.constant 0 : index
    %27 = vector.load %arg4[%c0_16, %c0_17] : memref<1x32xf32, #tpu.memory_space<vmem>>, vector<1x32xf32>
    %28 = arith.mulf %26, %27 : vector<1x32xf32>
    %c0_18 = arith.constant 0 : index
    %c0_19 = arith.constant 0 : index
    %29 = vector.load %arg5[%c0_18, %c0_19] : memref<1x32xf32, #tpu.memory_space<vmem>>, vector<1x32xf32>
    %30 = arith.mulf %17, %28 : vector<1x32xf32>
    %31 = arith.subf %29, %30 : vector<1x32xf32>
    %cst_20 = arith.constant dense<0.000000e+00> : vector<1x128xf32>
    %32 = tpu.matmul %28, %8, %cst_20 {dimension_numbers = #tpu.dot_dimension_numbers<[1], [1], [0], [0], [0, 0, 1, 0], [], []>} : vector<1x32xf32>, vector<128x32xf32>, vector<1x128xf32> -> vector<1x128xf32>
    %33 = vector.broadcast %32 : vector<1x128xf32> to vector<32x128xf32>
    %34 = arith.mulf %7, %33 : vector<32x128xf32>
    %cst_21 = arith.constant dense<0.000000e+00> : vector<1x128xf32>
    %35 = tpu.matmul %31, %8, %cst_21 {dimension_numbers = #tpu.dot_dimension_numbers<[1], [1], [0], [0], [0, 0, 1, 0], [], []>} : vector<1x32xf32>, vector<128x32xf32>, vector<1x128xf32> -> vector<1x128xf32>
    %36 = vector.broadcast %35 : vector<1x128xf32> to vector<32x128xf32>
    %37 = arith.addf %34, %36 : vector<32x128xf32>
    %cst_22 = arith.constant 0.000000e+00 : f32
    %38 = vector.broadcast %cst_22 : f32 to vector<32x128xf32>
    %39 = arith.maximumf %37, %38 : vector<32x128xf32>
    %c0_23 = arith.constant 0 : index
    %c0_24 = arith.constant 0 : index
    %40 = vector.load %arg6[%c0_23, %c0_24] : memref<32x128xf32, #tpu.memory_space<vmem>>, vector<32x128xf32>
    tpu.vector_store %arg6[%c0_23, %c0_24], %39 {strides = array<i32>} : memref<32x128xf32, #tpu.memory_space<vmem>>, vector<32x128xf32>,
    return
  }
}

module attributes {stable_mosaic.version = 11 : i64} {
  func.func @_layer_kernel(%arg0: memref<128x512xf32, #tpu.memory_space<vmem>>, %arg1: memref<512x128xf32, #tpu.memory_space<vmem>>, %arg2: memref<1x128xf32, #tpu.memory_space<vmem>>, %arg3: memref<128x32xf32, #tpu.memory_space<vmem>>, %arg4: memref<1x32xf32, #tpu.memory_space<vmem>>, %arg5: memref<1x32xf32, #tpu.memory_space<vmem>>, %arg6: memref<128x128xf32, #tpu.memory_space<vmem>>) attributes {dimension_semantics = [], scalar_prefetch = 0 : i64, scratch_operands = 0 : i64, tpu.core_type = #tpu.core_type<tc>} {
    %c0 = arith.constant 0 : index
    %c0_0 = arith.constant 0 : index
    %0 = vector.load %arg0[%c0, %c0_0] : memref<128x512xf32, #tpu.memory_space<vmem>>, vector<128x512xf32>
    %c0_1 = arith.constant 0 : index
    %c0_2 = arith.constant 0 : index
    %1 = vector.load %arg1[%c0_1, %c0_2] : memref<512x128xf32, #tpu.memory_space<vmem>>, vector<512x128xf32>
    %cst = arith.constant dense<0.000000e+00> : vector<128x128xf32>
    %2 = tpu.matmul %0, %1, %cst {dimension_numbers = #tpu.dot_dimension_numbers<[1], [0], [0], [1], [0, 0, 1, 1], [], []>} : vector<128x512xf32>, vector<512x128xf32>, vector<128x128xf32> -> vector<128x128xf32>
    %c0_3 = arith.constant 0 : index
    %c0_4 = arith.constant 0 : index
    %3 = vector.load %arg2[%c0_3, %c0_4] : memref<1x128xf32, #tpu.memory_space<vmem>>, vector<1x128xf32>
    %4 = vector.broadcast %3 : vector<1x128xf32> to vector<128x128xf32>
    %5 = arith.addf %2, %4 : vector<128x128xf32>
    %c0_5 = arith.constant 0 : index
    %c0_6 = arith.constant 0 : index
    %6 = vector.load %arg3[%c0_5, %c0_6] : memref<128x32xf32, #tpu.memory_space<vmem>>, vector<128x32xf32>
    %cst_7 = arith.constant dense<0.000000e+00> : vector<128x32xf32>
    %7 = tpu.matmul %5, %6, %cst_7 {dimension_numbers = #tpu.dot_dimension_numbers<[1], [0], [0], [1], [0, 0, 1, 1], [], []>} : vector<128x128xf32>, vector<128x32xf32>, vector<128x32xf32> -> vector<128x32xf32>
    %cst_8 = arith.constant dense<0.000000e+00> : vector<32xf32>
    %8 = vector.multi_reduction <add>, %7, %cst_8 [0] : vector<128x32xf32> to vector<32xf32>
    %9 = vector.shape_cast %8 : vector<32xf32> to vector<1x32xf32>
    %10 = arith.mulf %5, %5 : vector<128x128xf32>
    %cst_9 = arith.constant dense<0.000000e+00> : vector<128x32xf32>
    %11 = tpu.matmul %10, %6, %cst_9 {dimension_numbers = #tpu.dot_dimension_numbers<[1], [0], [0], [1], [0, 0, 1, 1], [], []>} : vector<128x128xf32>, vector<128x32xf32>, vector<128x32xf32> -> vector<128x32xf32>
    %cst_10 = arith.constant dense<0.000000e+00> : vector<32xf32>
    %12 = vector.multi_reduction <add>, %11, %cst_10 [0] : vector<128x32xf32> to vector<32xf32>
    %13 = vector.shape_cast %12 : vector<32xf32> to vector<1x32xf32>
    %cst_11 = arith.constant 5.120000e+02 : f32
    %14 = vector.broadcast %cst_11 : f32 to vector<1x32xf32>
    %15 = arith.divf %9, %14 : vector<1x32xf32>
    %cst_12 = arith.constant 5.120000e+02 : f32
    %16 = vector.broadcast %cst_12 : f32 to vector<1x32xf32>
    %17 = arith.divf %13, %16 : vector<1x32xf32>
    %18 = arith.mulf %15, %15 : vector<1x32xf32>
    %19 = arith.subf %17, %18 : vector<1x32xf32>
    %cst_13 = arith.constant 0.000000e+00 : f32
    %20 = vector.broadcast %cst_13 : f32 to vector<1x32xf32>
    %21 = arith.maximumf %19, %20 : vector<1x32xf32>
    %cst_14 = arith.constant 9.99999974E-6 : f32
    %22 = vector.broadcast %cst_14 : f32 to vector<1x32xf32>
    %23 = arith.addf %21, %22 : vector<1x32xf32>
    %24 = math.rsqrt %23 : vector<1x32xf32>
    %c0_15 = arith.constant 0 : index
    %c0_16 = arith.constant 0 : index
    %25 = vector.load %arg4[%c0_15, %c0_16] : memref<1x32xf32, #tpu.memory_space<vmem>>, vector<1x32xf32>
    %26 = arith.mulf %24, %25 : vector<1x32xf32>
    %c0_17 = arith.constant 0 : index
    %c0_18 = arith.constant 0 : index
    %27 = vector.load %arg5[%c0_17, %c0_18] : memref<1x32xf32, #tpu.memory_space<vmem>>, vector<1x32xf32>
    %28 = arith.mulf %15, %26 : vector<1x32xf32>
    %29 = arith.subf %27, %28 : vector<1x32xf32>
    %cst_19 = arith.constant dense<0.000000e+00> : vector<1x128xf32>
    %30 = tpu.matmul %26, %6, %cst_19 {dimension_numbers = #tpu.dot_dimension_numbers<[1], [1], [0], [0], [0, 0, 1, 0], [], []>} : vector<1x32xf32>, vector<128x32xf32>, vector<1x128xf32> -> vector<1x128xf32>
    %31 = vector.broadcast %30 : vector<1x128xf32> to vector<128x128xf32>
    %32 = arith.mulf %5, %31 : vector<128x128xf32>
    %cst_20 = arith.constant dense<0.000000e+00> : vector<1x128xf32>
    %33 = tpu.matmul %29, %6, %cst_20 {dimension_numbers = #tpu.dot_dimension_numbers<[1], [1], [0], [0], [0, 0, 1, 0], [], []>} : vector<1x32xf32>, vector<128x32xf32>, vector<1x128xf32> -> vector<1x128xf32>
    %34 = vector.broadcast %33 : vector<1x128xf32> to vector<128x128xf32>
    %35 = arith.addf %32, %34 : vector<128x128xf32>
    %cst_21 = arith.constant 0.000000e+00 : f32
    %36 = vector.broadcast %cst_21 : f32 to vector<128x128xf32>
    %37 = arith.maximumf %35, %36 : vector<128x128xf32>
    %c0_22 = arith.constant 0 : index
    %c0_23 = arith.constant 0 : index
    %38 = vector.load %arg6[%c0_22, %c0_23] : memref<128x128xf32, #tpu.memory_space<vmem>>, vector<128x128xf32>
    tpu.vector_store %arg6[%c0_22, %c0_23], %37 {strides = array<i32>} : memref<128x128xf32, #tpu.memory_space<vmem>>, vector<128x128xf32>,
    return
  }
}

module attributes {stable_mosaic.version = 11 : i64} {
  func.func @_layer_kernel(%arg0: memref<512x512xf32, #tpu.memory_space<vmem>>, %arg1: memref<512x128xf32, #tpu.memory_space<vmem>>, %arg2: memref<1x128xf32, #tpu.memory_space<vmem>>, %arg3: memref<512x128xf32, #tpu.memory_space<vmem>>) attributes {dimension_semantics = [], scalar_prefetch = 0 : i64, scratch_operands = 0 : i64, tpu.core_type = #tpu.core_type<tc>} {
    %c0 = arith.constant 0 : index
    %c0_0 = arith.constant 0 : index
    %0 = vector.load %arg0[%c0, %c0_0] : memref<512x512xf32, #tpu.memory_space<vmem>>, vector<512x512xf32>
    %c0_1 = arith.constant 0 : index
    %c0_2 = arith.constant 0 : index
    %1 = vector.load %arg1[%c0_1, %c0_2] : memref<512x128xf32, #tpu.memory_space<vmem>>, vector<512x128xf32>
    %cst = arith.constant dense<0.000000e+00> : vector<512x128xf32>
    %2 = tpu.matmul %0, %1, %cst {dimension_numbers = #tpu.dot_dimension_numbers<[1], [0], [0], [1], [0, 0, 1, 1], [], []>} : vector<512x512xf32>, vector<512x128xf32>, vector<512x128xf32> -> vector<512x128xf32>
    %c0_3 = arith.constant 0 : index
    %c0_4 = arith.constant 0 : index
    %3 = vector.load %arg2[%c0_3, %c0_4] : memref<1x128xf32, #tpu.memory_space<vmem>>, vector<1x128xf32>
    %4 = vector.broadcast %3 : vector<1x128xf32> to vector<512x128xf32>
    %5 = arith.addf %2, %4 : vector<512x128xf32>
    %6 = math.tanh %5 : vector<512x128xf32>
    %c0_5 = arith.constant 0 : index
    %c0_6 = arith.constant 0 : index
    %7 = vector.load %arg3[%c0_5, %c0_6] : memref<512x128xf32, #tpu.memory_space<vmem>>, vector<512x128xf32>
    tpu.vector_store %arg3[%c0_5, %c0_6], %6 {strides = array<i32>} : memref<512x128xf32, #tpu.memory_space<vmem>>, vector<512x128xf32>,
    return
  }
}

</mosaic_0001>

<bundles_post_ra>
// kernel: tile.48
= control target key start
LH: loop header
LB: loop body
LE: loop exit
PB: predicated region body
PF: predicated region fallthrough
CT: control target
= control target key end

     0   :  { %s22_s0 = inlined_call_operand.vmem [shape: f32[32], index: 0, kind: input, shape index: {}]   ;;  %s23_s1 = inlined_call_operand.vmem [shape: f32[4,32], index: 1, kind: output, shape index: {}]  }
   0x1   :  { %v4_v0 = vld [vmem:[%s22_s0] ss:$0 sm:$0xff] }
   0x2   :  { %5 = vst [vmem:[%s23_s1] sm:$0xf] %v4_v0 }

// kernel: tile.54
= control target key start
LH: loop header
LB: loop body
LE: loop exit
PB: predicated region body
PF: predicated region fallthrough
CT: control target
= control target key end

     0   :  { %vm7_vm0 = vcmask 261120   ;;  %s37_s8 = smov 32   ;;  %s38_s9 = smov 64   ;;  %vm13_vm1 = vcmask 1048320   ;;  %vm19_vm2 = vcmask 785920   ;;  %vm25_vm3 = vcmask 523520   ;;  %s55_s0 = inlined_call_operand.vmem [shape: f32[4,32], index: 0, kind: input, shape index: {}]   ;;  %s56_s1 = inlined_call_operand.vmem [shape: f32[1,128], index: 1, kind: output, shape index: {}]  }
   0x1   :  { %v4_v0 = vld [vmem:[%s55_s0] sm:$0xf]  ;;  %s36_s0 = smov 96  }
   0x2   :  { %5 = vst [vmem:[#allocation1] sm:$0xf] %v4_v0 }
   0x9   :  { %v10_v1 = vld [vmem:[#allocation1 + $0x3] sm:$0x1]   ;;  %v22_v2 = vld [vmem:[#allocation1 + $0x1] sm:$0x1]   ;;  %v6_v3 = vld [vmem:[#allocation1] sm:$0x1]  }
   0xa   :  { %11 = vrot.lane.b32.xlu0 %v10_v1, %s36_s0  ;;  %23 = vrot.lane.b32.xlu1 %v22_v2, %s37_s8  ;;  %v16_v4 = vld [vmem:[#allocation1 + $0x2] sm:$0x1]   ;;  %8 = vst.msk [vmem:[#allocation0] sm:$0x1] %vm7_vm0, %v6_v3  }
   0xe   :  { %17 = vrot.lane.b32.xlu0 %v16_v4, %s38_s9 }
  0x7c   :  { %v12_v5 = vpop.permute.xlu0 %11   ;;  %v24_v6 = vpop.permute.xlu1 %23  }
  0x7d   :  { %14 = vst.msk [vmem:[#allocation0] sm:$0x1] %vm13_vm1, %v12_v5  }
  0x80   :  { %v18_v7 = vpop.permute.xlu0 %17  }
  0x81   :  { %20 = vst.msk [vmem:[#allocation0] sm:$0x1] %vm19_vm2, %v18_v7  }
  0x82   :  { %26 = vst.msk [vmem:[#allocation0] sm:$0x1] %vm25_vm3, %v24_v6  }
  0x89   :  { %v30_v8 = vld [vmem:[#allocation0] sm:$0x1] }
  0x8a   :  { %32 = vst [vmem:[%s56_s1] sm:$0x1] %v30_v8 }

// kernel: vqvae8_forward.6
= control target key start
LH: loop header
LB: loop body
LE: loop exit
PB: predicated region body
PF: predicated region fallthrough
CT: control target
= control target key end

     0   :  { %v1460_v0 = vmov 0.0|0.0   ;;  %vm86_vm0 = vcmask 523264   ;;  %vm441_vm1 = vcmask 261120   ;;  %vm1461_vm3 = vmmov 0   ;;  %s2065_s1 = inlined_call_operand.vmem [shape: f32[192,128], index: 1, kind: input, shape index: {}]   ;;  %s2066_s0 = inlined_call_operand.vmem [shape: f32[128,192], index: 0, kind: input, shape index: {}]   ;;  %s2067_s3 = inlined_call_operand.vmem [shape: f32[128,32], index: 3, kind: input, shape index: {}]   ;;  %s2068_s2 = inlined_call_operand.vmem [shape: f32[1,128], index: 2, kind: input, shape index: {}]   ;;  %s2069_s4 = inlined_call_operand.vmem [shape: f32[1,32], index: 4, kind: input, shape index: {}]   ;;  %s2070_s5 = inlined_call_operand.vmem [shape: f32[1,32], index: 5, kind: input, shape index: {}]   ;;  %s2071_s6 = inlined_call_operand.vmem [shape: f32[128,128], index: 6, kind: output, shape index: {}]  }
   0x1   :  { %1291 = vmatprep.subr.bf16.mxu0 %v1460_v0  ;;  %v55_v1 = vld [vmem:[%s2065_s1] sm:$0xff]  ;;  %v56_v2 = vld [vmem:[%s2065_s1 + $0x8] sm:$0xff]  ;;  %v57_v3 = vld [vmem:[%s2065_s1 + $0x10] sm:$0xff] }
   0x2   :  { %v1292_v4 = vpack.c.bf16 %v56_v2, %v55_v1  ;;  %v58_v5 = vld [vmem:[%s2065_s1 + $0x18] sm:$0xff]  ;;  %v59_v7 = vld [vmem:[%s2065_s1 + $0x20] sm:$0xff]  ;;  %v60_v8 = vld [vmem:[%s2065_s1 + $0x28] sm:$0xff] }
   0x3   :  { %v1295_v6 = vpack.c.bf16 %v58_v5, %v57_v3  ;;  %v1298_v9 = vpack.c.bf16 %v60_v8, %v59_v7  ;;  %v61_v10 = vld [vmem:[%s2065_s1 + $0x30] sm:$0xff]  ;;  %v62_v11 = vld [vmem:[%s2065_s1 + $0x38] sm:$0xff]  ;;  %v24_v12 = vld [vmem:[%s2066_s0 + $0x8] sm:$0xff] }
   0x4   :  { %1293 = vmatpush1.bf16.msra.mxu0 %v1292_v4  ;;  %961 = vmatprep.mubr.msk.f32.mxu0 %vm86_vm0, %v24_v12  ;;  %v1301_v13 = vpack.c.bf16 %v62_v11, %v61_v10  ;;  %v63_v14 = vld [vmem:[%s2065_s1 + $0x40] sm:$0xff]  ;;  %v64_v15 = vld [vmem:[%s2065_s1 + $0x48] sm:$0xff]  ;;  %v65_v17 = vld [vmem:[%s2065_s1 + $0x50] sm:$0xff] }
   0x5   :  { %1294 = vmatprep.subr.bf16.mxu0 %v1460_v0  ;;  %v1304_v16 = vpack.c.bf16 %v64_v15, %v63_v14  ;;  %v66_v18 = vld [vmem:[%s2065_s1 + $0x58] sm:$0xff]  ;;  %v280_v19 = vld [vmem:[%s2067_s3] sm:$0xff]  ;;  %v281_v21 = vld [vmem:[%s2067_s3 + $0x8] sm:$0xff] }
   0x6   :  { %v1307_v20 = vpack.c.bf16 %v66_v18, %v65_v17  ;;  %v282_v22 = vld [vmem:[%s2067_s3 + $0x10] sm:$0xff]  ;;  %v283_v23 = vld [vmem:[%s2067_s3 + $0x18] sm:$0xff]  ;;  %v67_v24 = vld [vmem:[%s2065_s1 + $0x60] sm:$0xff]  ;;  %v1562_v26 = vpack.c.bf16 %v281_v21, %v280_v19 }
   0x7   :  { %v68_v25 = vld [vmem:[%s2065_s1 + $0x68] sm:$0xff]  ;;  %v1564_v27 = vpack.c.bf16 %v283_v23, %v282_v22  ;;  %v284_v28 = vld [vmem:[%s2067_s3 + $0x20] sm:$0xff]  ;;  %v69_v31 = vld [vmem:[%s2065_s1 + $0x70] sm:$0xff] }
   0x8   :  { %1296 = vmatpush1.bf16.msra.mxu0 %v1295_v6  ;;  %v285_v29 = vld [vmem:[%s2067_s3 + $0x28] sm:$0xff]  ;;  %1328 = vmatprep.subr.bf16.mxu1 %v1562_v26  ;;  %v1310_v30 = vpack.c.bf16 %v68_v25, %v67_v24  ;;  %v70_v32 = vld [vmem:[%s2065_s1 + $0x78] sm:$0xff]  ;;  %v286_v34 = vld [vmem:[%s2067_s3 + $0x30] sm:$0xff] }
   0x9   :  { %1297 = vmatprep.subr.bf16.mxu0 %v1460_v0  ;;  %1330 = vmatpush3.bf16.msra.mxu1 %v1562_v26  ;;  %v1582_v33 = vpack.c.bf16 %v285_v29, %v284_v28  ;;  %v287_v35 = vld [vmem:[%s2067_s3 + $0x38] sm:$0xff]  ;;  %v1313_v36 = vpack.c.bf16 %v70_v32, %v69_v31  ;;  %v71_v37 = vld [vmem:[%s2065_s1 + $0x80] sm:$0xff]  ;;  %v72_v38 = vld [vmem:[%s2065_s1 + $0x88] sm:$0xff] }
   0xa   :  { %1332 = vmatprep.subr.bf16.mxu1 %v1564_v27  ;;  %v1599_v39 = vpack.c.bf16 %v287_v35, %v286_v34  ;;  %v288_v40 = vld [vmem:[%s2067_s3 + $0x40] sm:$0xff]  ;;  %v289_v41 = vld [vmem:[%s2067_s3 + $0x48] sm:$0xff]  ;;  %v1316_v42 = vpack.c.bf16 %v72_v38, %v71_v37  ;;  %v73_v43 = vld [vmem:[%s2065_s1 + $0x90] sm:$0xff] }
   0xb   :  { %v74_v44 = vld [vmem:[%s2065_s1 + $0x98] sm:$0xff]  ;;  %v1616_v45 = vpack.c.bf16 %v289_v41, %v288_v40  ;;  %v290_v46 = vld [vmem:[%s2067_s3 + $0x50] sm:$0xff]  ;;  %v75_v49 = vld [vmem:[%s2065_s1 + $0xa0] sm:$0xff] }
   0xc   :  { %1299 = vmatpush1.bf16.msra.mxu0 %v1298_v9  ;;  %v291_v47 = vld [vmem:[%s2067_s3 + $0x58] sm:$0xff]  ;;  %v1319_v48 = vpack.c.bf16 %v74_v44, %v73_v43  ;;  %v76_v50 = vld [vmem:[%s2065_s1 + $0xa8] sm:$0xff]  ;;  %v292_v52 = vld [vmem:[%s2067_s3 + $0x60] sm:$0xff] }
   0xd   :  { %1300 = vmatprep.subr.bf16.mxu0 %v1460_v0  ;;  %1334 = vmatpush3.bf16.msra.mxu1 %v1564_v27  ;;  %v1633_v51 = vpack.c.bf16 %v291_v47, %v290_v46  ;;  %v293_v53 = vld [vmem:[%s2067_s3 + $0x68] sm:$0xff]  ;;  %v1322_v54 = vpack.c.bf16 %v76_v50, %v75_v49  ;;  %v77_v55 = vld [vmem:[%s2065_s1 + $0xb0] sm:$0xff]  ;;  %v78_v56 = vld [vmem:[%s2065_s1 + $0xb8] sm:$0xff] }
   0xe   :  { %1336 = vmatprep.subr.bf16.mxu1 %v1582_v33  ;;  %v1650_v57 = vpack.c.bf16 %v293_v53, %v292_v52  ;;  %v1325_v58 = vpack.c.bf16 %v78_v56, %v77_v55  ;;  %v23_v59 = vld [vmem:[%s2066_s0] sm:$0xff]  ;;  %v26_v60 = vld [vmem:[%s2066_s0 + $0x18] sm:$0xff]  ;;  %v25_v61 = vld [vmem:[%s2066_s0 + $0x10] sm:$0xff] }
   0xf   :  { %v28_v62 = vld [vmem:[%s2066_s0 + $0x28] sm:$0xff]  ;;  %v27_v63 = vld [vmem:[%s2066_s0 + $0x20] sm:$0xff]  ;;  %v30_v1 = vld [vmem:[%s2066_s0 + $0x38] sm:$0xff] }
  0x10   :  { %1302 = vmatpush1.bf16.msra.mxu0 %v1301_v13  ;;  %v29_v2 = vld [vmem:[%s2066_s0 + $0x30] sm:$0xff]  ;;  %v32_v3 = vld [vmem:[%s2066_s0 + $0x48] sm:$0xff]  ;;  %v31_v4 = vld [vmem:[%s2066_s0 + $0x40] sm:$0xff] }
  0x11   :  { %1303 = vmatprep.subr.bf16.mxu0 %v1460_v0  ;;  %1338 = vmatpush3.bf16.msra.mxu1 %v1582_v33  ;;  %v34_v5 = vld [vmem:[%s2066_s0 + $0x58] sm:$0xff]  ;;  %v33_v6 = vld [vmem:[%s2066_s0 + $0x50] sm:$0xff]  ;;  %v36_v7 = vld [vmem:[%s2066_s0 + $0x68] sm:$0xff] }
  0x12   :  { %1340 = vmatprep.subr.bf16.mxu1 %v1599_v39  ;;  %v35_v8 = vld [vmem:[%s2066_s0 + $0x60] sm:$0xff]  ;;  %v38_v9 = vld [vmem:[%s2066_s0 + $0x78] sm:$0xff]  ;;  %v37_v10 = vld [vmem:[%s2066_s0 + $0x70] sm:$0xff] }
  0x13   :  { %v40_v11 = vld [vmem:[%s2066_s0 + $0x88] sm:$0xff]  ;;  %v39_v12 = vld [vmem:[%s2066_s0 + $0x80] sm:$0xff]  ;;  %v42_v13 = vld [vmem:[%s2066_s0 + $0x98] sm:$0xff] }
  0x14   :  { %1305 = vmatpush1.bf16.msra.mxu0 %v1304_v16  ;;  %v41_v14 = vld [vmem:[%s2066_s0 + $0x90] sm:$0xff]  ;;  %v44_v15 = vld [vmem:[%s2066_s0 + $0xa8] sm:$0xff]  ;;  %v43_v16 = vld [vmem:[%s2066_s0 + $0xa0] sm:$0xff] }
  0x15   :  { %1306 = vmatprep.subr.bf16.mxu0 %v1460_v0  ;;  %1342 = vmatpush3.bf16.msra.mxu1 %v1599_v39  ;;  %v46_v17 = vld [vmem:[%s2066_s0 + $0xb8] sm:$0xff]  ;;  %v45_v18 = vld [vmem:[%s2066_s0 + $0xb0] sm:$0xff]  ;;  %v48_v19 = vld [vmem:[%s2066_s0 + $0xc8] sm:$0xff] }
  0x16   :  { %1344 = vmatprep.subr.bf16.mxu1 %v1616_v45  ;;  %v50_v21 = vld [vmem:[%s2066_s0 + $0xd8] sm:$0xff]  ;;  %v49_v22 = vld [vmem:[%s2066_s0 + $0xd0] sm:$0xff]  ;;  %v52_v23 = vld [vmem:[%s2066_s0 + $0xe8] sm:$0xff] }
  0x17   :  { %v51_v24 = vld [vmem:[%s2066_s0 + $0xe0] sm:$0xff]  ;;  %v54_v25 = vld [vmem:[%s2066_s0 + $0xf8] sm:$0xff]  ;;  %v53_v28 = vld [vmem:[%s2066_s0 + $0xf0] sm:$0xff] }
  0x18   :  { %1308 = vmatpush1.bf16.msra.mxu0 %v1307_v20  ;;  %v47_v20 = vld [vmem:[%s2066_s0 + $0xc0] sm:$0xff]  ;;  %v294_v29 = vld [vmem:[%s2067_s3 + $0x70] sm:$0xff]  ;;  %vm1895_vm2 = vmpackc.low %vm441_vm1, %vm441_vm1 }
  0x19   :  { %1309 = vmatprep.subr.bf16.mxu0 %v1460_v0  ;;  %1346 = vmatpush3.bf16.msra.mxu1 %v1616_v45  ;;  %v1779_v32 = vld [vmem:[%s2068_s2] ss:$0 sm:$0xff] }
  0x1a   :  { %1348 = vmatprep.subr.bf16.mxu1 %v1633_v51 }
  0x1c   :  { %1311 = vmatpush1.bf16.msra.mxu0 %v1310_v30  ;;  %v295_v30 = vld [vmem:[%s2067_s3 + $0x78] sm:$0xff] }
  0x1d   :  { %1312 = vmatprep.subr.bf16.mxu0 %v1460_v0  ;;  %1350 = vmatpush3.bf16.msra.mxu1 %v1633_v51  ;;  %v1771_v31 = vpack.c.bf16 %v295_v30, %v294_v29 }
  0x1e   :  { %1352 = vmatprep.subr.bf16.mxu1 %v1650_v57 }
  0x20   :  { %1314 = vmatpush1.bf16.msra.mxu0 %v1313_v36 }
  0x21   :  { %1315 = vmatprep.subr.bf16.mxu0 %v1460_v0  ;;  %1354 = vmatpush3.bf16.msra.mxu1 %v1650_v57 }
  0x22   :  { %1356 = vmatprep.subr.bf16.mxu1 %v1771_v31 }
  0x24   :  { %1317 = vmatpush1.bf16.msra.mxu0 %v1316_v42 }
  0x25   :  { %1318 = vmatprep.subr.bf16.mxu0 %v1460_v0  ;;  %1358 = vmatpush3.bf16.msra.mxu1 %v1771_v31 }
  0x26   :  { %1360 = vmatprep.subr.bf16.mxu1 %v1562_v26 }
  0x28   :  { %1320 = vmatpush1.bf16.msra.mxu0 %v1319_v48 }
  0x29   :  { %1321 = vmatprep.subr.bf16.mxu0 %v1460_v0 }
  0x2c   :  { %1323 = vmatpush1.bf16.msra.mxu0 %v1322_v54 }
  0x2d   :  { %1324 = vmatprep.subr.bf16.mxu0 %v1460_v0 }
  0x30   :  { %1326 = vmatpush1.bf16.msra.mxu0 %v1325_v58 }
  0x31   :  { %1391 = vmatprep.subr.bf16.mxu0 %v1460_v0 }
  0x33   :  { %200 = vmatmul.mubr.f32.vlgmr.msra.gmra.mrb[0].mxu0 %v23_v59 }
  0x34   :  { %962 = vmatprep.mubr.msk.f32.mxu0 %vm86_vm0, %v26_v60 }
  0x37   :  { %205 = vmatmul.mubr.f32.gmra.mrb[2].mxu0 %v25_v61 }
  0x38   :  { %963 = vmatprep.mubr.msk.f32.mxu0 %vm86_vm0, %v28_v62 }
  0x39   :  { %1394 = vmatpush3.bf16.xpose.msk.msra.mxu0 %vm1895_vm2, %v1562_v26 }
  0x3a   :  { %1395 = vmatprep.subr.bf16.mxu0 %v1460_v0 }
  0x3b   :  { %210 = vmatmul.mubr.f32.gmra.mrb[4].mxu0 %v27_v63 }
  0x3c   :  { %964 = vmatprep.mubr.msk.f32.mxu0 %vm86_vm0, %v30_v1 }
  0x3f   :  { %215 = vmatmul.mubr.f32.gmra.mrb[6].mxu0 %v29_v2 }
  0x40   :  { %965 = vmatprep.mubr.msk.f32.mxu0 %vm86_vm0, %v32_v3 }
  0x41   :  { %1398 = vmatpush3.bf16.xpose.msk.msra.mxu0 %vm1895_vm2, %v1564_v27 }
  0x42   :  { %1399 = vmatprep.subr.bf16.mxu0 %v1460_v0 }
  0x43   :  { %220 = vmatmul.mubr.f32.gmra.mrb[8].mxu0 %v31_v4 }
  0x44   :  { %966 = vmatprep.mubr.msk.f32.mxu0 %vm86_vm0, %v34_v5 }
  0x47   :  { %225 = vmatmul.mubr.f32.gmra.mrb[10].mxu0 %v33_v6 }
  0x48   :  { %967 = vmatprep.mubr.msk.f32.mxu0 %vm86_vm0, %v36_v7 }
  0x49   :  { %1402 = vmatpush3.bf16.xpose.msk.msra.mxu0 %vm1895_vm2, %v1582_v33 }
  0x4a   :  { %1403 = vmatprep.subr.bf16.mxu0 %v1460_v0 }
  0x4b   :  { %230 = vmatmul.mubr.f32.gmra.mrb[12].mxu0 %v35_v8 }
  0x4c   :  { %968 = vmatprep.mubr.msk.f32.mxu0 %vm86_vm0, %v38_v9 }
  0x4f   :  { %235 = vmatmul.mubr.f32.gmra.mrb[14].mxu0 %v37_v10 }
  0x50   :  { %969 = vmatprep.mubr.msk.f32.mxu0 %vm86_vm0, %v40_v11 }
  0x51   :  { %1406 = vmatpush3.bf16.xpose.msk.msra.mxu0 %vm1895_vm2, %v1599_v39 }
  0x52   :  { %1407 = vmatprep.subr.bf16.mxu0 %v1460_v0 }
  0x53   :  { %240 = vmatmul.mubr.f32.gmra.mrb[16].mxu0 %v39_v12 }
  0x54   :  { %970 = vmatprep.mubr.msk.f32.mxu0 %vm86_vm0, %v42_v13 }
  0x57   :  { %245 = vmatmul.mubr.f32.gmra.mrb[18].mxu0 %v41_v14 }
  0x58   :  { %971 = vmatprep.mubr.msk.f32.mxu0 %vm86_vm0, %v44_v15 }
  0x59   :  { %1410 = vmatpush3.bf16.xpose.msk.msra.mxu0 %vm1895_vm2, %v1616_v45 }
  0x5a   :  { %1411 = vmatprep.subr.bf16.mxu0 %v1460_v0 }
  0x5b   :  { %250 = vmatmul.mubr.f32.gmra.mrb[20].mxu0 %v43_v16 }
  0x5c   :  { %972 = vmatprep.mubr.msk.f32.mxu0 %vm86_vm0, %v46_v17 }
  0x5f   :  { %255 = vmatmul.mubr.f32.gmra.mrb[22].mxu0 %v45_v18 }
  0x60   :  { %973 = vmatprep.mubr.msk.f32.mxu0 %vm86_vm0, %v48_v19 }
  0x61   :  { %1414 = vmatpush3.bf16.xpose.msk.msra.mxu0 %vm1895_vm2, %v1633_v51 }
  0x62   :  { %1415 = vmatprep.subr.bf16.mxu0 %v1460_v0 }
  0x63   :  { %260 = vmatmul.mubr.f32.gmra.mrb[24].mxu0 %v47_v20 }
  0x64   :  { %974 = vmatprep.mubr.msk.f32.mxu0 %vm86_vm0, %v50_v21 }
  0x67   :  { %265 = vmatmul.mubr.f32.gmra.mrb[26].mxu0 %v49_v22 }
  0x68   :  { %975 = vmatprep.mubr.msk.f32.mxu0 %vm86_vm0, %v52_v23 }
  0x69   :  { %1418 = vmatpush3.bf16.xpose.msk.msra.mxu0 %vm1895_vm2, %v1650_v57 }
  0x6a   :  { %1419 = vmatprep.subr.bf16.mxu0 %v1460_v0 }
  0x6b   :  { %270 = vmatmul.mubr.f32.gmra.mrb[28].mxu0 %v51_v24 }
  0x6c   :  { %976 = vmatprep.mubr.msk.f32.mxu0 %vm86_vm0, %v54_v25 }
  0x6f   :  { %275 = vmatmul.mubr.f32.gmra.mrb[30].mxu0 %v53_v28 }
  0x71   :  { %1422 = vmatpush3.bf16.xpose.msk.msra.mxu0 %vm1895_vm2, %v1771_v31 }
 0x106   :  { %v201_v34 = vpop.f32.mrb[0].mxu0 }
 0x107   :  { %v1782_v35 = vadd.f32 %v1779_v32, %v201_v34  ;;  %v203_v36 = vpop.f32.mrb[1].mxu0 }
 0x109   :  { %1141 = vmatprep.mubr.f32.mxu1 %v1782_v35  ;;  %v479_v23 = vmul.f32 %v1782_v35, %v1782_v35 }
 0x10a   :  { %v206_v37 = vpop.f32.mrb[2].mxu0 }
 0x10b   :  { %v1786_v38 = vadd.f32 %v1779_v32, %v206_v37  ;;  %v208_v40 = vpop.f32.mrb[3].mxu0 }
 0x10d   :  { %1142 = vmatmul.mubr.f32.vlgmr.msra.gmra.mrb[0].mxu1 %v1786_v38  ;;  %v480_v24 = vmul.f32 %v1786_v38, %v1786_v38 }
 0x10e   :  { %v211_v41 = vpop.f32.mrb[4].mxu0  ;;  %1362 = vmatpush3.bf16.msra.mxu1 %v1562_v26 }
 0x10f   :  { %v1791_v42 = vadd.f32 %v1779_v32, %v211_v41  ;;  %v213_v43 = vpop.f32.mrb[5].mxu0  ;;  %1364 = vmatprep.subr.bf16.mxu1 %v1564_v27 }
 0x111   :  { %1144 = vmatprep.mubr.f32.mxu1 %v1791_v42  ;;  %v481_v25 = vmul.f32 %v1791_v42, %v1791_v42 }
 0x112   :  { %v216_v44 = vpop.f32.mrb[6].mxu0  ;;  %1366 = vmatpush3.bf16.msra.mxu1 %v1564_v27 }
 0x113   :  { %v1797_v46 = vadd.f32 %v1779_v32, %v216_v44  ;;  %v218_v47 = vpop.f32.mrb[7].mxu0  ;;  %1368 = vmatprep.subr.bf16.mxu1 %v1582_v33 }
 0x115   :  { %1145 = vmatmul.mubr.f32.gmra.mrb[2].mxu1 %v1797_v46  ;;  %v482_v28 = vmul.f32 %v1797_v46, %v1797_v46 }
 0x116   :  { %v221_v48 = vpop.f32.mrb[8].mxu0  ;;  %1370 = vmatpush3.bf16.msra.mxu1 %v1582_v33 }
 0x117   :  { %v1803_v49 = vadd.f32 %v1779_v32, %v221_v48  ;;  %v223_v50 = vpop.f32.mrb[9].mxu0  ;;  %1372 = vmatprep.subr.bf16.mxu1 %v1599_v39 }
 0x119   :  { %1147 = vmatprep.mubr.f32.mxu1 %v1803_v49  ;;  %v483_v29 = vmul.f32 %v1803_v49, %v1803_v49 }
 0x11a   :  { %v226_v52 = vpop.f32.mrb[10].mxu0  ;;  %1374 = vmatpush3.bf16.msra.mxu1 %v1599_v39 }
 0x11b   :  { %v1809_v53 = vadd.f32 %v1779_v32, %v226_v52  ;;  %v228_v54 = vpop.f32.mrb[11].mxu0  ;;  %1376 = vmatprep.subr.bf16.mxu1 %v1616_v45 }
 0x11d   :  { %1148 = vmatmul.mubr.f32.gmra.mrb[4].mxu1 %v1809_v53  ;;  %v484_v30 = vmul.f32 %v1809_v53, %v1809_v53 }
 0x11e   :  { %v231_v55 = vpop.f32.mrb[12].mxu0  ;;  %1378 = vmatpush3.bf16.msra.mxu1 %v1616_v45 }
 0x11f   :  { %v1815_v56 = vadd.f32 %v1779_v32, %v231_v55  ;;  %v233_v58 = vpop.f32.mrb[13].mxu0  ;;  %1380 = vmatprep.subr.bf16.mxu1 %v1633_v51 }
 0x121   :  { %1150 = vmatprep.mubr.f32.mxu1 %v1815_v56 }
 0x122   :  { %v236_v59 = vpop.f32.mrb[14].mxu0  ;;  %1382 = vmatpush3.bf16.msra.mxu1 %v1633_v51 }
 0x123   :  { %v1821_v60 = vadd.f32 %v1779_v32, %v236_v59  ;;  %v238_v61 = vpop.f32.mrb[15].mxu0  ;;  %1384 = vmatprep.subr.bf16.mxu1 %v1650_v57 }
 0x125   :  { %1151 = vmatmul.mubr.f32.gmra.mrb[6].mxu1 %v1821_v60  ;;  %v486_v34 = vmul.f32 %v1821_v60, %v1821_v60 }
 0x126   :  { %v241_v62 = vpop.f32.mrb[16].mxu0  ;;  %1386 = vmatpush3.bf16.msra.mxu1 %v1650_v57 }
 0x127   :  { %v1827_v63 = vadd.f32 %v1779_v32, %v241_v62  ;;  %v243_v1 = vpop.f32.mrb[17].mxu0  ;;  %1388 = vmatprep.subr.bf16.mxu1 %v1771_v31 }
 0x129   :  { %1153 = vmatprep.mubr.f32.mxu1 %v1827_v63  ;;  %v487_v36 = vmul.f32 %v1827_v63, %v1827_v63 }
 0x12a   :  { %v246_v2 = vpop.f32.mrb[18].mxu0  ;;  %1390 = vmatpush3.bf16.msra.mxu1 %v1771_v31 }
 0x12b   :  { %v1833_v3 = vadd.f32 %v1779_v32, %v246_v2  ;;  %v248_v4 = vpop.f32.mrb[19].mxu0  ;;  %1423 = vmatprep.subr.bf16.mxu1 %v1460_v0 }
 0x12d   :  { %1154 = vmatmul.mubr.f32.gmra.mrb[8].mxu1 %v1833_v3  ;;  %v488_v37 = vmul.f32 %v1833_v3, %v1833_v3 }
 0x12e   :  { %v251_v5 = vpop.f32.mrb[20].mxu0 }
 0x12f   :  { %v1838_v6 = vadd.f32 %v1779_v32, %v251_v5  ;;  %v253_v7 = vpop.f32.mrb[21].mxu0 }
 0x131   :  { %1156 = vmatprep.mubr.f32.mxu1 %v1838_v6  ;;  %v489_v40 = vmul.f32 %v1838_v6, %v1838_v6 }
 0x132   :  { %v256_v8 = vpop.f32.mrb[22].mxu0 }
 0x133   :  { %v1842_v9 = vadd.f32 %v1779_v32, %v256_v8  ;;  %v258_v10 = vpop.f32.mrb[23].mxu0 }
 0x135   :  { %1157 = vmatmul.mubr.f32.gmra.mrb[10].mxu1 %v1842_v9  ;;  %v490_v41 = vmul.f32 %v1842_v9, %v1842_v9 }
 0x136   :  { %v261_v11 = vpop.f32.mrb[24].mxu0 }
 0x137   :  { %v1846_v12 = vadd.f32 %v1779_v32, %v261_v11  ;;  %v263_v13 = vpop.f32.mrb[25].mxu0 }
 0x139   :  { %1159 = vmatprep.mubr.f32.mxu1 %v1846_v12  ;;  %v491_v43 = vmul.f32 %v1846_v12, %v1846_v12 }
 0x13a   :  { %v266_v14 = vpop.f32.mrb[26].mxu0 }
 0x13b   :  { %v1850_v15 = vadd.f32 %v1779_v32, %v266_v14  ;;  %v268_v16 = vpop.f32.mrb[27].mxu0 }
 0x13d   :  { %1160 = vmatmul.mubr.f32.gmra.mrb[12].mxu1 %v1850_v15  ;;  %v492_v44 = vmul.f32 %v1850_v15, %v1850_v15 }
 0x13e   :  { %v271_v17 = vpop.f32.mrb[28].mxu0 }
 0x13f   :  { %v1854_v18 = vadd.f32 %v1779_v32, %v271_v17  ;;  %v273_v19 = vpop.f32.mrb[29].mxu0 }
 0x141   :  { %1162 = vmatprep.mubr.f32.mxu1 %v1854_v18  ;;  %v493_v47 = vmul.f32 %v1854_v18, %v1854_v18 }
 0x142   :  { %v276_v20 = vpop.f32.mrb[30].mxu0 }
 0x143   :  { %v1858_v21 = vadd.f32 %v1779_v32, %v276_v20  ;;  %v278_v22 = vpop.f32.mrb[31].mxu0  ;;  %v485_v32 = vmul.f32 %v1815_v56, %v1815_v56 }
 0x145   :  { %1163 = vmatmul.mubr.f32.gmra.mrb[14].mxu1 %v1858_v21  ;;  %v494_v48 = vmul.f32 %v1858_v21, %v1858_v21 }
 0x146   :  { %1197 = vmatprep.mubr.f32.mxu1 %v479_v23 }
 0x149   :  { %1198 = vmatmul.mubr.f32.vlgmr.msra.gmra.mrb[16].mxu1 %v480_v24 }
 0x14a   :  { %1200 = vmatprep.mubr.f32.mxu1 %v481_v25  ;;  %1426 = vmatpush3.bf16.xpose.msk.msra.mxu1 %vm1895_vm2, %v1562_v26  ;;  %v1462_v26 = vmov 0.0  }
 0x14b   :  { %1427 = vmatprep.subr.bf16.mxu1 %v1460_v0  ;;  %1253 = vmatprep.mubr.msk.f32.mxu0 %vm1461_vm3, %v1462_v26 }
 0x14d   :  { %1201 = vmatmul.mubr.f32.gmra.mrb[18].mxu1 %v482_v28 }
 0x14e   :  { %1203 = vmatprep.mubr.f32.mxu1 %v483_v29 }
 0x151   :  { %1204 = vmatmul.mubr.f32.gmra.mrb[20].mxu1 %v484_v30 }
 0x152   :  { %1206 = vmatprep.mubr.f32.mxu1 %v485_v32  ;;  %1430 = vmatpush3.bf16.xpose.msk.msra.mxu1 %vm1895_vm2, %v1564_v27 }
 0x153   :  { %1431 = vmatprep.subr.bf16.mxu1 %v1460_v0 }
 0x155   :  { %1207 = vmatmul.mubr.f32.gmra.mrb[22].mxu1 %v486_v34 }
 0x156   :  { %1209 = vmatprep.mubr.f32.mxu1 %v487_v36 }
 0x159   :  { %1210 = vmatmul.mubr.f32.gmra.mrb[24].mxu1 %v488_v37 }
 0x15a   :  { %1212 = vmatprep.mubr.f32.mxu1 %v489_v40  ;;  %1434 = vmatpush3.bf16.xpose.msk.msra.mxu1 %vm1895_vm2, %v1582_v33 }
 0x15b   :  { %1435 = vmatprep.subr.bf16.mxu1 %v1460_v0 }
 0x15d   :  { %1213 = vmatmul.mubr.f32.gmra.mrb[26].mxu1 %v490_v41 }
 0x15e   :  { %1215 = vmatprep.mubr.f32.mxu1 %v491_v43 }
 0x161   :  { %1216 = vmatmul.mubr.f32.gmra.mrb[28].mxu1 %v492_v44 }
 0x162   :  { %1218 = vmatprep.mubr.f32.mxu1 %v493_v47  ;;  %1438 = vmatpush3.bf16.xpose.msk.msra.mxu1 %vm1895_vm2, %v1599_v39 }
 0x163   :  { %1439 = vmatprep.subr.bf16.mxu1 %v1460_v0 }
 0x165   :  { %1219 = vmatmul.mubr.f32.gmra.mrb[30].mxu1 %v494_v48 }
 0x166   :  { %1288 = vmatprep.mubr.msk.f32.mxu1 %vm1461_vm3, %v1462_v26 }
 0x16a   :  { %1442 = vmatpush3.bf16.xpose.msk.msra.mxu1 %vm1895_vm2, %v1616_v45 }
 0x16b   :  { %1443 = vmatprep.subr.bf16.mxu1 %v1460_v0 }
 0x172   :  { %1446 = vmatpush3.bf16.xpose.msk.msra.mxu1 %vm1895_vm2, %v1633_v51 }
 0x173   :  { %1447 = vmatprep.subr.bf16.mxu1 %v1460_v0 }
 0x17a   :  { %1450 = vmatpush3.bf16.xpose.msk.msra.mxu1 %vm1895_vm2, %v1650_v57 }
 0x17b   :  { %1451 = vmatprep.subr.bf16.mxu1 %v1460_v0 }
 0x182   :  { %1454 = vmatpush3.bf16.xpose.msk.msra.mxu1 %vm1895_vm2, %v1771_v31 }
 0x1e0   :  { %v1143_v27 = vpop.f32.mrb[0].mxu1 }
 0x1e1   :  { %v443_v33 = vsel %vm441_vm1, %v1143_v27, 0.0  ;;  %v362_v39 = vpop.f32.mrb[1].mxu1 }
 0x1e2   :  { %v442_v45 = vsel %vm441_vm1, %v362_v39, 0.0 }
 0x1e3   :  { %v444_v51 = vadd.f32 %v443_v33, %v442_v45 }
 0x1e8   :  { %v1146_v0 = vpop.f32.mrb[2].mxu1 }
 0x1e9   :  { %v372_v57 = vpop.f32.mrb[3].mxu1  ;;  %v447_v55 = vsel %vm441_vm1, %v1146_v0, 0.0 }
 0x1ea   :  { %v445_v52 = vsel %vm441_vm1, %v372_v57, 0.0 }
 0x1eb   :  { %v446_v54 = vadd.f32 %v445_v52, %v444_v51 }
 0x1ed   :  { %v448_v58 = vadd.f32 %v447_v55, %v446_v54 }
 0x1f0   :  { %v1149_v59 = vpop.f32.mrb[4].mxu1 }
 0x1f1   :  { %v382_v61 = vpop.f32.mrb[5].mxu1  ;;  %v451_v1 = vsel %vm441_vm1, %v1149_v59, 0.0 }
 0x1f2   :  { %v449_v62 = vsel %vm441_vm1, %v382_v61, 0.0 }
 0x1f3   :  { %v450_v31 = vadd.f32 %v449_v62, %v448_v58 }
 0x1f5   :  { %v452_v2 = vadd.f32 %v451_v1, %v450_v31 }
 0x1f8   :  { %v1152_v4 = vpop.f32.mrb[6].mxu1 }
 0x1f9   :  { %v392_v5 = vpop.f32.mrb[7].mxu1  ;;  %v455_v10 = vsel %vm441_vm1, %v1152_v4, 0.0 }
 0x1fa   :  { %v453_v7 = vsel %vm441_vm1, %v392_v5, 0.0 }
 0x1fb   :  { %v454_v8 = vadd.f32 %v453_v7, %v452_v2 }
 0x1fd   :  { %v456_v11 = vadd.f32 %v455_v10, %v454_v8 }
 0x200   :  { %v1155_v13 = vpop.f32.mrb[8].mxu1 }
 0x201   :  { %v402_v14 = vpop.f32.mrb[9].mxu1  ;;  %v459_v19 = vsel %vm441_vm1, %v1155_v13, 0.0 }
 0x202   :  { %v457_v16 = vsel %vm441_vm1, %v402_v14, 0.0 }
 0x203   :  { %v458_v17 = vadd.f32 %v457_v16, %v456_v11 }
 0x205   :  { %v460_v20 = vadd.f32 %v459_v19, %v458_v17 }
 0x208   :  { %v1158_v22 = vpop.f32.mrb[10].mxu1 }
 0x209   :  { %v412_v23 = vpop.f32.mrb[11].mxu1  ;;  %v463_v28 = vsel %vm441_vm1, %v1158_v22, 0.0 }
 0x20a   :  { %v461_v24 = vsel %vm441_vm1, %v412_v23, 0.0 }
 0x20b   :  { %v462_v25 = vadd.f32 %v461_v24, %v460_v20 }
 0x20d   :  { %v464_v29 = vadd.f32 %v463_v28, %v462_v25 }
 0x210   :  { %v1161_v30 = vpop.f32.mrb[12].mxu1 }
 0x211   :  { %v422_v32 = vpop.f32.mrb[13].mxu1  ;;  %v467_v37 = vsel %vm441_vm1, %v1161_v30, 0.0 }
 0x212   :  { %v465_v34 = vsel %vm441_vm1, %v422_v32, 0.0 }
 0x213   :  { %v466_v36 = vadd.f32 %v465_v34, %v464_v29 }
 0x215   :  { %v468_v40 = vadd.f32 %v467_v37, %v466_v36 }
 0x218   :  { %v1164_v41 = vpop.f32.mrb[14].mxu1 }
 0x219   :  { %v432_v43 = vpop.f32.mrb[15].mxu1  ;;  %v471_v48 = vsel %vm441_vm1, %v1164_v41, 0.0 }
 0x21a   :  { %v469_v44 = vsel %vm441_vm1, %v432_v43, 0.0 }
 0x21b   :  { %v470_v47 = vadd.f32 %v469_v44, %v468_v40 }
 0x21c   :  { %v1199_v50 = vpop.f32.mrb[16].mxu1 }
 0x21d   :  { %v472_v26 = vadd.f32 %v471_v48, %v470_v47  ;;  %v641_v27 = vsel %vm441_vm1, %v1199_v50, 0.0  ;;  %v561_v33 = vpop.f32.mrb[17].mxu1 }
 0x21e   :  { %v640_v39 = vsel %vm441_vm1, %v561_v33, 0.0 }
 0x21f   :  { %v642_v45 = vadd.f32 %v641_v27, %v640_v39  ;;  %v473_v16 = vrot.slane %v472_v26, 4 }
 0x220   :  { %v1202_v51 = vpop.f32.mrb[18].mxu1 }
 0x221   :  { %v571_v0 = vpop.f32.mrb[19].mxu1  ;;  %v645_v54 = vsel %vm441_vm1, %v1202_v51, 0.0  ;;  %v474_v25 = vadd.f32 %v473_v16, %v472_v26 }
 0x222   :  { %v643_v57 = vsel %vm441_vm1, %v571_v0, 0.0 }
 0x223   :  { %v644_v52 = vadd.f32 %v643_v57, %v642_v45  ;;  %v475_v37 = vrot.slane %v474_v25, 2 }
 0x224   :  { %v1205_v55 = vpop.f32.mrb[20].mxu1 }
 0x225   :  { %v581_v58 = vpop.f32.mrb[21].mxu1  ;;  %v646_v59 = vadd.f32 %v645_v54, %v644_v52  ;;  %v649_v31 = vsel %vm441_vm1, %v1205_v55, 0.0  ;;  %v476_v50 = vadd.f32 %v475_v37, %v474_v25 }
 0x226   :  { %v647_v61 = vsel %vm441_vm1, %v581_v58, 0.0 }
 0x227   :  { %v648_v62 = vadd.f32 %v647_v61, %v646_v59  ;;  %v477_v39 = vrot.slane %v476_v50, 1 }
 0x228   :  { %v1208_v1 = vpop.f32.mrb[22].mxu1 }
 0x229   :  { %v591_v2 = vpop.f32.mrb[23].mxu1  ;;  %v650_v4 = vadd.f32 %v649_v31, %v648_v62  ;;  %v653_v8 = vsel %vm441_vm1, %v1208_v1, 0.0  ;;  %v478_v0 = vadd.f32 %v477_v39, %v476_v50 }
 0x22a   :  { %v651_v5 = vsel %vm441_vm1, %v591_v2, 0.0  ;;  %v685_v2 = vld [vmem:[%s2069_s4] sm:$0x1] }
 0x22b   :  { %v652_v7 = vadd.f32 %v651_v5, %v650_v4  ;;  %v678_v54 = vmul.f32 0.001953125, %v478_v0 }
 0x22c   :  { %v1211_v10 = vpop.f32.mrb[24].mxu1 }
 0x22d   :  { %v601_v11 = vpop.f32.mrb[25].mxu1  ;;  %v654_v13 = vadd.f32 %v653_v8, %v652_v7  ;;  %v657_v19 = vsel %vm441_vm1, %v1211_v10, 0.0  ;;  %v680_v59 = vmul.f32 %v678_v54, %v678_v54  ;;  %v687_v7 = vld [vmem:[%s2070_s5] sm:$0x1] }
 0x22e   :  { %v655_v14 = vsel %vm441_vm1, %v601_v11, 0.0  ;;  %v811_v11 = vlaneseq }
 0x22f   :  { %v656_v17 = vadd.f32 %v655_v14, %v654_v13 }
 0x230   :  { %v1214_v20 = vpop.f32.mrb[26].mxu1  ;;  %v812_v13 = vshrl.u32 %v811_v11, 7 }
 0x231   :  { %v611_v22 = vpop.f32.mrb[27].mxu1  ;;  %v658_v23 = vadd.f32 %v657_v19, %v656_v17  ;;  %v661_v29 = vsel %vm441_vm1, %v1214_v20, 0.0 }
 0x232   :  { %v659_v24 = vsel %vm441_vm1, %v611_v22, 0.0  ;;  %v813_v14 = vsub.s32 0, %v812_v13 }
 0x233   :  { %v660_v28 = vadd.f32 %v659_v24, %v658_v23 }
 0x234   :  { %v1217_v30 = vpop.f32.mrb[28].mxu1 }
 0x235   :  { %v621_v32 = vpop.f32.mrb[29].mxu1  ;;  %v662_v34 = vadd.f32 %v661_v29, %v660_v28  ;;  %v665_v41 = vsel %vm441_vm1, %v1217_v30, 0.0 }
 0x236   :  { %v663_v36 = vsel %vm441_vm1, %v621_v32, 0.0 }
 0x237   :  { %v664_v40 = vadd.f32 %v663_v36, %v662_v34 }
 0x238   :  { %v1220_v43 = vpop.f32.mrb[30].mxu1 }
 0x239   :  { %v631_v44 = vpop.f32.mrb[31].mxu1  ;;  %v666_v47 = vadd.f32 %v665_v41, %v664_v40  ;;  %v669_v26 = vsel %vm441_vm1, %v1220_v43, 0.0 }
 0x23a   :  { %v667_v48 = vsel %vm441_vm1, %v631_v44, 0.0 }
 0x23b   :  { %v668_v27 = vadd.f32 %v667_v48, %v666_v47 }
 0x23d   :  { %v670_v33 = vadd.f32 %v669_v26, %v668_v27 }
 0x23f   :  { %v671_v45 = vrot.slane %v670_v33, 4 }
 0x241   :  { %v672_v51 = vadd.f32 %v671_v45, %v670_v33 }
 0x243   :  { %v673_v57 = vrot.slane %v672_v51, 2 }
 0x245   :  { %v674_v52 = vadd.f32 %v673_v57, %v672_v51 }
 0x247   :  { %v675_v55 = vrot.slane %v674_v52, 1 }
 0x249   :  { %v676_v58 = vadd.f32 %v675_v55, %v674_v52 }
 0x24b   :  { %v679_v61 = vmul.f32 0.001953125, %v676_v58 }
 0x24d   :  { %v681_v62 = vsub.f32 %v679_v61, %v680_v59 }
 0x24f   :  { %v682_v31 = vmax.f32 %v681_v62, 0.0 }
 0x251   :  { %v683_v1 = vadd.f32 1e-05, %v682_v31 }
 0x253   :  { %1458 = vrsqrt.f32 %v683_v1 }
 0x25d   :  { %v1459_v4 = vpop.eup %1458 }
 0x25e   :  { %v686_v5 = vmul.f32 %v1459_v4, %v685_v2 }
 0x260   :  { %1254 = vmatmul.mubr.msk.f32.vlgmr.msra.gmra.mrb[32].mxu0 %vm441_vm1, %v686_v5  ;;  %v688_v8 = vmul.f32 %v686_v5, %v678_v54 }
 0x262   :  { %v689_v10 = vsub.f32 %v687_v7, %v688_v8 }
 0x264   :  { %1289 = vmatmul.mubr.msk.f32.vlgmr.msra.gmra.mrb[32].mxu1 %vm441_vm1, %v689_v10 }
 0x333   :  { %v807_v16 = vpop.f32.mrb[32].mxu0 }
 0x334   :  { %v814_v17 = vrot.slane %v807_v16, %v813_v14  ;;  %v1255_v19 = vpop.f32.mrb[33].mxu0 }
 0x336   :  { %v815_v20 = vmul.f32 %v814_v17, %v1782_v35  ;;  %v816_v23 = vmul.f32 %v814_v17, %v1786_v38  ;;  %v817_v24 = vmul.f32 %v814_v17, %v1791_v42  ;;  %v818_v25 = vmul.f32 %v814_v17, %v1797_v46 }
 0x337   :  { %v900_v22 = vpop.f32.mrb[32].mxu1  ;;  %v819_v28 = vmul.f32 %v814_v17, %v1803_v49  ;;  %v820_v30 = vmul.f32 %v814_v17, %v1809_v53  ;;  %v821_v32 = vmul.f32 %v814_v17, %v1815_v56  ;;  %v822_v34 = vmul.f32 %v814_v17, %v1821_v60 }
 0x338   :  { %v1290_v29 = vpop.f32.mrb[33].mxu1  ;;  %v823_v36 = vmul.f32 %v814_v17, %v1827_v63  ;;  %v824_v35 = vmul.f32 %v814_v17, %v1833_v3  ;;  %v825_v37 = vmul.f32 %v814_v17, %v1838_v6  ;;  %v826_v38 = vmul.f32 %v814_v17, %v1842_v9 }
 0x339   :  { %v907_v42 = vrot.slane %v900_v22, %v813_v14  ;;  %v827_v46 = vmul.f32 %v814_v17, %v1846_v12  ;;  %v828_v49 = vmul.f32 %v814_v17, %v1850_v15  ;;  %v829_v40 = vmul.f32 %v814_v17, %v1854_v18 }
 0x33a   :  { %v830_v53 = vmul.f32 %v814_v17, %v1858_v21 }
 0x33b   :  { %v908_v56 = vadd.f32 %v907_v42, %v815_v20  ;;  %v909_v41 = vadd.f32 %v907_v42, %v816_v23  ;;  %v910_v60 = vadd.f32 %v907_v42, %v817_v24  ;;  %v911_v43 = vadd.f32 %v907_v42, %v818_v25 }
 0x33c   :  { %v912_v63 = vadd.f32 %v907_v42, %v819_v28  ;;  %v913_v44 = vadd.f32 %v907_v42, %v820_v30  ;;  %v914_v3 = vadd.f32 %v907_v42, %v821_v32  ;;  %v915_v47 = vadd.f32 %v907_v42, %v822_v34 }
 0x33d   :  { %v916_v6 = vadd.f32 %v907_v42, %v823_v36  ;;  %v917_v48 = vadd.f32 %v907_v42, %v824_v35  ;;  %v918_v9 = vadd.f32 %v907_v42, %v825_v37  ;;  %v919_v50 = vadd.f32 %v907_v42, %v826_v38 }
 0x33e   :  { %v920_v27 = vadd.f32 %v907_v42, %v827_v46  ;;  %v921_v12 = vadd.f32 %v907_v42, %v828_v49  ;;  %v922_v26 = vadd.f32 %v907_v42, %v829_v40  ;;  %v923_v15 = vadd.f32 %v907_v42, %v830_v53 }
 0x33f   :  { %v924_v33 = vmax.f32 %v908_v56, 0.0  ;;  %v925_v18 = vmax.f32 %v909_v41, 0.0  ;;  %v926_v39 = vmax.f32 %v910_v60, 0.0  ;;  %v927_v21 = vmax.f32 %v911_v43, 0.0 }
 0x340   :  { %v928_v45 = vmax.f32 %v912_v63, 0.0  ;;  %v929_v51 = vmax.f32 %v913_v44, 0.0  ;;  %v930_v0 = vmax.f32 %v914_v3, 0.0  ;;  %v931_v57 = vmax.f32 %v915_v47, 0.0 }
 0x341   :  { %v932_v52 = vmax.f32 %v916_v6, 0.0  ;;  %v933_v54 = vmax.f32 %v917_v48, 0.0  ;;  %v934_v55 = vmax.f32 %v918_v9, 0.0  ;;  %v935_v58 = vmax.f32 %v919_v50, 0.0  ;;  %940 = vst [vmem:[%s2071_s6] sm:$0xff] %v924_v33  ;;  %941 = vst [vmem:[%s2071_s6 + $0x8] sm:$0xff] %v925_v18 }
 0x342   :  { %942 = vst [vmem:[%s2071_s6 + $0x10] sm:$0xff] %v926_v39  ;;  %943 = vst [vmem:[%s2071_s6 + $0x18] sm:$0xff] %v927_v21  ;;  %v936_v59 = vmax.f32 %v920_v27, 0.0  ;;  %v937_v61 = vmax.f32 %v921_v12, 0.0  ;;  %v938_v62 = vmax.f32 %v922_v26, 0.0  ;;  %v939_v31 = vmax.f32 %v923_v15, 0.0 }
 0x343   :  { %944 = vst [vmem:[%s2071_s6 + $0x20] sm:$0xff] %v928_v45  ;;  %945 = vst [vmem:[%s2071_s6 + $0x28] sm:$0xff] %v929_v51 }
 0x344   :  { %946 = vst [vmem:[%s2071_s6 + $0x30] sm:$0xff] %v930_v0  ;;  %947 = vst [vmem:[%s2071_s6 + $0x38] sm:$0xff] %v931_v57 }
 0x345   :  { %948 = vst [vmem:[%s2071_s6 + $0x40] sm:$0xff] %v932_v52  ;;  %949 = vst [vmem:[%s2071_s6 + $0x48] sm:$0xff] %v933_v54 }
 0x346   :  { %950 = vst [vmem:[%s2071_s6 + $0x50] sm:$0xff] %v934_v55  ;;  %951 = vst [vmem:[%s2071_s6 + $0x58] sm:$0xff] %v935_v58 }
 0x347   :  { %952 = vst [vmem:[%s2071_s6 + $0x60] sm:$0xff] %v936_v59  ;;  %953 = vst [vmem:[%s2071_s6 + $0x68] sm:$0xff] %v937_v61 }
 0x348   :  { %954 = vst [vmem:[%s2071_s6 + $0x70] sm:$0xff] %v938_v62  ;;  %955 = vst [vmem:[%s2071_s6 + $0x78] sm:$0xff] %v939_v31 }

// kernel: tile.58
= control target key start
LH: loop header
LB: loop body
LE: loop exit
PB: predicated region body
PF: predicated region fallthrough
CT: control target
= control target key end

     0   :  { %2 = vsyncpa [#allocation1], 0  ;;  %s44_s6 = smov [#allocation0]   ;;  %s70_s0 = inlined_call_operand.hbm [shape: f32[32], index: 0, kind: input, shape index: {}]   ;;  %s71_s1 = inlined_call_operand.vmem [shape: f32[4,32], index: 1, kind: output, shape index: {}]  }
   0x1   :  { %s9_s7 = sshll.u32 %s44_s6, 4  ;;  %s20_s10 = scalar_lea.hbm %s70_s0, 16  ;;  %s10_s7 = int_to_ptr.vmem [resolvable:$true] %s9_s7 }
   0x2   :  { %p21_p0 = scmp.ne.s32.totalorder %s70_s0, %s20_s10  ;;  %p24_p1 = scmp.lt.u32.totalorder %s20_s10, %s70_s0 }
   0x4   :  { %p26_p2 = pnand %p24_p1, %p21_p0 }
   0x6   :  { %29 = shalt.err (!%p26_p2)
}
   0x7   :  { %s30_s15 = scalar_lea.vmem %s10_s7, 16  ;;  %s34_s16 = scalar_lea.vmem %s10_s7, 32 }
   0x8   :  { %p31_p3 = scmp.ne.s32.totalorder %s10_s7, %s30_s15  ;;  %p35_p4 = scmp.lt.s32.totalorder %s10_s7, %s10_s7 }
   0x9   :  { %p36_p5 = scmp.lt.s32.totalorder %s34_s16, %s30_s15 }
   0xb   :  { %p37_p6 = por %p36_p5, %p35_p4 }
   0xd   :  { %p38_p7 = pnand %p37_p6, %p31_p3 }
   0xf   :  { %41 = shalt.err (!%p38_p7)
}
  0x10   :  { %12 = dma.hbm_to_vmem [thread:$0]  %s70_s0, 16, %s10_s7, [#allocation1]  }
  0x11   :  { %42 = dma.done.wait [#allocation1], 16  }
  0x12   :  { %43 = vsyncadd [#allocation1], 4294967280  ;;  %v16_v0 = vld [vmem:[#allocation0] ss:$0 sm:$0xff] }
  0x13   :  { %17 = vst [vmem:[%s71_s1] sm:$0xf] %v16_v0 }
  0x14   :  { %18 = vsyncpa [#allocation1], 1 }

// kernel: vqvae8_forward.7
= control target key start
LH: loop header
LB: loop body
LE: loop exit
PB: predicated region body
PF: predicated region fallthrough
CT: control target
= control target key end

     0   :  { %vm1131_vm0 = vcmask 261120   ;;  %vm2479_vm2 = vmmov 0   ;;  %s3697_s1 = inlined_call_operand.vmem [shape: f32[2048,128], index: 1, kind: input, shape index: {}]   ;;  %s3698_s0 = inlined_call_operand.vmem [shape: f32[32,2048], index: 0, kind: input, shape index: {}]   ;;  %s3699_s3 = inlined_call_operand.vmem [shape: f32[128,32], index: 3, kind: input, shape index: {}]   ;;  %s3700_s2 = inlined_call_operand.vmem [shape: f32[1,128], index: 2, kind: input, shape index: {}]   ;;  %s3701_s4 = inlined_call_operand.vmem [shape: f32[1,32], index: 4, kind: input, shape index: {}]   ;;  %s3702_s5 = inlined_call_operand.vmem [shape: f32[1,32], index: 5, kind: input, shape index: {}]   ;;  %s3703_s6 = inlined_call_operand.vmem [shape: f32[32,128], index: 6, kind: output, shape index: {}]  }
   0x1   :  { %v103_v0 = vld [vmem:[%s3697_s1 + $0x80] sm:$0xff]  ;;  %v104_v1 = vld [vmem:[%s3697_s1 + $0x88] sm:$0xff]  ;;  %v105_v11 = vld [vmem:[%s3697_s1 + $0x90] sm:$0xff] }
   0x2   :  { %v87_v2 = vld [vmem:[%s3697_s1] sm:$0xff]  ;;  %v2089_v3 = vpack.c.bf16 %v104_v1, %v103_v0  ;;  %v88_v4 = vld [vmem:[%s3697_s1 + $0x8] sm:$0xff]  ;;  %v106_v13 = vld [vmem:[%s3697_s1 + $0x98] sm:$0xff] }
   0x3   :  { %v135_v5 = vld [vmem:[%s3697_s1 + $0x180] sm:$0xff]  ;;  %v136_v6 = vld [vmem:[%s3697_s1 + $0x188] sm:$0xff]  ;;  %v2091_v7 = vpack.c.bf16 %v88_v4, %v87_v2  ;;  %v89_v14 = vld [vmem:[%s3697_s1 + $0x10] sm:$0xff]  ;;  %v2093_v16 = vpack.c.bf16 %v106_v13, %v105_v11 }
   0x4   :  { %v2121_v8 = vpack.c.bf16 %v136_v6, %v135_v5  ;;  %v119_v9 = vld [vmem:[%s3697_s1 + $0x100] sm:$0xff]  ;;  %v120_v10 = vld [vmem:[%s3697_s1 + $0x108] sm:$0xff]  ;;  %2090 = vmatprep.subr.bf16.mxu0 %v2089_v3  ;;  %v90_v15 = vld [vmem:[%s3697_s1 + $0x18] sm:$0xff] }
   0x5   :  { %v2123_v12 = vpack.c.bf16 %v120_v10, %v119_v9  ;;  %2092 = vmatpush3.bf16.msra.mxu0 %v2091_v7  ;;  %v2095_v17 = vpack.c.bf16 %v90_v15, %v89_v14  ;;  %v137_v18 = vld [vmem:[%s3697_s1 + $0x190] sm:$0xff]  ;;  %v138_v19 = vld [vmem:[%s3697_s1 + $0x198] sm:$0xff]  ;;  %v107_v23 = vld [vmem:[%s3697_s1 + $0xa0] sm:$0xff] }
   0x6   :  { %2122 = vmatprep.subr.bf16.mxu1 %v2121_v8  ;;  %v121_v20 = vld [vmem:[%s3697_s1 + $0x110] sm:$0xff]  ;;  %v2125_v21 = vpack.c.bf16 %v138_v19, %v137_v18  ;;  %v122_v22 = vld [vmem:[%s3697_s1 + $0x118] sm:$0xff]  ;;  %v108_v24 = vld [vmem:[%s3697_s1 + $0xa8] sm:$0xff]  ;;  %2094 = vmatprep.subr.bf16.mxu0 %v2093_v16 }
   0x7   :  { %2124 = vmatpush3.bf16.msra.mxu1 %v2123_v12  ;;  %v2127_v25 = vpack.c.bf16 %v122_v22, %v121_v20  ;;  %v2097_v26 = vpack.c.bf16 %v108_v24, %v107_v23  ;;  %v91_v27 = vld [vmem:[%s3697_s1 + $0x20] sm:$0xff]  ;;  %v92_v28 = vld [vmem:[%s3697_s1 + $0x28] sm:$0xff]  ;;  %v109_v35 = vld [vmem:[%s3697_s1 + $0xb0] sm:$0xff] }
   0x8   :  { %v139_v29 = vld [vmem:[%s3697_s1 + $0x1a0] sm:$0xff]  ;;  %2126 = vmatprep.subr.bf16.mxu1 %v2125_v21  ;;  %v140_v30 = vld [vmem:[%s3697_s1 + $0x1a8] sm:$0xff]  ;;  %v2099_v33 = vpack.c.bf16 %v92_v28, %v91_v27  ;;  %v110_v36 = vld [vmem:[%s3697_s1 + $0xb8] sm:$0xff] }
   0x9   :  { %v123_v31 = vld [vmem:[%s3697_s1 + $0x120] sm:$0xff]  ;;  %v124_v32 = vld [vmem:[%s3697_s1 + $0x128] sm:$0xff]  ;;  %2096 = vmatpush3.bf16.msra.mxu0 %v2095_v17  ;;  %v2129_v34 = vpack.c.bf16 %v140_v30, %v139_v29  ;;  %v93_v37 = vld [vmem:[%s3697_s1 + $0x30] sm:$0xff]  ;;  %v2101_v39 = vpack.c.bf16 %v110_v36, %v109_v35 }
   0xa   :  { %2098 = vmatprep.subr.bf16.mxu0 %v2097_v26  ;;  %v2131_v38 = vpack.c.bf16 %v124_v32, %v123_v31  ;;  %v94_v40 = vld [vmem:[%s3697_s1 + $0x38] sm:$0xff]  ;;  %v141_v41 = vld [vmem:[%s3697_s1 + $0x1b0] sm:$0xff]  ;;  %v111_v46 = vld [vmem:[%s3697_s1 + $0xc0] sm:$0xff] }
   0xb   :  { %2128 = vmatpush3.bf16.msra.mxu1 %v2127_v25  ;;  %v142_v42 = vld [vmem:[%s3697_s1 + $0x1b8] sm:$0xff]  ;;  %v125_v44 = vld [vmem:[%s3697_s1 + $0x130] sm:$0xff]  ;;  %v112_v47 = vld [vmem:[%s3697_s1 + $0xc8] sm:$0xff]  ;;  %v2103_v48 = vpack.c.bf16 %v94_v40, %v93_v37 }
   0xc   :  { %2130 = vmatprep.subr.bf16.mxu1 %v2129_v34  ;;  %v2133_v43 = vpack.c.bf16 %v142_v42, %v141_v41  ;;  %v126_v45 = vld [vmem:[%s3697_s1 + $0x138] sm:$0xff]  ;;  %v143_v49 = vld [vmem:[%s3697_s1 + $0x1c0] sm:$0xff]  ;;  %v144_v50 = vld [vmem:[%s3697_s1 + $0x1c8] sm:$0xff]  ;;  %v2105_v52 = vpack.c.bf16 %v112_v47, %v111_v46 }
   0xd   :  { %2100 = vmatpush3.bf16.msra.mxu0 %v2099_v33  ;;  %v2135_v51 = vpack.c.bf16 %v126_v45, %v125_v44  ;;  %v95_v53 = vld [vmem:[%s3697_s1 + $0x40] sm:$0xff]  ;;  %v96_v54 = vld [vmem:[%s3697_s1 + $0x48] sm:$0xff]  ;;  %v2137_v56 = vpack.c.bf16 %v144_v50, %v143_v49  ;;  %v113_v58 = vld [vmem:[%s3697_s1 + $0xd0] sm:$0xff] }
   0xe   :  { %2102 = vmatprep.subr.bf16.mxu0 %v2101_v39  ;;  %v127_v55 = vld [vmem:[%s3697_s1 + $0x140] sm:$0xff]  ;;  %v128_v57 = vld [vmem:[%s3697_s1 + $0x148] sm:$0xff]  ;;  %v114_v59 = vld [vmem:[%s3697_s1 + $0xd8] sm:$0xff]  ;;  %v2107_v62 = vpack.c.bf16 %v96_v54, %v95_v53 }
   0xf   :  { %2132 = vmatpush3.bf16.msra.mxu1 %v2131_v38  ;;  %v145_v60 = vld [vmem:[%s3697_s1 + $0x1d0] sm:$0xff]  ;;  %v146_v61 = vld [vmem:[%s3697_s1 + $0x1d8] sm:$0xff]  ;;  %v2139_v63 = vpack.c.bf16 %v128_v57, %v127_v55  ;;  %v2109_v0 = vpack.c.bf16 %v114_v59, %v113_v58  ;;  %v115_v6 = vld [vmem:[%s3697_s1 + $0xe0] sm:$0xff] }
  0x10   :  { %2134 = vmatprep.subr.bf16.mxu1 %v2133_v43  ;;  %v97_v1 = vld [vmem:[%s3697_s1 + $0x50] sm:$0xff]  ;;  %v98_v2 = vld [vmem:[%s3697_s1 + $0x58] sm:$0xff]  ;;  %v2141_v4 = vpack.c.bf16 %v146_v61, %v145_v60  ;;  %v116_v7 = vld [vmem:[%s3697_s1 + $0xe8] sm:$0xff] }
  0x11   :  { %2104 = vmatpush3.bf16.msra.mxu0 %v2103_v48  ;;  %v129_v3 = vld [vmem:[%s3697_s1 + $0x150] sm:$0xff]  ;;  %v130_v5 = vld [vmem:[%s3697_s1 + $0x158] sm:$0xff]  ;;  %v147_v8 = vld [vmem:[%s3697_s1 + $0x1e0] sm:$0xff]  ;;  %v2111_v10 = vpack.c.bf16 %v98_v2, %v97_v1  ;;  %v2113_v14 = vpack.c.bf16 %v116_v7, %v115_v6 }
  0x12   :  { %2106 = vmatprep.subr.bf16.mxu0 %v2105_v52  ;;  %v148_v9 = vld [vmem:[%s3697_s1 + $0x1e8] sm:$0xff]  ;;  %v99_v11 = vld [vmem:[%s3697_s1 + $0x60] sm:$0xff]  ;;  %v2143_v13 = vpack.c.bf16 %v130_v5, %v129_v3  ;;  %v117_v19 = vld [vmem:[%s3697_s1 + $0xf0] sm:$0xff] }
  0x13   :  { %2136 = vmatpush3.bf16.msra.mxu1 %v2135_v51  ;;  %v100_v12 = vld [vmem:[%s3697_s1 + $0x68] sm:$0xff]  ;;  %v131_v15 = vld [vmem:[%s3697_s1 + $0x160] sm:$0xff]  ;;  %v2145_v18 = vpack.c.bf16 %v148_v9, %v147_v8  ;;  %v118_v20 = vld [vmem:[%s3697_s1 + $0xf8] sm:$0xff] }
  0x14   :  { %2138 = vmatprep.subr.bf16.mxu1 %v2137_v56  ;;  %v132_v16 = vld [vmem:[%s3697_s1 + $0x168] sm:$0xff]  ;;  %v26_v21 = vld [vmem:[%s3698_s0 + $0x18] sm:$0xff]  ;;  %v149_v22 = vld [vmem:[%s3697_s1 + $0x1f0] sm:$0xff]  ;;  %v2115_v24 = vpack.c.bf16 %v100_v12, %v99_v11  ;;  %v2117_v26 = vpack.c.bf16 %v118_v20, %v117_v19 }
  0x15   :  { %2108 = vmatpush3.bf16.msra.mxu0 %v2107_v62  ;;  %v24_v17 = vld [vmem:[%s3698_s0 + $0x8] sm:$0xff]  ;;  %v150_v23 = vld [vmem:[%s3697_s1 + $0x1f8] sm:$0xff]  ;;  %499 = vmatprep.mubr.f32.mxu1 %v26_v21  ;;  %v2147_v25 = vpack.c.bf16 %v132_v16, %v131_v15  ;;  %v101_v27 = vld [vmem:[%s3697_s1 + $0x70] sm:$0xff] }
  0x16   :  { %2110 = vmatprep.subr.bf16.mxu0 %v2109_v0  ;;  %414 = vmatprep.mubr.f32.mxu0 %v24_v17  ;;  %v102_v28 = vld [vmem:[%s3697_s1 + $0x78] sm:$0xff]  ;;  %v133_v29 = vld [vmem:[%s3697_s1 + $0x170] sm:$0xff]  ;;  %v2149_v30 = vpack.c.bf16 %v150_v23, %v149_v22  ;;  %v167_v32 = vld [vmem:[%s3697_s1 + $0x280] sm:$0xff] }
  0x17   :  { %2140 = vmatpush3.bf16.msra.mxu1 %v2139_v63  ;;  %v134_v31 = vld [vmem:[%s3697_s1 + $0x178] sm:$0xff]  ;;  %v168_v33 = vld [vmem:[%s3697_s1 + $0x288] sm:$0xff]  ;;  %v199_v34 = vld [vmem:[%s3697_s1 + $0x380] sm:$0xff]  ;;  %v2119_v36 = vpack.c.bf16 %v102_v28, %v101_v27 }
  0x18   :  { %2142 = vmatprep.subr.bf16.mxu1 %v2141_v4  ;;  %v200_v35 = vld [vmem:[%s3697_s1 + $0x388] sm:$0xff]  ;;  %v2151_v37 = vpack.c.bf16 %v134_v31, %v133_v29  ;;  %v2153_v38 = vpack.c.bf16 %v168_v33, %v167_v32  ;;  %v151_v39 = vld [vmem:[%s3697_s1 + $0x200] sm:$0xff]  ;;  %v169_v44 = vld [vmem:[%s3697_s1 + $0x290] sm:$0xff] }
  0x19   :  { %2112 = vmatpush3.bf16.msra.mxu0 %v2111_v10  ;;  %v152_v40 = vld [vmem:[%s3697_s1 + $0x208] sm:$0xff]  ;;  %v183_v41 = vld [vmem:[%s3697_s1 + $0x300] sm:$0xff]  ;;  %v2185_v42 = vpack.c.bf16 %v200_v35, %v199_v34  ;;  %v170_v45 = vld [vmem:[%s3697_s1 + $0x298] sm:$0xff] }
  0x1a   :  { %2114 = vmatprep.subr.bf16.mxu0 %v2113_v14  ;;  %v184_v43 = vld [vmem:[%s3697_s1 + $0x308] sm:$0xff]  ;;  %v201_v46 = vld [vmem:[%s3697_s1 + $0x390] sm:$0xff]  ;;  %v202_v47 = vld [vmem:[%s3697_s1 + $0x398] sm:$0xff]  ;;  %v2155_v49 = vpack.c.bf16 %v152_v40, %v151_v39  ;;  %v2157_v52 = vpack.c.bf16 %v170_v45, %v169_v44 }
  0x1b   :  { %2144 = vmatpush3.bf16.msra.mxu1 %v2143_v13  ;;  %v23_v48 = vld [vmem:[%s3698_s0] sm:$0xff]  ;;  %v25_v50 = vld [vmem:[%s3698_s0 + $0x10] sm:$0xff]  ;;  %v2187_v51 = vpack.c.bf16 %v184_v43, %v183_v41  ;;  %v154_v54 = vld [vmem:[%s3697_s1 + $0x218] sm:$0xff]  ;;  %v2189_v56 = vpack.c.bf16 %v202_v47, %v201_v46 }
  0x1c   :  { %2146 = vmatprep.subr.bf16.mxu1 %v2145_v18  ;;  %v153_v53 = vld [vmem:[%s3697_s1 + $0x210] sm:$0xff]  ;;  %v186_v57 = vld [vmem:[%s3697_s1 + $0x318] sm:$0xff]  ;;  %v171_v58 = vld [vmem:[%s3697_s1 + $0x2a0] sm:$0xff] }
  0x1d   :  { %2116 = vmatpush3.bf16.msra.mxu0 %v2115_v24  ;;  %v185_v55 = vld [vmem:[%s3697_s1 + $0x310] sm:$0xff]  ;;  %v172_v59 = vld [vmem:[%s3697_s1 + $0x2a8] sm:$0xff]  ;;  %v203_v60 = vld [vmem:[%s3697_s1 + $0x3a0] sm:$0xff]  ;;  %v2159_v62 = vpack.c.bf16 %v154_v54, %v153_v53 }
  0x1e   :  { %2118 = vmatprep.subr.bf16.mxu0 %v2117_v26  ;;  %v204_v61 = vld [vmem:[%s3697_s1 + $0x3a8] sm:$0xff]  ;;  %v155_v63 = vld [vmem:[%s3697_s1 + $0x220] sm:$0xff]  ;;  %v2191_v2 = vpack.c.bf16 %v186_v57, %v185_v55  ;;  %v2161_v3 = vpack.c.bf16 %v172_v59, %v171_v58  ;;  %v42_v6 = vld [vmem:[%s3698_s0 + $0x98] sm:$0xff] }
  0x1f   :  { %2148 = vmatpush3.bf16.msra.mxu1 %v2147_v25  ;;  %v40_v0 = vld [vmem:[%s3698_s0 + $0x88] sm:$0xff]  ;;  %v39_v1 = vld [vmem:[%s3698_s0 + $0x80] sm:$0xff]  ;;  %v2193_v7 = vpack.c.bf16 %v204_v61, %v203_v60  ;;  %v173_v9 = vld [vmem:[%s3697_s1 + $0x2b0] sm:$0xff] }
  0x20   :  { %2150 = vmatprep.subr.bf16.mxu1 %v2149_v30  ;;  %v156_v4 = vld [vmem:[%s3697_s1 + $0x228] sm:$0xff]  ;;  %v187_v5 = vld [vmem:[%s3697_s1 + $0x320] sm:$0xff]  ;;  %v174_v10 = vld [vmem:[%s3697_s1 + $0x2b8] sm:$0xff] }
  0x21   :  { %2120 = vmatpush3.bf16.msra.mxu0 %v2119_v36  ;;  %v188_v8 = vld [vmem:[%s3697_s1 + $0x328] sm:$0xff]  ;;  %v205_v11 = vld [vmem:[%s3697_s1 + $0x3b0] sm:$0xff]  ;;  %v206_v12 = vld [vmem:[%s3697_s1 + $0x3b8] sm:$0xff]  ;;  %v2163_v14 = vpack.c.bf16 %v156_v4, %v155_v63  ;;  %v2165_v19 = vpack.c.bf16 %v174_v10, %v173_v9 }
  0x22   :  { %2154 = vmatprep.subr.bf16.mxu0 %v2153_v38  ;;  %v41_v13 = vld [vmem:[%s3698_s0 + $0x90] sm:$0xff]  ;;  %v56_v16 = vld [vmem:[%s3698_s0 + $0x108] sm:$0xff]  ;;  %v55_v17 = vld [vmem:[%s3698_s0 + $0x100] sm:$0xff]  ;;  %v2195_v18 = vpack.c.bf16 %v188_v8, %v187_v5  ;;  %v2197_v23 = vpack.c.bf16 %v206_v12, %v205_v11 }
  0x23   :  { %2152 = vmatpush3.bf16.msra.mxu1 %v2151_v37  ;;  %v157_v15 = vld [vmem:[%s3697_s1 + $0x230] sm:$0xff]  ;;  %v158_v20 = vld [vmem:[%s3697_s1 + $0x238] sm:$0xff]  ;;  %v175_v25 = vld [vmem:[%s3697_s1 + $0x2c0] sm:$0xff] }
  0x24   :  { %2186 = vmatprep.subr.bf16.mxu1 %v2185_v42  ;;  %415 = vmatmul.mubr.f32.vlgmr.msra.gmra.mrb[0].mxu0 %v23_v48  ;;  %v189_v21 = vld [vmem:[%s3697_s1 + $0x330] sm:$0xff]  ;;  %v58_v22 = vld [vmem:[%s3698_s0 + $0x118] sm:$0xff]  ;;  %v176_v26 = vld [vmem:[%s3697_s1 + $0x2c8] sm:$0xff]  ;;  %v2167_v30 = vpack.c.bf16 %v158_v20, %v157_v15 }
  0x25   :  { %2156 = vmatpush3.bf16.msra.mxu0 %v2155_v49  ;;  %419 = vmatprep.mubr.f32.mxu0 %v40_v0  ;;  %v190_v24 = vld [vmem:[%s3697_s1 + $0x338] sm:$0xff]  ;;  %v207_v27 = vld [vmem:[%s3697_s1 + $0x3c0] sm:$0xff]  ;;  %v208_v28 = vld [vmem:[%s3697_s1 + $0x3c8] sm:$0xff]  ;;  %v2169_v35 = vpack.c.bf16 %v176_v26, %v175_v25 }
  0x26   :  { %500 = vmatmul.mubr.f32.vlgmr.msra.gmra.mrb[0].mxu1 %v25_v50  ;;  %2158 = vmatprep.subr.bf16.mxu0 %v2157_v52  ;;  %v57_v29 = vld [vmem:[%s3698_s0 + $0x110] sm:$0xff]  ;;  %v159_v31 = vld [vmem:[%s3697_s1 + $0x240] sm:$0xff]  ;;  %v72_v32 = vld [vmem:[%s3698_s0 + $0x188] sm:$0xff]  ;;  %v2199_v34 = vpack.c.bf16 %v190_v24, %v189_v21  ;;  %v2201_v39 = vpack.c.bf16 %v208_v28, %v207_v27 }
  0x27   :  { %2188 = vmatpush3.bf16.msra.mxu1 %v2187_v51  ;;  %504 = vmatprep.mubr.f32.mxu1 %v42_v6  ;;  %v71_v33 = vld [vmem:[%s3698_s0 + $0x180] sm:$0xff]  ;;  %v160_v36 = vld [vmem:[%s3697_s1 + $0x248] sm:$0xff]  ;;  %v74_v38 = vld [vmem:[%s3698_s0 + $0x198] sm:$0xff] }
  0x28   :  { %2190 = vmatprep.subr.bf16.mxu1 %v2189_v56  ;;  %420 = vmatmul.mubr.f32.gmra.mrb[2].mxu0 %v39_v1  ;;  %v191_v37 = vld [vmem:[%s3697_s1 + $0x340] sm:$0xff]  ;;  %v192_v40 = vld [vmem:[%s3697_s1 + $0x348] sm:$0xff]  ;;  %v177_v41 = vld [vmem:[%s3697_s1 + $0x2d0] sm:$0xff]  ;;  %v2171_v46 = vpack.c.bf16 %v160_v36, %v159_v31 }
  0x29   :  { %2160 = vmatpush3.bf16.msra.mxu0 %v2159_v62  ;;  %424 = vmatprep.mubr.f32.mxu0 %v56_v16  ;;  %v178_v42 = vld [vmem:[%s3697_s1 + $0x2d8] sm:$0xff]  ;;  %v209_v43 = vld [vmem:[%s3697_s1 + $0x3d0] sm:$0xff]  ;;  %v28_v48 = vld [vmem:[%s3698_s0 + $0x28] sm:$0xff]  ;;  %v2203_v49 = vpack.c.bf16 %v192_v40, %v191_v37 }
  0x2a   :  { %505 = vmatmul.mubr.f32.gmra.mrb[2].mxu1 %v41_v13  ;;  %2162 = vmatprep.subr.bf16.mxu0 %v2161_v3  ;;  %v210_v44 = vld [vmem:[%s3697_s1 + $0x3d8] sm:$0xff]  ;;  %v73_v45 = vld [vmem:[%s3698_s0 + $0x190] sm:$0xff]  ;;  %v2173_v50 = vpack.c.bf16 %v178_v42, %v177_v41  ;;  %v179_v56 = vld [vmem:[%s3697_s1 + $0x2e0] sm:$0xff] }
  0x2b   :  { %2192 = vmatpush3.bf16.msra.mxu1 %v2191_v2  ;;  %509 = vmatprep.mubr.f32.mxu1 %v58_v22  ;;  %v161_v47 = vld [vmem:[%s3697_s1 + $0x250] sm:$0xff]  ;;  %v162_v51 = vld [vmem:[%s3697_s1 + $0x258] sm:$0xff]  ;;  %v2205_v54 = vpack.c.bf16 %v210_v44, %v209_v43  ;;  %v180_v57 = vld [vmem:[%s3697_s1 + $0x2e8] sm:$0xff] }
  0x2c   :  { %2194 = vmatprep.subr.bf16.mxu1 %v2193_v7  ;;  %425 = vmatmul.mubr.f32.gmra.mrb[4].mxu0 %v55_v17  ;;  %v193_v52 = vld [vmem:[%s3697_s1 + $0x350] sm:$0xff]  ;;  %v30_v53 = vld [vmem:[%s3698_s0 + $0x38] sm:$0xff]  ;;  %v211_v58 = vld [vmem:[%s3697_s1 + $0x3e0] sm:$0xff]  ;;  %v2175_v60 = vpack.c.bf16 %v162_v51, %v161_v47  ;;  %v2177_v62 = vpack.c.bf16 %v180_v57, %v179_v56 }
  0x2d   :  { %2164 = vmatpush3.bf16.msra.mxu0 %v2163_v14  ;;  %429 = vmatprep.mubr.f32.mxu0 %v72_v32  ;;  %v194_v55 = vld [vmem:[%s3697_s1 + $0x358] sm:$0xff]  ;;  %v212_v59 = vld [vmem:[%s3697_s1 + $0x3e8] sm:$0xff]  ;;  %v163_v63 = vld [vmem:[%s3697_s1 + $0x260] sm:$0xff] }
  0x2e   :  { %510 = vmatmul.mubr.f32.gmra.mrb[4].mxu1 %v57_v29  ;;  %2166 = vmatprep.subr.bf16.mxu0 %v2165_v19  ;;  %v2207_v61 = vpack.c.bf16 %v194_v55, %v193_v52  ;;  %v164_v0 = vld [vmem:[%s3697_s1 + $0x268] sm:$0xff]  ;;  %v195_v1 = vld [vmem:[%s3697_s1 + $0x360] sm:$0xff]  ;;  %v2209_v2 = vpack.c.bf16 %v212_v59, %v211_v58  ;;  %v181_v4 = vld [vmem:[%s3697_s1 + $0x2f0] sm:$0xff] }
  0x2f   :  { %2196 = vmatpush3.bf16.msra.mxu1 %v2195_v18  ;;  %514 = vmatprep.mubr.f32.mxu1 %v74_v38  ;;  %v196_v3 = vld [vmem:[%s3697_s1 + $0x368] sm:$0xff]  ;;  %v182_v5 = vld [vmem:[%s3697_s1 + $0x2f8] sm:$0xff]  ;;  %v213_v6 = vld [vmem:[%s3697_s1 + $0x3f0] sm:$0xff]  ;;  %v2179_v8 = vpack.c.bf16 %v164_v0, %v163_v63 }
  0x30   :  { %2198 = vmatprep.subr.bf16.mxu1 %v2197_v23  ;;  %430 = vmatmul.mubr.f32.gmra.mrb[6].mxu0 %v71_v33  ;;  %v214_v7 = vld [vmem:[%s3697_s1 + $0x3f8] sm:$0xff]  ;;  %v2211_v9 = vpack.c.bf16 %v196_v3, %v195_v1  ;;  %v2181_v10 = vpack.c.bf16 %v182_v5, %v181_v4  ;;  %v165_v11 = vld [vmem:[%s3697_s1 + $0x270] sm:$0xff]  ;;  %v231_v16 = vld [vmem:[%s3697_s1 + $0x480] sm:$0xff] }
  0x31   :  { %2168 = vmatpush3.bf16.msra.mxu0 %v2167_v30  ;;  %584 = vmatprep.mubr.f32.mxu0 %v28_v48  ;;  %v166_v12 = vld [vmem:[%s3697_s1 + $0x278] sm:$0xff]  ;;  %v197_v13 = vld [vmem:[%s3697_s1 + $0x370] sm:$0xff]  ;;  %v2213_v14 = vpack.c.bf16 %v214_v7, %v213_v6  ;;  %v232_v17 = vld [vmem:[%s3697_s1 + $0x488] sm:$0xff] }
  0x32   :  { %515 = vmatmul.mubr.f32.gmra.mrb[6].mxu1 %v73_v45  ;;  %2170 = vmatprep.subr.bf16.mxu0 %v2169_v35  ;;  %v198_v15 = vld [vmem:[%s3697_s1 + $0x378] sm:$0xff]  ;;  %v263_v18 = vld [vmem:[%s3697_s1 + $0x580] sm:$0xff]  ;;  %v264_v19 = vld [vmem:[%s3697_s1 + $0x588] sm:$0xff]  ;;  %v2183_v20 = vpack.c.bf16 %v166_v12, %v165_v11  ;;  %v2217_v22 = vpack.c.bf16 %v232_v17, %v231_v16 }
  0x33   :  { %2200 = vmatpush3.bf16.msra.mxu1 %v2199_v34  ;;  %669 = vmatprep.mubr.f32.mxu1 %v30_v53  ;;  %v2215_v21 = vpack.c.bf16 %v198_v15, %v197_v13  ;;  %v215_v23 = vld [vmem:[%s3697_s1 + $0x400] sm:$0xff]  ;;  %v216_v24 = vld [vmem:[%s3697_s1 + $0x408] sm:$0xff]  ;;  %v2249_v25 = vpack.c.bf16 %v264_v19, %v263_v18  ;;  %v233_v29 = vld [vmem:[%s3697_s1 + $0x490] sm:$0xff] }
  0x34   :  { %2202 = vmatprep.subr.bf16.mxu1 %v2201_v39  ;;  %v247_v26 = vld [vmem:[%s3697_s1 + $0x500] sm:$0xff]  ;;  %v248_v27 = vld [vmem:[%s3697_s1 + $0x508] sm:$0xff]  ;;  %v234_v30 = vld [vmem:[%s3697_s1 + $0x498] sm:$0xff]  ;;  %v2219_v31 = vpack.c.bf16 %v216_v24, %v215_v23 }
  0x35   :  { %2172 = vmatpush3.bf16.msra.mxu0 %v2171_v46  ;;  %v27_v28 = vld [vmem:[%s3698_s0 + $0x20] sm:$0xff]  ;;  %v29_v32 = vld [vmem:[%s3698_s0 + $0x30] sm:$0xff]  ;;  %v266_v34 = vld [vmem:[%s3697_s1 + $0x598] sm:$0xff]  ;;  %v2251_v35 = vpack.c.bf16 %v248_v27, %v247_v26  ;;  %v2221_v40 = vpack.c.bf16 %v234_v30, %v233_v29 }
  0x36   :  { %2174 = vmatprep.subr.bf16.mxu0 %v2173_v50  ;;  %v265_v33 = vld [vmem:[%s3697_s1 + $0x590] sm:$0xff]  ;;  %v44_v36 = vld [vmem:[%s3698_s0 + $0xa8] sm:$0xff]  ;;  %v218_v38 = vld [vmem:[%s3697_s1 + $0x418] sm:$0xff] }
  0x37   :  { %2204 = vmatpush3.bf16.msra.mxu1 %v2203_v49  ;;  %v217_v37 = vld [vmem:[%s3697_s1 + $0x410] sm:$0xff]  ;;  %v43_v39 = vld [vmem:[%s3698_s0 + $0xa0] sm:$0xff]  ;;  %v250_v42 = vld [vmem:[%s3697_s1 + $0x518] sm:$0xff]  ;;  %v2253_v44 = vpack.c.bf16 %v266_v34, %v265_v33 }
  0x38   :  { %2206 = vmatprep.subr.bf16.mxu1 %v2205_v54  ;;  %v249_v41 = vld [vmem:[%s3697_s1 + $0x510] sm:$0xff]  ;;  %v46_v43 = vld [vmem:[%s3698_s0 + $0xb8] sm:$0xff]  ;;  %v235_v45 = vld [vmem:[%s3697_s1 + $0x4a0] sm:$0xff]  ;;  %v2223_v47 = vpack.c.bf16 %v218_v38, %v217_v37 }
  0x39   :  { %2176 = vmatpush3.bf16.msra.mxu0 %v2175_v60  ;;  %v236_v46 = vld [vmem:[%s3697_s1 + $0x4a8] sm:$0xff]  ;;  %v45_v48 = vld [vmem:[%s3698_s0 + $0xb0] sm:$0xff]  ;;  %v267_v49 = vld [vmem:[%s3697_s1 + $0x5a0] sm:$0xff]  ;;  %v2255_v51 = vpack.c.bf16 %v250_v42, %v249_v41 }
  0x3a   :  { %2178 = vmatprep.subr.bf16.mxu0 %v2177_v62  ;;  %v268_v50 = vld [vmem:[%s3697_s1 + $0x5a8] sm:$0xff]  ;;  %v219_v53 = vld [vmem:[%s3697_s1 + $0x420] sm:$0xff]  ;;  %v2225_v56 = vpack.c.bf16 %v236_v46, %v235_v45  ;;  %v62_v57 = vld [vmem:[%s3698_s0 + $0x138] sm:$0xff] }
  0x3b   :  { %2208 = vmatpush3.bf16.msra.mxu1 %v2207_v61  ;;  %v60_v52 = vld [vmem:[%s3698_s0 + $0x128] sm:$0xff]  ;;  %v59_v55 = vld [vmem:[%s3698_s0 + $0x120] sm:$0xff]  ;;  %v2257_v60 = vpack.c.bf16 %v268_v50, %v267_v49  ;;  %v61_v61 = vld [vmem:[%s3698_s0 + $0x130] sm:$0xff] }
  0x3c   :  { %2210 = vmatprep.subr.bf16.mxu1 %v2209_v2  ;;  %v220_v54 = vld [vmem:[%s3697_s1 + $0x428] sm:$0xff]  ;;  %v251_v58 = vld [vmem:[%s3697_s1 + $0x520] sm:$0xff]  ;;  %v237_v62 = vld [vmem:[%s3697_s1 + $0x4b0] sm:$0xff] }
  0x3d   :  { %2180 = vmatpush3.bf16.msra.mxu0 %v2179_v8  ;;  %v252_v59 = vld [vmem:[%s3697_s1 + $0x528] sm:$0xff]  ;;  %v238_v63 = vld [vmem:[%s3697_s1 + $0x4b8] sm:$0xff]  ;;  %v2227_v0 = vpack.c.bf16 %v220_v54, %v219_v53  ;;  %v269_v2 = vld [vmem:[%s3697_s1 + $0x5b0] sm:$0xff] }
  0x3e   :  { %2182 = vmatprep.subr.bf16.mxu0 %v2181_v10  ;;  %v76_v1 = vld [vmem:[%s3698_s0 + $0x1a8] sm:$0xff]  ;;  %v270_v3 = vld [vmem:[%s3697_s1 + $0x5b8] sm:$0xff]  ;;  %v2259_v4 = vpack.c.bf16 %v252_v59, %v251_v58  ;;  %v221_v5 = vld [vmem:[%s3697_s1 + $0x430] sm:$0xff]  ;;  %v2229_v8 = vpack.c.bf16 %v238_v63, %v237_v62 }
  0x3f   :  { %2212 = vmatpush3.bf16.msra.mxu1 %v2211_v9  ;;  %v222_v6 = vld [vmem:[%s3697_s1 + $0x438] sm:$0xff]  ;;  %v253_v7 = vld [vmem:[%s3697_s1 + $0x530] sm:$0xff]  ;;  %v239_v10 = vld [vmem:[%s3697_s1 + $0x4c0] sm:$0xff]  ;;  %v2261_v13 = vpack.c.bf16 %v270_v3, %v269_v2 }
  0x40   :  { %2214 = vmatprep.subr.bf16.mxu1 %v2213_v14  ;;  %v254_v9 = vld [vmem:[%s3697_s1 + $0x538] sm:$0xff]  ;;  %v240_v11 = vld [vmem:[%s3697_s1 + $0x4c8] sm:$0xff]  ;;  %v271_v14 = vld [vmem:[%s3697_s1 + $0x5c0] sm:$0xff]  ;;  %v2231_v17 = vpack.c.bf16 %v222_v6, %v221_v5 }
  0x41   :  { %2184 = vmatpush3.bf16.msra.mxu0 %v2183_v20  ;;  %v78_v12 = vld [vmem:[%s3698_s0 + $0x1b8] sm:$0xff]  ;;  %v272_v15 = vld [vmem:[%s3697_s1 + $0x5c8] sm:$0xff]  ;;  %v75_v16 = vld [vmem:[%s3698_s0 + $0x1a0] sm:$0xff]  ;;  %v2263_v19 = vpack.c.bf16 %v254_v9, %v253_v7  ;;  %v2233_v20 = vpack.c.bf16 %v240_v11, %v239_v10 }
  0x42   :  { %2218 = vmatprep.subr.bf16.mxu0 %v2217_v22  ;;  %v77_v18 = vld [vmem:[%s3698_s0 + $0x1b0] sm:$0xff]  ;;  %v224_v22 = vld [vmem:[%s3697_s1 + $0x448] sm:$0xff]  ;;  %v255_v23 = vld [vmem:[%s3697_s1 + $0x540] sm:$0xff]  ;;  %v2265_v24 = vpack.c.bf16 %v272_v15, %v271_v14 }
  0x43   :  { %2216 = vmatpush3.bf16.msra.mxu1 %v2215_v21  ;;  %v223_v21 = vld [vmem:[%s3697_s1 + $0x440] sm:$0xff]  ;;  %v241_v26 = vld [vmem:[%s3697_s1 + $0x4d0] sm:$0xff]  ;;  %v242_v27 = vld [vmem:[%s3697_s1 + $0x4d8] sm:$0xff] }
  0x44   :  { %2250 = vmatprep.subr.bf16.mxu1 %v2249_v25  ;;  %585 = vmatmul.mubr.f32.vlgmr.msra.gmra.mrb[8].mxu0 %v27_v28  ;;  %v256_v25 = vld [vmem:[%s3697_s1 + $0x548] sm:$0xff]  ;;  %v273_v28 = vld [vmem:[%s3697_s1 + $0x5d0] sm:$0xff]  ;;  %v274_v29 = vld [vmem:[%s3697_s1 + $0x5d8] sm:$0xff]  ;;  %v2237_v34 = vpack.c.bf16 %v242_v27, %v241_v26 }
  0x45   :  { %2220 = vmatpush3.bf16.msra.mxu0 %v2219_v31  ;;  %589 = vmatprep.mubr.f32.mxu0 %v44_v36  ;;  %v32_v30 = vld [vmem:[%s3698_s0 + $0x48] sm:$0xff]  ;;  %v2235_v31 = vpack.c.bf16 %v224_v22, %v223_v21  ;;  %v2267_v33 = vpack.c.bf16 %v256_v25, %v255_v23  ;;  %v226_v36 = vld [vmem:[%s3697_s1 + $0x458] sm:$0xff]  ;;  %v257_v37 = vld [vmem:[%s3697_s1 + $0x550] sm:$0xff]  ;;  %v2269_v38 = vpack.c.bf16 %v274_v29, %v273_v28 }
  0x46   :  { %670 = vmatmul.mubr.f32.vlgmr.msra.gmra.mrb[8].mxu1 %v29_v32  ;;  %2222 = vmatprep.subr.bf16.mxu0 %v2221_v40  ;;  %v34_v32 = vld [vmem:[%s3698_s0 + $0x58] sm:$0xff]  ;;  %v243_v40 = vld [vmem:[%s3697_s1 + $0x4e0] sm:$0xff]  ;;  %v244_v41 = vld [vmem:[%s3697_s1 + $0x4e8] sm:$0xff] }
  0x47   :  { %2252 = vmatpush3.bf16.msra.mxu1 %v2251_v35  ;;  %674 = vmatprep.mubr.f32.mxu1 %v46_v43  ;;  %v225_v35 = vld [vmem:[%s3697_s1 + $0x450] sm:$0xff]  ;;  %v275_v42 = vld [vmem:[%s3697_s1 + $0x5e0] sm:$0xff]  ;;  %v276_v43 = vld [vmem:[%s3697_s1 + $0x5e8] sm:$0xff]  ;;  %v2241_v46 = vpack.c.bf16 %v244_v41, %v243_v40 }
  0x48   :  { %590 = vmatmul.mubr.f32.gmra.mrb[10].mxu0 %v43_v39  ;;  %2254 = vmatprep.subr.bf16.mxu1 %v2253_v44  ;;  %v258_v39 = vld [vmem:[%s3697_s1 + $0x558] sm:$0xff]  ;;  %v2239_v44 = vpack.c.bf16 %v226_v36, %v225_v35  ;;  %v259_v49 = vld [vmem:[%s3697_s1 + $0x560] sm:$0xff]  ;;  %v2273_v50 = vpack.c.bf16 %v276_v43, %v275_v42  ;;  %v277_v54 = vld [vmem:[%s3697_s1 + $0x5f0] sm:$0xff] }
  0x49   :  { %2224 = vmatpush3.bf16.msra.mxu0 %v2223_v47  ;;  %594 = vmatprep.mubr.f32.mxu0 %v60_v52  ;;  %v2271_v45 = vpack.c.bf16 %v258_v39, %v257_v37  ;;  %v227_v47 = vld [vmem:[%s3697_s1 + $0x460] sm:$0xff]  ;;  %v245_v52 = vld [vmem:[%s3697_s1 + $0x4f0] sm:$0xff]  ;;  %v246_v53 = vld [vmem:[%s3697_s1 + $0x4f8] sm:$0xff] }
  0x4a   :  { %675 = vmatmul.mubr.f32.gmra.mrb[10].mxu1 %v45_v48  ;;  %2226 = vmatprep.subr.bf16.mxu0 %v2225_v56  ;;  %v228_v48 = vld [vmem:[%s3697_s1 + $0x468] sm:$0xff]  ;;  %v2245_v58 = vpack.c.bf16 %v246_v53, %v245_v52  ;;  %v229_v59 = vld [vmem:[%s3697_s1 + $0x470] sm:$0xff]  ;;  %v262_v63 = vld [vmem:[%s3697_s1 + $0x578] sm:$0xff] }
  0x4b   :  { %2256 = vmatpush3.bf16.msra.mxu1 %v2255_v51  ;;  %679 = vmatprep.mubr.f32.mxu1 %v62_v57  ;;  %v260_v51 = vld [vmem:[%s3697_s1 + $0x568] sm:$0xff]  ;;  %v2243_v56 = vpack.c.bf16 %v228_v48, %v227_v47  ;;  %v327_v2 = vld [vmem:[%s3697_s1 + $0x780] sm:$0xff]  ;;  %v298_v14 = vld [vmem:[%s3697_s1 + $0x698] sm:$0xff] }
  0x4c   :  { %595 = vmatmul.mubr.f32.gmra.mrb[12].mxu0 %v59_v55  ;;  %2258 = vmatprep.subr.bf16.mxu1 %v2257_v60  ;;  %v278_v55 = vld [vmem:[%s3697_s1 + $0x5f8] sm:$0xff]  ;;  %v2275_v57 = vpack.c.bf16 %v260_v51, %v259_v49  ;;  %v328_v3 = vld [vmem:[%s3697_s1 + $0x788] sm:$0xff]  ;;  %v279_v7 = vld [vmem:[%s3697_s1 + $0x600] sm:$0xff] }
  0x4d   :  { %2228 = vmatpush3.bf16.msra.mxu0 %v2227_v0  ;;  %599 = vmatprep.mubr.f32.mxu0 %v76_v1  ;;  %v230_v60 = vld [vmem:[%s3697_s1 + $0x478] sm:$0xff]  ;;  %v2277_v62 = vpack.c.bf16 %v278_v55, %v277_v54  ;;  %v295_v0 = vld [vmem:[%s3697_s1 + $0x680] sm:$0xff]  ;;  %v296_v1 = vld [vmem:[%s3697_s1 + $0x688] sm:$0xff]  ;;  %v2313_v9 = vpack.c.bf16 %v328_v3, %v327_v2 }
  0x4e   :  { %680 = vmatmul.mubr.f32.gmra.mrb[12].mxu1 %v61_v61  ;;  %2230 = vmatprep.subr.bf16.mxu0 %v2229_v8  ;;  %v261_v61 = vld [vmem:[%s3697_s1 + $0x570] sm:$0xff]  ;;  %v2281_v6 = vpack.c.bf16 %v296_v1, %v295_v0  ;;  %v280_v8 = vld [vmem:[%s3697_s1 + $0x608] sm:$0xff]  ;;  %v311_v10 = vld [vmem:[%s3697_s1 + $0x700] sm:$0xff] }
  0x4f   :  { %2260 = vmatpush3.bf16.msra.mxu1 %v2259_v4  ;;  %684 = vmatprep.mubr.f32.mxu1 %v78_v12  ;;  %v2247_v4 = vpack.c.bf16 %v230_v60, %v229_v59  ;;  %v2279_v5 = vpack.c.bf16 %v262_v63, %v261_v61  ;;  %v312_v11 = vld [vmem:[%s3697_s1 + $0x708] sm:$0xff]  ;;  %v31_v12 = vld [vmem:[%s3698_s0 + $0x40] sm:$0xff]  ;;  %v2283_v15 = vpack.c.bf16 %v280_v8, %v279_v7  ;;  %v281_v21 = vld [vmem:[%s3697_s1 + $0x610] sm:$0xff] }
  0x50   :  { %600 = vmatmul.mubr.f32.gmra.mrb[14].mxu0 %v75_v16  ;;  %2262 = vmatprep.subr.bf16.mxu1 %v2261_v13  ;;  %v297_v13 = vld [vmem:[%s3697_s1 + $0x690] sm:$0xff]  ;;  %v282_v22 = vld [vmem:[%s3697_s1 + $0x618] sm:$0xff]  ;;  %v47_v23 = vld [vmem:[%s3698_s0 + $0xc0] sm:$0xff] }
  0x51   :  { %2232 = vmatpush3.bf16.msra.mxu0 %v2231_v17  ;;  %754 = vmatprep.mubr.f32.mxu0 %v32_v30  ;;  %v33_v16 = vld [vmem:[%s3698_s0 + $0x50] sm:$0xff]  ;;  %v314_v26 = vld [vmem:[%s3697_s1 + $0x718] sm:$0xff]  ;;  %v299_v29 = vld [vmem:[%s3697_s1 + $0x6a0] sm:$0xff] }
  0x52   :  { %685 = vmatmul.mubr.f32.gmra.mrb[14].mxu1 %v77_v18  ;;  %2234 = vmatprep.subr.bf16.mxu0 %v2233_v20  ;;  %v329_v17 = vld [vmem:[%s3697_s1 + $0x790] sm:$0xff]  ;;  %v330_v18 = vld [vmem:[%s3697_s1 + $0x798] sm:$0xff]  ;;  %v48_v20 = vld [vmem:[%s3698_s0 + $0xc8] sm:$0xff] }
  0x53   :  { %2264 = vmatpush3.bf16.msra.mxu1 %v2263_v19  ;;  %839 = vmatprep.mubr.f32.mxu1 %v34_v32  ;;  %v2315_v19 = vpack.c.bf16 %v312_v11, %v311_v10  ;;  %v313_v25 = vld [vmem:[%s3697_s1 + $0x710] sm:$0xff]  ;;  %v50_v27 = vld [vmem:[%s3698_s0 + $0xd8] sm:$0xff]  ;;  %v2317_v28 = vpack.c.bf16 %v330_v18, %v329_v17  ;;  %v300_v30 = vld [vmem:[%s3697_s1 + $0x6a8] sm:$0xff] }
  0x54   :  { %2266 = vmatprep.subr.bf16.mxu1 %v2265_v24  ;;  %v2285_v24 = vpack.c.bf16 %v298_v14, %v297_v13  ;;  %v49_v32 = vld [vmem:[%s3698_s0 + $0xd0] sm:$0xff]  ;;  %v2319_v35 = vpack.c.bf16 %v314_v26, %v313_v25  ;;  %v64_v36 = vld [vmem:[%s3698_s0 + $0x148] sm:$0xff]  ;;  %v283_v37 = vld [vmem:[%s3697_s1 + $0x620] sm:$0xff]  ;;  %v2289_v40 = vpack.c.bf16 %v300_v30, %v299_v29 }
  0x55   :  { %2236 = vmatpush3.bf16.msra.mxu0 %v2235_v31  ;;  %v2287_v31 = vpack.c.bf16 %v282_v22, %v281_v21  ;;  %v63_v39 = vld [vmem:[%s3698_s0 + $0x140] sm:$0xff]  ;;  %v66_v41 = vld [vmem:[%s3698_s0 + $0x158] sm:$0xff]  ;;  %v316_v43 = vld [vmem:[%s3697_s1 + $0x728] sm:$0xff] }
  0x56   :  { %2238 = vmatprep.subr.bf16.mxu0 %v2237_v34  ;;  %v332_v34 = vld [vmem:[%s3697_s1 + $0x7a8] sm:$0xff]  ;;  %v315_v42 = vld [vmem:[%s3697_s1 + $0x720] sm:$0xff]  ;;  %v302_v47 = vld [vmem:[%s3697_s1 + $0x6b8] sm:$0xff] }
  0x57   :  { %2268 = vmatpush3.bf16.msra.mxu1 %v2267_v33  ;;  %v331_v33 = vld [vmem:[%s3697_s1 + $0x7a0] sm:$0xff]  ;;  %v80_v49 = vld [vmem:[%s3698_s0 + $0x1c8] sm:$0xff]  ;;  %v334_v51 = vld [vmem:[%s3697_s1 + $0x7b8] sm:$0xff]  ;;  %v2323_v52 = vpack.c.bf16 %v316_v43, %v315_v42 }
  0x58   :  { %2270 = vmatprep.subr.bf16.mxu1 %v2269_v38  ;;  %v284_v38 = vld [vmem:[%s3697_s1 + $0x628] sm:$0xff]  ;;  %v285_v53 = vld [vmem:[%s3697_s1 + $0x630] sm:$0xff]  ;;  %v286_v54 = vld [vmem:[%s3697_s1 + $0x638] sm:$0xff] }
  0x59   :  { %2240 = vmatpush3.bf16.msra.mxu0 %v2239_v44  ;;  %v2321_v44 = vpack.c.bf16 %v332_v34, %v331_v33  ;;  %v2291_v48 = vpack.c.bf16 %v284_v38, %v283_v37  ;;  %v317_v55 = vld [vmem:[%s3697_s1 + $0x730] sm:$0xff]  ;;  %v304_v59 = vld [vmem:[%s3697_s1 + $0x6c8] sm:$0xff]  ;;  %v82_v60 = vld [vmem:[%s3698_s0 + $0x1d8] sm:$0xff]  ;;  %v2295_v1 = vpack.c.bf16 %v286_v54, %v285_v53 }
  0x5a   :  { %2242 = vmatprep.subr.bf16.mxu0 %v2241_v46  ;;  %v301_v46 = vld [vmem:[%s3697_s1 + $0x6b0] sm:$0xff]  ;;  %v336_v63 = vld [vmem:[%s3697_s1 + $0x7c8] sm:$0xff]  ;;  %v79_v0 = vld [vmem:[%s3698_s0 + $0x1c0] sm:$0xff] }
  0x5b   :  { %2272 = vmatpush3.bf16.msra.mxu1 %v2271_v45  ;;  %v65_v45 = vld [vmem:[%s3698_s0 + $0x150] sm:$0xff]  ;;  %v319_v7 = vld [vmem:[%s3697_s1 + $0x740] sm:$0xff]  ;;  %v306_v11 = vld [vmem:[%s3697_s1 + $0x6d8] sm:$0xff] }
  0x5c   :  { %2274 = vmatprep.subr.bf16.mxu1 %v2273_v50  ;;  %v333_v50 = vld [vmem:[%s3697_s1 + $0x7b0] sm:$0xff]  ;;  %v338_v13 = vld [vmem:[%s3697_s1 + $0x7d8] sm:$0xff]  ;;  %v36_v14 = vld [vmem:[%s3698_s0 + $0x68] sm:$0xff] }
  0x5d   :  { %2244 = vmatpush3.bf16.msra.mxu0 %v2243_v56  ;;  %v2293_v56 = vpack.c.bf16 %v302_v47, %v301_v46  ;;  %v2325_v61 = vpack.c.bf16 %v334_v51, %v333_v50  ;;  %v81_v2 = vld [vmem:[%s3698_s0 + $0x1d0] sm:$0xff]  ;;  %v308_v25 = vld [vmem:[%s3697_s1 + $0x6e8] sm:$0xff]  ;;  %v339_v26 = vld [vmem:[%s3697_s1 + $0x7e0] sm:$0xff] }
  0x5e   :  { %2246 = vmatprep.subr.bf16.mxu0 %v2245_v58  ;;  %v303_v58 = vld [vmem:[%s3697_s1 + $0x6c0] sm:$0xff]  ;;  %v305_v10 = vld [vmem:[%s3697_s1 + $0x6d0] sm:$0xff]  ;;  %v310_v37 = vld [vmem:[%s3697_s1 + $0x6f8] sm:$0xff] }
  0x5f   :  { %2276 = vmatpush3.bf16.msra.mxu1 %v2275_v57  ;;  %v318_v57 = vld [vmem:[%s3697_s1 + $0x738] sm:$0xff]  ;;  %v2301_v18 = vpack.c.bf16 %v306_v11, %v305_v10  ;;  %v321_v21 = vld [vmem:[%s3697_s1 + $0x750] sm:$0xff]  ;;  %v323_v33 = vld [vmem:[%s3697_s1 + $0x760] sm:$0xff] }
  0x60   :  { %2278 = vmatprep.subr.bf16.mxu1 %v2277_v62  ;;  %v335_v62 = vld [vmem:[%s3697_s1 + $0x7c0] sm:$0xff]  ;;  %v2327_v3 = vpack.c.bf16 %v318_v57, %v317_v55  ;;  %v341_v38 = vld [vmem:[%s3697_s1 + $0x7f0] sm:$0xff]  ;;  %v326_v47 = vld [vmem:[%s3697_s1 + $0x778] sm:$0xff] }
  0x61   :  { %2248 = vmatpush3.bf16.msra.mxu0 %v2247_v4  ;;  %v2297_v4 = vpack.c.bf16 %v304_v59, %v303_v58  ;;  %v2329_v8 = vpack.c.bf16 %v336_v63, %v335_v62  ;;  %v293_v43 = vld [vmem:[%s3697_s1 + $0x670] sm:$0xff]  ;;  %v35_v50 = vld [vmem:[%s3698_s0 + $0x60] sm:$0xff]  ;;  %v54_v53 = vld [vmem:[%s3698_s0 + $0xf8] sm:$0xff] }
  0x62   :  { %2282 = vmatprep.subr.bf16.mxu0 %v2281_v6  ;;  %v288_v6 = vld [vmem:[%s3697_s1 + $0x648] sm:$0xff]  ;;  %v325_v46 = vld [vmem:[%s3697_s1 + $0x770] sm:$0xff]  ;;  %v51_v54 = vld [vmem:[%s3698_s0 + $0xe0] sm:$0xff] }
  0x63   :  { %2280 = vmatpush3.bf16.msra.mxu1 %v2279_v5  ;;  %v287_v5 = vld [vmem:[%s3697_s1 + $0x640] sm:$0xff]  ;;  %v37_v51 = vld [vmem:[%s3698_s0 + $0x70] sm:$0xff]  ;;  %v70_v57 = vld [vmem:[%s3698_s0 + $0x178] sm:$0xff] }
  0x64   :  { %2314 = vmatprep.subr.bf16.mxu1 %v2313_v9  ;;  %755 = vmatmul.mubr.f32.vlgmr.msra.gmra.mrb[16].mxu0 %v31_v12  ;;  %v320_v9 = vld [vmem:[%s3697_s1 + $0x748] sm:$0xff]  ;;  %v337_v12 = vld [vmem:[%s3697_s1 + $0x7d0] sm:$0xff]  ;;  %v67_v58 = vld [vmem:[%s3698_s0 + $0x160] sm:$0xff] }
  0x65   :  { %2284 = vmatpush3.bf16.msra.mxu0 %v2283_v15  ;;  %759 = vmatprep.mubr.f32.mxu0 %v48_v20  ;;  %v2299_v15 = vpack.c.bf16 %v288_v6, %v287_v5  ;;  %v2331_v17 = vpack.c.bf16 %v320_v9, %v319_v7  ;;  %v290_v20 = vld [vmem:[%s3697_s1 + $0x658] sm:$0xff]  ;;  %v2333_v22 = vpack.c.bf16 %v338_v13, %v337_v12  ;;  %v53_v55 = vld [vmem:[%s3698_s0 + $0xf0] sm:$0xff]  ;;  %v83_v62 = vld [vmem:[%s3698_s0 + $0x1e0] sm:$0xff] }
  0x66   :  { %840 = vmatmul.mubr.f32.vlgmr.msra.gmra.mrb[16].mxu1 %v33_v16  ;;  %2286 = vmatprep.subr.bf16.mxu0 %v2285_v24  ;;  %v38_v16 = vld [vmem:[%s3698_s0 + $0x78] sm:$0xff]  ;;  %v307_v24 = vld [vmem:[%s3697_s1 + $0x6e0] sm:$0xff]  ;;  %v69_v59 = vld [vmem:[%s3698_s0 + $0x170] sm:$0xff] }
  0x67   :  { %2316 = vmatpush3.bf16.msra.mxu1 %v2315_v19  ;;  %844 = vmatprep.mubr.f32.mxu1 %v50_v27  ;;  %v289_v19 = vld [vmem:[%s3697_s1 + $0x650] sm:$0xff]  ;;  %v340_v27 = vld [vmem:[%s3697_s1 + $0x7e8] sm:$0xff]  ;;  %v2305_v30 = vpack.c.bf16 %v308_v25, %v307_v24  ;;  %v1034_v6 = vld [vmem:[%s3699_s3 + $0x20] sm:$0xff]  ;;  %v2478_v24 = vmov 0.0|0.0  }
  0x68   :  { %760 = vmatmul.mubr.f32.gmra.mrb[18].mxu0 %v47_v23  ;;  %2318 = vmatprep.subr.bf16.mxu1 %v2317_v28  ;;  %v322_v23 = vld [vmem:[%s3697_s1 + $0x758] sm:$0xff]  ;;  %v2303_v28 = vpack.c.bf16 %v290_v20, %v289_v19  ;;  %v2337_v34 = vpack.c.bf16 %v340_v27, %v339_v26  ;;  %v85_v63 = vld [vmem:[%s3698_s0 + $0x1f0] sm:$0xff]  ;;  %v1035_v7 = vld [vmem:[%s3699_s3 + $0x28] sm:$0xff] }
  0x69   :  { %2288 = vmatpush3.bf16.msra.mxu0 %v2287_v31  ;;  %764 = vmatprep.mubr.f32.mxu0 %v64_v36  ;;  %v2335_v29 = vpack.c.bf16 %v322_v23, %v321_v21  ;;  %v291_v31 = vld [vmem:[%s3697_s1 + $0x660] sm:$0xff]  ;;  %v309_v36 = vld [vmem:[%s3697_s1 + $0x6f0] sm:$0xff]  ;;  %v1037_v10 = vld [vmem:[%s3699_s3 + $0x38] sm:$0xff] }
  0x6a   :  { %845 = vmatmul.mubr.f32.gmra.mrb[18].mxu1 %v49_v32  ;;  %2290 = vmatprep.subr.bf16.mxu0 %v2289_v40  ;;  %v292_v32 = vld [vmem:[%s3697_s1 + $0x668] sm:$0xff]  ;;  %v2309_v42 = vpack.c.bf16 %v310_v37, %v309_v36  ;;  %v1036_v9 = vld [vmem:[%s3699_s3 + $0x30] sm:$0xff]  ;;  %v1038_v12 = vld [vmem:[%s3699_s3 + $0x40] sm:$0xff] }
  0x6b   :  { %2320 = vmatpush3.bf16.msra.mxu1 %v2319_v35  ;;  %849 = vmatprep.mubr.f32.mxu1 %v66_v41  ;;  %v324_v35 = vld [vmem:[%s3697_s1 + $0x768] sm:$0xff]  ;;  %v2307_v40 = vpack.c.bf16 %v292_v32, %v291_v31  ;;  %v3514_v11 = vpack.c.bf16 %v1037_v10, %v1036_v9  ;;  %v1044_v21 = vld [vmem:[%s3699_s3 + $0x70] sm:$0xff]  ;;  %v1482_v26 = vld [vmem:[%s3700_s2] ss:$0 sm:$0xff] }
  0x6c   :  { %765 = vmatmul.mubr.f32.gmra.mrb[20].mxu0 %v63_v39  ;;  %2322 = vmatprep.subr.bf16.mxu1 %v2321_v44  ;;  %v342_v39 = vld [vmem:[%s3697_s1 + $0x7f8] sm:$0xff]  ;;  %v2339_v41 = vpack.c.bf16 %v324_v35, %v323_v33  ;;  %v1039_v13 = vld [vmem:[%s3699_s3 + $0x48] sm:$0xff]  ;;  %vm3586_vm1 = vmpackc.low %vm1131_vm0, %vm1131_vm0 }
  0x6d   :  { %2292 = vmatpush3.bf16.msra.mxu0 %v2291_v48  ;;  %769 = vmatprep.mubr.f32.mxu0 %v80_v49  ;;  %v294_v44 = vld [vmem:[%s3697_s1 + $0x678] sm:$0xff]  ;;  %v2343_v49 = vpack.c.bf16 %v326_v47, %v325_v46  ;;  %v1043_v19 = vld [vmem:[%s3699_s3 + $0x68] sm:$0xff] }
  0x6e   :  { %850 = vmatmul.mubr.f32.gmra.mrb[20].mxu1 %v65_v45  ;;  %2294 = vmatprep.subr.bf16.mxu0 %v2293_v56  ;;  %v2341_v45 = vpack.c.bf16 %v342_v39, %v341_v38  ;;  %v2311_v48 = vpack.c.bf16 %v294_v44, %v293_v43  ;;  %v68_v56 = vld [vmem:[%s3698_s0 + $0x168] sm:$0xff] }
  0x6f   :  { %2324 = vmatpush3.bf16.msra.mxu1 %v2323_v52  ;;  %854 = vmatprep.mubr.f32.mxu1 %v82_v60  ;;  %v52_v52 = vld [vmem:[%s3698_s0 + $0xe8] sm:$0xff] }
  0x70   :  { %770 = vmatmul.mubr.f32.gmra.mrb[22].mxu0 %v79_v0  ;;  %2326 = vmatprep.subr.bf16.mxu1 %v2325_v61  ;;  %v84_v60 = vld [vmem:[%s3698_s0 + $0x1e8] sm:$0xff]  ;;  %v86_v61 = vld [vmem:[%s3698_s0 + $0x1f8] sm:$0xff]  ;;  %v1030_v0 = vld [vmem:[%s3699_s3] sm:$0xff] }
  0x71   :  { %2296 = vmatpush3.bf16.msra.mxu0 %v2295_v1  ;;  %924 = vmatprep.mubr.f32.mxu0 %v36_v14  ;;  %v1031_v1 = vld [vmem:[%s3699_s3 + $0x8] sm:$0xff]  ;;  %v3528_v14 = vpack.c.bf16 %v1039_v13, %v1038_v12 }
  0x72   :  { %855 = vmatmul.mubr.f32.gmra.mrb[22].mxu1 %v81_v2  ;;  %2298 = vmatprep.subr.bf16.mxu0 %v2297_v4  ;;  %v3482_v2 = vpack.c.bf16 %v1031_v1, %v1030_v0  ;;  %v1033_v4 = vld [vmem:[%s3699_s3 + $0x18] sm:$0xff] }
  0x73   :  { %2328 = vmatpush3.bf16.msra.mxu1 %v2327_v3  ;;  %1009 = vmatprep.mubr.f32.mxu1 %v38_v16  ;;  %v1032_v3 = vld [vmem:[%s3699_s3 + $0x10] sm:$0xff]  ;;  %v1041_v16 = vld [vmem:[%s3699_s3 + $0x58] sm:$0xff] }
  0x74   :  { %2330 = vmatprep.subr.bf16.mxu1 %v2329_v8  ;;  %v3494_v5 = vpack.c.bf16 %v1033_v4, %v1032_v3  ;;  %v3506_v8 = vpack.c.bf16 %v1035_v7, %v1034_v6 }
  0x75   :  { %2300 = vmatpush3.bf16.msra.mxu0 %v2299_v15  ;;  %v1040_v15 = vld [vmem:[%s3699_s3 + $0x50] sm:$0xff] }
  0x76   :  { %2302 = vmatprep.subr.bf16.mxu0 %v2301_v18  ;;  %v1042_v18 = vld [vmem:[%s3699_s3 + $0x60] sm:$0xff] }
  0x77   :  { %2332 = vmatpush3.bf16.msra.mxu1 %v2331_v17  ;;  %v3542_v17 = vpack.c.bf16 %v1041_v16, %v1040_v15  ;;  %v3554_v20 = vpack.c.bf16 %v1043_v19, %v1042_v18 }
  0x78   :  { %2334 = vmatprep.subr.bf16.mxu1 %v2333_v22  ;;  %v1045_v22 = vld [vmem:[%s3699_s3 + $0x78] sm:$0xff] }
  0x79   :  { %2304 = vmatpush3.bf16.msra.mxu0 %v2303_v28  ;;  %v3566_v23 = vpack.c.bf16 %v1045_v22, %v1044_v21 }
  0x7a   :  { %2306 = vmatprep.subr.bf16.mxu0 %v2305_v30 }
  0x7b   :  { %2336 = vmatpush3.bf16.msra.mxu1 %v2335_v29 }
  0x7c   :  { %2338 = vmatprep.subr.bf16.mxu1 %v2337_v34 }
  0x7d   :  { %2308 = vmatpush3.bf16.msra.mxu0 %v2307_v40 }
  0x7e   :  { %2310 = vmatprep.subr.bf16.mxu0 %v2309_v42 }
  0x7f   :  { %2340 = vmatpush3.bf16.msra.mxu1 %v2339_v41 }
  0x80   :  { %2342 = vmatprep.subr.bf16.mxu1 %v2341_v45 }
  0x81   :  { %2312 = vmatpush3.bf16.msra.mxu0 %v2311_v48 }
  0x82   :  { %2346 = vmatprep.subr.bf16.mxu0 %v3482_v2 }
  0x83   :  { %2344 = vmatpush3.bf16.msra.mxu1 %v2343_v49 }
  0x84   :  { %925 = vmatmul.mubr.f32.vlgmr.msra.gmra.mrb[24].mxu0 %v35_v50  ;;  %2378 = vmatprep.subr.bf16.mxu1 %v3482_v2 }
  0x85   :  { %929 = vmatprep.mubr.f32.mxu0 %v52_v52  ;;  %2348 = vmatpush3.bf16.msra.mxu0 %v3482_v2 }
  0x86   :  { %1010 = vmatmul.mubr.f32.vlgmr.msra.gmra.mrb[24].mxu1 %v37_v51  ;;  %2350 = vmatprep.subr.bf16.mxu0 %v3494_v5 }
  0x87   :  { %1014 = vmatprep.mubr.f32.mxu1 %v54_v53  ;;  %2380 = vmatpush3.bf16.msra.mxu1 %v3482_v2 }
  0x88   :  { %930 = vmatmul.mubr.f32.gmra.mrb[26].mxu0 %v51_v54  ;;  %2382 = vmatprep.subr.bf16.mxu1 %v3494_v5 }
  0x89   :  { %934 = vmatprep.mubr.f32.mxu0 %v68_v56  ;;  %2352 = vmatpush3.bf16.msra.mxu0 %v3494_v5 }
  0x8a   :  { %1015 = vmatmul.mubr.f32.gmra.mrb[26].mxu1 %v53_v55  ;;  %2354 = vmatprep.subr.bf16.mxu0 %v3506_v8 }
  0x8b   :  { %1019 = vmatprep.mubr.f32.mxu1 %v70_v57  ;;  %2384 = vmatpush3.bf16.msra.mxu1 %v3494_v5 }
  0x8c   :  { %935 = vmatmul.mubr.f32.gmra.mrb[28].mxu0 %v67_v58  ;;  %2386 = vmatprep.subr.bf16.mxu1 %v3506_v8 }
  0x8d   :  { %939 = vmatprep.mubr.f32.mxu0 %v84_v60  ;;  %2356 = vmatpush3.bf16.msra.mxu0 %v3506_v8 }
  0x8e   :  { %1020 = vmatmul.mubr.f32.gmra.mrb[28].mxu1 %v69_v59  ;;  %2358 = vmatprep.subr.bf16.mxu0 %v3514_v11 }
  0x8f   :  { %1024 = vmatprep.mubr.f32.mxu1 %v86_v61  ;;  %2388 = vmatpush3.bf16.msra.mxu1 %v3506_v8 }
  0x90   :  { %940 = vmatmul.mubr.f32.gmra.mrb[30].mxu0 %v83_v62  ;;  %2390 = vmatprep.subr.bf16.mxu1 %v3514_v11 }
  0x91   :  { %2360 = vmatpush3.bf16.msra.mxu0 %v3514_v11 }
  0x92   :  { %1025 = vmatmul.mubr.f32.gmra.mrb[30].mxu1 %v85_v63  ;;  %2362 = vmatprep.subr.bf16.mxu0 %v3528_v14 }
  0x93   :  { %2392 = vmatpush3.bf16.msra.mxu1 %v3514_v11 }
  0x94   :  { %2394 = vmatprep.subr.bf16.mxu1 %v3528_v14 }
  0x95   :  { %2364 = vmatpush3.bf16.msra.mxu0 %v3528_v14 }
  0x96   :  { %2366 = vmatprep.subr.bf16.mxu0 %v3542_v17 }
  0x97   :  { %2396 = vmatpush3.bf16.msra.mxu1 %v3528_v14 }
  0x98   :  { %2398 = vmatprep.subr.bf16.mxu1 %v3542_v17 }
  0x99   :  { %2368 = vmatpush3.bf16.msra.mxu0 %v3542_v17 }
  0x9a   :  { %2370 = vmatprep.subr.bf16.mxu0 %v3554_v20 }
  0x9b   :  { %2400 = vmatpush3.bf16.msra.mxu1 %v3542_v17 }
  0x9c   :  { %2402 = vmatprep.subr.bf16.mxu1 %v3554_v20 }
  0x9d   :  { %2372 = vmatpush3.bf16.msra.mxu0 %v3554_v20 }
  0x9e   :  { %2374 = vmatprep.subr.bf16.mxu0 %v3566_v23 }
  0x9f   :  { %2404 = vmatpush3.bf16.msra.mxu1 %v3554_v20 }
  0xa0   :  { %2406 = vmatprep.subr.bf16.mxu1 %v3566_v23 }
  0xa1   :  { %2376 = vmatpush3.bf16.msra.mxu0 %v3566_v23 }
  0xa2   :  { %2409 = vmatprep.subr.bf16.mxu0 %v2478_v24 }
  0xa3   :  { %2408 = vmatpush3.bf16.msra.mxu1 %v3566_v23 }
  0xa4   :  { %2441 = vmatprep.subr.bf16.mxu1 %v2478_v24 }
  0xf7   :  { %v1549_v25 = vpop.f32.mrb[0].mxu0 }
  0xf8   :  { %v1550_v27 = vpop.f32.mrb[1].mxu0 }
  0xf9   :  { %v1593_v28 = vpop.f32.mrb[0].mxu1  ;;  %v1551_v29 = vadd.f32 %v1550_v27, %v1549_v25 }
  0xfa   :  { %v1594_v30 = vpop.f32.mrb[1].mxu1 }
  0xfb   :  { %v1595_v31 = vadd.f32 %v1594_v30, %v1593_v28  ;;  %v417_v32 = vadd.f32 %v1551_v29, %v1482_v26  ;;  %v1552_v33 = vpop.f32.mrb[2].mxu0 }
  0xfc   :  { %v1553_v34 = vpop.f32.mrb[3].mxu0 }
  0xfd   :  { %v1596_v35 = vpop.f32.mrb[2].mxu1  ;;  %v502_v36 = vadd.f32 %v1595_v31, %v417_v32  ;;  %v1554_v37 = vadd.f32 %v1553_v34, %v1552_v33 }
  0xfe   :  { %v1597_v38 = vpop.f32.mrb[3].mxu1 }
  0xff   :  { %v1598_v39 = vadd.f32 %v1597_v38, %v1596_v35  ;;  %v422_v40 = vadd.f32 %v1554_v37, %v1482_v26  ;;  %v1555_v41 = vpop.f32.mrb[4].mxu0 }
 0x100   :  { %v1556_v42 = vpop.f32.mrb[5].mxu0 }
 0x101   :  { %v1599_v43 = vpop.f32.mrb[4].mxu1  ;;  %v507_v44 = vadd.f32 %v1598_v39, %v422_v40  ;;  %v1557_v45 = vadd.f32 %v1556_v42, %v1555_v41 }
 0x102   :  { %v1600_v46 = vpop.f32.mrb[5].mxu1 }
 0x103   :  { %v1601_v47 = vadd.f32 %v1600_v46, %v1599_v43  ;;  %v427_v48 = vadd.f32 %v1557_v45, %v1482_v26  ;;  %v1558_v49 = vpop.f32.mrb[6].mxu0 }
 0x104   :  { %v1559_v50 = vpop.f32.mrb[7].mxu0 }
 0x105   :  { %v1602_v51 = vpop.f32.mrb[6].mxu1  ;;  %v512_v52 = vadd.f32 %v1601_v47, %v427_v48  ;;  %v1560_v53 = vadd.f32 %v1559_v50, %v1558_v49 }
 0x106   :  { %v1603_v54 = vpop.f32.mrb[7].mxu1 }
 0x107   :  { %v1604_v55 = vadd.f32 %v1603_v54, %v1602_v51  ;;  %v432_v56 = vadd.f32 %v1560_v53, %v1482_v26 }
 0x109   :  { %v517_v57 = vadd.f32 %v1604_v55, %v432_v56 }
 0x117   :  { %v1637_v58 = vpop.f32.mrb[8].mxu0 }
 0x118   :  { %v1638_v59 = vpop.f32.mrb[9].mxu0 }
 0x119   :  { %v1681_v60 = vpop.f32.mrb[8].mxu1  ;;  %v1639_v61 = vadd.f32 %v1638_v59, %v1637_v58 }
 0x11a   :  { %v1682_v62 = vpop.f32.mrb[9].mxu1 }
 0x11b   :  { %v1683_v63 = vadd.f32 %v1682_v62, %v1681_v60  ;;  %v587_v0 = vadd.f32 %v1639_v61, %v502_v36  ;;  %v1640_v1 = vpop.f32.mrb[10].mxu0 }
 0x11c   :  { %v1641_v3 = vpop.f32.mrb[11].mxu0 }
 0x11d   :  { %v1684_v4 = vpop.f32.mrb[10].mxu1  ;;  %v672_v6 = vadd.f32 %v1683_v63, %v587_v0  ;;  %v1642_v7 = vadd.f32 %v1641_v3, %v1640_v1 }
 0x11e   :  { %v1685_v9 = vpop.f32.mrb[11].mxu1 }
 0x11f   :  { %v1686_v10 = vadd.f32 %v1685_v9, %v1684_v4  ;;  %v592_v12 = vadd.f32 %v1642_v7, %v507_v44  ;;  %v1643_v13 = vpop.f32.mrb[12].mxu0 }
 0x120   :  { %v1644_v15 = vpop.f32.mrb[13].mxu0 }
 0x121   :  { %v1687_v16 = vpop.f32.mrb[12].mxu1  ;;  %v677_v18 = vadd.f32 %v1686_v10, %v592_v12  ;;  %v1645_v19 = vadd.f32 %v1644_v15, %v1643_v13 }
 0x122   :  { %v1688_v21 = vpop.f32.mrb[13].mxu1 }
 0x123   :  { %v1689_v22 = vadd.f32 %v1688_v21, %v1687_v16  ;;  %v597_v25 = vadd.f32 %v1645_v19, %v512_v52  ;;  %v1646_v26 = vpop.f32.mrb[14].mxu0 }
 0x124   :  { %v1647_v27 = vpop.f32.mrb[15].mxu0 }
 0x125   :  { %v1690_v28 = vpop.f32.mrb[14].mxu1  ;;  %v682_v29 = vadd.f32 %v1689_v22, %v597_v25  ;;  %v1648_v30 = vadd.f32 %v1647_v27, %v1646_v26 }
 0x126   :  { %v1691_v31 = vpop.f32.mrb[15].mxu1 }
 0x127   :  { %v1692_v32 = vadd.f32 %v1691_v31, %v1690_v28  ;;  %v602_v33 = vadd.f32 %v1648_v30, %v517_v57 }
 0x129   :  { %v687_v34 = vadd.f32 %v1692_v32, %v602_v33 }
 0x137   :  { %v1725_v35 = vpop.f32.mrb[16].mxu0 }
 0x138   :  { %v1726_v36 = vpop.f32.mrb[17].mxu0 }
 0x139   :  { %v1769_v37 = vpop.f32.mrb[16].mxu1  ;;  %v1727_v38 = vadd.f32 %v1726_v36, %v1725_v35 }
 0x13a   :  { %v1770_v39 = vpop.f32.mrb[17].mxu1 }
 0x13b   :  { %v1771_v40 = vadd.f32 %v1770_v39, %v1769_v37  ;;  %v757_v41 = vadd.f32 %v1727_v38, %v672_v6  ;;  %v1728_v42 = vpop.f32.mrb[18].mxu0 }
 0x13c   :  { %v1729_v43 = vpop.f32.mrb[19].mxu0 }
 0x13d   :  { %v1772_v44 = vpop.f32.mrb[18].mxu1  ;;  %v842_v45 = vadd.f32 %v1771_v40, %v757_v41  ;;  %v1730_v46 = vadd.f32 %v1729_v43, %v1728_v42 }
 0x13e   :  { %v1773_v47 = vpop.f32.mrb[19].mxu1 }
 0x13f   :  { %v1774_v48 = vadd.f32 %v1773_v47, %v1772_v44  ;;  %v762_v49 = vadd.f32 %v1730_v46, %v677_v18  ;;  %v1731_v50 = vpop.f32.mrb[20].mxu0 }
 0x140   :  { %v1732_v51 = vpop.f32.mrb[21].mxu0 }
 0x141   :  { %v1775_v52 = vpop.f32.mrb[20].mxu1  ;;  %v847_v53 = vadd.f32 %v1774_v48, %v762_v49  ;;  %v1733_v54 = vadd.f32 %v1732_v51, %v1731_v50 }
 0x142   :  { %v1776_v55 = vpop.f32.mrb[21].mxu1 }
 0x143   :  { %v1777_v56 = vadd.f32 %v1776_v55, %v1775_v52  ;;  %v767_v57 = vadd.f32 %v1733_v54, %v682_v29  ;;  %v1734_v58 = vpop.f32.mrb[22].mxu0 }
 0x144   :  { %v1735_v59 = vpop.f32.mrb[23].mxu0 }
 0x145   :  { %v1778_v60 = vpop.f32.mrb[22].mxu1  ;;  %v852_v61 = vadd.f32 %v1777_v56, %v767_v57  ;;  %v1736_v62 = vadd.f32 %v1735_v59, %v1734_v58 }
 0x146   :  { %v1779_v63 = vpop.f32.mrb[23].mxu1 }
 0x147   :  { %v1780_v0 = vadd.f32 %v1779_v63, %v1778_v60  ;;  %v772_v1 = vadd.f32 %v1736_v62, %v687_v34  ;;  %v1381_v34 = vlaneseq }
 0x149   :  { %v857_v3 = vadd.f32 %v1780_v0, %v772_v1 }
 0x157   :  { %v1813_v4 = vpop.f32.mrb[24].mxu0 }
 0x158   :  { %v1814_v6 = vpop.f32.mrb[25].mxu0 }
 0x159   :  { %v1857_v7 = vpop.f32.mrb[24].mxu1  ;;  %v1815_v9 = vadd.f32 %v1814_v6, %v1813_v4 }
 0x15a   :  { %v1858_v10 = vpop.f32.mrb[25].mxu1 }
 0x15b   :  { %v1859_v12 = vadd.f32 %v1858_v10, %v1857_v7  ;;  %v927_v13 = vadd.f32 %v1815_v9, %v842_v45  ;;  %v1816_v15 = vpop.f32.mrb[26].mxu0 }
 0x15c   :  { %v1817_v16 = vpop.f32.mrb[27].mxu0 }
 0x15d   :  { %v1860_v18 = vpop.f32.mrb[26].mxu1  ;;  %v3577_v19 = vadd.f32 %v1859_v12, %v927_v13  ;;  %v1818_v21 = vadd.f32 %v1817_v16, %v1816_v15 }
 0x15e   :  { %v1861_v22 = vpop.f32.mrb[27].mxu1 }
 0x15f   :  { %v1862_v25 = vadd.f32 %v1861_v22, %v1860_v18  ;;  %v932_v26 = vadd.f32 %v1818_v21, %v847_v53  ;;  %v1819_v27 = vpop.f32.mrb[28].mxu0  ;;  %1975 = vmatprep.mubr.f32.mxu0 %v3577_v19  ;;  %v1145_v28 = vmul.f32 %v3577_v19, %v3577_v19 }
 0x160   :  { %v1820_v29 = vpop.f32.mrb[29].mxu0 }
 0x161   :  { %v1863_v30 = vpop.f32.mrb[28].mxu1  ;;  %v3582_v31 = vadd.f32 %v1862_v25, %v932_v26  ;;  %v1821_v32 = vadd.f32 %v1820_v29, %v1819_v27  ;;  %2013 = vmatprep.mubr.f32.mxu1 %v1145_v28  ;;  %v1255_v27 = vld [vmem:[%s3701_s4] sm:$0x1] }
 0x162   :  { %v1864_v33 = vpop.f32.mrb[29].mxu1 }
 0x163   :  { %v1865_v35 = vadd.f32 %v1864_v33, %v1863_v30  ;;  %v1146_v36 = vmul.f32 %v3582_v31, %v3582_v31  ;;  %v937_v37 = vadd.f32 %v1821_v32, %v852_v61  ;;  %v1822_v38 = vpop.f32.mrb[30].mxu0  ;;  %1976 = vmatmul.mubr.f32.vlgmr.msra.gmra.mrb[32].mxu0 %v3582_v31  ;;  %v1257_v30 = vld [vmem:[%s3702_s5] sm:$0x1] }
 0x164   :  { %v1823_v39 = vpop.f32.mrb[31].mxu0  ;;  %2412 = vmatpush3.bf16.xpose.msk.msra.mxu0 %vm3586_vm1, %v3482_v2 }
 0x165   :  { %v1866_v40 = vpop.f32.mrb[30].mxu1  ;;  %v3596_v41 = vadd.f32 %v1865_v35, %v937_v37  ;;  %v1824_v42 = vadd.f32 %v1823_v39, %v1822_v38  ;;  %2014 = vmatmul.mubr.f32.vlgmr.msra.gmra.mrb[32].mxu1 %v1146_v36  ;;  %2413 = vmatprep.subr.bf16.mxu0 %v2478_v24  ;;  %v1382_v35 = vshrl.u32 %v1381_v34, 7 }
 0x166   :  { %v1867_v43 = vpop.f32.mrb[31].mxu1  ;;  %2444 = vmatpush3.bf16.xpose.msk.msra.mxu1 %vm3586_vm1, %v3482_v2  ;;  %v2480_v2 = vmov 0.0  }
 0x167   :  { %v1868_v44 = vadd.f32 %v1867_v43, %v1866_v40  ;;  %v942_v45 = vadd.f32 %v1824_v42, %v857_v3  ;;  %1978 = vmatprep.mubr.f32.mxu0 %v3596_v41  ;;  %v1147_v46 = vmul.f32 %v3596_v41, %v3596_v41  ;;  %2445 = vmatprep.subr.bf16.mxu1 %v2478_v24  ;;  %v1383_v36 = vsub.s32 0, %v1382_v35 }
 0x169   :  { %v3606_v47 = vadd.f32 %v1868_v44, %v942_v45  ;;  %2016 = vmatprep.mubr.f32.mxu1 %v1147_v46 }
 0x16b   :  { %1979 = vmatmul.mubr.f32.gmra.mrb[34].mxu0 %v3606_v47  ;;  %v1148_v48 = vmul.f32 %v3606_v47, %v3606_v47 }
 0x16c   :  { %2416 = vmatpush3.bf16.xpose.msk.msra.mxu0 %vm3586_vm1, %v3494_v5  ;;  %2051 = vmatprep.mubr.msk.f32.mxu0 %vm2479_vm2, %v2480_v2 }
 0x16d   :  { %2017 = vmatmul.mubr.f32.gmra.mrb[34].mxu1 %v1148_v48  ;;  %2417 = vmatprep.subr.bf16.mxu0 %v2478_v24 }
 0x16e   :  { %2448 = vmatpush3.bf16.xpose.msk.msra.mxu1 %vm3586_vm1, %v3494_v5  ;;  %2086 = vmatprep.mubr.msk.f32.mxu1 %vm2479_vm2, %v2480_v2 }
 0x16f   :  { %2449 = vmatprep.subr.bf16.mxu1 %v2478_v24 }
 0x174   :  { %2420 = vmatpush3.bf16.xpose.msk.msra.mxu0 %vm3586_vm1, %v3506_v8 }
 0x175   :  { %2421 = vmatprep.subr.bf16.mxu0 %v2478_v24 }
 0x176   :  { %2452 = vmatpush3.bf16.xpose.msk.msra.mxu1 %vm3586_vm1, %v3506_v8 }
 0x177   :  { %2453 = vmatprep.subr.bf16.mxu1 %v2478_v24 }
 0x17c   :  { %2424 = vmatpush3.bf16.xpose.msk.msra.mxu0 %vm3586_vm1, %v3514_v11 }
 0x17d   :  { %2425 = vmatprep.subr.bf16.mxu0 %v2478_v24 }
 0x17e   :  { %2456 = vmatpush3.bf16.xpose.msk.msra.mxu1 %vm3586_vm1, %v3514_v11 }
 0x17f   :  { %2457 = vmatprep.subr.bf16.mxu1 %v2478_v24 }
 0x184   :  { %2428 = vmatpush3.bf16.xpose.msk.msra.mxu0 %vm3586_vm1, %v3528_v14 }
 0x185   :  { %2429 = vmatprep.subr.bf16.mxu0 %v2478_v24 }
 0x186   :  { %2460 = vmatpush3.bf16.xpose.msk.msra.mxu1 %vm3586_vm1, %v3528_v14 }
 0x187   :  { %2461 = vmatprep.subr.bf16.mxu1 %v2478_v24 }
 0x18c   :  { %2432 = vmatpush3.bf16.xpose.msk.msra.mxu0 %vm3586_vm1, %v3542_v17 }
 0x18d   :  { %2433 = vmatprep.subr.bf16.mxu0 %v2478_v24 }
 0x18e   :  { %2464 = vmatpush3.bf16.xpose.msk.msra.mxu1 %vm3586_vm1, %v3542_v17 }
 0x18f   :  { %2465 = vmatprep.subr.bf16.mxu1 %v2478_v24 }
 0x194   :  { %2436 = vmatpush3.bf16.xpose.msk.msra.mxu0 %vm3586_vm1, %v3554_v20 }
 0x195   :  { %2437 = vmatprep.subr.bf16.mxu0 %v2478_v24 }
 0x196   :  { %2468 = vmatpush3.bf16.xpose.msk.msra.mxu1 %vm3586_vm1, %v3554_v20 }
 0x197   :  { %2469 = vmatprep.subr.bf16.mxu1 %v2478_v24 }
 0x19c   :  { %2440 = vmatpush3.bf16.xpose.msk.msra.mxu0 %vm3586_vm1, %v3566_v23 }
 0x19e   :  { %2472 = vmatpush3.bf16.xpose.msk.msra.mxu1 %vm3586_vm1, %v3566_v23 }
 0x236   :  { %v1977_v5 = vpop.f32.mrb[32].mxu0 }
 0x237   :  { %v1133_v8 = vsel %vm1131_vm0, %v1977_v5, 0.0  ;;  %v1112_v11 = vpop.f32.mrb[33].mxu0 }
 0x238   :  { %v1132_v14 = vsel %vm1131_vm0, %v1112_v11, 0.0  ;;  %v2015_v17 = vpop.f32.mrb[32].mxu1 }
 0x239   :  { %v1134_v20 = vadd.f32 %v1133_v8, %v1132_v14  ;;  %v1235_v24 = vsel %vm1131_vm0, %v2015_v17, 0.0  ;;  %v1215_v49 = vpop.f32.mrb[33].mxu1 }
 0x23a   :  { %v1234_v50 = vsel %vm1131_vm0, %v1215_v49, 0.0 }
 0x23b   :  { %v1236_v51 = vadd.f32 %v1235_v24, %v1234_v50 }
 0x23e   :  { %v1980_v52 = vpop.f32.mrb[34].mxu0 }
 0x23f   :  { %v1122_v23 = vpop.f32.mrb[35].mxu0  ;;  %v1137_v57 = vsel %vm1131_vm0, %v1980_v52, 0.0 }
 0x240   :  { %v1135_v53 = vsel %vm1131_vm0, %v1122_v23, 0.0  ;;  %v2018_v54 = vpop.f32.mrb[34].mxu1 }
 0x241   :  { %v1136_v55 = vadd.f32 %v1135_v53, %v1134_v20  ;;  %v1225_v56 = vpop.f32.mrb[35].mxu1  ;;  %v1239_v61 = vsel %vm1131_vm0, %v2018_v54, 0.0 }
 0x242   :  { %v1237_v58 = vsel %vm1131_vm0, %v1225_v56, 0.0 }
 0x243   :  { %v1138_v59 = vadd.f32 %v1137_v57, %v1136_v55  ;;  %v1238_v60 = vadd.f32 %v1237_v58, %v1236_v51 }
 0x245   :  { %v1139_v62 = vrot.slane %v1138_v59, 4  ;;  %v1240_v63 = vadd.f32 %v1239_v61, %v1238_v60 }
 0x247   :  { %v1140_v0 = vadd.f32 %v1139_v62, %v1138_v59  ;;  %v1241_v1 = vrot.slane %v1240_v63, 4 }
 0x249   :  { %v1141_v3 = vrot.slane %v1140_v0, 2  ;;  %v1242_v4 = vadd.f32 %v1241_v1, %v1240_v63 }
 0x24b   :  { %v1142_v6 = vadd.f32 %v1141_v3, %v1140_v0  ;;  %v1243_v7 = vrot.slane %v1242_v4, 2 }
 0x24d   :  { %v1143_v9 = vrot.slane %v1142_v6, 1  ;;  %v1244_v10 = vadd.f32 %v1243_v7, %v1242_v4 }
 0x24f   :  { %v1144_v12 = vadd.f32 %v1143_v9, %v1142_v6  ;;  %v1245_v13 = vrot.slane %v1244_v10, 1 }
 0x251   :  { %v1248_v15 = vmul.f32 0.0078125, %v1144_v12  ;;  %v1246_v16 = vadd.f32 %v1245_v13, %v1244_v10 }
 0x253   :  { %v1250_v18 = vmul.f32 %v1248_v15, %v1248_v15  ;;  %v1249_v21 = vmul.f32 0.0078125, %v1246_v16 }
 0x255   :  { %v1251_v22 = vsub.f32 %v1249_v21, %v1250_v18 }
 0x257   :  { %v1252_v25 = vmax.f32 %v1251_v22, 0.0 }
 0x259   :  { %v1253_v26 = vadd.f32 1e-05, %v1252_v25 }
 0x25b   :  { %2476 = vrsqrt.f32 %v1253_v26 }
 0x265   :  { %v2477_v28 = vpop.eup %2476 }
 0x266   :  { %v1256_v29 = vmul.f32 %v2477_v28, %v1255_v27 }
 0x268   :  { %2052 = vmatmul.mubr.msk.f32.vlgmr.msra.gmra.mrb[36].mxu0 %vm1131_vm0, %v1256_v29  ;;  %v1258_v32 = vmul.f32 %v1256_v29, %v1248_v15 }
 0x26a   :  { %v1259_v33 = vsub.f32 %v1257_v30, %v1258_v32 }
 0x26c   :  { %2087 = vmatmul.mubr.msk.f32.vlgmr.msra.gmra.mrb[36].mxu1 %vm1131_vm0, %v1259_v33 }
 0x33b   :  { %v1377_v37 = vpop.f32.mrb[36].mxu0 }
 0x33c   :  { %v1384_v38 = vrot.slane %v1377_v37, %v1383_v36  ;;  %v2053_v39 = vpop.f32.mrb[37].mxu0 }
 0x33e   :  { %v1385_v40 = vmul.f32 %v1384_v38, %v3577_v19  ;;  %v1386_v43 = vmul.f32 %v1384_v38, %v3582_v31  ;;  %v1387_v44 = vmul.f32 %v1384_v38, %v3596_v41  ;;  %v1388_v45 = vmul.f32 %v1384_v38, %v3606_v47 }
 0x33f   :  { %v1458_v42 = vpop.f32.mrb[36].mxu1 }
 0x340   :  { %v1465_v46 = vrot.slane %v1458_v42, %v1383_v36  ;;  %v2088_v48 = vpop.f32.mrb[37].mxu1 }
 0x342   :  { %v1466_v2 = vadd.f32 %v1465_v46, %v1385_v40  ;;  %v1467_v5 = vadd.f32 %v1465_v46, %v1386_v43  ;;  %v1468_v8 = vadd.f32 %v1465_v46, %v1387_v44  ;;  %v1469_v11 = vadd.f32 %v1465_v46, %v1388_v45 }
 0x344   :  { %v1470_v14 = vmax.f32 %v1466_v2, 0.0  ;;  %v1471_v17 = vmax.f32 %v1467_v5, 0.0  ;;  %v1472_v20 = vmax.f32 %v1468_v8, 0.0  ;;  %v1473_v24 = vmax.f32 %v1469_v11, 0.0 }
 0x346   :  { %1474 = vst [vmem:[%s3703_s6] sm:$0xff] %v1470_v14  ;;  %1475 = vst [vmem:[%s3703_s6 + $0x8] sm:$0xff] %v1471_v17 }
 0x347   :  { %1476 = vst [vmem:[%s3703_s6 + $0x10] sm:$0xff] %v1472_v20  ;;  %1477 = vst [vmem:[%s3703_s6 + $0x18] sm:$0xff] %v1473_v24 }

// kernel: vqvae8_forward.9
= control target key start
LH: loop header
LB: loop body
LE: loop exit
PB: predicated region body
PF: predicated region fallthrough
CT: control target
= control target key end

     0   :  { %vm397_vm0 = vcmask 261120   ;;  %vm1289_vm2 = vmmov 0   ;;  %s1787_s1 = inlined_call_operand.vmem [shape: f32[512,128], index: 1, kind: input, shape index: {}]   ;;  %s1788_s0 = inlined_call_operand.vmem [shape: f32[32,512], index: 0, kind: input, shape index: {}]   ;;  %s1789_s3 = inlined_call_operand.vmem [shape: f32[128,32], index: 3, kind: input, shape index: {}]   ;;  %s1790_s2 = inlined_call_operand.vmem [shape: f32[1,128], index: 2, kind: input, shape index: {}]   ;;  %s1791_s4 = inlined_call_operand.vmem [shape: f32[1,32], index: 4, kind: input, shape index: {}]   ;;  %s1792_s5 = inlined_call_operand.vmem [shape: f32[1,32], index: 5, kind: input, shape index: {}]   ;;  %s1793_s6 = inlined_call_operand.vmem [shape: f32[32,128], index: 6, kind: output, shape index: {}]  }
   0x1   :  { %v71_v0 = vld [vmem:[%s1787_s1 + $0x80] sm:$0xff]  ;;  %v72_v1 = vld [vmem:[%s1787_s1 + $0x88] sm:$0xff]  ;;  %v73_v11 = vld [vmem:[%s1787_s1 + $0x90] sm:$0xff] }
   0x2   :  { %v55_v2 = vld [vmem:[%s1787_s1] sm:$0xff]  ;;  %v1091_v3 = vpack.c.bf16 %v72_v1, %v71_v0  ;;  %v56_v4 = vld [vmem:[%s1787_s1 + $0x8] sm:$0xff]  ;;  %v74_v13 = vld [vmem:[%s1787_s1 + $0x98] sm:$0xff] }
   0x3   :  { %v103_v5 = vld [vmem:[%s1787_s1 + $0x180] sm:$0xff]  ;;  %v104_v6 = vld [vmem:[%s1787_s1 + $0x188] sm:$0xff]  ;;  %v1093_v7 = vpack.c.bf16 %v56_v4, %v55_v2  ;;  %v57_v14 = vld [vmem:[%s1787_s1 + $0x10] sm:$0xff]  ;;  %v1095_v16 = vpack.c.bf16 %v74_v13, %v73_v11 }
   0x4   :  { %v1123_v8 = vpack.c.bf16 %v104_v6, %v103_v5  ;;  %v87_v9 = vld [vmem:[%s1787_s1 + $0x100] sm:$0xff]  ;;  %v88_v10 = vld [vmem:[%s1787_s1 + $0x108] sm:$0xff]  ;;  %1092 = vmatprep.subr.bf16.mxu0 %v1091_v3  ;;  %v58_v15 = vld [vmem:[%s1787_s1 + $0x18] sm:$0xff] }
   0x5   :  { %v1125_v12 = vpack.c.bf16 %v88_v10, %v87_v9  ;;  %1094 = vmatpush3.bf16.msra.mxu0 %v1093_v7  ;;  %v1097_v17 = vpack.c.bf16 %v58_v15, %v57_v14  ;;  %v105_v18 = vld [vmem:[%s1787_s1 + $0x190] sm:$0xff]  ;;  %v106_v19 = vld [vmem:[%s1787_s1 + $0x198] sm:$0xff]  ;;  %v75_v23 = vld [vmem:[%s1787_s1 + $0xa0] sm:$0xff] }
   0x6   :  { %1124 = vmatprep.subr.bf16.mxu1 %v1123_v8  ;;  %v89_v20 = vld [vmem:[%s1787_s1 + $0x110] sm:$0xff]  ;;  %v1127_v21 = vpack.c.bf16 %v106_v19, %v105_v18  ;;  %v90_v22 = vld [vmem:[%s1787_s1 + $0x118] sm:$0xff]  ;;  %v76_v24 = vld [vmem:[%s1787_s1 + $0xa8] sm:$0xff]  ;;  %1096 = vmatprep.subr.bf16.mxu0 %v1095_v16 }
   0x7   :  { %1126 = vmatpush3.bf16.msra.mxu1 %v1125_v12  ;;  %v1129_v25 = vpack.c.bf16 %v90_v22, %v89_v20  ;;  %v1099_v26 = vpack.c.bf16 %v76_v24, %v75_v23  ;;  %v59_v27 = vld [vmem:[%s1787_s1 + $0x20] sm:$0xff]  ;;  %v60_v28 = vld [vmem:[%s1787_s1 + $0x28] sm:$0xff]  ;;  %v77_v35 = vld [vmem:[%s1787_s1 + $0xb0] sm:$0xff] }
   0x8   :  { %v107_v29 = vld [vmem:[%s1787_s1 + $0x1a0] sm:$0xff]  ;;  %1128 = vmatprep.subr.bf16.mxu1 %v1127_v21  ;;  %v108_v30 = vld [vmem:[%s1787_s1 + $0x1a8] sm:$0xff]  ;;  %v1101_v33 = vpack.c.bf16 %v60_v28, %v59_v27  ;;  %v78_v36 = vld [vmem:[%s1787_s1 + $0xb8] sm:$0xff] }
   0x9   :  { %v91_v31 = vld [vmem:[%s1787_s1 + $0x120] sm:$0xff]  ;;  %v92_v32 = vld [vmem:[%s1787_s1 + $0x128] sm:$0xff]  ;;  %1098 = vmatpush3.bf16.msra.mxu0 %v1097_v17  ;;  %v1131_v34 = vpack.c.bf16 %v108_v30, %v107_v29  ;;  %v61_v37 = vld [vmem:[%s1787_s1 + $0x30] sm:$0xff]  ;;  %v1103_v39 = vpack.c.bf16 %v78_v36, %v77_v35 }
   0xa   :  { %1100 = vmatprep.subr.bf16.mxu0 %v1099_v26  ;;  %v1133_v38 = vpack.c.bf16 %v92_v32, %v91_v31  ;;  %v62_v40 = vld [vmem:[%s1787_s1 + $0x38] sm:$0xff]  ;;  %v109_v41 = vld [vmem:[%s1787_s1 + $0x1b0] sm:$0xff]  ;;  %v79_v46 = vld [vmem:[%s1787_s1 + $0xc0] sm:$0xff] }
   0xb   :  { %1130 = vmatpush3.bf16.msra.mxu1 %v1129_v25  ;;  %v110_v42 = vld [vmem:[%s1787_s1 + $0x1b8] sm:$0xff]  ;;  %v93_v44 = vld [vmem:[%s1787_s1 + $0x130] sm:$0xff]  ;;  %v80_v47 = vld [vmem:[%s1787_s1 + $0xc8] sm:$0xff]  ;;  %v1105_v48 = vpack.c.bf16 %v62_v40, %v61_v37 }
   0xc   :  { %1132 = vmatprep.subr.bf16.mxu1 %v1131_v34  ;;  %v1135_v43 = vpack.c.bf16 %v110_v42, %v109_v41  ;;  %v94_v45 = vld [vmem:[%s1787_s1 + $0x138] sm:$0xff]  ;;  %v111_v49 = vld [vmem:[%s1787_s1 + $0x1c0] sm:$0xff]  ;;  %v112_v50 = vld [vmem:[%s1787_s1 + $0x1c8] sm:$0xff]  ;;  %v1107_v52 = vpack.c.bf16 %v80_v47, %v79_v46 }
   0xd   :  { %1102 = vmatpush3.bf16.msra.mxu0 %v1101_v33  ;;  %v1137_v51 = vpack.c.bf16 %v94_v45, %v93_v44  ;;  %v63_v53 = vld [vmem:[%s1787_s1 + $0x40] sm:$0xff]  ;;  %v64_v54 = vld [vmem:[%s1787_s1 + $0x48] sm:$0xff]  ;;  %v1139_v56 = vpack.c.bf16 %v112_v50, %v111_v49  ;;  %v81_v58 = vld [vmem:[%s1787_s1 + $0xd0] sm:$0xff] }
   0xe   :  { %1104 = vmatprep.subr.bf16.mxu0 %v1103_v39  ;;  %v95_v55 = vld [vmem:[%s1787_s1 + $0x140] sm:$0xff]  ;;  %v96_v57 = vld [vmem:[%s1787_s1 + $0x148] sm:$0xff]  ;;  %v82_v59 = vld [vmem:[%s1787_s1 + $0xd8] sm:$0xff]  ;;  %v1109_v62 = vpack.c.bf16 %v64_v54, %v63_v53 }
   0xf   :  { %1134 = vmatpush3.bf16.msra.mxu1 %v1133_v38  ;;  %v113_v60 = vld [vmem:[%s1787_s1 + $0x1d0] sm:$0xff]  ;;  %v114_v61 = vld [vmem:[%s1787_s1 + $0x1d8] sm:$0xff]  ;;  %v1141_v63 = vpack.c.bf16 %v96_v57, %v95_v55  ;;  %v1111_v0 = vpack.c.bf16 %v82_v59, %v81_v58  ;;  %v83_v6 = vld [vmem:[%s1787_s1 + $0xe0] sm:$0xff] }
  0x10   :  { %1136 = vmatprep.subr.bf16.mxu1 %v1135_v43  ;;  %v65_v1 = vld [vmem:[%s1787_s1 + $0x50] sm:$0xff]  ;;  %v66_v2 = vld [vmem:[%s1787_s1 + $0x58] sm:$0xff]  ;;  %v1143_v4 = vpack.c.bf16 %v114_v61, %v113_v60  ;;  %v84_v7 = vld [vmem:[%s1787_s1 + $0xe8] sm:$0xff] }
  0x11   :  { %1106 = vmatpush3.bf16.msra.mxu0 %v1105_v48  ;;  %v97_v3 = vld [vmem:[%s1787_s1 + $0x150] sm:$0xff]  ;;  %v98_v5 = vld [vmem:[%s1787_s1 + $0x158] sm:$0xff]  ;;  %v115_v8 = vld [vmem:[%s1787_s1 + $0x1e0] sm:$0xff]  ;;  %v1113_v10 = vpack.c.bf16 %v66_v2, %v65_v1  ;;  %v1115_v14 = vpack.c.bf16 %v84_v7, %v83_v6 }
  0x12   :  { %1108 = vmatprep.subr.bf16.mxu0 %v1107_v52  ;;  %v116_v9 = vld [vmem:[%s1787_s1 + $0x1e8] sm:$0xff]  ;;  %v67_v11 = vld [vmem:[%s1787_s1 + $0x60] sm:$0xff]  ;;  %v1145_v13 = vpack.c.bf16 %v98_v5, %v97_v3  ;;  %v85_v19 = vld [vmem:[%s1787_s1 + $0xf0] sm:$0xff] }
  0x13   :  { %1138 = vmatpush3.bf16.msra.mxu1 %v1137_v51  ;;  %v68_v12 = vld [vmem:[%s1787_s1 + $0x68] sm:$0xff]  ;;  %v99_v15 = vld [vmem:[%s1787_s1 + $0x160] sm:$0xff]  ;;  %v1147_v18 = vpack.c.bf16 %v116_v9, %v115_v8  ;;  %v86_v20 = vld [vmem:[%s1787_s1 + $0xf8] sm:$0xff] }
  0x14   :  { %1140 = vmatprep.subr.bf16.mxu1 %v1139_v56  ;;  %v100_v16 = vld [vmem:[%s1787_s1 + $0x168] sm:$0xff]  ;;  %v26_v22 = vld [vmem:[%s1788_s0 + $0x18] sm:$0xff]  ;;  %v117_v23 = vld [vmem:[%s1787_s1 + $0x1f0] sm:$0xff]  ;;  %v1117_v26 = vpack.c.bf16 %v68_v12, %v67_v11  ;;  %v1119_v28 = vpack.c.bf16 %v86_v20, %v85_v19 }
  0x15   :  { %1110 = vmatpush3.bf16.msra.mxu0 %v1109_v62  ;;  %v24_v17 = vld [vmem:[%s1788_s0 + $0x8] sm:$0xff]  ;;  %v118_v24 = vld [vmem:[%s1787_s1 + $0x1f8] sm:$0xff]  ;;  %v42_v25 = vmax.f32 %v26_v22, 0.0  ;;  %v1149_v27 = vpack.c.bf16 %v100_v16, %v99_v15  ;;  %v69_v29 = vld [vmem:[%s1787_s1 + $0x70] sm:$0xff] }
  0x16   :  { %1112 = vmatprep.subr.bf16.mxu0 %v1111_v0  ;;  %v40_v21 = vmax.f32 %v24_v17, 0.0  ;;  %v70_v30 = vld [vmem:[%s1787_s1 + $0x78] sm:$0xff]  ;;  %v1151_v31 = vpack.c.bf16 %v118_v24, %v117_v23  ;;  %v101_v32 = vld [vmem:[%s1787_s1 + $0x170] sm:$0xff]  ;;  %v296_v34 = vld [vmem:[%s1789_s3] sm:$0xff]  ;;  %v1288_v24 = vmov 0.0|0.0  }
  0x17   :  { %1142 = vmatpush3.bf16.msra.mxu1 %v1141_v63  ;;  %v102_v33 = vld [vmem:[%s1787_s1 + $0x178] sm:$0xff]  ;;  %275 = vmatprep.mubr.f32.mxu1 %v42_v25  ;;  %v297_v35 = vld [vmem:[%s1789_s3 + $0x8] sm:$0xff]  ;;  %v1121_v36 = vpack.c.bf16 %v70_v30, %v69_v29  ;;  %v23_v37 = vld [vmem:[%s1788_s0] sm:$0xff] }
  0x18   :  { %1144 = vmatprep.subr.bf16.mxu1 %v1143_v4  ;;  %190 = vmatprep.mubr.f32.mxu0 %v40_v21  ;;  %v1153_v38 = vpack.c.bf16 %v102_v33, %v101_v32  ;;  %v25_v39 = vld [vmem:[%s1788_s0 + $0x10] sm:$0xff]  ;;  %v28_v40 = vld [vmem:[%s1788_s0 + $0x28] sm:$0xff]  ;;  %v1539_v41 = vpack.c.bf16 %v297_v35, %v296_v34  ;;  %v30_v42 = vld [vmem:[%s1788_s0 + $0x38] sm:$0xff]  ;;  %v39_v43 = vmax.f32 %v23_v37, 0.0 }
  0x19   :  { %1114 = vmatpush3.bf16.msra.mxu0 %v1113_v10  ;;  %v298_v44 = vld [vmem:[%s1789_s3 + $0x10] sm:$0xff]  ;;  %v299_v45 = vld [vmem:[%s1789_s3 + $0x18] sm:$0xff]  ;;  %v41_v46 = vmax.f32 %v25_v39, 0.0  ;;  %v44_v47 = vmax.f32 %v28_v40, 0.0  ;;  %v27_v48 = vld [vmem:[%s1788_s0 + $0x20] sm:$0xff]  ;;  %v46_v49 = vmax.f32 %v30_v42, 0.0 }
  0x1a   :  { %1116 = vmatprep.subr.bf16.mxu0 %v1115_v14  ;;  %v29_v50 = vld [vmem:[%s1788_s0 + $0x30] sm:$0xff]  ;;  %v32_v51 = vld [vmem:[%s1788_s0 + $0x48] sm:$0xff]  ;;  %v34_v52 = vld [vmem:[%s1788_s0 + $0x58] sm:$0xff]  ;;  %v1564_v53 = vpack.c.bf16 %v299_v45, %v298_v44  ;;  %v43_v54 = vmax.f32 %v27_v48, 0.0 }
  0x1b   :  { %1146 = vmatpush3.bf16.msra.mxu1 %v1145_v13  ;;  %v300_v55 = vld [vmem:[%s1789_s3 + $0x20] sm:$0xff]  ;;  %v301_v56 = vld [vmem:[%s1789_s3 + $0x28] sm:$0xff]  ;;  %v45_v57 = vmax.f32 %v29_v50, 0.0  ;;  %v48_v58 = vmax.f32 %v32_v51, 0.0  ;;  %v50_v60 = vmax.f32 %v34_v52, 0.0  ;;  %v33_v61 = vld [vmem:[%s1788_s0 + $0x50] sm:$0xff] }
  0x1c   :  { %1148 = vmatprep.subr.bf16.mxu1 %v1147_v18  ;;  %v31_v59 = vld [vmem:[%s1788_s0 + $0x40] sm:$0xff]  ;;  %v36_v62 = vld [vmem:[%s1788_s0 + $0x68] sm:$0xff]  ;;  %v38_v63 = vld [vmem:[%s1788_s0 + $0x78] sm:$0xff]  ;;  %v1587_v0 = vpack.c.bf16 %v301_v56, %v300_v55  ;;  %v49_v4 = vmax.f32 %v33_v61, 0.0 }
  0x1d   :  { %1118 = vmatpush3.bf16.msra.mxu0 %v1117_v26  ;;  %v47_v1 = vmax.f32 %v31_v59, 0.0  ;;  %v302_v2 = vld [vmem:[%s1789_s3 + $0x30] sm:$0xff]  ;;  %v303_v3 = vld [vmem:[%s1789_s3 + $0x38] sm:$0xff]  ;;  %v52_v5 = vmax.f32 %v36_v62, 0.0  ;;  %v35_v6 = vld [vmem:[%s1788_s0 + $0x60] sm:$0xff]  ;;  %v54_v7 = vmax.f32 %v38_v63, 0.0 }
  0x1e   :  { %1120 = vmatprep.subr.bf16.mxu0 %v1119_v28  ;;  %v37_v8 = vld [vmem:[%s1788_s0 + $0x70] sm:$0xff]  ;;  %v1605_v9 = vpack.c.bf16 %v303_v3, %v302_v2  ;;  %v51_v10 = vmax.f32 %v35_v6, 0.0  ;;  %v304_v11 = vld [vmem:[%s1789_s3 + $0x40] sm:$0xff]  ;;  %v305_v12 = vld [vmem:[%s1789_s3 + $0x48] sm:$0xff] }
  0x1f   :  { %1150 = vmatpush3.bf16.msra.mxu1 %v1149_v27  ;;  %v53_v13 = vmax.f32 %v37_v8, 0.0  ;;  %v1617_v14 = vpack.c.bf16 %v305_v12, %v304_v11  ;;  %v306_v15 = vld [vmem:[%s1789_s3 + $0x50] sm:$0xff]  ;;  %v307_v16 = vld [vmem:[%s1789_s3 + $0x58] sm:$0xff]  ;;  %v308_v18 = vld [vmem:[%s1789_s3 + $0x60] sm:$0xff] }
  0x20   :  { %1152 = vmatprep.subr.bf16.mxu1 %v1151_v31  ;;  %v1632_v17 = vpack.c.bf16 %v307_v16, %v306_v15  ;;  %v309_v19 = vld [vmem:[%s1789_s3 + $0x68] sm:$0xff]  ;;  %v310_v21 = vld [vmem:[%s1789_s3 + $0x70] sm:$0xff]  ;;  %v311_v22 = vld [vmem:[%s1789_s3 + $0x78] sm:$0xff] }
  0x21   :  { %1122 = vmatpush3.bf16.msra.mxu0 %v1121_v36  ;;  %v1644_v20 = vpack.c.bf16 %v309_v19, %v308_v18  ;;  %v1656_v23 = vpack.c.bf16 %v311_v22, %v310_v21  ;;  %v748_v26 = vld [vmem:[%s1790_s2] ss:$0 sm:$0xff]  ;;  %vm1676_vm1 = vmpackc.low %vm397_vm0, %vm397_vm0 }
  0x22   :  { %1156 = vmatprep.subr.bf16.mxu0 %v1539_v41 }
  0x23   :  { %1154 = vmatpush3.bf16.msra.mxu1 %v1153_v38 }
  0x24   :  { %1188 = vmatprep.subr.bf16.mxu1 %v1539_v41  ;;  %191 = vmatmul.mubr.f32.vlgmr.msra.gmra.mrb[0].mxu0 %v39_v43 }
  0x25   :  { %195 = vmatprep.mubr.f32.mxu0 %v44_v47  ;;  %1158 = vmatpush3.bf16.msra.mxu0 %v1539_v41 }
  0x26   :  { %276 = vmatmul.mubr.f32.vlgmr.msra.gmra.mrb[0].mxu1 %v41_v46  ;;  %1160 = vmatprep.subr.bf16.mxu0 %v1564_v53 }
  0x27   :  { %280 = vmatprep.mubr.f32.mxu1 %v46_v49  ;;  %1190 = vmatpush3.bf16.msra.mxu1 %v1539_v41  ;;  %v647_v49 = vlaneseq }
  0x28   :  { %196 = vmatmul.mubr.f32.gmra.mrb[2].mxu0 %v43_v54  ;;  %1192 = vmatprep.subr.bf16.mxu1 %v1564_v53 }
  0x29   :  { %200 = vmatprep.mubr.f32.mxu0 %v48_v58  ;;  %1162 = vmatpush3.bf16.msra.mxu0 %v1564_v53 }
  0x2a   :  { %281 = vmatmul.mubr.f32.gmra.mrb[2].mxu1 %v45_v57  ;;  %1164 = vmatprep.subr.bf16.mxu0 %v1587_v0 }
  0x2b   :  { %285 = vmatprep.mubr.f32.mxu1 %v50_v60  ;;  %1194 = vmatpush3.bf16.msra.mxu1 %v1564_v53 }
  0x2c   :  { %201 = vmatmul.mubr.f32.gmra.mrb[4].mxu0 %v47_v1  ;;  %1196 = vmatprep.subr.bf16.mxu1 %v1587_v0 }
  0x2d   :  { %205 = vmatprep.mubr.f32.mxu0 %v52_v5  ;;  %1166 = vmatpush3.bf16.msra.mxu0 %v1587_v0 }
  0x2e   :  { %286 = vmatmul.mubr.f32.gmra.mrb[4].mxu1 %v49_v4  ;;  %1168 = vmatprep.subr.bf16.mxu0 %v1605_v9 }
  0x2f   :  { %290 = vmatprep.mubr.f32.mxu1 %v54_v7  ;;  %1198 = vmatpush3.bf16.msra.mxu1 %v1587_v0 }
  0x30   :  { %206 = vmatmul.mubr.f32.gmra.mrb[6].mxu0 %v51_v10  ;;  %1200 = vmatprep.subr.bf16.mxu1 %v1605_v9 }
  0x31   :  { %1170 = vmatpush3.bf16.msra.mxu0 %v1605_v9 }
  0x32   :  { %291 = vmatmul.mubr.f32.gmra.mrb[6].mxu1 %v53_v13  ;;  %1172 = vmatprep.subr.bf16.mxu0 %v1617_v14 }
  0x33   :  { %1202 = vmatpush3.bf16.msra.mxu1 %v1605_v9 }
  0x34   :  { %1204 = vmatprep.subr.bf16.mxu1 %v1617_v14 }
  0x35   :  { %1174 = vmatpush3.bf16.msra.mxu0 %v1617_v14 }
  0x36   :  { %1176 = vmatprep.subr.bf16.mxu0 %v1632_v17 }
  0x37   :  { %1206 = vmatpush3.bf16.msra.mxu1 %v1617_v14 }
  0x38   :  { %1208 = vmatprep.subr.bf16.mxu1 %v1632_v17 }
  0x39   :  { %1178 = vmatpush3.bf16.msra.mxu0 %v1632_v17 }
  0x3a   :  { %1180 = vmatprep.subr.bf16.mxu0 %v1644_v20 }
  0x3b   :  { %1210 = vmatpush3.bf16.msra.mxu1 %v1632_v17 }
  0x3c   :  { %1212 = vmatprep.subr.bf16.mxu1 %v1644_v20 }
  0x3d   :  { %1182 = vmatpush3.bf16.msra.mxu0 %v1644_v20 }
  0x3e   :  { %1184 = vmatprep.subr.bf16.mxu0 %v1656_v23 }
  0x3f   :  { %1214 = vmatpush3.bf16.msra.mxu1 %v1644_v20 }
  0x40   :  { %1216 = vmatprep.subr.bf16.mxu1 %v1656_v23 }
  0x41   :  { %1186 = vmatpush3.bf16.msra.mxu0 %v1656_v23 }
  0x42   :  { %1219 = vmatprep.subr.bf16.mxu0 %v1288_v24 }
  0x43   :  { %1218 = vmatpush3.bf16.msra.mxu1 %v1656_v23 }
  0x44   :  { %1251 = vmatprep.subr.bf16.mxu1 %v1288_v24 }
  0xf7   :  { %v815_v25 = vpop.f32.mrb[0].mxu0 }
  0xf8   :  { %v816_v27 = vpop.f32.mrb[1].mxu0 }
  0xf9   :  { %v859_v28 = vpop.f32.mrb[0].mxu1  ;;  %v817_v29 = vadd.f32 %v816_v27, %v815_v25 }
  0xfa   :  { %v860_v30 = vpop.f32.mrb[1].mxu1 }
  0xfb   :  { %v861_v31 = vadd.f32 %v860_v30, %v859_v28  ;;  %v193_v32 = vadd.f32 %v817_v29, %v748_v26  ;;  %v818_v33 = vpop.f32.mrb[2].mxu0 }
  0xfc   :  { %v819_v34 = vpop.f32.mrb[3].mxu0 }
  0xfd   :  { %v862_v35 = vpop.f32.mrb[2].mxu1  ;;  %v1667_v36 = vadd.f32 %v861_v31, %v193_v32  ;;  %v820_v37 = vadd.f32 %v819_v34, %v818_v33 }
  0xfe   :  { %v863_v38 = vpop.f32.mrb[3].mxu1 }
  0xff   :  { %v864_v39 = vadd.f32 %v863_v38, %v862_v35  ;;  %v198_v40 = vadd.f32 %v820_v37, %v748_v26  ;;  %v821_v42 = vpop.f32.mrb[4].mxu0  ;;  %977 = vmatprep.mubr.f32.mxu0 %v1667_v36  ;;  %v411_v43 = vmul.f32 %v1667_v36, %v1667_v36 }
 0x100   :  { %v822_v44 = vpop.f32.mrb[5].mxu0 }
 0x101   :  { %v865_v45 = vpop.f32.mrb[4].mxu1  ;;  %v1672_v46 = vadd.f32 %v864_v39, %v198_v40  ;;  %v823_v47 = vadd.f32 %v822_v44, %v821_v42  ;;  %1015 = vmatprep.mubr.f32.mxu1 %v411_v43  ;;  %v521_v42 = vld [vmem:[%s1791_s4] sm:$0x1] }
 0x102   :  { %v866_v48 = vpop.f32.mrb[5].mxu1 }
 0x103   :  { %v867_v50 = vadd.f32 %v866_v48, %v865_v45  ;;  %v412_v51 = vmul.f32 %v1672_v46, %v1672_v46  ;;  %v203_v52 = vadd.f32 %v823_v47, %v748_v26  ;;  %v824_v54 = vpop.f32.mrb[6].mxu0  ;;  %978 = vmatmul.mubr.f32.vlgmr.msra.gmra.mrb[8].mxu0 %v1672_v46  ;;  %v523_v45 = vld [vmem:[%s1792_s5] sm:$0x1] }
 0x104   :  { %v825_v55 = vpop.f32.mrb[7].mxu0  ;;  %1222 = vmatpush3.bf16.xpose.msk.msra.mxu0 %vm1676_vm1, %v1539_v41 }
 0x105   :  { %v868_v56 = vpop.f32.mrb[6].mxu1  ;;  %v1686_v57 = vadd.f32 %v867_v50, %v203_v52  ;;  %v826_v58 = vadd.f32 %v825_v55, %v824_v54  ;;  %1016 = vmatmul.mubr.f32.vlgmr.msra.gmra.mrb[8].mxu1 %v412_v51  ;;  %1223 = vmatprep.subr.bf16.mxu0 %v1288_v24  ;;  %v648_v50 = vshrl.u32 %v647_v49, 7 }
 0x106   :  { %v869_v59 = vpop.f32.mrb[7].mxu1  ;;  %1254 = vmatpush3.bf16.xpose.msk.msra.mxu1 %vm1676_vm1, %v1539_v41  ;;  %v1290_v41 = vmov 0.0  }
 0x107   :  { %v870_v60 = vadd.f32 %v869_v59, %v868_v56  ;;  %v208_v61 = vadd.f32 %v826_v58, %v748_v26  ;;  %980 = vmatprep.mubr.f32.mxu0 %v1686_v57  ;;  %v413_v62 = vmul.f32 %v1686_v57, %v1686_v57  ;;  %1255 = vmatprep.subr.bf16.mxu1 %v1288_v24  ;;  %v649_v51 = vsub.s32 0, %v648_v50 }
 0x109   :  { %v1696_v63 = vadd.f32 %v870_v60, %v208_v61  ;;  %1018 = vmatprep.mubr.f32.mxu1 %v413_v62 }
 0x10b   :  { %981 = vmatmul.mubr.f32.gmra.mrb[10].mxu0 %v1696_v63  ;;  %v414_v1 = vmul.f32 %v1696_v63, %v1696_v63 }
 0x10c   :  { %1226 = vmatpush3.bf16.xpose.msk.msra.mxu0 %vm1676_vm1, %v1564_v53  ;;  %1053 = vmatprep.mubr.msk.f32.mxu0 %vm1289_vm2, %v1290_v41 }
 0x10d   :  { %1019 = vmatmul.mubr.f32.gmra.mrb[10].mxu1 %v414_v1  ;;  %1227 = vmatprep.subr.bf16.mxu0 %v1288_v24 }
 0x10e   :  { %1258 = vmatpush3.bf16.xpose.msk.msra.mxu1 %vm1676_vm1, %v1564_v53  ;;  %1088 = vmatprep.mubr.msk.f32.mxu1 %vm1289_vm2, %v1290_v41 }
 0x10f   :  { %1259 = vmatprep.subr.bf16.mxu1 %v1288_v24 }
 0x114   :  { %1230 = vmatpush3.bf16.xpose.msk.msra.mxu0 %vm1676_vm1, %v1587_v0 }
 0x115   :  { %1231 = vmatprep.subr.bf16.mxu0 %v1288_v24 }
 0x116   :  { %1262 = vmatpush3.bf16.xpose.msk.msra.mxu1 %vm1676_vm1, %v1587_v0 }
 0x117   :  { %1263 = vmatprep.subr.bf16.mxu1 %v1288_v24 }
 0x11c   :  { %1234 = vmatpush3.bf16.xpose.msk.msra.mxu0 %vm1676_vm1, %v1605_v9 }
 0x11d   :  { %1235 = vmatprep.subr.bf16.mxu0 %v1288_v24 }
 0x11e   :  { %1266 = vmatpush3.bf16.xpose.msk.msra.mxu1 %vm1676_vm1, %v1605_v9 }
 0x11f   :  { %1267 = vmatprep.subr.bf16.mxu1 %v1288_v24 }
 0x124   :  { %1238 = vmatpush3.bf16.xpose.msk.msra.mxu0 %vm1676_vm1, %v1617_v14 }
 0x125   :  { %1239 = vmatprep.subr.bf16.mxu0 %v1288_v24 }
 0x126   :  { %1270 = vmatpush3.bf16.xpose.msk.msra.mxu1 %vm1676_vm1, %v1617_v14 }
 0x127   :  { %1271 = vmatprep.subr.bf16.mxu1 %v1288_v24 }
 0x12c   :  { %1242 = vmatpush3.bf16.xpose.msk.msra.mxu0 %vm1676_vm1, %v1632_v17 }
 0x12d   :  { %1243 = vmatprep.subr.bf16.mxu0 %v1288_v24 }
 0x12e   :  { %1274 = vmatpush3.bf16.xpose.msk.msra.mxu1 %vm1676_vm1, %v1632_v17 }
 0x12f   :  { %1275 = vmatprep.subr.bf16.mxu1 %v1288_v24 }
 0x134   :  { %1246 = vmatpush3.bf16.xpose.msk.msra.mxu0 %vm1676_vm1, %v1644_v20 }
 0x135   :  { %1247 = vmatprep.subr.bf16.mxu0 %v1288_v24 }
 0x136   :  { %1278 = vmatpush3.bf16.xpose.msk.msra.mxu1 %vm1676_vm1, %v1644_v20 }
 0x137   :  { %1279 = vmatprep.subr.bf16.mxu1 %v1288_v24 }
 0x13c   :  { %1250 = vmatpush3.bf16.xpose.msk.msra.mxu0 %vm1676_vm1, %v1656_v23 }
 0x13e   :  { %1282 = vmatpush3.bf16.xpose.msk.msra.mxu1 %vm1676_vm1, %v1656_v23 }
 0x1d6   :  { %v979_v53 = vpop.f32.mrb[8].mxu0 }
 0x1d7   :  { %v399_v0 = vsel %vm397_vm0, %v979_v53, 0.0  ;;  %v378_v2 = vpop.f32.mrb[9].mxu0 }
 0x1d8   :  { %v398_v3 = vsel %vm397_vm0, %v378_v2, 0.0  ;;  %v1017_v4 = vpop.f32.mrb[8].mxu1 }
 0x1d9   :  { %v400_v5 = vadd.f32 %v399_v0, %v398_v3  ;;  %v501_v6 = vsel %vm397_vm0, %v1017_v4, 0.0  ;;  %v481_v7 = vpop.f32.mrb[9].mxu1 }
 0x1da   :  { %v500_v8 = vsel %vm397_vm0, %v481_v7, 0.0 }
 0x1db   :  { %v502_v9 = vadd.f32 %v501_v6, %v500_v8 }
 0x1de   :  { %v982_v10 = vpop.f32.mrb[10].mxu0 }
 0x1df   :  { %v388_v11 = vpop.f32.mrb[11].mxu0  ;;  %v403_v16 = vsel %vm397_vm0, %v982_v10, 0.0 }
 0x1e0   :  { %v401_v12 = vsel %vm397_vm0, %v388_v11, 0.0  ;;  %v1020_v13 = vpop.f32.mrb[10].mxu1 }
 0x1e1   :  { %v402_v14 = vadd.f32 %v401_v12, %v400_v5  ;;  %v491_v15 = vpop.f32.mrb[11].mxu1  ;;  %v505_v20 = vsel %vm397_vm0, %v1020_v13, 0.0 }
 0x1e2   :  { %v503_v17 = vsel %vm397_vm0, %v491_v15, 0.0 }
 0x1e3   :  { %v404_v18 = vadd.f32 %v403_v16, %v402_v14  ;;  %v504_v19 = vadd.f32 %v503_v17, %v502_v9 }
 0x1e5   :  { %v405_v21 = vrot.slane %v404_v18, 4  ;;  %v506_v22 = vadd.f32 %v505_v20, %v504_v19 }
 0x1e7   :  { %v406_v23 = vadd.f32 %v405_v21, %v404_v18  ;;  %v507_v24 = vrot.slane %v506_v22, 4 }
 0x1e9   :  { %v407_v25 = vrot.slane %v406_v23, 2  ;;  %v508_v26 = vadd.f32 %v507_v24, %v506_v22 }
 0x1eb   :  { %v408_v27 = vadd.f32 %v407_v25, %v406_v23  ;;  %v509_v28 = vrot.slane %v508_v26, 2 }
 0x1ed   :  { %v409_v29 = vrot.slane %v408_v27, 1  ;;  %v510_v30 = vadd.f32 %v509_v28, %v508_v26 }
 0x1ef   :  { %v410_v31 = vadd.f32 %v409_v29, %v408_v27  ;;  %v511_v32 = vrot.slane %v510_v30, 1 }
 0x1f1   :  { %v514_v33 = vmul.f32 0.0078125, %v410_v31  ;;  %v512_v34 = vadd.f32 %v511_v32, %v510_v30 }
 0x1f3   :  { %v516_v35 = vmul.f32 %v514_v33, %v514_v33  ;;  %v515_v37 = vmul.f32 0.0078125, %v512_v34 }
 0x1f5   :  { %v517_v38 = vsub.f32 %v515_v37, %v516_v35 }
 0x1f7   :  { %v518_v39 = vmax.f32 %v517_v38, 0.0 }
 0x1f9   :  { %v519_v40 = vadd.f32 1e-05, %v518_v39 }
 0x1fb   :  { %1286 = vrsqrt.f32 %v519_v40 }
 0x205   :  { %v1287_v43 = vpop.eup %1286 }
 0x206   :  { %v522_v44 = vmul.f32 %v1287_v43, %v521_v42 }
 0x208   :  { %1054 = vmatmul.mubr.msk.f32.vlgmr.msra.gmra.mrb[12].mxu0 %vm397_vm0, %v522_v44  ;;  %v524_v47 = vmul.f32 %v522_v44, %v514_v33 }
 0x20a   :  { %v525_v48 = vsub.f32 %v523_v45, %v524_v47 }
 0x20c   :  { %1089 = vmatmul.mubr.msk.f32.vlgmr.msra.gmra.mrb[12].mxu1 %vm397_vm0, %v525_v48 }
 0x2db   :  { %v643_v52 = vpop.f32.mrb[12].mxu0 }
 0x2dc   :  { %v650_v54 = vrot.slane %v643_v52, %v649_v51  ;;  %v1055_v55 = vpop.f32.mrb[13].mxu0 }
 0x2de   :  { %v651_v56 = vmul.f32 %v650_v54, %v1667_v36  ;;  %v652_v59 = vmul.f32 %v650_v54, %v1672_v46  ;;  %v653_v60 = vmul.f32 %v650_v54, %v1686_v57  ;;  %v654_v61 = vmul.f32 %v650_v54, %v1696_v63 }
 0x2df   :  { %v724_v58 = vpop.f32.mrb[12].mxu1 }
 0x2e0   :  { %v731_v62 = vrot.slane %v724_v58, %v649_v51  ;;  %v1090_v1 = vpop.f32.mrb[13].mxu1 }
 0x2e2   :  { %v732_v41 = vadd.f32 %v731_v62, %v651_v56  ;;  %v733_v53 = vadd.f32 %v731_v62, %v652_v59  ;;  %v734_v0 = vadd.f32 %v731_v62, %v653_v60  ;;  %v735_v2 = vadd.f32 %v731_v62, %v654_v61 }
 0x2e4   :  { %v736_v3 = vmax.f32 %v732_v41, 0.0  ;;  %v737_v4 = vmax.f32 %v733_v53, 0.0  ;;  %v738_v5 = vmax.f32 %v734_v0, 0.0  ;;  %v739_v6 = vmax.f32 %v735_v2, 0.0 }
 0x2e6   :  { %740 = vst [vmem:[%s1793_s6] sm:$0xff] %v736_v3  ;;  %741 = vst [vmem:[%s1793_s6 + $0x8] sm:$0xff] %v737_v4 }
 0x2e7   :  { %742 = vst [vmem:[%s1793_s6 + $0x10] sm:$0xff] %v738_v5  ;;  %743 = vst [vmem:[%s1793_s6 + $0x18] sm:$0xff] %v739_v6 }

// kernel: vqvae8_forward.8
= control target key start
LH: loop header
LB: loop body
LE: loop exit
PB: predicated region body
PF: predicated region fallthrough
CT: control target
= control target key end

     0   :  { %s9303_s6 = smov 1   ;;  %s9304_s10 = smov 2   ;;  %s10755_s0 = inlined_call_operand.smem [shape: u32[41], index: -1, kind: input, shape index: {}] }
   0x1   :  { %s9356_s5 = sld [smem:[%s10755_s0]]   ;;  %s9305_s14 = smov 3  }
   0x2   :  { %s9361_s9 = sld [smem:[%s10755_s0 + %s9303_s6]]   ;;  %s9306_s18 = smov 4  }
   0x3   :  { %s9366_s13 = sld [smem:[%s10755_s0 + %s9304_s10]]   ;;  %s9307_s22 = smov 5  }
   0x4   :  { %s9371_s17 = sld [smem:[%s10755_s0 + %s9305_s14]]   ;;  %s9308_s26 = smov 6  }
   0x5   :  { %s9376_s21 = sld [smem:[%s10755_s0 + %s9306_s18]]   ;;  %s9309_s30 = smov 7  }
   0x6   :  { %s9381_s25 = sld [smem:[%s10755_s0 + %s9307_s22]]   ;;  %s9310_s4 = smov 8  }
   0x7   :  { %s9386_s29 = sld [smem:[%s10755_s0 + %s9308_s26]]   ;;  %s9311_s10 = smov 9  }
   0x8   :  { %s9391_s3 = sld [smem:[%s10755_s0 + %s9309_s30]]   ;;  %s9312_s15 = smov 10  }
   0x9   :  { %s9396_s8 = sld [smem:[%s10755_s0 + %s9310_s4]]   ;;  %s9313_s20 = smov 11  }
   0xa   :  { %s9401_s14 = sld [smem:[%s10755_s0 + %s9311_s10]]   ;;  %s9314_s26 = smov 12  }
   0xb   :  { %10774 = sst [smem:[#allocation8_spill]] %s9376_s21  ;;  %s9315_s1 = smov 13  }
   0xc   :  { %10775 = sst [smem:[#allocation9_spill]] %s9381_s25  ;;  %s9316_s7 = smov 14  }
   0xd   :  { %s9406_s19 = sld [smem:[%s10755_s0 + %s9312_s15]]   ;;  %s9317_s15 = smov 15  }
   0xe   :  { %s9411_s24 = sld [smem:[%s10755_s0 + %s9313_s20]]   ;;  %s9318_s22 = smov 16  }
   0xf   :  { %s9416_s30 = sld [smem:[%s10755_s0 + %s9314_s26]]   ;;  %s9319_s28 = smov 17  }
  0x10   :  { %s9421_s6 = sld [smem:[%s10755_s0 + %s9315_s1]]  }
  0x11   :  { %s9426_s12 = sld [smem:[%s10755_s0 + %s9316_s7]]   ;;  %s9320_s7 = smov 18  }
  0x12   :  { %s9431_s20 = sld [smem:[%s10755_s0 + %s9317_s15]]   ;;  %s9321_s15 = smov 19  }
  0x13   :  { %s9436_s27 = sld [smem:[%s10755_s0 + %s9318_s22]]   ;;  %s9322_s22 = smov 20  }
  0x14   :  { %s9441_s4 = sld [smem:[%s10755_s0 + %s9319_s28]]   ;;  %s9323_s28 = smov 21  }
  0x15   :  { %s9446_s25 = sld [smem:[%s10755_s0 + %s9320_s7]]   ;;  %s9324_s7 = smov 22  }
  0x16   :  { %s9451_s21 = sld [smem:[%s10755_s0 + %s9321_s15]]   ;;  %s9325_s15 = smov 23  }
  0x18   :  { %10776 = sst [smem:[#allocation10_spill]] %s9431_s20 }
  0x19   :  { %10777 = sst [smem:[#allocation11_spill]] %s9436_s27 }
  0x1a   :  { %10778 = sst [smem:[#allocation12_spill]] %s9441_s4 }
  0x1b   :  { %s9456_s27 = sld [smem:[%s10755_s0 + %s9322_s22]]   ;;  %s9326_s22 = smov 24  }
  0x1c   :  { %10779 = sst [smem:[#allocation13_spill]] %s9451_s21 }
  0x1d   :  { %s9461_s4 = sld [smem:[%s10755_s0 + %s9323_s28]]   ;;  %s9327_s28 = smov 25  }
  0x1e   :  { %s9466_s20 = sld [smem:[%s10755_s0 + %s9324_s7]]   ;;  %s9328_s7 = smov 26  }
  0x1f   :  { %s9471_s21 = sld [smem:[%s10755_s0 + %s9325_s15]]   ;;  %s9329_s15 = smov 27  }
  0x21   :  { %10780 = sst [smem:[#allocation14_spill]] %s9456_s27 }
  0x22   :  { %s9476_s27 = sld [smem:[%s10755_s0 + %s9326_s22]]   ;;  %s9330_s22 = smov 28  }
  0x23   :  { %10781 = sst [smem:[#allocation15_spill]] %s9461_s4 }
  0x24   :  { %10782 = sst [smem:[#allocation16_spill]] %s9466_s20 }
  0x25   :  { %10783 = sst [smem:[#allocation17_spill]] %s9471_s21 }
  0x26   :  { %s9481_s4 = sld [smem:[%s10755_s0 + %s9327_s28]]   ;;  %s9331_s28 = smov 29  }
  0x27   :  { %s9486_s20 = sld [smem:[%s10755_s0 + %s9328_s7]]   ;;  %s9332_s7 = smov 30  }
  0x28   :  { %10784 = sst [smem:[#allocation18_spill]] %s9476_s27 }
  0x29   :  { %s9491_s21 = sld [smem:[%s10755_s0 + %s9329_s15]]   ;;  %s9333_s15 = smov 31  }
  0x2a   :  { %s9496_s27 = sld [smem:[%s10755_s0 + %s9330_s22]]   ;;  %s9334_s22 = smov 32  }
  0x2c   :  { %10785 = sst [smem:[#allocation19_spill]] %s9481_s4 }
  0x2d   :  { %10786 = sst [smem:[#allocation20_spill]] %s9486_s20 }
  0x2e   :  { %s9501_s4 = sld [smem:[%s10755_s0 + %s9331_s28]]   ;;  %s9335_s28 = smov 33  }
  0x2f   :  { %10787 = sst [smem:[#allocation21_spill]] %s9491_s21 }
  0x30   :  { %10788 = sst [smem:[#allocation22_spill]] %s9496_s27 }
  0x31   :  { %s9506_s20 = sld [smem:[%s10755_s0 + %s9332_s7]]   ;;  %s9336_s7 = smov 34  }
  0x32   :  { %s9511_s21 = sld [smem:[%s10755_s0 + %s9333_s15]]   ;;  %s9337_s15 = smov 35  }
  0x33   :  { %s9516_s27 = sld [smem:[%s10755_s0 + %s9334_s22]]   ;;  %s9338_s22 = smov 36  }
  0x34   :  { %10789 = sst [smem:[#allocation23_spill]] %s9501_s4 }
  0x35   :  { %s9521_s4 = sld [smem:[%s10755_s0 + %s9335_s28]]   ;;  %s9339_s28 = smov 37  }
  0x37   :  { %10790 = sst [smem:[#allocation24_spill]] %s9506_s20 }
  0x38   :  { %10791 = sst [smem:[#allocation25_spill]] %s9511_s21 }
  0x39   :  { %10792 = sst [smem:[#allocation26_spill]] %s9516_s27 }
  0x3a   :  { %s9526_s20 = sld [smem:[%s10755_s0 + %s9336_s7]]   ;;  %s9340_s7 = smov 38  }
  0x3b   :  { %10793 = sst [smem:[#allocation27_spill]] %s9521_s4 }
  0x3c   :  { %s9531_s21 = sld [smem:[%s10755_s0 + %s9337_s15]]   ;;  %s9341_s15 = smov 39  }
  0x3d   :  { %s9536_s27 = sld [smem:[%s10755_s0 + %s9338_s22]]   ;;  %s9342_s22 = smov 40  }
  0x3e   :  { %s9541_s4 = sld [smem:[%s10755_s0 + %s9339_s28]]  }
  0x40   :  { %10794 = sst [smem:[#allocation28_spill]] %s9526_s20 }
  0x41   :  { %s9546_s20 = sld [smem:[%s10755_s0 + %s9340_s7]]  }
  0x42   :  { %10795 = sst [smem:[#allocation29_spill]] %s9531_s21 }
  0x43   :  { %10796 = sst [smem:[#allocation30_spill]] %s9536_s27 }
  0x44   :  { %s9551_s21 = sld [smem:[%s10755_s0 + %s9341_s15]]  }
  0x45   :  { %s9556_s27 = sld [smem:[%s10755_s0 + %s9342_s22]]  }
  0x46   :  { %87 = vsyncpa [#allocation3], 0  ;;  %v233_v0 = vld [vmem:[%s9361_s9 + $0x80] sm:$0xff]  ;;  %v234_v1 = vld [vmem:[%s9361_s9 + $0x88] sm:$0xff] }
  0x47   :  { %v217_v2 = vld [vmem:[%s9361_s9] sm:$0xff]  ;;  %v8574_v3 = vpack.c.bf16 %v234_v1, %v233_v0  ;;  %v218_v4 = vld [vmem:[%s9361_s9 + $0x8] sm:$0xff]  ;;  %v235_v11 = vld [vmem:[%s9361_s9 + $0x90] sm:$0xff] }
  0x48   :  { %v265_v5 = vld [vmem:[%s9361_s9 + $0x180] sm:$0xff]  ;;  %v266_v6 = vld [vmem:[%s9361_s9 + $0x188] sm:$0xff]  ;;  %v8576_v7 = vpack.c.bf16 %v218_v4, %v217_v2  ;;  %v236_v13 = vld [vmem:[%s9361_s9 + $0x98] sm:$0xff] }
  0x49   :  { %v8606_v8 = vpack.c.bf16 %v266_v6, %v265_v5  ;;  %v249_v9 = vld [vmem:[%s9361_s9 + $0x100] sm:$0xff]  ;;  %v250_v10 = vld [vmem:[%s9361_s9 + $0x108] sm:$0xff]  ;;  %8575 = vmatprep.subr.bf16.mxu0 %v8574_v3  ;;  %v219_v14 = vld [vmem:[%s9361_s9 + $0x10] sm:$0xff]  ;;  %v8578_v16 = vpack.c.bf16 %v236_v13, %v235_v11 }
  0x4a   :  { %v8608_v12 = vpack.c.bf16 %v250_v10, %v249_v9  ;;  %v220_v15 = vld [vmem:[%s9361_s9 + $0x18] sm:$0xff]  ;;  %8577 = vmatpush3.bf16.msra.mxu0 %v8576_v7  ;;  %v267_v18 = vld [vmem:[%s9361_s9 + $0x190] sm:$0xff]  ;;  %v237_v23 = vld [vmem:[%s9361_s9 + $0xa0] sm:$0xff] }
  0x4b   :  { %8607 = vmatprep.subr.bf16.mxu1 %v8606_v8  ;;  %v8580_v17 = vpack.c.bf16 %v220_v15, %v219_v14  ;;  %v268_v19 = vld [vmem:[%s9361_s9 + $0x198] sm:$0xff]  ;;  %v251_v20 = vld [vmem:[%s9361_s9 + $0x110] sm:$0xff]  ;;  %v238_v24 = vld [vmem:[%s9361_s9 + $0xa8] sm:$0xff]  ;;  %8579 = vmatprep.subr.bf16.mxu0 %v8578_v16 }
  0x4c   :  { %8609 = vmatpush3.bf16.msra.mxu1 %v8608_v12  ;;  %v8610_v21 = vpack.c.bf16 %v268_v19, %v267_v18  ;;  %v252_v22 = vld [vmem:[%s9361_s9 + $0x118] sm:$0xff]  ;;  %v8582_v26 = vpack.c.bf16 %v238_v24, %v237_v23  ;;  %v221_v27 = vld [vmem:[%s9361_s9 + $0x20] sm:$0xff]  ;;  %v222_v28 = vld [vmem:[%s9361_s9 + $0x28] sm:$0xff] }
  0x4d   :  { %v8612_v25 = vpack.c.bf16 %v252_v22, %v251_v20  ;;  %v269_v29 = vld [vmem:[%s9361_s9 + $0x1a0] sm:$0xff]  ;;  %v270_v30 = vld [vmem:[%s9361_s9 + $0x1a8] sm:$0xff]  ;;  %v8584_v33 = vpack.c.bf16 %v222_v28, %v221_v27  ;;  %v239_v35 = vld [vmem:[%s9361_s9 + $0xb0] sm:$0xff] }
  0x4e   :  { %8611 = vmatprep.subr.bf16.mxu1 %v8610_v21  ;;  %v253_v31 = vld [vmem:[%s9361_s9 + $0x120] sm:$0xff]  ;;  %v254_v32 = vld [vmem:[%s9361_s9 + $0x128] sm:$0xff]  ;;  %8581 = vmatpush3.bf16.msra.mxu0 %v8580_v17  ;;  %v8614_v34 = vpack.c.bf16 %v270_v30, %v269_v29  ;;  %v240_v36 = vld [vmem:[%s9361_s9 + $0xb8] sm:$0xff] }
  0x4f   :  { %v223_v37 = vld [vmem:[%s9361_s9 + $0x30] sm:$0xff]  ;;  %8583 = vmatprep.subr.bf16.mxu0 %v8582_v26  ;;  %v8616_v38 = vpack.c.bf16 %v254_v32, %v253_v31  ;;  %v8586_v39 = vpack.c.bf16 %v240_v36, %v239_v35  ;;  %v224_v40 = vld [vmem:[%s9361_s9 + $0x38] sm:$0xff]  ;;  %v241_v46 = vld [vmem:[%s9361_s9 + $0xc0] sm:$0xff] }
  0x50   :  { %8613 = vmatpush3.bf16.msra.mxu1 %v8612_v25  ;;  %v271_v41 = vld [vmem:[%s9361_s9 + $0x1b0] sm:$0xff]  ;;  %v272_v42 = vld [vmem:[%s9361_s9 + $0x1b8] sm:$0xff]  ;;  %v242_v47 = vld [vmem:[%s9361_s9 + $0xc8] sm:$0xff]  ;;  %v8588_v48 = vpack.c.bf16 %v224_v40, %v223_v37 }
  0x51   :  { %8615 = vmatprep.subr.bf16.mxu1 %v8614_v34  ;;  %v8618_v43 = vpack.c.bf16 %v272_v42, %v271_v41  ;;  %v255_v44 = vld [vmem:[%s9361_s9 + $0x130] sm:$0xff]  ;;  %v256_v45 = vld [vmem:[%s9361_s9 + $0x138] sm:$0xff]  ;;  %v273_v49 = vld [vmem:[%s9361_s9 + $0x1c0] sm:$0xff]  ;;  %v8590_v52 = vpack.c.bf16 %v242_v47, %v241_v46 }
  0x52   :  { %8585 = vmatpush3.bf16.msra.mxu0 %v8584_v33  ;;  %v274_v50 = vld [vmem:[%s9361_s9 + $0x1c8] sm:$0xff]  ;;  %v8620_v51 = vpack.c.bf16 %v256_v45, %v255_v44  ;;  %v225_v53 = vld [vmem:[%s9361_s9 + $0x40] sm:$0xff]  ;;  %v243_v58 = vld [vmem:[%s9361_s9 + $0xd0] sm:$0xff] }
  0x53   :  { %8587 = vmatprep.subr.bf16.mxu0 %v8586_v39  ;;  %v226_v54 = vld [vmem:[%s9361_s9 + $0x48] sm:$0xff]  ;;  %v257_v55 = vld [vmem:[%s9361_s9 + $0x140] sm:$0xff]  ;;  %v8622_v56 = vpack.c.bf16 %v274_v50, %v273_v49  ;;  %v244_v59 = vld [vmem:[%s9361_s9 + $0xd8] sm:$0xff] }
  0x54   :  { %8617 = vmatpush3.bf16.msra.mxu1 %v8616_v38  ;;  %v258_v57 = vld [vmem:[%s9361_s9 + $0x148] sm:$0xff]  ;;  %v275_v60 = vld [vmem:[%s9361_s9 + $0x1d0] sm:$0xff]  ;;  %v276_v61 = vld [vmem:[%s9361_s9 + $0x1d8] sm:$0xff]  ;;  %v8592_v62 = vpack.c.bf16 %v226_v54, %v225_v53  ;;  %v8594_v0 = vpack.c.bf16 %v244_v59, %v243_v58 }
  0x55   :  { %8619 = vmatprep.subr.bf16.mxu1 %v8618_v43  ;;  %v8624_v63 = vpack.c.bf16 %v258_v57, %v257_v55  ;;  %v227_v1 = vld [vmem:[%s9361_s9 + $0x50] sm:$0xff]  ;;  %v228_v2 = vld [vmem:[%s9361_s9 + $0x58] sm:$0xff]  ;;  %v8626_v4 = vpack.c.bf16 %v276_v61, %v275_v60  ;;  %v245_v6 = vld [vmem:[%s9361_s9 + $0xe0] sm:$0xff] }
  0x56   :  { %8589 = vmatpush3.bf16.msra.mxu0 %v8588_v48  ;;  %v259_v3 = vld [vmem:[%s9361_s9 + $0x150] sm:$0xff]  ;;  %v260_v5 = vld [vmem:[%s9361_s9 + $0x158] sm:$0xff]  ;;  %v246_v7 = vld [vmem:[%s9361_s9 + $0xe8] sm:$0xff]  ;;  %v8596_v10 = vpack.c.bf16 %v228_v2, %v227_v1 }
  0x57   :  { %8591 = vmatprep.subr.bf16.mxu0 %v8590_v52  ;;  %v277_v8 = vld [vmem:[%s9361_s9 + $0x1e0] sm:$0xff]  ;;  %v278_v9 = vld [vmem:[%s9361_s9 + $0x1e8] sm:$0xff]  ;;  %v8628_v13 = vpack.c.bf16 %v260_v5, %v259_v3  ;;  %v8598_v14 = vpack.c.bf16 %v246_v7, %v245_v6  ;;  %v247_v19 = vld [vmem:[%s9361_s9 + $0xf0] sm:$0xff] }
  0x58   :  { %8621 = vmatpush3.bf16.msra.mxu1 %v8620_v51  ;;  %v229_v11 = vld [vmem:[%s9361_s9 + $0x60] sm:$0xff]  ;;  %v230_v12 = vld [vmem:[%s9361_s9 + $0x68] sm:$0xff]  ;;  %v8630_v18 = vpack.c.bf16 %v278_v9, %v277_v8  ;;  %v248_v20 = vld [vmem:[%s9361_s9 + $0xf8] sm:$0xff] }
  0x59   :  { %8623 = vmatprep.subr.bf16.mxu1 %v8622_v56  ;;  %v261_v15 = vld [vmem:[%s9361_s9 + $0x160] sm:$0xff]  ;;  %v262_v16 = vld [vmem:[%s9361_s9 + $0x168] sm:$0xff]  ;;  %v204_v21 = vld [vmem:[%s9356_s5 + $0x18] sm:$0xff]  ;;  %v8600_v24 = vpack.c.bf16 %v230_v12, %v229_v11  ;;  %v8602_v26 = vpack.c.bf16 %v248_v20, %v247_v19 }
  0x5a   :  { %8593 = vmatpush3.bf16.msra.mxu0 %v8592_v62  ;;  %v202_v17 = vld [vmem:[%s9356_s5 + $0x8] sm:$0xff]  ;;  %v279_v22 = vld [vmem:[%s9361_s9 + $0x1f0] sm:$0xff]  ;;  %v280_v23 = vld [vmem:[%s9361_s9 + $0x1f8] sm:$0xff]  ;;  %437 = vmatprep.mubr.f32.mxu1 %v204_v21  ;;  %v8632_v25 = vpack.c.bf16 %v262_v16, %v261_v15 }
  0x5b   :  { %8595 = vmatprep.subr.bf16.mxu0 %v8594_v0  ;;  %352 = vmatprep.mubr.f32.mxu0 %v202_v17  ;;  %v231_v27 = vld [vmem:[%s9361_s9 + $0x70] sm:$0xff]  ;;  %v232_v28 = vld [vmem:[%s9361_s9 + $0x78] sm:$0xff]  ;;  %v8634_v29 = vpack.c.bf16 %v280_v23, %v279_v22 }
  0x5c   :  { %8625 = vmatpush3.bf16.msra.mxu1 %v8624_v63  ;;  %v263_v30 = vld [vmem:[%s9361_s9 + $0x170] sm:$0xff]  ;;  %v264_v31 = vld [vmem:[%s9361_s9 + $0x178] sm:$0xff] }
  0x5d   :  { %8627 = vmatprep.subr.bf16.mxu1 %v8626_v4 }
  0x5e   :  { %8597 = vmatpush3.bf16.msra.mxu0 %v8596_v10 }
  0x5f   :  { %8599 = vmatprep.subr.bf16.mxu0 %v8598_v14 }
  0x60   :  { %8629 = vmatpush3.bf16.msra.mxu1 %v8628_v13 }
  0x61   :  { %8631 = vmatprep.subr.bf16.mxu1 %v8630_v18 }
  0x62   :  { %88 = vsyncpa [#allocation5], 0  ;;  %8601 = vmatpush3.bf16.msra.mxu0 %v8600_v24  ;;  %v8604_v32 = vpack.c.bf16 %v232_v28, %v231_v27  ;;  %v8636_v33 = vpack.c.bf16 %v264_v31, %v263_v30  ;;  %v201_v34 = vld [vmem:[%s9356_s5] sm:$0xff]  ;;  %v203_v35 = vld [vmem:[%s9356_s5 + $0x10] sm:$0xff]  ;;  %vm508_vm0 = vcmask 261120   ;;  %s10805_s0 = sld [smem:[#allocation10_spill]] }
  0x63   :  { %8603 = vmatprep.subr.bf16.mxu0 %v8602_v26  ;;  %v206_v36 = vld [vmem:[%s9356_s5 + $0x28] sm:$0xff]  ;;  %v208_v37 = vld [vmem:[%s9356_s5 + $0x38] sm:$0xff]  ;;  %v205_v38 = vld [vmem:[%s9356_s5 + $0x20] sm:$0xff]  ;;  %s10807_s9 = sld [smem:[#allocation12_spill]]  ;;  %vm3610_vm2 = vcmask 523264   ;;  %s10825_s28 = sld [smem:[#allocation22_spill]] }
  0x64   :  { %8633 = vmatpush3.bf16.msra.mxu1 %v8632_v25  ;;  %v207_v39 = vld [vmem:[%s9356_s5 + $0x30] sm:$0xff]  ;;  %v210_v40 = vld [vmem:[%s9356_s5 + $0x48] sm:$0xff]  ;;  %v212_v41 = vld [vmem:[%s9356_s5 + $0x58] sm:$0xff]  ;;  %s10826_s1 = sld [smem:[#allocation23_spill]]  ;;  %s10831_s2 = sld [smem:[#allocation28_spill]] }
  0x65   :  { %8635 = vmatprep.subr.bf16.mxu1 %v8634_v29  ;;  %v209_v42 = vld [vmem:[%s9356_s5 + $0x40] sm:$0xff]  ;;  %v211_v43 = vld [vmem:[%s9356_s5 + $0x50] sm:$0xff]  ;;  %v214_v44 = vld [vmem:[%s9356_s5 + $0x68] sm:$0xff]  ;;  %s10835_s7 = sld [smem:[#allocation25_spill]]  ;;  %s10836_s10 = sld [smem:[#allocation26_spill]] }
  0x66   :  { %8605 = vmatpush3.bf16.msra.mxu0 %v8604_v32  ;;  %v216_v45 = vld [vmem:[%s9356_s5 + $0x78] sm:$0xff]  ;;  %v213_v46 = vld [vmem:[%s9356_s5 + $0x60] sm:$0xff]  ;;  %v215_v47 = vld [vmem:[%s9356_s5 + $0x70] sm:$0xff]  ;;  %s10806_s5 = sld [smem:[#allocation11_spill]]  ;;  %s9344_s15 = smov [#allocation2]  }
  0x67   :  { %v9639_v48 = vld [vmem:[%s9371_s17] sm:$0xff]  ;;  %v463_v50 = vld [vmem:[%s9386_s29 + $0x28] sm:$0xff]  ;;  %v9670_v28 = vld [vmem:[%s9371_s17 + $0x10] sm:$0xff]  ;;  %s10837_s11 = sld [smem:[#allocation27_spill]]  ;;  %s6709_s16 = sshll.u32 %s9344_s15, 4  ;;  %s6710_s16 = int_to_ptr.vmem [resolvable:$true] %s6709_s16 }
  0x68   :  { %8637 = vmatpush3.bf16.msra.mxu1 %v8636_v33  ;;  %v462_v49 = vld [vmem:[%s9386_s29 + $0x20] sm:$0xff]  ;;  %v9667_v27 = vld [vmem:[%s9371_s17 + $0x8] sm:$0xff]  ;;  %v9677_v29 = vld [vmem:[%s9371_s17 + $0x18] sm:$0xff]  ;;  %s9345_s18 = smov [#allocation4]   ;;  %s9255_s23 = scalar_lea.vmem %s6710_s16, 512 }
  0x69   :  { %353 = vmatmul.mubr.f32.vlgmr.msra.gmra.mrb[0].mxu0 %v201_v34  ;;  %v8646_v51 = vpack.c.bf16 %v463_v50, %v462_v49  ;;  %v6780_v53 = vld [vmem:[%s9366_s13] ss:$0 sm:$0xff]  ;;  %v9687_v31 = vld [vmem:[%s9371_s17 + $0x28] sm:$0xff]  ;;  %v9690_v32 = vld [vmem:[%s9371_s17 + $0x30] sm:$0xff]  ;;  %s10808_s13 = sld [smem:[#allocation8_spill]]  ;;  %s6721_s22 = sshll.u32 %s9345_s18, 4  ;;  %s10713_s22 = int_to_ptr.vmem [resolvable:$true] %s6721_s22 }
  0x6a   :  { %357 = vmatprep.mubr.f32.mxu0 %v206_v36  ;;  %v9680_v30 = vld [vmem:[%s9371_s17 + $0x20] sm:$0xff]  ;;  %v9697_v33 = vld [vmem:[%s9371_s17 + $0x38] sm:$0xff]  ;;  %v9710_v36 = vld [vmem:[%s9371_s17 + $0x50] sm:$0xff]  ;;  %p9256_p0 = scmp.ne.s32.totalorder %s6710_s16, %s9255_s23  ;;  %p9260_p1 = scmp.lt.s32.totalorder %s6710_s16, %s6710_s16 }
  0x6b   :  { %438 = vmatmul.mubr.f32.vlgmr.msra.gmra.mrb[0].mxu1 %v203_v35  ;;  %8647 = vmatprep.subr.bf16.mxu1 %v8646_v51  ;;  %v9700_v34 = vld [vmem:[%s9371_s17 + $0x40] sm:$0xff]  ;;  %v9707_v35 = vld [vmem:[%s9371_s17 + $0x48] sm:$0xff]  ;;  %v9770_v49 = vld [vmem:[%s9371_s17 + $0xb0] sm:$0xff]  ;;  %p9261_p2 = scmp.lt.s32.totalorder %s9255_s23, %s9255_s23 }
  0x6c   :  { %442 = vmatprep.mubr.f32.mxu1 %v208_v37  ;;  %8649 = vmatpush3.bf16.msra.mxu1 %v8646_v51  ;;  %v9717_v37 = vld [vmem:[%s9371_s17 + $0x58] sm:$0xff]  ;;  %v9780_v51 = vld [vmem:[%s9371_s17 + $0xc0] sm:$0xff]  ;;  %vm10136_vm1 = vmpackc.low %vm508_vm0, %vm508_vm0 }
  0x6d   :  { %358 = vmatmul.mubr.f32.gmra.mrb[2].mxu0 %v205_v38  ;;  %v9720_v38 = vld [vmem:[%s9371_s17 + $0x60] sm:$0xff]  ;;  %v9777_v50 = vld [vmem:[%s9371_s17 + $0xb8] sm:$0xff]  ;;  %p9262_p3 = por %p9261_p2, %p9260_p1 }
  0x6e   :  { %362 = vmatprep.mubr.f32.mxu0 %v210_v40  ;;  %v9730_v40 = vld [vmem:[%s9371_s17 + $0x70] sm:$0xff] }
  0x6f   :  { %443 = vmatmul.mubr.f32.gmra.mrb[2].mxu1 %v207_v39  ;;  %v9727_v39 = vld [vmem:[%s9371_s17 + $0x68] sm:$0xff]  ;;  %p9263_p4 = pnand %p9262_p3, %p9256_p0 }
  0x70   :  { %447 = vmatprep.mubr.f32.mxu1 %v212_v41  ;;  %v9737_v41 = vld [vmem:[%s9371_s17 + $0x78] sm:$0xff] }
  0x71   :  { %363 = vmatmul.mubr.f32.gmra.mrb[4].mxu0 %v209_v42  ;;  %v9740_v42 = vld [vmem:[%s9371_s17 + $0x80] sm:$0xff] }
  0x72   :  { %367 = vmatprep.mubr.f32.mxu0 %v214_v44  ;;  %v9750_v44 = vld [vmem:[%s9371_s17 + $0x90] sm:$0xff] }
  0x73   :  { %448 = vmatmul.mubr.f32.gmra.mrb[4].mxu1 %v211_v43  ;;  %v9747_v43 = vld [vmem:[%s9371_s17 + $0x88] sm:$0xff] }
  0x74   :  { %452 = vmatprep.mubr.f32.mxu1 %v216_v45  ;;  %v9757_v45 = vld [vmem:[%s9371_s17 + $0x98] sm:$0xff] }
  0x75   :  { %368 = vmatmul.mubr.f32.gmra.mrb[6].mxu0 %v213_v46  ;;  %v9760_v46 = vld [vmem:[%s9371_s17 + $0xa0] sm:$0xff] }
  0x76   :  { %7730 = vmatprep.mubr.msk.f32.mxu0 %vm508_vm0, %v9639_v48 }
  0x77   :  { %453 = vmatmul.mubr.f32.gmra.mrb[6].mxu1 %v215_v47  ;;  %v9767_v47 = vld [vmem:[%s9371_s17 + $0xa8] sm:$0xff] }
 0x13c   :  { %v7162_v52 = vpop.f32.mrb[0].mxu0 }
 0x13d   :  { %v7163_v54 = vpop.f32.mrb[1].mxu0 }
 0x13e   :  { %v7206_v55 = vpop.f32.mrb[0].mxu1  ;;  %v7164_v56 = vadd.f32 %v7163_v54, %v7162_v52  ;;  %v9787_v52 = vld [vmem:[%s9371_s17 + $0xc8] sm:$0xff]  ;;  %v9797_v54 = vld [vmem:[%s9371_s17 + $0xd8] sm:$0xff] }
 0x13f   :  { %v7207_v57 = vpop.f32.mrb[1].mxu1 }
 0x140   :  { %v7208_v58 = vadd.f32 %v7207_v57, %v7206_v55  ;;  %v355_v59 = vadd.f32 %v7164_v56, %v6780_v53  ;;  %v7165_v60 = vpop.f32.mrb[2].mxu0  ;;  %v9800_v55 = vld [vmem:[%s9371_s17 + $0xe0] sm:$0xff]  ;;  %v9807_v56 = vld [vmem:[%s9371_s17 + $0xe8] sm:$0xff]  ;;  %v9810_v57 = vld [vmem:[%s9371_s17 + $0xf0] sm:$0xff] }
 0x141   :  { %v7166_v61 = vpop.f32.mrb[3].mxu0 }
 0x142   :  { %v7209_v62 = vpop.f32.mrb[2].mxu1  ;;  %v9646_v63 = vadd.f32 %v7208_v58, %v355_v59  ;;  %v7167_v0 = vadd.f32 %v7166_v61, %v7165_v60  ;;  %v9817_v58 = vld [vmem:[%s9371_s17 + $0xf8] sm:$0xff]  ;;  %v9820_v59 = vld [vmem:[%s9371_s17 + $0x100] sm:$0xff]  ;;  %v9827_v60 = vld [vmem:[%s9371_s17 + $0x108] sm:$0xff] }
 0x143   :  { %v7210_v1 = vpop.f32.mrb[3].mxu1  ;;  %v9830_v61 = vld [vmem:[%s9371_s17 + $0x110] sm:$0xff] }
 0x144   :  { %v7211_v2 = vadd.f32 %v7210_v1, %v7209_v62  ;;  %v360_v3 = vadd.f32 %v7167_v0, %v6780_v53  ;;  %v7168_v4 = vpop.f32.mrb[4].mxu0  ;;  %v10764_v11 = vmax.f32 %v9646_v63, 0.0  ;;  %10797 = vst [vmem:[#allocation31_spill] sm:$0xff] %v9830_v61  ;;  %v9837_v62 = vld [vmem:[%s9371_s17 + $0x118] sm:$0xff]  ;;  %v464_v0 = vld [vmem:[%s9386_s29 + $0x30] sm:$0xff] }
 0x145   :  { %v7169_v5 = vpop.f32.mrb[5].mxu0  ;;  %10798 = vst [vmem:[#allocation32_spill] sm:$0xff] %v9837_v62  ;;  %v465_v1 = vld [vmem:[%s9386_s29 + $0x38] sm:$0xff] }
 0x146   :  { %v7212_v6 = vpop.f32.mrb[4].mxu1  ;;  %v9648_v7 = vadd.f32 %v7211_v2, %v360_v3  ;;  %v7170_v8 = vadd.f32 %v7169_v5, %v7168_v4  ;;  %v8650_v2 = vpack.c.bf16 %v465_v1, %v464_v0  ;;  %v458_v3 = vld [vmem:[%s9386_s29] sm:$0xff]  ;;  %v459_v4 = vld [vmem:[%s9386_s29 + $0x8] sm:$0xff] }
 0x147   :  { %v7213_v9 = vpop.f32.mrb[5].mxu1  ;;  %v8654_v5 = vpack.c.bf16 %v459_v4, %v458_v3  ;;  %v468_v3 = vld [vmem:[%s9386_s29 + $0x50] sm:$0xff]  ;;  %v469_v4 = vld [vmem:[%s9386_s29 + $0x58] sm:$0xff] }
 0x148   :  { %v7214_v10 = vadd.f32 %v7213_v9, %v7212_v6  ;;  %v10763_v12 = vmax.f32 %v9648_v7, 0.0  ;;  %v365_v13 = vadd.f32 %v7170_v8, %v6780_v53  ;;  %v7171_v14 = vpop.f32.mrb[6].mxu0  ;;  %8651 = vmatprep.subr.bf16.mxu1 %v8650_v2  ;;  %v497_v6 = vld [vmem:[%s9406_s19] sm:$0xff]  ;;  %v498_v8 = vld [vmem:[%s9406_s19 + $0x8] sm:$0xff] }
 0x149   :  { %v7172_v15 = vpop.f32.mrb[7].mxu0  ;;  %8653 = vmatpush3.bf16.msra.mxu1 %v8650_v2  ;;  %v8718_v9 = vpack.c.bf16 %v498_v8, %v497_v6  ;;  %v8666_v8 = vpack.c.bf16 %v469_v4, %v468_v3  ;;  %v476_v3 = vld [vmem:[%s9386_s29 + $0x90] sm:$0xff]  ;;  %v477_v4 = vld [vmem:[%s9386_s29 + $0x98] sm:$0xff] }
 0x14a   :  { %v7215_v16 = vpop.f32.mrb[6].mxu1  ;;  %v9652_v17 = vadd.f32 %v7214_v10, %v365_v13  ;;  %v7173_v18 = vadd.f32 %v7172_v15, %v7171_v14  ;;  %v8638_v20 = vpack.c.bf16 %v10763_v12, %v10764_v11  ;;  %8655 = vmatprep.subr.bf16.mxu1 %v8654_v5 }
 0x14b   :  { %v7216_v19 = vpop.f32.mrb[7].mxu1 }
 0x14c   :  { %v7217_v21 = vadd.f32 %v7216_v19, %v7215_v16  ;;  %v370_v22 = vadd.f32 %v7173_v18, %v6780_v53  ;;  %8639 = vmatprep.subr.bf16.mxu0 %v8638_v20  ;;  %v10762_v24 = vmax.f32 %v9652_v17, 0.0  ;;  %v9790_v53 = vld [vmem:[%s9371_s17 + $0xd0] sm:$0xff]  ;;  %v461_v18 = vld [vmem:[%s9386_s29 + $0x18] sm:$0xff] }
 0x14d   :  { %8641 = vmatpush3.bf16.msra.mxu0 %v8638_v20  ;;  %v460_v16 = vld [vmem:[%s9386_s29 + $0x10] sm:$0xff] }
 0x14e   :  { %v9658_v23 = vadd.f32 %v7217_v21, %v370_v22  ;;  %v8658_v21 = vpack.c.bf16 %v461_v18, %v460_v16  ;;  %v466_v22 = vld [vmem:[%s9386_s29 + $0x40] sm:$0xff] }
 0x14f   :  { %v470_v16 = vld [vmem:[%s9386_s29 + $0x60] sm:$0xff] }
 0x150   :  { %v10761_v25 = vmax.f32 %v9658_v23, 0.0 }
 0x152   :  { %v8642_v26 = vpack.c.bf16 %v10761_v25, %v10762_v24 }
 0x154   :  { %8643 = vmatprep.subr.bf16.mxu0 %v8642_v26 }
 0x155   :  { %8645 = vmatpush3.bf16.msra.mxu0 %v8642_v26  ;;  %v467_v26 = vld [vmem:[%s9386_s29 + $0x48] sm:$0xff] }
 0x156   :  { %8719 = vmatprep.subr.bf16.mxu0 %v8718_v9  ;;  %v8662_v2 = vpack.c.bf16 %v467_v26, %v466_v22  ;;  %v473_v22 = vld [vmem:[%s9386_s29 + $0x78] sm:$0xff] }
 0x158   :  { %7731 = vmatmul.mubr.msk.f32.vlgmr.msra.gmra.mrb[8].mxu0 %vm508_vm0, %v9667_v27 }
 0x159   :  { %7733 = vmatprep.mubr.msk.f32.mxu0 %vm508_vm0, %v9670_v28  ;;  %8721 = vmatpush3.bf16.msra.mxu0 %v8718_v9 }
 0x15c   :  { %7734 = vmatmul.mubr.msk.f32.gmra.mrb[10].mxu0 %vm508_vm0, %v9677_v29 }
 0x15d   :  { %7736 = vmatprep.mubr.msk.f32.mxu0 %vm508_vm0, %v9680_v30 }
 0x160   :  { %7737 = vmatmul.mubr.msk.f32.gmra.mrb[12].mxu0 %vm508_vm0, %v9687_v31 }
 0x161   :  { %7739 = vmatprep.mubr.msk.f32.mxu0 %vm508_vm0, %v9690_v32 }
 0x164   :  { %7740 = vmatmul.mubr.msk.f32.gmra.mrb[14].mxu0 %vm508_vm0, %v9697_v33 }
 0x165   :  { %7742 = vmatprep.mubr.msk.f32.mxu0 %vm508_vm0, %v9700_v34 }
 0x168   :  { %7743 = vmatmul.mubr.msk.f32.gmra.mrb[16].mxu0 %vm508_vm0, %v9707_v35 }
 0x169   :  { %7745 = vmatprep.mubr.msk.f32.mxu0 %vm508_vm0, %v9710_v36 }
 0x16c   :  { %7746 = vmatmul.mubr.msk.f32.gmra.mrb[18].mxu0 %vm508_vm0, %v9717_v37 }
 0x16d   :  { %7748 = vmatprep.mubr.msk.f32.mxu0 %vm508_vm0, %v9720_v38 }
 0x170   :  { %7749 = vmatmul.mubr.msk.f32.gmra.mrb[20].mxu0 %vm508_vm0, %v9727_v39 }
 0x171   :  { %7751 = vmatprep.mubr.msk.f32.mxu0 %vm508_vm0, %v9730_v40 }
 0x174   :  { %7752 = vmatmul.mubr.msk.f32.gmra.mrb[22].mxu0 %vm508_vm0, %v9737_v41 }
 0x175   :  { %7754 = vmatprep.mubr.msk.f32.mxu0 %vm508_vm0, %v9740_v42 }
 0x178   :  { %7755 = vmatmul.mubr.msk.f32.gmra.mrb[24].mxu0 %vm508_vm0, %v9747_v43 }
 0x179   :  { %7757 = vmatprep.mubr.msk.f32.mxu0 %vm508_vm0, %v9750_v44 }
 0x17c   :  { %7758 = vmatmul.mubr.msk.f32.gmra.mrb[26].mxu0 %vm508_vm0, %v9757_v45 }
 0x17d   :  { %7760 = vmatprep.mubr.msk.f32.mxu0 %vm508_vm0, %v9760_v46 }
 0x180   :  { %7761 = vmatmul.mubr.msk.f32.gmra.mrb[28].mxu0 %vm508_vm0, %v9767_v47 }
 0x181   :  { %7763 = vmatprep.mubr.msk.f32.mxu0 %vm508_vm0, %v9770_v49 }
 0x184   :  { %7764 = vmatmul.mubr.msk.f32.gmra.mrb[30].mxu0 %vm508_vm0, %v9777_v50 }
 0x185   :  { %7766 = vmatprep.mubr.msk.f32.mxu0 %vm508_vm0, %v9780_v51 }
 0x188   :  { %7767 = vmatmul.mubr.msk.f32.gmra.mrb[32].mxu0 %vm508_vm0, %v9787_v52 }
 0x189   :  { %7769 = vmatprep.mubr.msk.f32.mxu0 %vm508_vm0, %v9790_v53 }
 0x18c   :  { %7770 = vmatmul.mubr.msk.f32.gmra.mrb[34].mxu0 %vm508_vm0, %v9797_v54 }
 0x18d   :  { %7772 = vmatprep.mubr.msk.f32.mxu0 %vm508_vm0, %v9800_v55 }
 0x190   :  { %7773 = vmatmul.mubr.msk.f32.gmra.mrb[36].mxu0 %vm508_vm0, %v9807_v56 }
 0x191   :  { %7775 = vmatprep.mubr.msk.f32.mxu0 %vm508_vm0, %v9810_v57 }
 0x194   :  { %7776 = vmatmul.mubr.msk.f32.gmra.mrb[38].mxu0 %vm508_vm0, %v9817_v58 }
 0x195   :  { %7778 = vmatprep.mubr.msk.f32.mxu0 %vm508_vm0, %v9820_v59 }
 0x198   :  { %7779 = vmatmul.mubr.msk.f32.gmra.mrb[40].mxu0 %vm508_vm0, %v9827_v60 }
 0x199   :  { %7781 = vmatprep.mubr.msk.f32.mxu0 %vm508_vm0, %v9830_v61 }
 0x19c   :  { %7782 = vmatmul.mubr.msk.f32.gmra.mrb[42].mxu0 %vm508_vm0, %v9837_v62 }
 0x22b   :  { %v7732_v10 = vpop.f32.mrb[8].mxu0 }
 0x22c   :  { %v683_v13 = vpop.f32.mrb[9].mxu0 }
 0x22f   :  { %v7735_v14 = vpop.f32.mrb[10].mxu0 }
 0x230   :  { %v693_v15 = vpop.f32.mrb[11].mxu0 }
 0x233   :  { %v7738_v19 = vpop.f32.mrb[12].mxu0 }
 0x234   :  { %v703_v20 = vpop.f32.mrb[13].mxu0 }
 0x235   :  { %7792 = vmatprep.mubr.msk.f32.mxu1 %vm508_vm0, %v703_v20 }
 0x236   :  { %7793 = vmatmul.mubr.msk.f32.vlgmr.msra.gmra.mrb[8].mxu1 %vm508_vm0, %v7738_v19 }
 0x237   :  { %v7741_v0 = vpop.f32.mrb[14].mxu0  ;;  %8657 = vmatpush3.bf16.msra.mxu1 %v8654_v5  ;;  %v471_v5 = vld [vmem:[%s9386_s29 + $0x68] sm:$0xff] }
 0x238   :  { %v713_v1 = vpop.f32.mrb[15].mxu0  ;;  %8659 = vmatprep.subr.bf16.mxu1 %v8658_v21  ;;  %v8670_v19 = vpack.c.bf16 %v471_v5, %v470_v16  ;;  %v478_v16 = vld [vmem:[%s9386_s29 + $0xa0] sm:$0xff]  ;;  %v479_v5 = vld [vmem:[%s9386_s29 + $0xa8] sm:$0xff] }
 0x239   :  { %7795 = vmatprep.mubr.msk.f32.mxu1 %vm508_vm0, %v713_v1 }
 0x23a   :  { %7796 = vmatmul.mubr.msk.f32.gmra.mrb[10].mxu1 %vm508_vm0, %v7741_v0  ;;  %v475_v0 = vld [vmem:[%s9386_s29 + $0x88] sm:$0xff] }
 0x23b   :  { %8661 = vmatpush3.bf16.msra.mxu1 %v8658_v21  ;;  %7806 = vmatprep.mubr.msk.f32.mxu1 %vm508_vm0, %v683_v13  ;;  %v7744_v6 = vpop.f32.mrb[16].mxu0  ;;  %v472_v21 = vld [vmem:[%s9386_s29 + $0x70] sm:$0xff] }
 0x23c   :  { %8663 = vmatprep.subr.bf16.mxu1 %v8662_v2  ;;  %v723_v9 = vpop.f32.mrb[17].mxu0 }
 0x23e   :  { %7807 = vmatmul.mubr.msk.f32.vlgmr.msra.gmra.mrb[8].mxu1 %vm508_vm0, %v7732_v10  ;;  %v8674_v10 = vpack.c.bf16 %v473_v22, %v472_v21  ;;  %v480_v21 = vld [vmem:[%s9386_s29 + $0xb0] sm:$0xff]  ;;  %v481_v22 = vld [vmem:[%s9386_s29 + $0xb8] sm:$0xff] }
 0x23f   :  { %7809 = vmatprep.mubr.msk.f32.mxu1 %vm508_vm0, %v693_v15  ;;  %8665 = vmatpush3.bf16.msra.mxu1 %v8662_v2  ;;  %v7747_v18 = vpop.f32.mrb[18].mxu0  ;;  %v474_v15 = vld [vmem:[%s9386_s29 + $0x80] sm:$0xff] }
 0x240   :  { %8667 = vmatprep.subr.bf16.mxu1 %v8666_v8  ;;  %v733_v20 = vpop.f32.mrb[19].mxu0 }
 0x242   :  { %7810 = vmatmul.mubr.msk.f32.gmra.mrb[10].mxu1 %vm508_vm0, %v7735_v14  ;;  %v8678_v14 = vpack.c.bf16 %v475_v0, %v474_v15  ;;  %v482_v15 = vld [vmem:[%s9386_s29 + $0xc0] sm:$0xff]  ;;  %v483_v0 = vld [vmem:[%s9386_s29 + $0xc8] sm:$0xff] }
 0x243   :  { %8669 = vmatpush3.bf16.msra.mxu1 %v8666_v8  ;;  %7820 = vmatprep.mubr.msk.f32.mxu1 %vm508_vm0, %v723_v9  ;;  %v7750_v13 = vpop.f32.mrb[20].mxu0 }
 0x244   :  { %8671 = vmatprep.subr.bf16.mxu1 %v8670_v19  ;;  %v743_v26 = vpop.f32.mrb[21].mxu0 }
 0x246   :  { %7821 = vmatmul.mubr.msk.f32.vlgmr.msra.gmra.mrb[8].mxu1 %vm508_vm0, %v7744_v6  ;;  %v8682_v6 = vpack.c.bf16 %v477_v4, %v476_v3  ;;  %v484_v3 = vld [vmem:[%s9386_s29 + $0xd0] sm:$0xff]  ;;  %v485_v4 = vld [vmem:[%s9386_s29 + $0xd8] sm:$0xff] }
 0x247   :  { %8673 = vmatpush3.bf16.msra.mxu1 %v8670_v19  ;;  %7823 = vmatprep.mubr.msk.f32.mxu1 %vm508_vm0, %v733_v20  ;;  %v7753_v1 = vpop.f32.mrb[22].mxu0 }
 0x248   :  { %8675 = vmatprep.subr.bf16.mxu1 %v8674_v10  ;;  %v753_v2 = vpop.f32.mrb[23].mxu0 }
 0x24a   :  { %7824 = vmatmul.mubr.msk.f32.gmra.mrb[10].mxu1 %vm508_vm0, %v7747_v18  ;;  %v8686_v18 = vpack.c.bf16 %v479_v5, %v478_v16  ;;  %v486_v16 = vld [vmem:[%s9386_s29 + $0xe0] sm:$0xff]  ;;  %v487_v5 = vld [vmem:[%s9386_s29 + $0xe8] sm:$0xff] }
 0x24b   :  { %8677 = vmatpush3.bf16.msra.mxu1 %v8674_v10  ;;  %7834 = vmatprep.mubr.msk.f32.mxu1 %vm508_vm0, %v743_v26  ;;  %v7756_v8 = vpop.f32.mrb[24].mxu0 }
 0x24c   :  { %8679 = vmatprep.subr.bf16.mxu1 %v8678_v14  ;;  %v763_v9 = vpop.f32.mrb[25].mxu0 }
 0x24e   :  { %7835 = vmatmul.mubr.msk.f32.vlgmr.msra.gmra.mrb[8].mxu1 %vm508_vm0, %v7750_v13  ;;  %v8690_v13 = vpack.c.bf16 %v481_v22, %v480_v21  ;;  %v488_v21 = vld [vmem:[%s9386_s29 + $0xf0] sm:$0xff]  ;;  %v489_v22 = vld [vmem:[%s9386_s29 + $0xf8] sm:$0xff] }
 0x24f   :  { %8681 = vmatpush3.bf16.msra.mxu1 %v8678_v14  ;;  %7837 = vmatprep.mubr.msk.f32.mxu1 %vm508_vm0, %v753_v2  ;;  %v7759_v19 = vpop.f32.mrb[26].mxu0 }
 0x250   :  { %8683 = vmatprep.subr.bf16.mxu1 %v8682_v6  ;;  %v773_v20 = vpop.f32.mrb[27].mxu0 }
 0x252   :  { %7838 = vmatmul.mubr.msk.f32.gmra.mrb[10].mxu1 %vm508_vm0, %v7753_v1  ;;  %v8694_v1 = vpack.c.bf16 %v483_v0, %v482_v15  ;;  %v490_v15 = vld [vmem:[%s9386_s29 + $0x100] sm:$0xff]  ;;  %v491_v0 = vld [vmem:[%s9386_s29 + $0x108] sm:$0xff] }
 0x253   :  { %8685 = vmatpush3.bf16.msra.mxu1 %v8682_v6  ;;  %7848 = vmatprep.mubr.msk.f32.mxu1 %vm508_vm0, %v763_v9  ;;  %v7762_v10 = vpop.f32.mrb[28].mxu0 }
 0x254   :  { %8687 = vmatprep.subr.bf16.mxu1 %v8686_v18  ;;  %v783_v26 = vpop.f32.mrb[29].mxu0 }
 0x256   :  { %7849 = vmatmul.mubr.msk.f32.vlgmr.msra.gmra.mrb[8].mxu1 %vm508_vm0, %v7756_v8  ;;  %v8698_v8 = vpack.c.bf16 %v485_v4, %v484_v3  ;;  %v492_v3 = vld [vmem:[%s9386_s29 + $0x110] sm:$0xff]  ;;  %v493_v4 = vld [vmem:[%s9386_s29 + $0x118] sm:$0xff]  ;;  %s10812_s29 = sld [smem:[#allocation14_spill]] }
 0x257   :  { %8689 = vmatpush3.bf16.msra.mxu1 %v8686_v18  ;;  %7851 = vmatprep.mubr.msk.f32.mxu1 %vm508_vm0, %v773_v20  ;;  %v7765_v14 = vpop.f32.mrb[30].mxu0 }
 0x258   :  { %8691 = vmatprep.subr.bf16.mxu1 %v8690_v13  ;;  %v793_v2 = vpop.f32.mrb[31].mxu0 }
 0x25a   :  { %7852 = vmatmul.mubr.msk.f32.gmra.mrb[10].mxu1 %vm508_vm0, %v7759_v19  ;;  %v8702_v19 = vpack.c.bf16 %v487_v5, %v486_v16 }
 0x25b   :  { %8693 = vmatpush3.bf16.msra.mxu1 %v8690_v13  ;;  %7862 = vmatprep.mubr.msk.f32.mxu1 %vm508_vm0, %v783_v26  ;;  %v7768_v6 = vpop.f32.mrb[32].mxu0 }
 0x25c   :  { %8695 = vmatprep.subr.bf16.mxu1 %v8694_v1  ;;  %v803_v9 = vpop.f32.mrb[33].mxu0 }
 0x25e   :  { %7863 = vmatmul.mubr.msk.f32.vlgmr.msra.gmra.mrb[8].mxu1 %vm508_vm0, %v7762_v10  ;;  %v8706_v10 = vpack.c.bf16 %v489_v22, %v488_v21  ;;  %v6853_v21 = vld [vmem:[%s9391_s3] ss:$0 sm:$0xff]  ;;  %s10813_s3 = sld [smem:[#allocation15_spill]] }
 0x25f   :  { %8697 = vmatpush3.bf16.msra.mxu1 %v8694_v1  ;;  %7865 = vmatprep.mubr.msk.f32.mxu1 %vm508_vm0, %v793_v2  ;;  %v7771_v18 = vpop.f32.mrb[34].mxu0  ;;  %v8710_v2 = vpack.c.bf16 %v491_v0, %v490_v15 }
 0x260   :  { %8699 = vmatprep.subr.bf16.mxu1 %v8698_v8  ;;  %v813_v20 = vpop.f32.mrb[35].mxu0 }
 0x262   :  { %7866 = vmatmul.mubr.msk.f32.gmra.mrb[10].mxu1 %vm508_vm0, %v7765_v14 }
 0x263   :  { %8701 = vmatpush3.bf16.msra.mxu1 %v8698_v8  ;;  %7876 = vmatprep.mubr.msk.f32.mxu1 %vm508_vm0, %v803_v9  ;;  %v7774_v13 = vpop.f32.mrb[36].mxu0  ;;  %v8714_v9 = vpack.c.bf16 %v493_v4, %v492_v3 }
 0x264   :  { %8703 = vmatprep.subr.bf16.mxu1 %v8702_v19  ;;  %v823_v26 = vpop.f32.mrb[37].mxu0 }
 0x266   :  { %7877 = vmatmul.mubr.msk.f32.vlgmr.msra.gmra.mrb[8].mxu1 %vm508_vm0, %v7768_v6 }
 0x267   :  { %8705 = vmatpush3.bf16.msra.mxu1 %v8702_v19  ;;  %7879 = vmatprep.mubr.msk.f32.mxu1 %vm508_vm0, %v813_v20  ;;  %v7777_v1 = vpop.f32.mrb[38].mxu0  ;;  %v500_v19 = vld [vmem:[%s9406_s19 + $0x18] sm:$0xff] }
 0x268   :  { %8707 = vmatprep.subr.bf16.mxu1 %v8706_v10  ;;  %v833_v14 = vpop.f32.mrb[39].mxu0 }
 0x26a   :  { %7880 = vmatmul.mubr.msk.f32.gmra.mrb[10].mxu1 %vm508_vm0, %v7771_v18  ;;  %v499_v18 = vld [vmem:[%s9406_s19 + $0x10] sm:$0xff]  ;;  %s10819_s19 = sld [smem:[#allocation20_spill]] }
 0x26b   :  { %8709 = vmatpush3.bf16.msra.mxu1 %v8706_v10  ;;  %7890 = vmatprep.mubr.msk.f32.mxu1 %vm508_vm0, %v823_v26  ;;  %v7780_v8 = vpop.f32.mrb[40].mxu0  ;;  %v8722_v20 = vpack.c.bf16 %v500_v19, %v499_v18 }
 0x26c   :  { %8711 = vmatprep.subr.bf16.mxu1 %v8710_v2  ;;  %v843_v6 = vpop.f32.mrb[41].mxu0 }
 0x26d   :  { %8723 = vmatprep.subr.bf16.mxu0 %v8722_v20 }
 0x26e   :  { %7891 = vmatmul.mubr.msk.f32.vlgmr.msra.gmra.mrb[8].mxu1 %vm508_vm0, %v7774_v13  ;;  %8725 = vmatpush3.bf16.msra.mxu0 %v8722_v20 }
 0x26f   :  { %8713 = vmatpush3.bf16.msra.mxu1 %v8710_v2  ;;  %7893 = vmatprep.mubr.msk.f32.mxu1 %vm508_vm0, %v833_v14  ;;  %v7783_v16 = vpop.f32.mrb[42].mxu0 }
 0x270   :  { %8715 = vmatprep.subr.bf16.mxu1 %v8714_v9  ;;  %v853_v5 = vpop.f32.mrb[43].mxu0 }
 0x272   :  { %7894 = vmatmul.mubr.msk.f32.gmra.mrb[10].mxu1 %vm508_vm0, %v7777_v1 }
 0x273   :  { %8717 = vmatpush3.bf16.msra.mxu1 %v8714_v9  ;;  %7904 = vmatprep.mubr.msk.f32.mxu1 %vm508_vm0, %v843_v6 }
 0x276   :  { %7905 = vmatmul.mubr.msk.f32.vlgmr.msra.gmra.mrb[8].mxu1 %vm508_vm0, %v7780_v8 }
 0x277   :  { %7907 = vmatprep.mubr.msk.f32.mxu1 %vm508_vm0, %v853_v5 }
 0x27a   :  { %7908 = vmatmul.mubr.msk.f32.gmra.mrb[10].mxu1 %vm508_vm0, %v7783_v16 }
 0x27b   :  { %7932 = vmatprep.mubr.msk.f32.mxu1 %vm508_vm0, %v9639_v48 }
 0x349   :  { %v7906_v22 = vpop.f32.mrb[8].mxu1 }
 0x34a   :  { %v1770_v13 = vadd.f32 %v7906_v22, %v6853_v21  ;;  %v1740_v10 = vpop.f32.mrb[9].mxu1 }
 0x34b   :  { %v1769_v26 = vadd.f32 %v6853_v21, %v1740_v10 }
 0x34c   :  { %v1774_v15 = vsel %vm508_vm0, %v1770_v13, 0.0  ;;  %v1789_v0 = vmul.f32 %v1770_v13, %v1770_v13 }
 0x34d   :  { %v1773_v1 = vsel %vm508_vm0, %v1769_v26, 0.0  ;;  %v1788_v2 = vmul.f32 %v1769_v26, %v1769_v26  ;;  %v7909_v14 = vpop.f32.mrb[10].mxu1 }
 0x34e   :  { %v1793_v3 = vsel %vm508_vm0, %v1789_v0, 0.0  ;;  %v1775_v48 = vadd.f32 %v1774_v15, %v1773_v1  ;;  %v1772_v4 = vadd.f32 %v7909_v14, %v6853_v21  ;;  %v1750_v8 = vpop.f32.mrb[11].mxu1 }
 0x34f   :  { %v1792_v9 = vsel %vm508_vm0, %v1788_v2, 0.0  ;;  %v1771_v6 = vadd.f32 %v6853_v21, %v1750_v8 }
 0x350   :  { %v1794_v16 = vadd.f32 %v1793_v3, %v1792_v9  ;;  %v1791_v5 = vmul.f32 %v1772_v4, %v1772_v4  ;;  %v1778_v22 = vsel %vm508_vm0, %v1772_v4, 0.0 }
 0x351   :  { %v1776_v18 = vsel %vm508_vm0, %v1771_v6, 0.0  ;;  %v1790_v19 = vmul.f32 %v1771_v6, %v1771_v6 }
 0x352   :  { %v1777_v20 = vadd.f32 %v1776_v18, %v1775_v48  ;;  %v1797_v0 = vsel %vm508_vm0, %v1791_v5, 0.0 }
 0x353   :  { %v1795_v10 = vsel %vm508_vm0, %v1790_v19, 0.0 }
 0x354   :  { %v1779_v25 = vadd.f32 %v1778_v22, %v1777_v20  ;;  %v1796_v24 = vadd.f32 %v1795_v10, %v1794_v16 }
 0x356   :  { %v1780_v15 = vrot.slane %v1779_v25, 4  ;;  %v1798_v1 = vadd.f32 %v1797_v0, %v1796_v24 }
 0x358   :  { %v1781_v14 = vadd.f32 %v1780_v15, %v1779_v25  ;;  %v1799_v12 = vrot.slane %v1798_v1, 4  ;;  %v6854_v15 = vld [vmem:[%s9396_s8] ss:$0 sm:$0xff]  ;;  %s10814_s8 = sld [smem:[#allocation9_spill]] }
 0x35a   :  { %v1782_v2 = vrot.slane %v1781_v14, 2  ;;  %v1800_v21 = vadd.f32 %v1799_v12, %v1798_v1 }
 0x35c   :  { %v1783_v3 = vadd.f32 %v1782_v2, %v1781_v14  ;;  %v1801_v8 = vrot.slane %v1800_v21, 2 }
 0x35e   :  { %v1784_v9 = vrot.slane %v1783_v3, 1  ;;  %v1802_v11 = vadd.f32 %v1801_v8, %v1800_v21 }
 0x360   :  { %v1785_v48 = vadd.f32 %v1784_v9, %v1783_v3  ;;  %v1803_v18 = vrot.slane %v1802_v11, 1  ;;  %v6855_v3 = vld [vmem:[%s9401_s14] ss:$0 sm:$0xff]  ;;  %s10815_s14 = sld [smem:[#allocation16_spill]] }
 0x362   :  { %v1787_v62 = vmul.f32 0.03125, %v1785_v48  ;;  %v1804_v61 = vadd.f32 %v1803_v18, %v1802_v11 }
 0x364   :  { %v1805_v19 = vmul.f32 0.03125, %v1804_v61  ;;  %v1806_v16 = vmul.f32 %v1787_v62, %v1787_v62  ;;  %v1810_v20 = vsub.f32 %v1770_v13, %v1787_v62  ;;  %v1811_v5 = vsub.f32 %v1771_v6, %v1787_v62 }
 0x365   :  { %v1809_v22 = vsub.f32 %v1769_v26, %v1787_v62  ;;  %v1812_v24 = vsub.f32 %v1772_v4, %v1787_v62 }
 0x366   :  { %v1807_v25 = vsub.f32 %v1805_v19, %v1806_v16  ;;  %v6856_v16 = vld [vmem:[%s9411_s24] ss:$0 sm:$0xff]  ;;  %s10821_s24 = sld [smem:[#allocation18_spill]] }
 0x368   :  { %v1808_v10 = vmax.f32 %v1807_v25, 0.0 }
 0x36a   :  { %v1813_v0 = vadd.f32 1e-05, %v1808_v10 }
 0x36c   :  { %9203 = vrsqrt.f32 %v1813_v0 }
 0x376   :  { %v9204_v12 = vpop.eup %9203 }
 0x377   :  { %v1816_v1 = vmul.f32 %v9204_v12, %v1810_v20  ;;  %v1817_v14 = vmul.f32 %v9204_v12, %v1811_v5  ;;  %v1815_v2 = vmul.f32 %v9204_v12, %v1809_v22  ;;  %v1818_v21 = vmul.f32 %v9204_v12, %v1812_v24 }
 0x379   :  { %v1826_v8 = vmul.f32 %v6854_v15, %v1816_v1  ;;  %v1827_v11 = vmul.f32 %v6854_v15, %v1817_v14  ;;  %v1825_v61 = vmul.f32 %v6854_v15, %v1815_v2  ;;  %v1828_v9 = vmul.f32 %v6854_v15, %v1818_v21 }
 0x37b   :  { %v1835_v13 = vadd.f32 %v6855_v3, %v1825_v61  ;;  %v1836_v6 = vadd.f32 %v6855_v3, %v1826_v8  ;;  %v1837_v26 = vadd.f32 %v6855_v3, %v1827_v11  ;;  %v1838_v48 = vadd.f32 %v6855_v3, %v1828_v9 }
 0x37d   :  { %v1839_v62 = vmax.f32 %v1835_v13, 0.0  ;;  %v1840_v4 = vmax.f32 %v1836_v6, 0.0  ;;  %v1841_v18 = vmax.f32 %v1837_v26, 0.0  ;;  %v1842_v19 = vmax.f32 %v1838_v48, 0.0 }
 0x37f   :  { %7918 = vmatprep.mubr.msk.f32.mxu0 %vm508_vm0, %v1839_v62 }
 0x380   :  { %7919 = vmatmul.mubr.msk.f32.vlgmr.msra.gmra.mrb[44].mxu0 %vm508_vm0, %v1840_v4 }
 0x381   :  { %7921 = vmatprep.mubr.msk.f32.mxu0 %vm508_vm0, %v1841_v18 }
 0x384   :  { %7922 = vmatmul.mubr.msk.f32.gmra.mrb[46].mxu0 %vm508_vm0, %v1842_v19 }
 0x453   :  { %v7920_v20 = vpop.f32.mrb[44].mxu0 }
 0x454   :  { %v1933_v5 = vadd.f32 %v7920_v20, %v6856_v16  ;;  %v1927_v22 = vpop.f32.mrb[45].mxu0 }
 0x455   :  { %v1928_v24 = vadd.f32 %v6856_v16, %v1927_v22 }
 0x456   :  { %v1947_v25 = vsel %vm508_vm0, %v1933_v5, 0.0  ;;  %v1961_v10 = vmul.f32 %v1933_v5, %v1933_v5 }
 0x457   :  { %v1946_v0 = vsel %vm508_vm0, %v1928_v24, 0.0  ;;  %v1960_v12 = vmul.f32 %v1928_v24, %v1928_v24  ;;  %v7923_v15 = vpop.f32.mrb[46].mxu0 }
 0x458   :  { %v1965_v1 = vsel %vm508_vm0, %v1961_v10, 0.0  ;;  %v1948_v14 = vadd.f32 %v1947_v25, %v1946_v0  ;;  %v1943_v2 = vadd.f32 %v7923_v15, %v6856_v16  ;;  %v1937_v21 = vpop.f32.mrb[47].mxu0 }
 0x459   :  { %v1964_v3 = vsel %vm508_vm0, %v1960_v12, 0.0  ;;  %v1938_v8 = vadd.f32 %v6856_v16, %v1937_v21 }
 0x45a   :  { %v1966_v11 = vadd.f32 %v1965_v1, %v1964_v3  ;;  %v1963_v61 = vmul.f32 %v1943_v2, %v1943_v2  ;;  %v1951_v26 = vsel %vm508_vm0, %v1943_v2, 0.0 }
 0x45b   :  { %v1949_v9 = vsel %vm508_vm0, %v1938_v8, 0.0  ;;  %v1962_v13 = vmul.f32 %v1938_v8, %v1938_v8 }
 0x45c   :  { %v1950_v6 = vadd.f32 %v1949_v9, %v1948_v14  ;;  %v1969_v18 = vsel %vm508_vm0, %v1963_v61, 0.0 }
 0x45d   :  { %v1967_v62 = vsel %vm508_vm0, %v1962_v13, 0.0 }
 0x45e   :  { %v1952_v4 = vadd.f32 %v1951_v26, %v1950_v6  ;;  %v1968_v48 = vadd.f32 %v1967_v62, %v1966_v11 }
 0x460   :  { %v1953_v19 = vrot.slane %v1952_v4, 4  ;;  %v1970_v20 = vadd.f32 %v1969_v18, %v1968_v48 }
 0x462   :  { %v1954_v22 = vadd.f32 %v1953_v19, %v1952_v4  ;;  %v1971_v25 = vrot.slane %v1970_v20, 4 }
 0x464   :  { %v1955_v10 = vrot.slane %v1954_v22, 2  ;;  %v1972_v16 = vadd.f32 %v1971_v25, %v1970_v20  ;;  %v6861_v20 = vld [vmem:[%s9416_s30] ss:$0 sm:$0xff]  ;;  %s10822_s30 = sld [smem:[#allocation19_spill]] }
 0x466   :  { %v1956_v0 = vadd.f32 %v1955_v10, %v1954_v22  ;;  %v1973_v12 = vrot.slane %v1972_v16, 2 }
 0x468   :  { %v1957_v15 = vrot.slane %v1956_v0, 1  ;;  %v1974_v1 = vadd.f32 %v1973_v12, %v1972_v16 }
 0x46a   :  { %v1958_v14 = vadd.f32 %v1957_v15, %v1956_v0  ;;  %v1975_v21 = vrot.slane %v1974_v1, 1  ;;  %v6862_v0 = vld [vmem:[%s9421_s6] ss:$0 sm:$0xff]  ;;  %s10823_s6 = sld [smem:[#allocation21_spill]] }
 0x46c   :  { %v1959_v3 = vmul.f32 0.03125, %v1958_v14  ;;  %v1976_v9 = vadd.f32 %v1975_v21, %v1974_v1 }
 0x46e   :  { %v1977_v13 = vmul.f32 0.03125, %v1976_v9  ;;  %v1978_v11 = vmul.f32 %v1959_v3, %v1959_v3  ;;  %v1983_v6 = vsub.f32 %v1938_v8, %v1959_v3  ;;  %v1981_v61 = vsub.f32 %v1928_v24, %v1959_v3 }
 0x46f   :  { %v1982_v26 = vsub.f32 %v1933_v5, %v1959_v3  ;;  %v1984_v62 = vsub.f32 %v1943_v2, %v1959_v3  ;;  %v10799_v2 = vmax.f32 %v9646_v63, 0.0  ;;  %v10800_v9 = vmax.f32 %v9648_v7, 0.0 }
 0x470   :  { %v1979_v4 = vsub.f32 %v1977_v13, %v1978_v11  ;;  %v10801_v11 = vmax.f32 %v9652_v17, 0.0 }
 0x472   :  { %v1980_v48 = vmax.f32 %v1979_v4, 0.0 }
 0x474   :  { %v1985_v18 = vadd.f32 1e-05, %v1980_v48 }
 0x476   :  { %9205 = vrsqrt.f32 %v1985_v18  ;;  %v2028_v18 = vld [vmem:[%s9426_s12 + $0x68] sm:$0xff] }
 0x480   :  { %v9206_v19 = vpop.eup %9205 }
 0x481   :  { %v1989_v22 = vmul.f32 %v9206_v19, %v1983_v6  ;;  %v1987_v25 = vmul.f32 %v9206_v19, %v1981_v61  ;;  %v1988_v10 = vmul.f32 %v9206_v19, %v1982_v26  ;;  %v1990_v16 = vmul.f32 %v9206_v19, %v1984_v62 }
 0x482   :  { %v10802_v61 = vmax.f32 %v9658_v23, 0.0  ;;  %v10803_v23 = vld [vmem:[#allocation31_spill] sm:$0xff] }
 0x483   :  { %v1999_v12 = vmul.f32 %v6861_v20, %v1989_v22  ;;  %v1997_v15 = vmul.f32 %v6861_v20, %v1987_v25  ;;  %v1998_v1 = vmul.f32 %v6861_v20, %v1988_v10  ;;  %v2000_v14 = vmul.f32 %v6861_v20, %v1990_v16  ;;  %v2029_v25 = vld [vmem:[%s9426_s12 + $0x70] sm:$0xff]  ;;  %v2030_v10 = vld [vmem:[%s9426_s12 + $0x78] sm:$0xff] }
 0x485   :  { %v2007_v21 = vadd.f32 %v6862_v0, %v1997_v15  ;;  %v2008_v8 = vadd.f32 %v6862_v0, %v1998_v1  ;;  %v2009_v24 = vadd.f32 %v6862_v0, %v1999_v12  ;;  %v2010_v5 = vadd.f32 %v6862_v0, %v2000_v14  ;;  %v2031_v15 = vld [vmem:[%s9426_s12 + $0x80] sm:$0xff]  ;;  %v2032_v1 = vld [vmem:[%s9426_s12 + $0x88] sm:$0xff] }
 0x486   :  { %v8762_v0 = vpack.c.bf16 %v2030_v10, %v2029_v25  ;;  %v2056_v10 = vld [vmem:[%s9446_s25 + $0x10] sm:$0xff] }
 0x487   :  { %v9945_v3 = vadd.f32 %v2007_v21, %v10799_v2  ;;  %v9949_v13 = vadd.f32 %v2008_v8, %v10800_v9  ;;  %v9953_v6 = vadd.f32 %v2009_v24, %v10801_v11  ;;  %v9957_v26 = vadd.f32 %v2010_v5, %v10802_v61  ;;  %v2033_v24 = vld [vmem:[%s9426_s12 + $0x90] sm:$0xff]  ;;  %v2034_v5 = vld [vmem:[%s9426_s12 + $0x98] sm:$0xff]  ;;  %v2035_v61 = vld [vmem:[%s9426_s12 + $0xa0] sm:$0xff] }
 0x488   :  { %v8766_v21 = vpack.c.bf16 %v2032_v1, %v2031_v15  ;;  %v8770_v9 = vpack.c.bf16 %v2034_v5, %v2033_v24 }
 0x489   :  { %v2061_v62 = vmax.f32 %v9945_v3, 0.0  ;;  %v2062_v4 = vmax.f32 %v9949_v13, 0.0  ;;  %v2063_v63 = vmax.f32 %v9953_v6, 0.0  ;;  %v2064_v48 = vmax.f32 %v9957_v26, 0.0  ;;  %v6957_v6 = vld [vmem:[%s10814_s8] ss:$0 sm:$0xff] }
 0x48b   :  { %v8726_v7 = vpack.c.bf16 %v2062_v4, %v2061_v62  ;;  %v8730_v17 = vpack.c.bf16 %v2064_v48, %v2063_v63 }
 0x48d   :  { %8727 = vmatprep.subr.bf16.mxu1 %v8726_v7 }
 0x48e   :  { %8729 = vmatpush3.bf16.msra.mxu1 %v8726_v7  ;;  %v2036_v7 = vld [vmem:[%s9426_s12 + $0xa8] sm:$0xff] }
 0x48f   :  { %8731 = vmatprep.subr.bf16.mxu1 %v8730_v17 }
 0x492   :  { %8733 = vmatpush3.bf16.msra.mxu1 %v8730_v17 }
 0x495   :  { %7933 = vmatmul.mubr.msk.f32.vlgmr.msra.gmra.mrb[12].mxu1 %vm508_vm0, %v9667_v27  ;;  %v10804_v27 = vld [vmem:[#allocation32_spill] sm:$0xff] }
 0x496   :  { %7935 = vmatprep.mubr.msk.f32.mxu1 %vm508_vm0, %v9670_v28  ;;  %v2019_v28 = vld [vmem:[%s9426_s12 + $0x20] sm:$0xff] }
 0x499   :  { %7936 = vmatmul.mubr.msk.f32.gmra.mrb[14].mxu1 %vm508_vm0, %v9677_v29  ;;  %v2020_v29 = vld [vmem:[%s9426_s12 + $0x28] sm:$0xff] }
 0x49a   :  { %7938 = vmatprep.mubr.msk.f32.mxu1 %vm508_vm0, %v9680_v30  ;;  %v8734_v30 = vpack.c.bf16 %v2020_v29, %v2019_v28  ;;  %v2037_v28 = vld [vmem:[%s9426_s12 + $0xb0] sm:$0xff]  ;;  %v2038_v29 = vld [vmem:[%s9426_s12 + $0xb8] sm:$0xff] }
 0x49c   :  { %8735 = vmatprep.subr.bf16.mxu0 %v8734_v30 }
 0x49d   :  { %7939 = vmatmul.mubr.msk.f32.gmra.mrb[16].mxu1 %vm508_vm0, %v9687_v31  ;;  %8737 = vmatpush3.bf16.msra.mxu0 %v8734_v30  ;;  %v2021_v31 = vld [vmem:[%s9426_s12 + $0x30] sm:$0xff] }
 0x49e   :  { %7941 = vmatprep.mubr.msk.f32.mxu1 %vm508_vm0, %v9690_v32  ;;  %v2022_v32 = vld [vmem:[%s9426_s12 + $0x38] sm:$0xff] }
 0x4a1   :  { %7942 = vmatmul.mubr.msk.f32.gmra.mrb[18].mxu1 %vm508_vm0, %v9697_v33  ;;  %v8738_v33 = vpack.c.bf16 %v2022_v32, %v2021_v31  ;;  %v8778_v31 = vpack.c.bf16 %v2038_v29, %v2037_v28 }
 0x4a2   :  { %7944 = vmatprep.mubr.msk.f32.mxu1 %vm508_vm0, %v9700_v34  ;;  %v2015_v34 = vld [vmem:[%s9426_s12] sm:$0xff] }
 0x4a3   :  { %8739 = vmatprep.subr.bf16.mxu0 %v8738_v33 }
 0x4a4   :  { %8741 = vmatpush3.bf16.msra.mxu0 %v8738_v33  ;;  %v2039_v33 = vld [vmem:[%s9426_s12 + $0xc0] sm:$0xff] }
 0x4a5   :  { %7945 = vmatmul.mubr.msk.f32.gmra.mrb[20].mxu1 %vm508_vm0, %v9707_v35  ;;  %v2016_v35 = vld [vmem:[%s9426_s12 + $0x8] sm:$0xff] }
 0x4a6   :  { %7947 = vmatprep.mubr.msk.f32.mxu1 %vm508_vm0, %v9710_v36  ;;  %v8742_v36 = vpack.c.bf16 %v2016_v35, %v2015_v34  ;;  %v2040_v34 = vld [vmem:[%s9426_s12 + $0xc8] sm:$0xff] }
 0x4a8   :  { %8743 = vmatprep.subr.bf16.mxu0 %v8742_v36 }
 0x4a9   :  { %7948 = vmatmul.mubr.msk.f32.gmra.mrb[22].mxu1 %vm508_vm0, %v9717_v37  ;;  %v2054_v37 = vld [vmem:[%s9446_s25] sm:$0xff] }
 0x4aa   :  { %7950 = vmatprep.mubr.msk.f32.mxu1 %vm508_vm0, %v9720_v38  ;;  %v2055_v38 = vld [vmem:[%s9446_s25 + $0x8] sm:$0xff] }
 0x4ad   :  { %7951 = vmatmul.mubr.msk.f32.gmra.mrb[24].mxu1 %vm508_vm0, %v9727_v39  ;;  %v8806_v39 = vpack.c.bf16 %v2055_v38, %v2054_v37  ;;  %v2041_v38 = vld [vmem:[%s9426_s12 + $0xd0] sm:$0xff] }
 0x4ae   :  { %7953 = vmatprep.mubr.msk.f32.mxu1 %vm508_vm0, %v9730_v40 }
 0x4af   :  { %8807 = vmatprep.subr.bf16.mxu1 %v8806_v39 }
 0x4b0   :  { %8809 = vmatpush3.bf16.msra.mxu1 %v8806_v39  ;;  %v2042_v39 = vld [vmem:[%s9426_s12 + $0xd8] sm:$0xff] }
 0x4b1   :  { %7954 = vmatmul.mubr.msk.f32.gmra.mrb[26].mxu1 %vm508_vm0, %v9737_v41 }
 0x4b2   :  { %7956 = vmatprep.mubr.msk.f32.mxu1 %vm508_vm0, %v9740_v42 }
 0x4b5   :  { %7957 = vmatmul.mubr.msk.f32.gmra.mrb[28].mxu1 %vm508_vm0, %v9747_v43 }
 0x4b6   :  { %7959 = vmatprep.mubr.msk.f32.mxu1 %vm508_vm0, %v9750_v44  ;;  %v2017_v44 = vld [vmem:[%s9426_s12 + $0x10] sm:$0xff] }
 0x4b9   :  { %7960 = vmatmul.mubr.msk.f32.gmra.mrb[30].mxu1 %vm508_vm0, %v9757_v45  ;;  %v2018_v45 = vld [vmem:[%s9426_s12 + $0x18] sm:$0xff] }
 0x4ba   :  { %7962 = vmatprep.mubr.msk.f32.mxu1 %vm508_vm0, %v9760_v46 }
 0x4bd   :  { %7963 = vmatmul.mubr.msk.f32.gmra.mrb[32].mxu1 %vm508_vm0, %v9767_v47 }
 0x4be   :  { %7965 = vmatprep.mubr.msk.f32.mxu1 %vm508_vm0, %v9770_v49  ;;  %v8746_v49 = vpack.c.bf16 %v2018_v45, %v2017_v44  ;;  %v2044_v44 = vld [vmem:[%s9426_s12 + $0xe8] sm:$0xff] }
 0x4c1   :  { %7966 = vmatmul.mubr.msk.f32.gmra.mrb[34].mxu1 %vm508_vm0, %v9777_v50  ;;  %v2023_v50 = vld [vmem:[%s9426_s12 + $0x40] sm:$0xff] }
 0x4c2   :  { %7968 = vmatprep.mubr.msk.f32.mxu1 %vm508_vm0, %v9780_v51  ;;  %v2024_v51 = vld [vmem:[%s9426_s12 + $0x48] sm:$0xff] }
 0x4c5   :  { %7969 = vmatmul.mubr.msk.f32.gmra.mrb[36].mxu1 %vm508_vm0, %v9787_v52 }
 0x4c6   :  { %7971 = vmatprep.mubr.msk.f32.mxu1 %vm508_vm0, %v9790_v53 }
 0x4c9   :  { %7972 = vmatmul.mubr.msk.f32.gmra.mrb[38].mxu1 %vm508_vm0, %v9797_v54  ;;  %v8750_v54 = vpack.c.bf16 %v2024_v51, %v2023_v50  ;;  %v2046_v50 = vld [vmem:[%s9426_s12 + $0xf8] sm:$0xff] }
 0x4ca   :  { %7974 = vmatprep.mubr.msk.f32.mxu1 %vm508_vm0, %v9800_v55  ;;  %v2025_v55 = vld [vmem:[%s9426_s12 + $0x50] sm:$0xff] }
 0x4cd   :  { %7975 = vmatmul.mubr.msk.f32.gmra.mrb[40].mxu1 %vm508_vm0, %v9807_v56  ;;  %v2026_v56 = vld [vmem:[%s9426_s12 + $0x58] sm:$0xff] }
 0x4ce   :  { %7977 = vmatprep.mubr.msk.f32.mxu1 %vm508_vm0, %v9810_v57 }
 0x4d1   :  { %7978 = vmatmul.mubr.msk.f32.gmra.mrb[42].mxu1 %vm508_vm0, %v9817_v58  ;;  %v8754_v58 = vpack.c.bf16 %v2026_v56, %v2025_v55  ;;  %v2048_v55 = vld [vmem:[%s9426_s12 + $0x108] sm:$0xff] }
 0x4d2   :  { %7980 = vmatprep.mubr.msk.f32.mxu1 %vm508_vm0, %v9820_v59 }
 0x4d5   :  { %7981 = vmatmul.mubr.msk.f32.gmra.mrb[44].mxu1 %vm508_vm0, %v9827_v60  ;;  %v2027_v60 = vld [vmem:[%s9426_s12 + $0x60] sm:$0xff] }
 0x4d6   :  { %7983 = vmatprep.mubr.msk.f32.mxu1 %vm508_vm0, %v10803_v23  ;;  %v8758_v20 = vpack.c.bf16 %v2028_v18, %v2027_v60  ;;  %v8774_v23 = vpack.c.bf16 %v2036_v7, %v2035_v61  ;;  %v2050_v60 = vld [vmem:[%s9426_s12 + $0x118] sm:$0xff] }
 0x4d9   :  { %7984 = vmatmul.mubr.msk.f32.gmra.mrb[46].mxu1 %vm508_vm0, %v10804_v27 }
 0x568   :  { %v7934_v40 = vpop.f32.mrb[12].mxu1 }
 0x569   :  { %v2131_v41 = vpop.f32.mrb[13].mxu1 }
 0x56c   :  { %v7937_v42 = vpop.f32.mrb[14].mxu1 }
 0x56d   :  { %v2141_v43 = vpop.f32.mrb[15].mxu1 }
 0x570   :  { %v7940_v46 = vpop.f32.mrb[16].mxu1 }
 0x571   :  { %v2151_v47 = vpop.f32.mrb[17].mxu1 }
 0x572   :  { %7994 = vmatprep.mubr.msk.f32.mxu0 %vm508_vm0, %v2151_v47 }
 0x573   :  { %7995 = vmatmul.mubr.msk.f32.vlgmr.msra.gmra.mrb[48].mxu0 %vm508_vm0, %v7940_v46 }
 0x574   :  { %v7943_v52 = vpop.f32.mrb[18].mxu1  ;;  %8745 = vmatpush3.bf16.msra.mxu0 %v8742_v36  ;;  %v8782_v36 = vpack.c.bf16 %v2040_v34, %v2039_v33 }
 0x575   :  { %v2161_v53 = vpop.f32.mrb[19].mxu1  ;;  %8747 = vmatprep.subr.bf16.mxu0 %v8746_v49 }
 0x576   :  { %7997 = vmatprep.mubr.msk.f32.mxu0 %vm508_vm0, %v2161_v53 }
 0x577   :  { %7998 = vmatmul.mubr.msk.f32.gmra.mrb[50].mxu0 %vm508_vm0, %v7943_v52 }
 0x578   :  { %8749 = vmatpush3.bf16.msra.mxu0 %v8746_v49  ;;  %8008 = vmatprep.mubr.msk.f32.mxu0 %vm508_vm0, %v2131_v41  ;;  %v7946_v57 = vpop.f32.mrb[20].mxu1  ;;  %v8786_v41 = vpack.c.bf16 %v2042_v39, %v2041_v38  ;;  %v2045_v49 = vld [vmem:[%s9426_s12 + $0xf0] sm:$0xff] }
 0x579   :  { %8751 = vmatprep.subr.bf16.mxu0 %v8750_v54  ;;  %v2171_v59 = vpop.f32.mrb[21].mxu1  ;;  %v8794_v52 = vpack.c.bf16 %v2046_v50, %v2045_v49 }
 0x57b   :  { %8009 = vmatmul.mubr.msk.f32.vlgmr.msra.gmra.mrb[48].mxu0 %vm508_vm0, %v7934_v40 }
 0x57c   :  { %8011 = vmatprep.mubr.msk.f32.mxu0 %vm508_vm0, %v2141_v43  ;;  %8753 = vmatpush3.bf16.msra.mxu0 %v8750_v54  ;;  %v7949_v19 = vpop.f32.mrb[22].mxu1  ;;  %v2043_v43 = vld [vmem:[%s9426_s12 + $0xe0] sm:$0xff] }
 0x57d   :  { %8755 = vmatprep.subr.bf16.mxu0 %v8754_v58  ;;  %v2181_v22 = vpop.f32.mrb[23].mxu1  ;;  %v8790_v46 = vpack.c.bf16 %v2044_v44, %v2043_v43  ;;  %v2047_v54 = vld [vmem:[%s9426_s12 + $0x100] sm:$0xff] }
 0x57f   :  { %8012 = vmatmul.mubr.msk.f32.gmra.mrb[50].mxu0 %vm508_vm0, %v7937_v42 }
 0x580   :  { %8757 = vmatpush3.bf16.msra.mxu0 %v8754_v58  ;;  %8022 = vmatprep.mubr.msk.f32.mxu0 %vm508_vm0, %v2171_v59  ;;  %v7952_v16 = vpop.f32.mrb[24].mxu1  ;;  %v2049_v59 = vld [vmem:[%s9426_s12 + $0x110] sm:$0xff]  ;;  %s10824_s12 = sld [smem:[#allocation24_spill]] }
 0x581   :  { %8759 = vmatprep.subr.bf16.mxu0 %v8758_v20  ;;  %v2191_v12 = vpop.f32.mrb[25].mxu1 }
 0x583   :  { %8023 = vmatmul.mubr.msk.f32.vlgmr.msra.gmra.mrb[48].mxu0 %vm508_vm0, %v7946_v57  ;;  %v8798_v57 = vpack.c.bf16 %v2048_v55, %v2047_v54 }
 0x584   :  { %8761 = vmatpush3.bf16.msra.mxu0 %v8758_v20  ;;  %8025 = vmatprep.mubr.msk.f32.mxu0 %vm508_vm0, %v2181_v22  ;;  %v7955_v14 = vpop.f32.mrb[26].mxu1 }
 0x585   :  { %8763 = vmatprep.subr.bf16.mxu0 %v8762_v0  ;;  %v2201_v8 = vpop.f32.mrb[27].mxu1 }
 0x587   :  { %8026 = vmatmul.mubr.msk.f32.gmra.mrb[50].mxu0 %vm508_vm0, %v7949_v19  ;;  %v8802_v19 = vpack.c.bf16 %v2050_v60, %v2049_v59 }
 0x588   :  { %8765 = vmatpush3.bf16.msra.mxu0 %v8762_v0  ;;  %8036 = vmatprep.mubr.msk.f32.mxu0 %vm508_vm0, %v2191_v12  ;;  %v7958_v2 = vpop.f32.mrb[28].mxu1  ;;  %v6935_v12 = vld [vmem:[%s10805_s0] ss:$0 sm:$0xff] }
 0x589   :  { %8767 = vmatprep.subr.bf16.mxu0 %v8766_v21  ;;  %v2211_v11 = vpop.f32.mrb[29].mxu1 }
 0x58b   :  { %8037 = vmatmul.mubr.msk.f32.vlgmr.msra.gmra.mrb[48].mxu0 %vm508_vm0, %v7952_v16  ;;  %v2057_v16 = vld [vmem:[%s9446_s25 + $0x18] sm:$0xff]  ;;  %s10811_s25 = sld [smem:[#allocation13_spill]] }
 0x58c   :  { %8769 = vmatpush3.bf16.msra.mxu0 %v8766_v21  ;;  %8039 = vmatprep.mubr.msk.f32.mxu0 %vm508_vm0, %v2201_v8  ;;  %v7961_v17 = vpop.f32.mrb[30].mxu1  ;;  %v8810_v0 = vpack.c.bf16 %v2057_v16, %v2056_v10 }
 0x58d   :  { %8771 = vmatprep.subr.bf16.mxu0 %v8770_v9  ;;  %v2221_v27 = vpop.f32.mrb[31].mxu1 }
 0x58e   :  { %8811 = vmatprep.subr.bf16.mxu1 %v8810_v0 }
 0x58f   :  { %8040 = vmatmul.mubr.msk.f32.gmra.mrb[50].mxu0 %vm508_vm0, %v7955_v14  ;;  %8813 = vmatpush3.bf16.msra.mxu1 %v8810_v0  ;;  %v6937_v0 = vld [vmem:[%s10807_s9] ss:$0 sm:$0xff] }
 0x590   :  { %8773 = vmatpush3.bf16.msra.mxu0 %v8770_v9  ;;  %8050 = vmatprep.mubr.msk.f32.mxu0 %vm508_vm0, %v2211_v11  ;;  %v7964_v30 = vpop.f32.mrb[32].mxu1 }
 0x591   :  { %8775 = vmatprep.subr.bf16.mxu0 %v8774_v23  ;;  %v2231_v32 = vpop.f32.mrb[33].mxu1 }
 0x593   :  { %8051 = vmatmul.mubr.msk.f32.vlgmr.msra.gmra.mrb[48].mxu0 %vm508_vm0, %v7958_v2 }
 0x594   :  { %8777 = vmatpush3.bf16.msra.mxu0 %v8774_v23  ;;  %8053 = vmatprep.mubr.msk.f32.mxu0 %vm508_vm0, %v2221_v27  ;;  %v7967_v35 = vpop.f32.mrb[34].mxu1 }
 0x595   :  { %8779 = vmatprep.subr.bf16.mxu0 %v8778_v31  ;;  %v2241_v37 = vpop.f32.mrb[35].mxu1 }
 0x597   :  { %8054 = vmatmul.mubr.msk.f32.gmra.mrb[50].mxu0 %vm508_vm0, %v7961_v17 }
 0x598   :  { %8781 = vmatpush3.bf16.msra.mxu0 %v8778_v31  ;;  %8064 = vmatprep.mubr.msk.f32.mxu0 %vm508_vm0, %v2231_v32  ;;  %v7970_v40 = vpop.f32.mrb[36].mxu1 }
 0x599   :  { %8783 = vmatprep.subr.bf16.mxu0 %v8782_v36  ;;  %v2251_v42 = vpop.f32.mrb[37].mxu1 }
 0x59b   :  { %8065 = vmatmul.mubr.msk.f32.vlgmr.msra.gmra.mrb[48].mxu0 %vm508_vm0, %v7964_v30 }
 0x59c   :  { %8785 = vmatpush3.bf16.msra.mxu0 %v8782_v36  ;;  %8067 = vmatprep.mubr.msk.f32.mxu0 %vm508_vm0, %v2241_v37  ;;  %v7973_v45 = vpop.f32.mrb[38].mxu1 }
 0x59d   :  { %8787 = vmatprep.subr.bf16.mxu0 %v8786_v41  ;;  %v2261_v47 = vpop.f32.mrb[39].mxu1 }
 0x59f   :  { %8068 = vmatmul.mubr.msk.f32.gmra.mrb[50].mxu0 %vm508_vm0, %v7967_v35 }
 0x5a0   :  { %8789 = vmatpush3.bf16.msra.mxu0 %v8786_v41  ;;  %8078 = vmatprep.mubr.msk.f32.mxu0 %vm508_vm0, %v2251_v42  ;;  %v7976_v51 = vpop.f32.mrb[40].mxu1 }
 0x5a1   :  { %8791 = vmatprep.subr.bf16.mxu0 %v8790_v46  ;;  %v2271_v53 = vpop.f32.mrb[41].mxu1 }
 0x5a3   :  { %8079 = vmatmul.mubr.msk.f32.vlgmr.msra.gmra.mrb[48].mxu0 %vm508_vm0, %v7970_v40 }
 0x5a4   :  { %8793 = vmatpush3.bf16.msra.mxu0 %v8790_v46  ;;  %8081 = vmatprep.mubr.msk.f32.mxu0 %vm508_vm0, %v2261_v47  ;;  %v7979_v56 = vpop.f32.mrb[42].mxu1 }
 0x5a5   :  { %8795 = vmatprep.subr.bf16.mxu0 %v8794_v52  ;;  %v2281_v58 = vpop.f32.mrb[43].mxu1 }
 0x5a7   :  { %8082 = vmatmul.mubr.msk.f32.gmra.mrb[50].mxu0 %vm508_vm0, %v7973_v45 }
 0x5a8   :  { %8797 = vmatpush3.bf16.msra.mxu0 %v8794_v52  ;;  %8092 = vmatprep.mubr.msk.f32.mxu0 %vm508_vm0, %v2271_v53  ;;  %v7982_v18 = vpop.f32.mrb[44].mxu1 }
 0x5a9   :  { %8799 = vmatprep.subr.bf16.mxu0 %v8798_v57  ;;  %v2291_v20 = vpop.f32.mrb[45].mxu1 }
 0x5ab   :  { %8093 = vmatmul.mubr.msk.f32.vlgmr.msra.gmra.mrb[48].mxu0 %vm508_vm0, %v7976_v51 }
 0x5ac   :  { %8801 = vmatpush3.bf16.msra.mxu0 %v8798_v57  ;;  %8095 = vmatprep.mubr.msk.f32.mxu0 %vm508_vm0, %v2281_v58  ;;  %v7985_v22 = vpop.f32.mrb[46].mxu1 }
 0x5ad   :  { %8803 = vmatprep.subr.bf16.mxu0 %v8802_v19  ;;  %v2301_v25 = vpop.f32.mrb[47].mxu1 }
 0x5af   :  { %8096 = vmatmul.mubr.msk.f32.gmra.mrb[50].mxu0 %vm508_vm0, %v7979_v56 }
 0x5b0   :  { %8805 = vmatpush3.bf16.msra.mxu0 %v8802_v19  ;;  %8106 = vmatprep.mubr.msk.f32.mxu0 %vm508_vm0, %v2291_v20  ;;  %v6936_v20 = vld [vmem:[%s10806_s5] ss:$0 sm:$0xff] }
 0x5b3   :  { %8107 = vmatmul.mubr.msk.f32.vlgmr.msra.gmra.mrb[48].mxu0 %vm508_vm0, %v7982_v18 }
 0x5b4   :  { %8109 = vmatprep.mubr.msk.f32.mxu0 %vm508_vm0, %v2301_v25 }
 0x5b7   :  { %8110 = vmatmul.mubr.msk.f32.gmra.mrb[50].mxu0 %vm508_vm0, %v7985_v22 }
 0x686   :  { %v8108_v15 = vpop.f32.mrb[48].mxu0 }
 0x687   :  { %v3218_v1 = vadd.f32 %v8108_v15, %v6935_v12  ;;  %v3188_v14 = vpop.f32.mrb[49].mxu0 }
 0x688   :  { %v3217_v21 = vadd.f32 %v6935_v12, %v3188_v14 }
 0x689   :  { %v3222_v8 = vsel %vm508_vm0, %v3218_v1, 0.0  ;;  %v3236_v24 = vmul.f32 %v3218_v1, %v3218_v1 }
 0x68a   :  { %v3221_v5 = vsel %vm508_vm0, %v3217_v21, 0.0  ;;  %v3235_v2 = vmul.f32 %v3217_v21, %v3217_v21  ;;  %v8111_v9 = vpop.f32.mrb[50].mxu0 }
 0x68b   :  { %v3240_v11 = vsel %vm508_vm0, %v3236_v24, 0.0  ;;  %v3223_v61 = vadd.f32 %v3222_v8, %v3221_v5  ;;  %v3220_v7 = vadd.f32 %v8111_v9, %v6935_v12  ;;  %v3198_v17 = vpop.f32.mrb[51].mxu0 }
 0x68c   :  { %v3239_v23 = vsel %vm508_vm0, %v3235_v2, 0.0  ;;  %v3219_v27 = vadd.f32 %v6935_v12, %v3198_v17  ;;  %v3467_v17 = vld [vmem:[%s10808_s13 + $0x8] sm:$0xff] }
 0x68d   :  { %v3241_v28 = vadd.f32 %v3240_v11, %v3239_v23  ;;  %v3238_v29 = vmul.f32 %v3220_v7, %v3220_v7  ;;  %v3226_v33 = vsel %vm508_vm0, %v3220_v7, 0.0 }
 0x68e   :  { %v3224_v30 = vsel %vm508_vm0, %v3219_v27, 0.0  ;;  %v3237_v31 = vmul.f32 %v3219_v27, %v3219_v27 }
 0x68f   :  { %v3225_v32 = vadd.f32 %v3224_v30, %v3223_v61  ;;  %v3244_v37 = vsel %vm508_vm0, %v3238_v29, 0.0  ;;  %v3469_v29 = vld [vmem:[%s10808_s13 + $0x18] sm:$0xff] }
 0x690   :  { %v3242_v34 = vsel %vm508_vm0, %v3237_v31, 0.0  ;;  %v3470_v31 = vld [vmem:[%s10808_s13 + $0x20] sm:$0xff] }
 0x691   :  { %v3227_v35 = vadd.f32 %v3226_v33, %v3225_v32  ;;  %v3243_v36 = vadd.f32 %v3242_v34, %v3241_v28  ;;  %v3468_v28 = vld [vmem:[%s10808_s13 + $0x10] sm:$0xff]  ;;  %v3471_v32 = vld [vmem:[%s10808_s13 + $0x28] sm:$0xff] }
 0x692   :  { %v8820_v30 = vpack.c.bf16 %v3469_v29, %v3468_v28  ;;  %v8826_v33 = vpack.c.bf16 %v3471_v32, %v3470_v31  ;;  %v3472_v34 = vld [vmem:[%s10808_s13 + $0x30] sm:$0xff]  ;;  %v6943_v31 = vld [vmem:[%s10812_s29] ss:$0 sm:$0xff] }
 0x693   :  { %v3228_v38 = vrot.slane %v3227_v35, 4  ;;  %v3245_v39 = vadd.f32 %v3244_v37, %v3243_v36  ;;  %v6938_v37 = vld [vmem:[%s10811_s25] ss:$0 sm:$0xff] }
 0x695   :  { %v3229_v40 = vadd.f32 %v3228_v38, %v3227_v35  ;;  %v3246_v41 = vrot.slane %v3245_v39, 4  ;;  %v3473_v35 = vld [vmem:[%s10808_s13 + $0x38] sm:$0xff] }
 0x696   :  { %v8832_v36 = vpack.c.bf16 %v3473_v35, %v3472_v34 }
 0x697   :  { %v3230_v42 = vrot.slane %v3229_v40, 2  ;;  %v3247_v43 = vadd.f32 %v3246_v41, %v3245_v39 }
 0x699   :  { %v3231_v44 = vadd.f32 %v3230_v42, %v3229_v40  ;;  %v3248_v45 = vrot.slane %v3247_v43, 2 }
 0x69b   :  { %v3232_v46 = vrot.slane %v3231_v44, 1  ;;  %v3249_v47 = vadd.f32 %v3248_v45, %v3247_v43 }
 0x69d   :  { %v3233_v49 = vadd.f32 %v3232_v46, %v3231_v44  ;;  %v3250_v50 = vrot.slane %v3249_v47, 1 }
 0x69f   :  { %v3234_v51 = vmul.f32 0.03125, %v3233_v49  ;;  %v3251_v52 = vadd.f32 %v3250_v50, %v3249_v47 }
 0x6a1   :  { %v3252_v53 = vmul.f32 0.03125, %v3251_v52  ;;  %v3253_v54 = vmul.f32 %v3234_v51, %v3234_v51  ;;  %v3257_v55 = vsub.f32 %v3218_v1, %v3234_v51  ;;  %v3258_v56 = vsub.f32 %v3219_v27, %v3234_v51 }
 0x6a2   :  { %v3256_v57 = vsub.f32 %v3217_v21, %v3234_v51  ;;  %v3259_v58 = vsub.f32 %v3220_v7, %v3234_v51  ;;  %v3466_v7 = vld [vmem:[%s10808_s13] sm:$0xff] }
 0x6a3   :  { %v3254_v59 = vsub.f32 %v3252_v53, %v3253_v54  ;;  %v8814_v23 = vpack.c.bf16 %v3467_v17, %v3466_v7 }
 0x6a5   :  { %v3255_v60 = vmax.f32 %v3254_v59, 0.0  ;;  %8816 = vmatprep.subr.msk.bf16.mxu0 %vm10136_vm1, %v8814_v23  ;;  %8839 = vmatprep.subr.bf16.mxu1 %v8814_v23 }
 0x6a6   :  { %8819 = vmatpush3.bf16.xpose.msk.msra.mxu0 %vm10136_vm1, %v8814_v23 }
 0x6a7   :  { %v3260_v18 = vadd.f32 1e-05, %v3255_v60  ;;  %8822 = vmatprep.subr.msk.bf16.mxu0 %vm10136_vm1, %v8820_v30 }
 0x6a9   :  { %9207 = vrsqrt.f32 %v3260_v18 }
 0x6ae   :  { %8825 = vmatpush3.bf16.xpose.msk.msra.mxu0 %vm10136_vm1, %v8820_v30 }
 0x6af   :  { %8828 = vmatprep.subr.msk.bf16.mxu0 %vm10136_vm1, %v8826_v33 }
 0x6b3   :  { %v9208_v19 = vpop.eup %9207 }
 0x6b4   :  { %v3263_v22 = vmul.f32 %v9208_v19, %v3257_v55  ;;  %v3264_v25 = vmul.f32 %v9208_v19, %v3258_v56  ;;  %v3262_v10 = vmul.f32 %v9208_v19, %v3256_v57  ;;  %v3265_v16 = vmul.f32 %v9208_v19, %v3259_v58 }
 0x6b6   :  { %v3273_v12 = vmul.f32 %v6936_v20, %v3263_v22  ;;  %v3274_v15 = vmul.f32 %v6936_v20, %v3264_v25  ;;  %v3272_v14 = vmul.f32 %v6936_v20, %v3262_v10  ;;  %v3275_v1 = vmul.f32 %v6936_v20, %v3265_v16  ;;  %8831 = vmatpush3.bf16.xpose.msk.msra.mxu0 %vm10136_vm1, %v8826_v33 }
 0x6b7   :  { %8834 = vmatprep.subr.msk.bf16.mxu0 %vm10136_vm1, %v8832_v36 }
 0x6b8   :  { %v3282_v8 = vadd.f32 %v6937_v0, %v3272_v14  ;;  %v3283_v21 = vadd.f32 %v6937_v0, %v3273_v12  ;;  %v3284_v24 = vadd.f32 %v6937_v0, %v3274_v15  ;;  %v3285_v9 = vadd.f32 %v6937_v0, %v3275_v1 }
 0x6ba   :  { %v3286_v5 = vmax.f32 %v3282_v8, 0.0  ;;  %v3287_v2 = vmax.f32 %v3283_v21, 0.0  ;;  %v3288_v11 = vmax.f32 %v3284_v24, 0.0  ;;  %v3289_v61 = vmax.f32 %v3285_v9, 0.0 }
 0x6bc   :  { %8120 = vmatprep.mubr.msk.f32.mxu1 %vm508_vm0, %v3286_v5 }
 0x6bd   :  { %8121 = vmatmul.mubr.msk.f32.vlgmr.msra.gmra.mrb[48].mxu1 %vm508_vm0, %v3287_v2 }
 0x6be   :  { %8123 = vmatprep.mubr.msk.f32.mxu1 %vm508_vm0, %v3288_v11  ;;  %8841 = vmatpush3.bf16.msra.mxu1 %v8814_v23 }
 0x6bf   :  { %8843 = vmatprep.subr.bf16.mxu1 %v8820_v30  ;;  %8837 = vmatpush3.bf16.xpose.msk.msra.mxu0 %vm10136_vm1, %v8832_v36 }
 0x6c1   :  { %8124 = vmatmul.mubr.msk.f32.gmra.mrb[50].mxu1 %vm508_vm0, %v3289_v61 }
 0x6c2   :  { %8845 = vmatpush3.bf16.msra.mxu1 %v8820_v30 }
 0x6c3   :  { %8847 = vmatprep.subr.bf16.mxu1 %v8826_v33 }
 0x6c6   :  { %8849 = vmatpush3.bf16.msra.mxu1 %v8826_v33 }
 0x6c7   :  { %8851 = vmatprep.subr.bf16.mxu1 %v8832_v36 }
 0x6ca   :  { %8853 = vmatpush3.bf16.msra.mxu1 %v8832_v36  ;;  %v6944_v36 = vld [vmem:[%s10813_s3] ss:$0 sm:$0xff] }
 0x790   :  { %v8122_v38 = vpop.f32.mrb[48].mxu1 }
 0x791   :  { %v3380_v39 = vadd.f32 %v8122_v38, %v6938_v37  ;;  %v3374_v40 = vpop.f32.mrb[49].mxu1 }
 0x792   :  { %v3375_v41 = vadd.f32 %v6938_v37, %v3374_v40 }
 0x793   :  { %v3394_v42 = vsel %vm508_vm0, %v3380_v39, 0.0  ;;  %v3408_v43 = vmul.f32 %v3380_v39, %v3380_v39 }
 0x794   :  { %v3393_v44 = vsel %vm508_vm0, %v3375_v41, 0.0  ;;  %v3407_v45 = vmul.f32 %v3375_v41, %v3375_v41  ;;  %v8125_v46 = vpop.f32.mrb[50].mxu1 }
 0x795   :  { %v3412_v47 = vsel %vm508_vm0, %v3408_v43, 0.0  ;;  %v3395_v49 = vadd.f32 %v3394_v42, %v3393_v44  ;;  %v3390_v50 = vadd.f32 %v8125_v46, %v6938_v37  ;;  %v3384_v51 = vpop.f32.mrb[51].mxu1 }
 0x796   :  { %v3411_v52 = vsel %vm508_vm0, %v3407_v45, 0.0  ;;  %v3385_v53 = vadd.f32 %v6938_v37, %v3384_v51 }
 0x797   :  { %v3413_v54 = vadd.f32 %v3412_v47, %v3411_v52  ;;  %v3410_v55 = vmul.f32 %v3390_v50, %v3390_v50  ;;  %v3398_v59 = vsel %vm508_vm0, %v3390_v50, 0.0 }
 0x798   :  { %v3396_v56 = vsel %vm508_vm0, %v3385_v53, 0.0  ;;  %v3409_v57 = vmul.f32 %v3385_v53, %v3385_v53 }
 0x799   :  { %v3397_v58 = vadd.f32 %v3396_v56, %v3395_v49  ;;  %v3416_v20 = vsel %vm508_vm0, %v3410_v55, 0.0 }
 0x79a   :  { %v3414_v60 = vsel %vm508_vm0, %v3409_v57, 0.0 }
 0x79b   :  { %v3399_v18 = vadd.f32 %v3398_v59, %v3397_v58  ;;  %v3415_v19 = vadd.f32 %v3414_v60, %v3413_v54  ;;  %v3623_v59 = vlaneseq }
 0x79d   :  { %v3400_v22 = vrot.slane %v3399_v18, 4  ;;  %v3417_v25 = vadd.f32 %v3416_v20, %v3415_v19  ;;  %v10194_v60 = vand.u32 127, %v3623_v59 }
 0x79f   :  { %v3401_v10 = vadd.f32 %v3400_v22, %v3399_v18  ;;  %v3418_v16 = vrot.slane %v3417_v25, 4 }
 0x7a1   :  { %v3402_v0 = vrot.slane %v3401_v10, 2  ;;  %v3419_v12 = vadd.f32 %v3418_v16, %v3417_v25 }
 0x7a3   :  { %v3403_v15 = vadd.f32 %v3402_v0, %v3401_v10  ;;  %v3420_v14 = vrot.slane %v3419_v12, 2 }
 0x7a5   :  { %v3404_v1 = vrot.slane %v3403_v15, 1  ;;  %v3421_v8 = vadd.f32 %v3420_v14, %v3419_v12 }
 0x7a7   :  { %v3405_v21 = vadd.f32 %v3404_v1, %v3403_v15  ;;  %v3422_v24 = vrot.slane %v3421_v8, 1 }
 0x7a9   :  { %v3406_v5 = vmul.f32 0.03125, %v3405_v21  ;;  %v3423_v2 = vadd.f32 %v3422_v24, %v3421_v8 }
 0x7ab   :  { %v3424_v9 = vmul.f32 0.03125, %v3423_v2  ;;  %v3425_v11 = vmul.f32 %v3406_v5, %v3406_v5  ;;  %v3429_v61 = vsub.f32 %v3380_v39, %v3406_v5  ;;  %v3430_v7 = vsub.f32 %v3385_v53, %v3406_v5 }
 0x7ac   :  { %v3428_v17 = vsub.f32 %v3375_v41, %v3406_v5  ;;  %v3431_v23 = vsub.f32 %v3390_v50, %v3406_v5 }
 0x7ad   :  { %v3426_v27 = vsub.f32 %v3424_v9, %v3425_v11 }
 0x7af   :  { %v3427_v28 = vmax.f32 %v3426_v27, 0.0 }
 0x7b1   :  { %v3432_v29 = vadd.f32 1e-05, %v3427_v28 }
 0x7b3   :  { %9209 = vrsqrt.f32 %v3432_v29 }
 0x7bd   :  { %v9210_v30 = vpop.eup %9209 }
 0x7be   :  { %v3435_v32 = vmul.f32 %v9210_v30, %v3429_v61  ;;  %v3436_v33 = vmul.f32 %v9210_v30, %v3430_v7  ;;  %v3434_v34 = vmul.f32 %v9210_v30, %v3428_v17  ;;  %v3437_v35 = vmul.f32 %v9210_v30, %v3431_v23 }
 0x7c0   :  { %v3445_v37 = vmul.f32 %v6943_v31, %v3435_v32  ;;  %v3446_v38 = vmul.f32 %v6943_v31, %v3436_v33  ;;  %v3444_v40 = vmul.f32 %v6943_v31, %v3434_v34  ;;  %v3447_v42 = vmul.f32 %v6943_v31, %v3437_v35 }
 0x7c2   :  { %v3454_v43 = vadd.f32 %v6944_v36, %v3444_v40  ;;  %v3455_v39 = vadd.f32 %v6944_v36, %v3445_v37  ;;  %v3456_v44 = vadd.f32 %v6944_v36, %v3446_v38  ;;  %v3457_v41 = vadd.f32 %v6944_v36, %v3447_v42 }
 0x7c4   :  { %v3458_v45 = vadd.f32 %v3454_v43, %v2061_v62  ;;  %v3459_v46 = vadd.f32 %v3455_v39, %v2062_v4  ;;  %v3460_v47 = vadd.f32 %v3456_v44, %v2063_v63  ;;  %v3461_v49 = vadd.f32 %v3457_v41, %v2064_v48 }
 0x7c6   :  { %3462 = vst.msk [vmem:[#allocation2] sm:$0xff] %vm508_vm0, %v3458_v45  ;;  %8142 = vmatprep.mubr.msk.f32.mxu0 %vm508_vm0, %v3458_v45  ;;  %3463 = vst.msk [vmem:[#allocation2 + $0x8] sm:$0xff] %vm508_vm0, %v3459_v46 }
 0x7c7   :  { %3464 = vst.msk [vmem:[#allocation2 + $0x10] sm:$0xff] %vm508_vm0, %v3460_v47  ;;  %3465 = vst.msk [vmem:[#allocation2 + $0x18] sm:$0xff] %vm508_vm0, %v3461_v49  ;;  %8143 = vmatmul.mubr.msk.f32.vlgmr.msra.gmra.mrb[52].mxu0 %vm508_vm0, %v3459_v46 }
 0x7c8   :  { %8145 = vmatprep.mubr.msk.f32.mxu0 %vm508_vm0, %v3460_v47 }
 0x7cb   :  { %8146 = vmatmul.mubr.msk.f32.gmra.mrb[54].mxu0 %vm508_vm0, %v3461_v49 }
 0x89a   :  { %v8144_v3 = vpop.f32.mrb[52].mxu0 }
 0x89b   :  { %v3576_v13 = vpop.f32.mrb[53].mxu0  ;;  %v3597_v26 = vmul.f32 2.0, %v8144_v3 }
 0x89c   :  { %v3596_v62 = vmul.f32 2.0, %v3576_v13 }
 0x89d   :  { %v3607_v53 = vsub.f32 %v6957_v6, %v3597_v26 }
 0x89e   :  { %v8147_v4 = vpop.f32.mrb[54].mxu0  ;;  %v3606_v63 = vsub.f32 %v6957_v6, %v3596_v62 }
 0x89f   :  { %v3586_v48 = vpop.f32.mrb[55].mxu0  ;;  %v3599_v50 = vmul.f32 2.0, %v8147_v4  ;;  %v3614_v55 = vsel %vm3610_vm2, %v3607_v53, inf  ;;  %v9343_v4 = vmov 0.0  }
 0x8a0   :  { %v3598_v51 = vmul.f32 2.0, %v3586_v48  ;;  %v3611_v52 = vsel %vm3610_vm2, %v3606_v63, inf }
 0x8a1   :  { %3612 = vmin.xlane.f32.xlu0 %v3611_v52  ;;  %v3609_v57 = vsub.f32 %v6957_v6, %v3599_v50 }
 0x8a2   :  { %v3608_v54 = vsub.f32 %v6957_v6, %v3598_v51 }
 0x8a3   :  { %v3620_v58 = vsel %vm3610_vm2, %v3609_v57, inf }
 0x8a4   :  { %v3617_v56 = vsel %vm3610_vm2, %v3608_v54, inf }
 0x8a5   :  { %3615 = vmin.xlane.f32.xlu0 %v3614_v55  ;;  %3618 = vmin.xlane.f32.xlu1 %v3617_v56 }
 0x8a9   :  { %3621 = vmin.xlane.f32.xlu1 %v3620_v58  ;;  %v10213_v58 = vld [vmem:[%s9371_s17] sm:$0xff] }
 0x92e   :  { %v3613_v18 = vpop.xlane.xlu0 %3612 }
 0x92f   :  { %vm3625_vm3 = vcmp.le.f32.partialorder %v3606_v63, %v3613_v18 }
 0x930   :  { %v3629_v19 = vsel %vm3625_vm3, %v10194_v60, 64 }
 0x931   :  { %v3633_v20 = vsel %vm3610_vm2, %v3629_v19, 2147483647 }
 0x932   :  { %v3616_v22 = vpop.xlane.xlu0 %3615  ;;  %v3619_v25 = vpop.xlane.xlu1 %3618  ;;  %v3635_v10 = vshra.s32 %v3633_v20, 16  ;;  %v3634_v7 = vand.u32 65535, %v3633_v20 }
 0x933   :  { %vm3626_vm4 = vcmp.le.f32.partialorder %v3607_v53, %v3616_v22  ;;  %vm3627_vm5 = vcmp.le.f32.partialorder %v3608_v54, %v3619_v25 }
 0x934   :  { %v3630_v16 = vsel %vm3626_vm4, %v10194_v60, 64  ;;  %v3631_v0 = vsel %vm3627_vm5, %v10194_v60, 64  ;;  %v3637_v12 = vcvt.s32.f32 %v3635_v10  ;;  %v3636_v23 = vcvt.s32.f32 %v3634_v7  ;;  %v10306_v7 = vld [vmem:[%s9371_s17 + $0x68] sm:$0xff] }
 0x935   :  { %v3648_v15 = vsel %vm3610_vm2, %v3630_v16, 2147483647  ;;  %v3663_v14 = vsel %vm3610_vm2, %v3631_v0, 2147483647 }
 0x936   :  { %3638 = vmin.xlane.f32.xlu0 %v3637_v12  ;;  %v3622_v1 = vpop.xlane.xlu1 %3621  ;;  %v3650_v8 = vshra.s32 %v3648_v15, 16  ;;  %v3665_v21 = vshra.s32 %v3663_v14, 16  ;;  %v3664_v27 = vand.u32 65535, %v3663_v14  ;;  %v3649_v28 = vand.u32 65535, %v3648_v15  ;;  %v10251_v15 = vld [vmem:[%s9371_s17 + $0x10] sm:$0xff]  ;;  %v10256_v14 = vld [vmem:[%s9371_s17 + $0x18] sm:$0xff] }
 0x937   :  { %vm3628_vm6 = vcmp.le.f32.partialorder %v3609_v57, %v3622_v1  ;;  %v10261_v1 = vld [vmem:[%s9371_s17 + $0x20] sm:$0xff] }
 0x938   :  { %v3632_v24 = vsel %vm3628_vm6, %v10194_v60, 64  ;;  %v3652_v5 = vcvt.s32.f32 %v3650_v8  ;;  %v3667_v2 = vcvt.s32.f32 %v3665_v21  ;;  %v3666_v32 = vcvt.s32.f32 %v3664_v27  ;;  %v10266_v8 = vld [vmem:[%s9371_s17 + $0x28] sm:$0xff]  ;;  %v10271_v21 = vld [vmem:[%s9371_s17 + $0x30] sm:$0xff]  ;;  %v10321_v27 = vld [vmem:[%s9371_s17 + $0x80] sm:$0xff] }
 0x939   :  { %v3678_v9 = vsel %vm3610_vm2, %v3632_v24, 2147483647  ;;  %v3651_v33 = vcvt.s32.f32 %v3649_v28  ;;  %v10276_v24 = vld [vmem:[%s9371_s17 + $0x38] sm:$0xff]  ;;  %v10326_v28 = vld [vmem:[%s9371_s17 + $0x88] sm:$0xff] }
 0x93a   :  { %3653 = vmin.xlane.f32.xlu1 %v3652_v5  ;;  %3668 = vmin.xlane.f32.xlu0 %v3667_v2  ;;  %v3680_v11 = vshra.s32 %v3678_v9, 16  ;;  %v3679_v34 = vand.u32 65535, %v3678_v9  ;;  %v10291_v9 = vld [vmem:[%s9371_s17 + $0x50] sm:$0xff] }
 0x93c   :  { %v3682_v61 = vcvt.s32.f32 %v3680_v11  ;;  %v3681_v38 = vcvt.s32.f32 %v3679_v34  ;;  %v10296_v11 = vld [vmem:[%s9371_s17 + $0x58] sm:$0xff] }
 0x93d   :  { %v10356_v34 = vld [vmem:[%s9371_s17 + $0xb8] sm:$0xff] }
 0x93e   :  { %3683 = vmin.xlane.f32.xlu1 %v3682_v61 }
 0x9c3   :  { %v3639_v17 = vpop.xlane.xlu0 %3638 }
 0x9c4   :  { %vm3640_vm7 = vcmp.eq.f32.partialorder %v3637_v12, %v3639_v17  ;;  %v3645_v42 = vcvt.f32.s32 %v3639_v17  ;;  %v10246_v12 = vld [vmem:[%s9371_s17 + $0x8] sm:$0xff]  ;;  %v10311_v17 = vld [vmem:[%s9371_s17 + $0x70] sm:$0xff] }
 0x9c5   :  { %v3641_v29 = vsel %vm3640_vm7, %v3636_v23, inf  ;;  %v10316_v23 = vld [vmem:[%s9371_s17 + $0x78] sm:$0xff] }
 0x9c6   :  { %3642 = vmin.xlane.f32.xlu0 %v3641_v29  ;;  %v3646_v41 = vshll.u32 %v3645_v42, 16  ;;  %v10331_v29 = vld [vmem:[%s9371_s17 + $0x90] sm:$0xff]  ;;  %v10386_v42 = vld [vmem:[%s9371_s17 + $0xe8] sm:$0xff] }
 0x9c7   :  { %v3669_v30 = vpop.xlane.xlu0 %3668  ;;  %v3654_v31 = vpop.xlane.xlu1 %3653 }
 0x9c8   :  { %vm3670_vm8 = vcmp.eq.f32.partialorder %v3667_v2, %v3669_v30  ;;  %vm3655_vm9 = vcmp.eq.f32.partialorder %v3652_v5, %v3654_v31  ;;  %v3675_v43 = vcvt.f32.s32 %v3669_v30  ;;  %v3660_v39 = vcvt.f32.s32 %v3654_v31  ;;  %v10281_v5 = vld [vmem:[%s9371_s17 + $0x40] sm:$0xff]  ;;  %v10286_v2 = vld [vmem:[%s9371_s17 + $0x48] sm:$0xff]  ;;  %v10336_v30 = vld [vmem:[%s9371_s17 + $0x98] sm:$0xff] }
 0x9c9   :  { %v3671_v35 = vsel %vm3670_vm8, %v3666_v32, inf  ;;  %v3656_v36 = vsel %vm3655_vm9, %v3651_v33, inf  ;;  %v10341_v31 = vld [vmem:[%s9371_s17 + $0xa0] sm:$0xff]  ;;  %v10346_v32 = vld [vmem:[%s9371_s17 + $0xa8] sm:$0xff]  ;;  %v10351_v33 = vld [vmem:[%s9371_s17 + $0xb0] sm:$0xff] }
 0x9ca   :  { %3672 = vmin.xlane.f32.xlu0 %v3671_v35  ;;  %3657 = vmin.xlane.f32.xlu1 %v3656_v36  ;;  %v3676_v47 = vshll.u32 %v3675_v43, 16  ;;  %v3661_v49 = vshll.u32 %v3660_v39, 16  ;;  %v10361_v35 = vld [vmem:[%s9371_s17 + $0xc0] sm:$0xff]  ;;  %v10366_v36 = vld [vmem:[%s9371_s17 + $0xc8] sm:$0xff]  ;;  %v10391_v43 = vld [vmem:[%s9371_s17 + $0xf0] sm:$0xff] }
 0x9cb   :  { %v3684_v37 = vpop.xlane.xlu1 %3683  ;;  %v10396_v39 = vld [vmem:[%s9371_s17 + $0xf8] sm:$0xff] }
 0x9cc   :  { %vm3685_vm10 = vcmp.eq.f32.partialorder %v3682_v61, %v3684_v37  ;;  %v3690_v6 = vcvt.f32.s32 %v3684_v37  ;;  %v10301_v61 = vld [vmem:[%s9371_s17 + $0x60] sm:$0xff]  ;;  %v10371_v37 = vld [vmem:[%s9371_s17 + $0xd0] sm:$0xff] }
 0x9cd   :  { %v3686_v40 = vsel %vm3685_vm10, %v3681_v38, inf  ;;  %v10376_v38 = vld [vmem:[%s9371_s17 + $0xd8] sm:$0xff] }
 0x9ce   :  { %3687 = vmin.xlane.f32.xlu1 %v3686_v40  ;;  %v3691_v52 = vshll.u32 %v3690_v6, 16  ;;  %v10381_v40 = vld [vmem:[%s9371_s17 + $0xe0] sm:$0xff]  ;;  %v3813_v6 = vld [vmem:[%s10815_s14 + $0x38] sm:$0xff] }
 0xa53   :  { %v3643_v44 = vpop.xlane.xlu0 %3642 }
 0xa54   :  { %v3644_v45 = vcvt.f32.s32 %v3643_v44  ;;  %v10401_v44 = vld [vmem:[%s9371_s17 + $0x100] sm:$0xff] }
 0xa56   :  { %v3647_v46 = vadd.s32 %v3646_v41, %v3644_v45  ;;  %v10406_v41 = vld [vmem:[%s9371_s17 + $0x108] sm:$0xff]  ;;  %v10411_v45 = vld [vmem:[%s9371_s17 + $0x110] sm:$0xff] }
 0xa57   :  { %v3673_v3 = vpop.xlane.xlu0 %3672  ;;  %v3658_v13 = vpop.xlane.xlu1 %3657  ;;  %10816 = vst [vmem:[#allocation31_spill] sm:$0xff] %v10406_v41  ;;  %10817 = vst [vmem:[#allocation32_spill] sm:$0xff] %v10411_v45 }
 0xa58   :  { %v3674_v26 = vcvt.f32.s32 %v3673_v3  ;;  %v3659_v62 = vcvt.f32.s32 %v3658_v13  ;;  %vm3693_vm11 = vcmp.eq.s32.totalorder %v10194_v60, %v3647_v46  ;;  %v10416_v46 = vld [vmem:[%s9371_s17 + $0x118] sm:$0xff]  ;;  %v3812_v13 = vld [vmem:[%s10815_s14 + $0x30] sm:$0xff]  ;;  %s10820_s17 = sld [smem:[#allocation17_spill]] }
 0xa59   :  { %v6958_v63 = vsel %vm3693_vm11, 1.0, %v9343_v4  ;;  %10818 = vst [vmem:[#allocation33_spill] sm:$0xff] %v10416_v46 }
 0xa5a   :  { %v3677_v48 = vadd.s32 %v3676_v47, %v3674_v26  ;;  %v3662_v50 = vadd.s32 %v3661_v49, %v3659_v62  ;;  %8164 = vmatprep.mubr.msk.f32.mxu1 %vm3610_vm2, %v6958_v63  ;;  %v3810_v47 = vld [vmem:[%s10815_s14 + $0x20] sm:$0xff]  ;;  %v3811_v49 = vld [vmem:[%s10815_s14 + $0x28] sm:$0xff]  ;;  %v8866_v26 = vpack.c.bf16 %v3813_v6, %v3812_v13 }
 0xa5b   :  { %v3688_v51 = vpop.xlane.xlu1 %3687  ;;  %v8862_v3 = vpack.c.bf16 %v3811_v49, %v3810_v47  ;;  %v3806_v62 = vld [vmem:[%s10815_s14] sm:$0xff] }
 0xa5c   :  { %vm3695_vm12 = vcmp.eq.s32.totalorder %v10194_v60, %v3677_v48  ;;  %vm3694_vm13 = vcmp.eq.s32.totalorder %v10194_v60, %v3662_v50  ;;  %v3689_v53 = vcvt.f32.s32 %v3688_v51  ;;  %v3845_v48 = vld [vmem:[%s10819_s19] sm:$0xff]  ;;  %v3846_v50 = vld [vmem:[%s10819_s19 + $0x8] sm:$0xff] }
 0xa5d   :  { %v6959_v54 = vsel %vm3694_vm13, 1.0, %v9343_v4  ;;  %v6960_v55 = vsel %vm3695_vm12, 1.0, %v9343_v4  ;;  %8863 = vmatprep.subr.bf16.mxu0 %v8862_v3  ;;  %v8934_v51 = vpack.c.bf16 %v3846_v50, %v3845_v48  ;;  %v3814_v49 = vld [vmem:[%s10815_s14 + $0x40] sm:$0xff] }
 0xa5e   :  { %v3692_v56 = vadd.s32 %v3691_v52, %v3689_v53  ;;  %8165 = vmatmul.mubr.msk.f32.vlgmr.msra.gmra.mrb[52].mxu1 %vm3610_vm2, %v6959_v54  ;;  %8865 = vmatpush3.bf16.msra.mxu0 %v8862_v3  ;;  %v3815_v3 = vld [vmem:[%s10815_s14 + $0x48] sm:$0xff] }
 0xa5f   :  { %8167 = vmatprep.mubr.msk.f32.mxu1 %vm3610_vm2, %v6960_v55  ;;  %8867 = vmatprep.subr.bf16.mxu0 %v8866_v26 }
 0xa60   :  { %vm3696_vm14 = vcmp.eq.s32.totalorder %v10194_v60, %v3692_v56  ;;  %v3808_v56 = vld [vmem:[%s10815_s14 + $0x10] sm:$0xff] }
 0xa61   :  { %v6961_v57 = vsel %vm3696_vm14, 1.0, %v9343_v4  ;;  %v3807_v4 = vld [vmem:[%s10815_s14 + $0x8] sm:$0xff] }
 0xa62   :  { %8168 = vmatmul.mubr.msk.f32.gmra.mrb[54].mxu1 %vm3610_vm2, %v6961_v57  ;;  %8869 = vmatpush3.bf16.msra.mxu0 %v8866_v26  ;;  %v8870_v63 = vpack.c.bf16 %v3807_v4, %v3806_v62  ;;  %v3809_v57 = vld [vmem:[%s10815_s14 + $0x18] sm:$0xff]  ;;  %v8878_v26 = vpack.c.bf16 %v3815_v3, %v3814_v49  ;;  %v3816_v62 = vld [vmem:[%s10815_s14 + $0x50] sm:$0xff] }
 0xa63   :  { %8178 = vmatprep.mubr.msk.f32.mxu1 %vm508_vm0, %v10213_v58  ;;  %v8874_v47 = vpack.c.bf16 %v3809_v57, %v3808_v56  ;;  %v3817_v4 = vld [vmem:[%s10815_s14 + $0x58] sm:$0xff]  ;;  %v3818_v56 = vld [vmem:[%s10815_s14 + $0x60] sm:$0xff] }
 0xa64   :  { %8871 = vmatprep.subr.bf16.mxu0 %v8870_v63  ;;  %v8882_v50 = vpack.c.bf16 %v3817_v4, %v3816_v62  ;;  %v3821_v49 = vld [vmem:[%s10815_s14 + $0x78] sm:$0xff]  ;;  %v3824_v62 = vld [vmem:[%s10815_s14 + $0x90] sm:$0xff] }
 0xa65   :  { %v3825_v4 = vld [vmem:[%s10815_s14 + $0x98] sm:$0xff] }
 0xb31   :  { %v10217_v59 = vpop.f32.mrb[52].mxu1 }
 0xb32   :  { %3803 = vst.msk [vmem:[#allocation4 + $0x8] sm:$0xff] %vm508_vm0, %v10217_v59  ;;  %v10769_v18 = vmax.f32 %v10217_v59, 0.0  ;;  %v10222_v19 = vpop.f32.mrb[53].mxu1 }
 0xb33   :  { %3802 = vst.msk [vmem:[#allocation4] sm:$0xff] %vm508_vm0, %v10222_v19  ;;  %v10770_v60 = vmax.f32 %v10222_v19, 0.0 }
 0xb35   :  { %v8854_v20 = vpack.c.bf16 %v10769_v18, %v10770_v60  ;;  %v10231_v22 = vpop.f32.mrb[54].mxu1 }
 0xb36   :  { %3805 = vst.msk [vmem:[#allocation4 + $0x18] sm:$0xff] %vm508_vm0, %v10231_v22  ;;  %v10767_v25 = vmax.f32 %v10231_v22, 0.0  ;;  %v10236_v10 = vpop.f32.mrb[55].mxu1 }
 0xb37   :  { %3804 = vst.msk [vmem:[#allocation4 + $0x10] sm:$0xff] %vm508_vm0, %v10236_v10  ;;  %v10768_v16 = vmax.f32 %v10236_v10, 0.0  ;;  %8855 = vmatprep.subr.bf16.mxu1 %v8854_v20 }
 0xb38   :  { %8857 = vmatpush3.bf16.msra.mxu1 %v8854_v20 }
 0xb39   :  { %v8858_v0 = vpack.c.bf16 %v10767_v25, %v10768_v16 }
 0xb3b   :  { %8859 = vmatprep.subr.bf16.mxu1 %v8858_v0 }
 0xb3c   :  { %8861 = vmatpush3.bf16.msra.mxu1 %v8858_v0 }
 0xb3d   :  { %8935 = vmatprep.subr.bf16.mxu1 %v8934_v51 }
 0xb3f   :  { %8179 = vmatmul.mubr.msk.f32.vlgmr.msra.gmra.mrb[56].mxu1 %vm508_vm0, %v10246_v12 }
 0xb40   :  { %8181 = vmatprep.mubr.msk.f32.mxu1 %vm508_vm0, %v10251_v15  ;;  %8937 = vmatpush3.bf16.msra.mxu1 %v8934_v51 }
 0xb43   :  { %8182 = vmatmul.mubr.msk.f32.gmra.mrb[58].mxu1 %vm508_vm0, %v10256_v14 }
 0xb44   :  { %8184 = vmatprep.mubr.msk.f32.mxu1 %vm508_vm0, %v10261_v1 }
 0xb47   :  { %8185 = vmatmul.mubr.msk.f32.gmra.mrb[60].mxu1 %vm508_vm0, %v10266_v8 }
 0xb48   :  { %8187 = vmatprep.mubr.msk.f32.mxu1 %vm508_vm0, %v10271_v21 }
 0xb4b   :  { %8188 = vmatmul.mubr.msk.f32.gmra.mrb[62].mxu1 %vm508_vm0, %v10276_v24 }
 0xb4c   :  { %8190 = vmatprep.mubr.msk.f32.mxu1 %vm508_vm0, %v10281_v5 }
 0xb4f   :  { %8191 = vmatmul.mubr.msk.f32.gmra.mrb[64].mxu1 %vm508_vm0, %v10286_v2 }
 0xb50   :  { %8193 = vmatprep.mubr.msk.f32.mxu1 %vm508_vm0, %v10291_v9 }
 0xb53   :  { %8194 = vmatmul.mubr.msk.f32.gmra.mrb[66].mxu1 %vm508_vm0, %v10296_v11 }
 0xb54   :  { %8196 = vmatprep.mubr.msk.f32.mxu1 %vm508_vm0, %v10301_v61 }
 0xb57   :  { %8197 = vmatmul.mubr.msk.f32.gmra.mrb[68].mxu1 %vm508_vm0, %v10306_v7 }
 0xb58   :  { %8199 = vmatprep.mubr.msk.f32.mxu1 %vm508_vm0, %v10311_v17 }
 0xb5b   :  { %8200 = vmatmul.mubr.msk.f32.gmra.mrb[70].mxu1 %vm508_vm0, %v10316_v23 }
 0xb5c   :  { %8202 = vmatprep.mubr.msk.f32.mxu1 %vm508_vm0, %v10321_v27 }
 0xb5f   :  { %8203 = vmatmul.mubr.msk.f32.gmra.mrb[72].mxu1 %vm508_vm0, %v10326_v28 }
 0xb60   :  { %8205 = vmatprep.mubr.msk.f32.mxu1 %vm508_vm0, %v10331_v29 }
 0xb63   :  { %8206 = vmatmul.mubr.msk.f32.gmra.mrb[74].mxu1 %vm508_vm0, %v10336_v30 }
 0xb64   :  { %8208 = vmatprep.mubr.msk.f32.mxu1 %vm508_vm0, %v10341_v31 }
 0xb67   :  { %8209 = vmatmul.mubr.msk.f32.gmra.mrb[76].mxu1 %vm508_vm0, %v10346_v32 }
 0xb68   :  { %8211 = vmatprep.mubr.msk.f32.mxu1 %vm508_vm0, %v10351_v33 }
 0xb6b   :  { %8212 = vmatmul.mubr.msk.f32.gmra.mrb[78].mxu1 %vm508_vm0, %v10356_v34 }
 0xb6c   :  { %8214 = vmatprep.mubr.msk.f32.mxu1 %vm508_vm0, %v10361_v35 }
 0xb6f   :  { %8215 = vmatmul.mubr.msk.f32.gmra.mrb[80].mxu1 %vm508_vm0, %v10366_v36 }
 0xb70   :  { %8217 = vmatprep.mubr.msk.f32.mxu1 %vm508_vm0, %v10371_v37 }
 0xb73   :  { %8218 = vmatmul.mubr.msk.f32.gmra.mrb[82].mxu1 %vm508_vm0, %v10376_v38 }
 0xb74   :  { %8220 = vmatprep.mubr.msk.f32.mxu1 %vm508_vm0, %v10381_v40 }
 0xb77   :  { %8221 = vmatmul.mubr.msk.f32.gmra.mrb[84].mxu1 %vm508_vm0, %v10386_v42 }
 0xb78   :  { %8223 = vmatprep.mubr.msk.f32.mxu1 %vm508_vm0, %v10391_v43 }
 0xb7b   :  { %8224 = vmatmul.mubr.msk.f32.gmra.mrb[86].mxu1 %vm508_vm0, %v10396_v39 }
 0xb7c   :  { %8226 = vmatprep.mubr.msk.f32.mxu1 %vm508_vm0, %v10401_v44 }
 0xb7f   :  { %8227 = vmatmul.mubr.msk.f32.gmra.mrb[88].mxu1 %vm508_vm0, %v10406_v41 }
 0xb80   :  { %8229 = vmatprep.mubr.msk.f32.mxu1 %vm508_vm0, %v10411_v45 }
 0xb83   :  { %8230 = vmatmul.mubr.msk.f32.gmra.mrb[90].mxu1 %vm508_vm0, %v10416_v46 }
 0xc12   :  { %v8180_v52 = vpop.f32.mrb[56].mxu1 }
 0xc13   :  { %v3922_v53 = vpop.f32.mrb[57].mxu1 }
 0xc16   :  { %v8183_v54 = vpop.f32.mrb[58].mxu1 }
 0xc17   :  { %v3932_v55 = vpop.f32.mrb[59].mxu1 }
 0xc1a   :  { %v8186_v20 = vpop.f32.mrb[60].mxu1 }
 0xc1b   :  { %v3942_v0 = vpop.f32.mrb[61].mxu1 }
 0xc1c   :  { %8240 = vmatprep.mubr.msk.f32.mxu0 %vm508_vm0, %v3942_v0 }
 0xc1d   :  { %8241 = vmatmul.mubr.msk.f32.vlgmr.msra.gmra.mrb[56].mxu0 %vm508_vm0, %v8186_v20 }
 0xc1e   :  { %v8189_v13 = vpop.f32.mrb[62].mxu1  ;;  %8873 = vmatpush3.bf16.msra.mxu0 %v8870_v63  ;;  %v3819_v63 = vld [vmem:[%s10815_s14 + $0x68] sm:$0xff] }
 0xc1f   :  { %v3952_v6 = vpop.f32.mrb[63].mxu1  ;;  %8875 = vmatprep.subr.bf16.mxu0 %v8874_v47  ;;  %v8886_v20 = vpack.c.bf16 %v3819_v63, %v3818_v56  ;;  %v3826_v56 = vld [vmem:[%s10815_s14 + $0xa0] sm:$0xff]  ;;  %v3827_v63 = vld [vmem:[%s10815_s14 + $0xa8] sm:$0xff] }
 0xc20   :  { %8243 = vmatprep.mubr.msk.f32.mxu0 %vm508_vm0, %v3952_v6 }
 0xc21   :  { %8244 = vmatmul.mubr.msk.f32.gmra.mrb[58].mxu0 %vm508_vm0, %v8189_v13  ;;  %v3823_v13 = vld [vmem:[%s10815_s14 + $0x88] sm:$0xff] }
 0xc22   :  { %8877 = vmatpush3.bf16.msra.mxu0 %v8874_v47  ;;  %8254 = vmatprep.mubr.msk.f32.mxu0 %vm508_vm0, %v3922_v53  ;;  %v8192_v48 = vpop.f32.mrb[64].mxu1  ;;  %v3820_v47 = vld [vmem:[%s10815_s14 + $0x70] sm:$0xff] }
 0xc23   :  { %8879 = vmatprep.subr.bf16.mxu0 %v8878_v26  ;;  %v3962_v51 = vpop.f32.mrb[65].mxu1 }
 0xc25   :  { %8255 = vmatmul.mubr.msk.f32.vlgmr.msra.gmra.mrb[56].mxu0 %vm508_vm0, %v8180_v52  ;;  %v8890_v52 = vpack.c.bf16 %v3821_v49, %v3820_v47  ;;  %v3828_v47 = vld [vmem:[%s10815_s14 + $0xb0] sm:$0xff]  ;;  %v3829_v49 = vld [vmem:[%s10815_s14 + $0xb8] sm:$0xff] }
 0xc26   :  { %8257 = vmatprep.mubr.msk.f32.mxu0 %vm508_vm0, %v3932_v55  ;;  %8881 = vmatpush3.bf16.msra.mxu0 %v8878_v26  ;;  %v8195_v57 = vpop.f32.mrb[66].mxu1  ;;  %v3822_v55 = vld [vmem:[%s10815_s14 + $0x80] sm:$0xff] }
 0xc27   :  { %8883 = vmatprep.subr.bf16.mxu0 %v8882_v50  ;;  %v3972_v0 = vpop.f32.mrb[67].mxu1 }
 0xc29   :  { %8258 = vmatmul.mubr.msk.f32.gmra.mrb[58].mxu0 %vm508_vm0, %v8183_v54  ;;  %v8894_v54 = vpack.c.bf16 %v3823_v13, %v3822_v55  ;;  %v3830_v55 = vld [vmem:[%s10815_s14 + $0xc0] sm:$0xff]  ;;  %v3831_v13 = vld [vmem:[%s10815_s14 + $0xc8] sm:$0xff] }
 0xc2a   :  { %8885 = vmatpush3.bf16.msra.mxu0 %v8882_v50  ;;  %8268 = vmatprep.mubr.msk.f32.mxu0 %vm508_vm0, %v3962_v51  ;;  %v8198_v53 = vpop.f32.mrb[68].mxu1 }
 0xc2b   :  { %8887 = vmatprep.subr.bf16.mxu0 %v8886_v20  ;;  %v3982_v3 = vpop.f32.mrb[69].mxu1 }
 0xc2d   :  { %8269 = vmatmul.mubr.msk.f32.vlgmr.msra.gmra.mrb[56].mxu0 %vm508_vm0, %v8192_v48  ;;  %v8898_v48 = vpack.c.bf16 %v3825_v4, %v3824_v62  ;;  %v3832_v62 = vld [vmem:[%s10815_s14 + $0xd0] sm:$0xff]  ;;  %v3833_v4 = vld [vmem:[%s10815_s14 + $0xd8] sm:$0xff] }
 0xc2e   :  { %8889 = vmatpush3.bf16.msra.mxu0 %v8886_v20  ;;  %8271 = vmatprep.mubr.msk.f32.mxu0 %vm508_vm0, %v3972_v0  ;;  %v8201_v6 = vpop.f32.mrb[70].mxu1 }
 0xc2f   :  { %8891 = vmatprep.subr.bf16.mxu0 %v8890_v52  ;;  %v3992_v26 = vpop.f32.mrb[71].mxu1 }
 0xc31   :  { %8272 = vmatmul.mubr.msk.f32.gmra.mrb[58].mxu0 %vm508_vm0, %v8195_v57  ;;  %v8902_v57 = vpack.c.bf16 %v3827_v63, %v3826_v56  ;;  %v3834_v56 = vld [vmem:[%s10815_s14 + $0xe0] sm:$0xff]  ;;  %v3835_v63 = vld [vmem:[%s10815_s14 + $0xe8] sm:$0xff] }
 0xc32   :  { %8893 = vmatpush3.bf16.msra.mxu0 %v8890_v52  ;;  %8282 = vmatprep.mubr.msk.f32.mxu0 %vm508_vm0, %v3982_v3  ;;  %v8204_v50 = vpop.f32.mrb[72].mxu1 }
 0xc33   :  { %8895 = vmatprep.subr.bf16.mxu0 %v8894_v54  ;;  %v4002_v51 = vpop.f32.mrb[73].mxu1 }
 0xc35   :  { %8283 = vmatmul.mubr.msk.f32.vlgmr.msra.gmra.mrb[56].mxu0 %vm508_vm0, %v8198_v53  ;;  %v8906_v53 = vpack.c.bf16 %v3829_v49, %v3828_v47  ;;  %v3836_v47 = vld [vmem:[%s10815_s14 + $0xf0] sm:$0xff]  ;;  %v3837_v49 = vld [vmem:[%s10815_s14 + $0xf8] sm:$0xff] }
 0xc36   :  { %8897 = vmatpush3.bf16.msra.mxu0 %v8894_v54  ;;  %8285 = vmatprep.mubr.msk.f32.mxu0 %vm508_vm0, %v3992_v26  ;;  %v8207_v20 = vpop.f32.mrb[74].mxu1 }
 0xc37   :  { %8899 = vmatprep.subr.bf16.mxu0 %v8898_v48  ;;  %v4012_v0 = vpop.f32.mrb[75].mxu1 }
 0xc39   :  { %8286 = vmatmul.mubr.msk.f32.gmra.mrb[58].mxu0 %vm508_vm0, %v8201_v6  ;;  %v8910_v6 = vpack.c.bf16 %v3831_v13, %v3830_v55  ;;  %v3838_v55 = vld [vmem:[%s10815_s14 + $0x100] sm:$0xff]  ;;  %v3839_v13 = vld [vmem:[%s10815_s14 + $0x108] sm:$0xff] }
 0xc3a   :  { %8901 = vmatpush3.bf16.msra.mxu0 %v8898_v48  ;;  %8296 = vmatprep.mubr.msk.f32.mxu0 %vm508_vm0, %v4002_v51  ;;  %v8210_v52 = vpop.f32.mrb[76].mxu1 }
 0xc3b   :  { %8903 = vmatprep.subr.bf16.mxu0 %v8902_v57  ;;  %v4022_v3 = vpop.f32.mrb[77].mxu1 }
 0xc3d   :  { %8297 = vmatmul.mubr.msk.f32.vlgmr.msra.gmra.mrb[56].mxu0 %vm508_vm0, %v8204_v50  ;;  %v8914_v50 = vpack.c.bf16 %v3833_v4, %v3832_v62  ;;  %v3840_v62 = vld [vmem:[%s10815_s14 + $0x110] sm:$0xff]  ;;  %v3841_v4 = vld [vmem:[%s10815_s14 + $0x118] sm:$0xff] }
 0xc3e   :  { %8905 = vmatpush3.bf16.msra.mxu0 %v8902_v57  ;;  %8299 = vmatprep.mubr.msk.f32.mxu0 %vm508_vm0, %v4012_v0  ;;  %v8213_v54 = vpop.f32.mrb[78].mxu1 }
 0xc3f   :  { %8907 = vmatprep.subr.bf16.mxu0 %v8906_v53  ;;  %v4032_v26 = vpop.f32.mrb[79].mxu1 }
 0xc41   :  { %8300 = vmatmul.mubr.msk.f32.gmra.mrb[58].mxu0 %vm508_vm0, %v8207_v20  ;;  %v8918_v20 = vpack.c.bf16 %v3835_v63, %v3834_v56 }
 0xc42   :  { %8909 = vmatpush3.bf16.msra.mxu0 %v8906_v53  ;;  %8310 = vmatprep.mubr.msk.f32.mxu0 %vm508_vm0, %v4022_v3  ;;  %v8216_v48 = vpop.f32.mrb[80].mxu1 }
 0xc43   :  { %8911 = vmatprep.subr.bf16.mxu0 %v8910_v6  ;;  %v4042_v51 = vpop.f32.mrb[81].mxu1 }
 0xc45   :  { %8311 = vmatmul.mubr.msk.f32.vlgmr.msra.gmra.mrb[56].mxu0 %vm508_vm0, %v8210_v52  ;;  %v8922_v52 = vpack.c.bf16 %v3837_v49, %v3836_v47  ;;  %v7038_v47 = vld [vmem:[%s10820_s17] ss:$0 sm:$0xff] }
 0xc46   :  { %8913 = vmatpush3.bf16.msra.mxu0 %v8910_v6  ;;  %8313 = vmatprep.mubr.msk.f32.mxu0 %vm508_vm0, %v4032_v26  ;;  %v8219_v57 = vpop.f32.mrb[82].mxu1  ;;  %v8926_v26 = vpack.c.bf16 %v3839_v13, %v3838_v55 }
 0xc47   :  { %8915 = vmatprep.subr.bf16.mxu0 %v8914_v50  ;;  %v4052_v0 = vpop.f32.mrb[83].mxu1 }
 0xc49   :  { %8314 = vmatmul.mubr.msk.f32.gmra.mrb[58].mxu0 %vm508_vm0, %v8213_v54 }
 0xc4a   :  { %8917 = vmatpush3.bf16.msra.mxu0 %v8914_v50  ;;  %8324 = vmatprep.mubr.msk.f32.mxu0 %vm508_vm0, %v4042_v51  ;;  %v8222_v53 = vpop.f32.mrb[84].mxu1  ;;  %v8930_v51 = vpack.c.bf16 %v3841_v4, %v3840_v62 }
 0xc4b   :  { %8919 = vmatprep.subr.bf16.mxu0 %v8918_v20  ;;  %v4062_v3 = vpop.f32.mrb[85].mxu1 }
 0xc4d   :  { %8325 = vmatmul.mubr.msk.f32.vlgmr.msra.gmra.mrb[56].mxu0 %vm508_vm0, %v8216_v48 }
 0xc4e   :  { %8921 = vmatpush3.bf16.msra.mxu0 %v8918_v20  ;;  %8327 = vmatprep.mubr.msk.f32.mxu0 %vm508_vm0, %v4052_v0  ;;  %v8225_v6 = vpop.f32.mrb[86].mxu1  ;;  %v3848_v20 = vld [vmem:[%s10819_s19 + $0x18] sm:$0xff] }
 0xc4f   :  { %8923 = vmatprep.subr.bf16.mxu0 %v8922_v52  ;;  %v4072_v54 = vpop.f32.mrb[87].mxu1 }
 0xc51   :  { %8328 = vmatmul.mubr.msk.f32.gmra.mrb[58].mxu0 %vm508_vm0, %v8219_v57  ;;  %v3847_v57 = vld [vmem:[%s10819_s19 + $0x10] sm:$0xff] }
 0xc52   :  { %8925 = vmatpush3.bf16.msra.mxu0 %v8922_v52  ;;  %8338 = vmatprep.mubr.msk.f32.mxu0 %vm508_vm0, %v4062_v3  ;;  %v8228_v50 = vpop.f32.mrb[88].mxu1  ;;  %v8938_v0 = vpack.c.bf16 %v3848_v20, %v3847_v57 }
 0xc53   :  { %8927 = vmatprep.subr.bf16.mxu0 %v8926_v26  ;;  %v4082_v48 = vpop.f32.mrb[89].mxu1 }
 0xc54   :  { %8939 = vmatprep.subr.bf16.mxu1 %v8938_v0 }
 0xc55   :  { %8339 = vmatmul.mubr.msk.f32.vlgmr.msra.gmra.mrb[56].mxu0 %vm508_vm0, %v8222_v53  ;;  %8941 = vmatpush3.bf16.msra.mxu1 %v8938_v0 }
 0xc56   :  { %8929 = vmatpush3.bf16.msra.mxu0 %v8926_v26  ;;  %8341 = vmatprep.mubr.msk.f32.mxu0 %vm508_vm0, %v4072_v54  ;;  %v8231_v56 = vpop.f32.mrb[90].mxu1 }
 0xc57   :  { %8931 = vmatprep.subr.bf16.mxu0 %v8930_v51  ;;  %v4092_v63 = vpop.f32.mrb[91].mxu1 }
 0xc59   :  { %8342 = vmatmul.mubr.msk.f32.gmra.mrb[58].mxu0 %vm508_vm0, %v8225_v6 }
 0xc5a   :  { %8933 = vmatpush3.bf16.msra.mxu0 %v8930_v51  ;;  %8352 = vmatprep.mubr.msk.f32.mxu0 %vm508_vm0, %v4082_v48 }
 0xc5d   :  { %8353 = vmatmul.mubr.msk.f32.vlgmr.msra.gmra.mrb[56].mxu0 %vm508_vm0, %v8228_v50 }
 0xc5e   :  { %8355 = vmatprep.mubr.msk.f32.mxu0 %vm508_vm0, %v4092_v63 }
 0xc61   :  { %8356 = vmatmul.mubr.msk.f32.gmra.mrb[58].mxu0 %vm508_vm0, %v8231_v56 }
 0xd30   :  { %v8354_v49 = vpop.f32.mrb[56].mxu0 }
 0xd31   :  { %v5009_v53 = vadd.f32 %v8354_v49, %v7038_v47  ;;  %v4979_v52 = vpop.f32.mrb[57].mxu0 }
 0xd32   :  { %v5008_v3 = vadd.f32 %v7038_v47, %v4979_v52 }
 0xd33   :  { %v5013_v55 = vsel %vm508_vm0, %v5009_v53, 0.0  ;;  %v5027_v13 = vmul.f32 %v5009_v53, %v5009_v53 }
 0xd34   :  { %v5012_v6 = vsel %vm508_vm0, %v5008_v3, 0.0  ;;  %v5026_v26 = vmul.f32 %v5008_v3, %v5008_v3  ;;  %v8357_v54 = vpop.f32.mrb[58].mxu0 }
 0xd35   :  { %v5031_v62 = vsel %vm508_vm0, %v5027_v13, 0.0  ;;  %v5014_v4 = vadd.f32 %v5013_v55, %v5012_v6  ;;  %v5011_v50 = vadd.f32 %v8357_v54, %v7038_v47  ;;  %v4989_v51 = vpop.f32.mrb[59].mxu0 }
 0xd36   :  { %v5030_v48 = vsel %vm508_vm0, %v5026_v26, 0.0  ;;  %v5010_v56 = vadd.f32 %v7038_v47, %v4989_v51 }
 0xd37   :  { %v5032_v63 = vadd.f32 %v5031_v62, %v5030_v48  ;;  %v5029_v57 = vmul.f32 %v5011_v50, %v5011_v50  ;;  %v5017_v52 = vsel %vm508_vm0, %v5011_v50, 0.0 }
 0xd38   :  { %v5015_v20 = vsel %vm508_vm0, %v5010_v56, 0.0  ;;  %v5028_v0 = vmul.f32 %v5010_v56, %v5010_v56 }
 0xd39   :  { %v5016_v49 = vadd.f32 %v5015_v20, %v5014_v4  ;;  %v5035_v13 = vsel %vm508_vm0, %v5029_v57, 0.0 }
 0xd3a   :  { %v5033_v25 = vsel %vm508_vm0, %v5028_v0, 0.0 }
 0xd3b   :  { %v5018_v16 = vadd.f32 %v5017_v52, %v5016_v49  ;;  %v5034_v18 = vadd.f32 %v5033_v25, %v5032_v63 }
 0xd3d   :  { %v5019_v55 = vrot.slane %v5018_v16, 4  ;;  %v5036_v6 = vadd.f32 %v5035_v13, %v5034_v18 }
 0xd3f   :  { %v5020_v54 = vadd.f32 %v5019_v55, %v5018_v16  ;;  %v5037_v60 = vrot.slane %v5036_v6, 4  ;;  %v7039_v55 = vld [vmem:[%s10821_s24] ss:$0 sm:$0xff] }
 0xd41   :  { %v5021_v26 = vrot.slane %v5020_v54, 2  ;;  %v5038_v47 = vadd.f32 %v5037_v60, %v5036_v6 }
 0xd43   :  { %v5022_v62 = vadd.f32 %v5021_v26, %v5020_v54  ;;  %v5039_v51 = vrot.slane %v5038_v47, 2 }
 0xd45   :  { %v5023_v48 = vrot.slane %v5022_v62, 1  ;;  %v5040_v46 = vadd.f32 %v5039_v51, %v5038_v47 }
 0xd47   :  { %v5024_v4 = vadd.f32 %v5023_v48, %v5022_v62  ;;  %v5041_v20 = vrot.slane %v5040_v46, 1  ;;  %v7040_v62 = vld [vmem:[%s10822_s30] ss:$0 sm:$0xff] }
 0xd49   :  { %v5025_v45 = vmul.f32 0.03125, %v5024_v4  ;;  %v5042_v41 = vadd.f32 %v5041_v20, %v5040_v46 }
 0xd4b   :  { %v5043_v0 = vmul.f32 0.03125, %v5042_v41  ;;  %v5044_v25 = vmul.f32 %v5025_v45, %v5025_v45  ;;  %v5048_v63 = vsub.f32 %v5009_v53, %v5025_v45  ;;  %v5049_v57 = vsub.f32 %v5010_v56, %v5025_v45 }
 0xd4c   :  { %v5047_v49 = vsub.f32 %v5008_v3, %v5025_v45  ;;  %v5050_v18 = vsub.f32 %v5011_v50, %v5025_v45 }
 0xd4d   :  { %v5045_v16 = vsub.f32 %v5043_v0, %v5044_v25  ;;  %v7041_v25 = vld [vmem:[%s10823_s6] ss:$0 sm:$0xff] }
 0xd4f   :  { %v5046_v52 = vmax.f32 %v5045_v16, 0.0 }
 0xd51   :  { %v5051_v13 = vadd.f32 1e-05, %v5046_v52 }
 0xd53   :  { %9211 = vrsqrt.f32 %v5051_v13 }
 0xd5d   :  { %v9212_v60 = vpop.eup %9211 }
 0xd5e   :  { %v5054_v6 = vmul.f32 %v9212_v60, %v5048_v63  ;;  %v5055_v54 = vmul.f32 %v9212_v60, %v5049_v57  ;;  %v5053_v26 = vmul.f32 %v9212_v60, %v5047_v49  ;;  %v5056_v47 = vmul.f32 %v9212_v60, %v5050_v18 }
 0xd60   :  { %v5064_v51 = vmul.f32 %v7039_v55, %v5054_v6  ;;  %v5065_v46 = vmul.f32 %v7039_v55, %v5055_v54  ;;  %v5063_v41 = vmul.f32 %v7039_v55, %v5053_v26  ;;  %v5066_v48 = vmul.f32 %v7039_v55, %v5056_v47 }
 0xd62   :  { %v5073_v53 = vadd.f32 %v7040_v62, %v5063_v41  ;;  %v5074_v56 = vadd.f32 %v7040_v62, %v5064_v51  ;;  %v5075_v3 = vadd.f32 %v7040_v62, %v5065_v46  ;;  %v5076_v4 = vadd.f32 %v7040_v62, %v5066_v48  ;;  %v5257_v51 = vld [vmem:[%s10824_s12 + $0x20] sm:$0xff]  ;;  %v5258_v46 = vld [vmem:[%s10824_s12 + $0x28] sm:$0xff] }
 0xd63   :  { %v8950_v48 = vpack.c.bf16 %v5258_v46, %v5257_v51 }
 0xd64   :  { %v5077_v45 = vmax.f32 %v5073_v53, 0.0  ;;  %v5078_v50 = vmax.f32 %v5074_v56, 0.0  ;;  %v5079_v20 = vmax.f32 %v5075_v3, 0.0  ;;  %v5080_v0 = vmax.f32 %v5076_v4, 0.0 }
 0xd65   :  { %8951 = vmatprep.subr.bf16.mxu0 %v8950_v48 }
 0xd66   :  { %8366 = vmatprep.mubr.msk.f32.mxu1 %vm508_vm0, %v5077_v45  ;;  %8953 = vmatpush3.bf16.msra.mxu0 %v8950_v48 }
 0xd67   :  { %8367 = vmatmul.mubr.msk.f32.vlgmr.msra.gmra.mrb[92].mxu1 %vm508_vm0, %v5078_v50 }
 0xd68   :  { %8369 = vmatprep.mubr.msk.f32.mxu1 %vm508_vm0, %v5079_v20 }
 0xd6b   :  { %8370 = vmatmul.mubr.msk.f32.gmra.mrb[94].mxu1 %vm508_vm0, %v5080_v0 }
 0xd6c   :  { %8380 = vmatprep.mubr.msk.f32.mxu1 %vm508_vm0, %v10213_v58 }
 0xe3a   :  { %v8368_v63 = vpop.f32.mrb[92].mxu1 }
 0xe3b   :  { %v5171_v57 = vadd.f32 %v8368_v63, %v7041_v25  ;;  %v5165_v49 = vpop.f32.mrb[93].mxu1 }
 0xe3c   :  { %v5166_v18 = vadd.f32 %v7041_v25, %v5165_v49 }
 0xe3d   :  { %v5185_v16 = vsel %vm508_vm0, %v5171_v57, 0.0  ;;  %v5199_v52 = vmul.f32 %v5171_v57, %v5171_v57 }
 0xe3e   :  { %v5184_v13 = vsel %vm508_vm0, %v5166_v18, 0.0  ;;  %v5198_v60 = vmul.f32 %v5166_v18, %v5166_v18  ;;  %v8371_v55 = vpop.f32.mrb[94].mxu1 }
 0xe3f   :  { %v5203_v6 = vsel %vm508_vm0, %v5199_v52, 0.0  ;;  %v5186_v54 = vadd.f32 %v5185_v16, %v5184_v13  ;;  %v5181_v26 = vadd.f32 %v8371_v55, %v7041_v25  ;;  %v5175_v47 = vpop.f32.mrb[95].mxu1 }
 0xe40   :  { %v5202_v58 = vsel %vm508_vm0, %v5198_v60, 0.0  ;;  %v5176_v62 = vadd.f32 %v7041_v25, %v5175_v47 }
 0xe41   :  { %v5204_v41 = vadd.f32 %v5203_v6, %v5202_v58  ;;  %v5201_v53 = vmul.f32 %v5181_v26, %v5181_v26  ;;  %v5189_v50 = vsel %vm508_vm0, %v5181_v26, 0.0 }
 0xe42   :  { %v5187_v56 = vsel %vm508_vm0, %v5176_v62, 0.0  ;;  %v5200_v3 = vmul.f32 %v5176_v62, %v5176_v62 }
 0xe43   :  { %v5188_v45 = vadd.f32 %v5187_v56, %v5186_v54  ;;  %v5207_v63 = vsel %vm508_vm0, %v5201_v53, 0.0 }
 0xe44   :  { %v5205_v4 = vsel %vm508_vm0, %v5200_v3, 0.0 }
 0xe45   :  { %v5190_v20 = vadd.f32 %v5189_v50, %v5188_v45  ;;  %v5206_v0 = vadd.f32 %v5205_v4, %v5204_v41 }
 0xe47   :  { %v5191_v25 = vrot.slane %v5190_v20, 4  ;;  %v5208_v49 = vadd.f32 %v5207_v63, %v5206_v0 }
 0xe49   :  { %v5192_v16 = vadd.f32 %v5191_v25, %v5190_v20  ;;  %v5209_v52 = vrot.slane %v5208_v49, 4  ;;  %v7046_v25 = vld [vmem:[%s10825_s28] ss:$0 sm:$0xff] }
 0xe4b   :  { %v5193_v13 = vrot.slane %v5192_v16, 2  ;;  %v5210_v60 = vadd.f32 %v5209_v52, %v5208_v49 }
 0xe4d   :  { %v5194_v55 = vadd.f32 %v5193_v13, %v5192_v16  ;;  %v5211_v6 = vrot.slane %v5210_v60, 2 }
 0xe4f   :  { %v5195_v47 = vrot.slane %v5194_v55, 1  ;;  %v5212_v54 = vadd.f32 %v5211_v6, %v5210_v60  ;;  %v7047_v60 = vld [vmem:[%s10826_s1] ss:$0 sm:$0xff] }
 0xe51   :  { %v5196_v58 = vadd.f32 %v5195_v47, %v5194_v55  ;;  %v5213_v51 = vrot.slane %v5212_v54, 1 }
 0xe53   :  { %v5197_v46 = vmul.f32 0.03125, %v5196_v58  ;;  %v5214_v56 = vadd.f32 %v5213_v51, %v5212_v54 }
 0xe55   :  { %v5215_v48 = vmul.f32 0.03125, %v5214_v56  ;;  %v5216_v41 = vmul.f32 %v5197_v46, %v5197_v46  ;;  %v5221_v3 = vsub.f32 %v5176_v62, %v5197_v46  ;;  %v5219_v53 = vsub.f32 %v5166_v18, %v5197_v46 }
 0xe56   :  { %v5220_v45 = vsub.f32 %v5171_v57, %v5197_v46  ;;  %v5222_v50 = vsub.f32 %v5181_v26, %v5197_v46  ;;  %v10827_v26 = vmax.f32 %v10222_v19, 0.0  ;;  %v10828_v46 = vmax.f32 %v10217_v59, 0.0 }
 0xe57   :  { %v5217_v4 = vsub.f32 %v5215_v48, %v5216_v41  ;;  %v10829_v48 = vmax.f32 %v10236_v10, 0.0  ;;  %v10832_v10 = vld [vmem:[#allocation31_spill] sm:$0xff] }
 0xe59   :  { %v5218_v20 = vmax.f32 %v5217_v4, 0.0 }
 0xe5b   :  { %v5223_v0 = vadd.f32 1e-05, %v5218_v20 }
 0xe5d   :  { %9213 = vrsqrt.f32 %v5223_v0 }
 0xe67   :  { %v9214_v63 = vpop.eup %9213 }
 0xe68   :  { %v5227_v49 = vmul.f32 %v9214_v63, %v5221_v3  ;;  %v5225_v16 = vmul.f32 %v9214_v63, %v5219_v53  ;;  %v5226_v52 = vmul.f32 %v9214_v63, %v5220_v45  ;;  %v5228_v13 = vmul.f32 %v9214_v63, %v5222_v50 }
 0xe69   :  { %v10830_v3 = vmax.f32 %v10231_v22, 0.0 }
 0xe6a   :  { %v5237_v55 = vmul.f32 %v7046_v25, %v5227_v49  ;;  %v5235_v6 = vmul.f32 %v7046_v25, %v5225_v16  ;;  %v5236_v47 = vmul.f32 %v7046_v25, %v5226_v52  ;;  %v5238_v54 = vmul.f32 %v7046_v25, %v5228_v13  ;;  %v5267_v25 = vld [vmem:[%s10824_s12 + $0x70] sm:$0xff]  ;;  %v5268_v49 = vld [vmem:[%s10824_s12 + $0x78] sm:$0xff] }
 0xe6b   :  { %v8978_v52 = vpack.c.bf16 %v5268_v49, %v5267_v25  ;;  %v5294_v49 = vld [vmem:[%s10831_s2 + $0x10] sm:$0xff] }
 0xe6c   :  { %v5245_v58 = vadd.f32 %v7047_v60, %v5235_v6  ;;  %v5246_v62 = vadd.f32 %v7047_v60, %v5236_v47  ;;  %v5247_v18 = vadd.f32 %v7047_v60, %v5237_v55  ;;  %v5248_v57 = vadd.f32 %v7047_v60, %v5238_v54  ;;  %v5269_v60 = vld [vmem:[%s10824_s12 + $0x80] sm:$0xff]  ;;  %v5270_v55 = vld [vmem:[%s10824_s12 + $0x88] sm:$0xff] }
 0xe6d   :  { %v8982_v47 = vpack.c.bf16 %v5270_v55, %v5269_v60 }
 0xe6e   :  { %v10528_v51 = vadd.f32 %v5245_v58, %v10827_v26  ;;  %v10532_v56 = vadd.f32 %v5246_v62, %v10828_v46  ;;  %v10536_v41 = vadd.f32 %v5247_v18, %v10829_v48  ;;  %v10540_v53 = vadd.f32 %v5248_v57, %v10830_v3  ;;  %v5271_v58 = vld [vmem:[%s10824_s12 + $0x90] sm:$0xff]  ;;  %v5272_v62 = vld [vmem:[%s10824_s12 + $0x98] sm:$0xff]  ;;  %v5273_v46 = vld [vmem:[%s10824_s12 + $0xa0] sm:$0xff] }
 0xe6f   :  { %v8986_v57 = vpack.c.bf16 %v5272_v62, %v5271_v58  ;;  %v5274_v48 = vld [vmem:[%s10824_s12 + $0xa8] sm:$0xff] }
 0xe70   :  { %v5299_v45 = vmax.f32 %v10528_v51, 0.0  ;;  %v5300_v50 = vmax.f32 %v10532_v56, 0.0  ;;  %v5301_v19 = vmax.f32 %v10536_v41, 0.0  ;;  %v5302_v4 = vmax.f32 %v10540_v53, 0.0 }
 0xe72   :  { %v8942_v59 = vpack.c.bf16 %v5300_v50, %v5299_v45  ;;  %v8946_v22 = vpack.c.bf16 %v5302_v4, %v5301_v19 }
 0xe74   :  { %8943 = vmatprep.subr.bf16.mxu1 %v8942_v59 }
 0xe75   :  { %8945 = vmatpush3.bf16.msra.mxu1 %v8942_v59  ;;  %v8990_v59 = vpack.c.bf16 %v5274_v48, %v5273_v46 }
 0xe76   :  { %8947 = vmatprep.subr.bf16.mxu1 %v8946_v22 }
 0xe79   :  { %8949 = vmatpush3.bf16.msra.mxu1 %v8946_v22 }
 0xe7c   :  { %8381 = vmatmul.mubr.msk.f32.vlgmr.msra.gmra.mrb[96].mxu1 %vm508_vm0, %v10246_v12  ;;  %v10833_v12 = vld [vmem:[#allocation32_spill] sm:$0xff] }
 0xe7d   :  { %8383 = vmatprep.mubr.msk.f32.mxu1 %vm508_vm0, %v10251_v15  ;;  %v10834_v15 = vld [vmem:[#allocation33_spill] sm:$0xff] }
 0xe80   :  { %8384 = vmatmul.mubr.msk.f32.gmra.mrb[98].mxu1 %vm508_vm0, %v10256_v14  ;;  %v5259_v14 = vld [vmem:[%s10824_s12 + $0x30] sm:$0xff] }
 0xe81   :  { %8386 = vmatprep.mubr.msk.f32.mxu1 %vm508_vm0, %v10261_v1  ;;  %v5260_v1 = vld [vmem:[%s10824_s12 + $0x38] sm:$0xff] }
 0xe84   :  { %8387 = vmatmul.mubr.msk.f32.gmra.mrb[100].mxu1 %vm508_vm0, %v10266_v8  ;;  %v8954_v8 = vpack.c.bf16 %v5260_v1, %v5259_v14 }
 0xe85   :  { %8389 = vmatprep.mubr.msk.f32.mxu1 %vm508_vm0, %v10271_v21  ;;  %v5253_v21 = vld [vmem:[%s10824_s12] sm:$0xff] }
 0xe86   :  { %8955 = vmatprep.subr.bf16.mxu0 %v8954_v8 }
 0xe87   :  { %8957 = vmatpush3.bf16.msra.mxu0 %v8954_v8  ;;  %v5277_v8 = vld [vmem:[%s10824_s12 + $0xc0] sm:$0xff] }
 0xe88   :  { %8390 = vmatmul.mubr.msk.f32.gmra.mrb[102].mxu1 %vm508_vm0, %v10276_v24  ;;  %v5254_v24 = vld [vmem:[%s10824_s12 + $0x8] sm:$0xff] }
 0xe89   :  { %8392 = vmatprep.mubr.msk.f32.mxu1 %vm508_vm0, %v10281_v5  ;;  %v8958_v5 = vpack.c.bf16 %v5254_v24, %v5253_v21  ;;  %v5278_v21 = vld [vmem:[%s10824_s12 + $0xc8] sm:$0xff] }
 0xe8b   :  { %8959 = vmatprep.subr.bf16.mxu0 %v8958_v5 }
 0xe8c   :  { %8393 = vmatmul.mubr.msk.f32.gmra.mrb[104].mxu1 %vm508_vm0, %v10286_v2  ;;  %v5292_v2 = vld [vmem:[%s10831_s2] sm:$0xff] }
 0xe8d   :  { %8395 = vmatprep.mubr.msk.f32.mxu1 %vm508_vm0, %v10291_v9  ;;  %v5293_v9 = vld [vmem:[%s10831_s2 + $0x8] sm:$0xff] }
 0xe90   :  { %8396 = vmatmul.mubr.msk.f32.gmra.mrb[106].mxu1 %vm508_vm0, %v10296_v11  ;;  %v9022_v11 = vpack.c.bf16 %v5293_v9, %v5292_v2  ;;  %v5279_v9 = vld [vmem:[%s10824_s12 + $0xd0] sm:$0xff] }
 0xe91   :  { %8398 = vmatprep.mubr.msk.f32.mxu1 %vm508_vm0, %v10301_v61 }
 0xe92   :  { %9023 = vmatprep.subr.bf16.mxu1 %v9022_v11 }
 0xe93   :  { %9025 = vmatpush3.bf16.msra.mxu1 %v9022_v11  ;;  %v5280_v11 = vld [vmem:[%s10824_s12 + $0xd8] sm:$0xff] }
 0xe94   :  { %8399 = vmatmul.mubr.msk.f32.gmra.mrb[108].mxu1 %vm508_vm0, %v10306_v7 }
 0xe95   :  { %8401 = vmatprep.mubr.msk.f32.mxu1 %vm508_vm0, %v10311_v17 }
 0xe98   :  { %8402 = vmatmul.mubr.msk.f32.gmra.mrb[110].mxu1 %vm508_vm0, %v10316_v23 }
 0xe99   :  { %8404 = vmatprep.mubr.msk.f32.mxu1 %vm508_vm0, %v10321_v27  ;;  %v5255_v27 = vld [vmem:[%s10824_s12 + $0x10] sm:$0xff] }
 0xe9c   :  { %8405 = vmatmul.mubr.msk.f32.gmra.mrb[112].mxu1 %vm508_vm0, %v10326_v28  ;;  %v5256_v28 = vld [vmem:[%s10824_s12 + $0x18] sm:$0xff] }
 0xe9d   :  { %8407 = vmatprep.mubr.msk.f32.mxu1 %vm508_vm0, %v10331_v29 }
 0xea0   :  { %8408 = vmatmul.mubr.msk.f32.gmra.mrb[114].mxu1 %vm508_vm0, %v10336_v30 }
 0xea1   :  { %8410 = vmatprep.mubr.msk.f32.mxu1 %vm508_vm0, %v10341_v31  ;;  %v8962_v31 = vpack.c.bf16 %v5256_v28, %v5255_v27  ;;  %v5282_v27 = vld [vmem:[%s10824_s12 + $0xe8] sm:$0xff] }
 0xea4   :  { %8411 = vmatmul.mubr.msk.f32.gmra.mrb[116].mxu1 %vm508_vm0, %v10346_v32  ;;  %v5261_v32 = vld [vmem:[%s10824_s12 + $0x40] sm:$0xff] }
 0xea5   :  { %8413 = vmatprep.mubr.msk.f32.mxu1 %vm508_vm0, %v10351_v33  ;;  %v5262_v33 = vld [vmem:[%s10824_s12 + $0x48] sm:$0xff] }
 0xea8   :  { %8414 = vmatmul.mubr.msk.f32.gmra.mrb[118].mxu1 %vm508_vm0, %v10356_v34 }
 0xea9   :  { %8416 = vmatprep.mubr.msk.f32.mxu1 %vm508_vm0, %v10361_v35 }
 0xeac   :  { %8417 = vmatmul.mubr.msk.f32.gmra.mrb[120].mxu1 %vm508_vm0, %v10366_v36  ;;  %v8966_v36 = vpack.c.bf16 %v5262_v33, %v5261_v32  ;;  %v5284_v32 = vld [vmem:[%s10824_s12 + $0xf8] sm:$0xff] }
 0xead   :  { %8419 = vmatprep.mubr.msk.f32.mxu1 %vm508_vm0, %v10371_v37  ;;  %v5263_v37 = vld [vmem:[%s10824_s12 + $0x50] sm:$0xff] }
 0xeb0   :  { %8420 = vmatmul.mubr.msk.f32.gmra.mrb[122].mxu1 %vm508_vm0, %v10376_v38  ;;  %v5264_v38 = vld [vmem:[%s10824_s12 + $0x58] sm:$0xff] }
 0xeb1   :  { %8422 = vmatprep.mubr.msk.f32.mxu1 %vm508_vm0, %v10381_v40 }
 0xeb4   :  { %8423 = vmatmul.mubr.msk.f32.gmra.mrb[124].mxu1 %vm508_vm0, %v10386_v42  ;;  %v8970_v42 = vpack.c.bf16 %v5264_v38, %v5263_v37  ;;  %v5286_v37 = vld [vmem:[%s10824_s12 + $0x108] sm:$0xff] }
 0xeb5   :  { %8425 = vmatprep.mubr.msk.f32.mxu1 %vm508_vm0, %v10391_v43 }
 0xeb8   :  { %8426 = vmatmul.mubr.msk.f32.gmra.mrb[126].mxu1 %vm508_vm0, %v10396_v39  ;;  %v5265_v39 = vld [vmem:[%s10824_s12 + $0x60] sm:$0xff] }
 0xeb9   :  { %8428 = vmatprep.mubr.msk.f32.mxu1 %vm508_vm0, %v10401_v44  ;;  %v5266_v44 = vld [vmem:[%s10824_s12 + $0x68] sm:$0xff] }
 0xeba   :  { %v8974_v0 = vpack.c.bf16 %v5266_v44, %v5265_v39  ;;  %v5288_v39 = vld [vmem:[%s10824_s12 + $0x118] sm:$0xff] }
 0xebc   :  { %8429 = vmatmul.mubr.msk.f32.gmra.mrb[128].mxu1 %vm508_vm0, %v10832_v10  ;;  %v5275_v10 = vld [vmem:[%s10824_s12 + $0xb0] sm:$0xff] }
 0xebd   :  { %8431 = vmatprep.mubr.msk.f32.mxu1 %vm508_vm0, %v10833_v12  ;;  %v5276_v12 = vld [vmem:[%s10824_s12 + $0xb8] sm:$0xff] }
 0xebe   :  { %v8994_v14 = vpack.c.bf16 %v5276_v12, %v5275_v10 }
 0xec0   :  { %8432 = vmatmul.mubr.msk.f32.gmra.mrb[130].mxu1 %vm508_vm0, %v10834_v15 }
 0xf4f   :  { %v8382_v61 = vpop.f32.mrb[96].mxu1 }
 0xf50   :  { %v5369_v7 = vpop.f32.mrb[97].mxu1 }
 0xf53   :  { %v8385_v17 = vpop.f32.mrb[98].mxu1 }
 0xf54   :  { %v5379_v23 = vpop.f32.mrb[99].mxu1 }
 0xf57   :  { %v8388_v29 = vpop.f32.mrb[100].mxu1 }
 0xf58   :  { %v5389_v30 = vpop.f32.mrb[101].mxu1 }
 0xf59   :  { %8442 = vmatprep.mubr.msk.f32.mxu0 %vm508_vm0, %v5389_v30 }
 0xf5a   :  { %8443 = vmatmul.mubr.msk.f32.vlgmr.msra.gmra.mrb[60].mxu0 %vm508_vm0, %v8388_v29 }
 0xf5b   :  { %v8391_v34 = vpop.f32.mrb[102].mxu1  ;;  %8961 = vmatpush3.bf16.msra.mxu0 %v8958_v5  ;;  %v8998_v5 = vpack.c.bf16 %v5278_v21, %v5277_v8 }
 0xf5c   :  { %v5399_v35 = vpop.f32.mrb[103].mxu1  ;;  %8963 = vmatprep.subr.bf16.mxu0 %v8962_v31 }
 0xf5d   :  { %8445 = vmatprep.mubr.msk.f32.mxu0 %vm508_vm0, %v5399_v35 }
 0xf5e   :  { %8446 = vmatmul.mubr.msk.f32.gmra.mrb[62].mxu0 %vm508_vm0, %v8391_v34 }
 0xf5f   :  { %8965 = vmatpush3.bf16.msra.mxu0 %v8962_v31  ;;  %8456 = vmatprep.mubr.msk.f32.mxu0 %vm508_vm0, %v5369_v7  ;;  %v8394_v40 = vpop.f32.mrb[104].mxu1  ;;  %v9002_v7 = vpack.c.bf16 %v5280_v11, %v5279_v9  ;;  %v5283_v31 = vld [vmem:[%s10824_s12 + $0xf0] sm:$0xff] }
 0xf60   :  { %8967 = vmatprep.subr.bf16.mxu0 %v8966_v36  ;;  %v5409_v43 = vpop.f32.mrb[105].mxu1  ;;  %v9010_v34 = vpack.c.bf16 %v5284_v32, %v5283_v31 }
 0xf62   :  { %8457 = vmatmul.mubr.msk.f32.vlgmr.msra.gmra.mrb[60].mxu0 %vm508_vm0, %v8382_v61 }
 0xf63   :  { %8459 = vmatprep.mubr.msk.f32.mxu0 %vm508_vm0, %v5379_v23  ;;  %8969 = vmatpush3.bf16.msra.mxu0 %v8966_v36  ;;  %v8397_v20 = vpop.f32.mrb[106].mxu1  ;;  %v5281_v23 = vld [vmem:[%s10824_s12 + $0xe0] sm:$0xff] }
 0xf64   :  { %8971 = vmatprep.subr.bf16.mxu0 %v8970_v42  ;;  %v5419_v63 = vpop.f32.mrb[107].mxu1  ;;  %v9006_v29 = vpack.c.bf16 %v5282_v27, %v5281_v23  ;;  %v5285_v36 = vld [vmem:[%s10824_s12 + $0x100] sm:$0xff] }
 0xf66   :  { %8460 = vmatmul.mubr.msk.f32.gmra.mrb[62].mxu0 %vm508_vm0, %v8385_v17 }
 0xf67   :  { %8973 = vmatpush3.bf16.msra.mxu0 %v8970_v42  ;;  %8470 = vmatprep.mubr.msk.f32.mxu0 %vm508_vm0, %v5409_v43  ;;  %v8400_v16 = vpop.f32.mrb[108].mxu1  ;;  %v5287_v43 = vld [vmem:[%s10824_s12 + $0x110] sm:$0xff] }
 0xf68   :  { %8975 = vmatprep.subr.bf16.mxu0 %v8974_v0  ;;  %v5429_v13 = vpop.f32.mrb[109].mxu1 }
 0xf6a   :  { %8471 = vmatmul.mubr.msk.f32.vlgmr.msra.gmra.mrb[60].mxu0 %vm508_vm0, %v8394_v40  ;;  %v9014_v40 = vpack.c.bf16 %v5286_v37, %v5285_v36 }
 0xf6b   :  { %8977 = vmatpush3.bf16.msra.mxu0 %v8974_v0  ;;  %8473 = vmatprep.mubr.msk.f32.mxu0 %vm508_vm0, %v5419_v63  ;;  %v8403_v6 = vpop.f32.mrb[110].mxu1 }
 0xf6c   :  { %8979 = vmatprep.subr.bf16.mxu0 %v8978_v52  ;;  %v5439_v54 = vpop.f32.mrb[111].mxu1 }
 0xf6e   :  { %8474 = vmatmul.mubr.msk.f32.gmra.mrb[62].mxu0 %vm508_vm0, %v8397_v20  ;;  %v9018_v20 = vpack.c.bf16 %v5288_v39, %v5287_v43 }
 0xf6f   :  { %8981 = vmatpush3.bf16.msra.mxu0 %v8978_v52  ;;  %8484 = vmatprep.mubr.msk.f32.mxu0 %vm508_vm0, %v5429_v13  ;;  %v8406_v18 = vpop.f32.mrb[112].mxu1  ;;  %v7120_v13 = vld [vmem:[%s10835_s7] ss:$0 sm:$0xff] }
 0xf70   :  { %8983 = vmatprep.subr.bf16.mxu0 %v8982_v47  ;;  %v5449_v26 = vpop.f32.mrb[113].mxu1 }
 0xf72   :  { %8485 = vmatmul.mubr.msk.f32.vlgmr.msra.gmra.mrb[60].mxu0 %vm508_vm0, %v8400_v16  ;;  %v5295_v16 = vld [vmem:[%s10831_s2 + $0x18] sm:$0xff] }
 0xf73   :  { %8985 = vmatpush3.bf16.msra.mxu0 %v8982_v47  ;;  %8487 = vmatprep.mubr.msk.f32.mxu0 %vm508_vm0, %v5439_v54  ;;  %v8409_v3 = vpop.f32.mrb[114].mxu1  ;;  %v9026_v52 = vpack.c.bf16 %v5295_v16, %v5294_v49 }
 0xf74   :  { %8987 = vmatprep.subr.bf16.mxu0 %v8986_v57  ;;  %v5459_v22 = vpop.f32.mrb[115].mxu1 }
 0xf75   :  { %9027 = vmatprep.subr.bf16.mxu1 %v9026_v52 }
 0xf76   :  { %8488 = vmatmul.mubr.msk.f32.gmra.mrb[62].mxu0 %vm508_vm0, %v8403_v6  ;;  %9029 = vmatpush3.bf16.msra.mxu1 %v9026_v52  ;;  %v7122_v52 = vld [vmem:[%s10837_s11] ss:$0 sm:$0xff] }
 0xf77   :  { %8989 = vmatpush3.bf16.msra.mxu0 %v8986_v57  ;;  %8498 = vmatprep.mubr.msk.f32.mxu0 %vm508_vm0, %v5449_v26  ;;  %v8412_v15 = vpop.f32.mrb[116].mxu1 }
 0xf78   :  { %8991 = vmatprep.subr.bf16.mxu0 %v8990_v59  ;;  %v5469_v1 = vpop.f32.mrb[117].mxu1 }
 0xf7a   :  { %8499 = vmatmul.mubr.msk.f32.vlgmr.msra.gmra.mrb[60].mxu0 %vm508_vm0, %v8406_v18 }
 0xf7b   :  { %8993 = vmatpush3.bf16.msra.mxu0 %v8990_v59  ;;  %8501 = vmatprep.mubr.msk.f32.mxu0 %vm508_vm0, %v5459_v22  ;;  %v8415_v24 = vpop.f32.mrb[118].mxu1 }
 0xf7c   :  { %8995 = vmatprep.subr.bf16.mxu0 %v8994_v14  ;;  %v5479_v2 = vpop.f32.mrb[119].mxu1 }
 0xf7e   :  { %8502 = vmatmul.mubr.msk.f32.gmra.mrb[62].mxu0 %vm508_vm0, %v8409_v3 }
 0xf7f   :  { %8997 = vmatpush3.bf16.msra.mxu0 %v8994_v14  ;;  %8512 = vmatprep.mubr.msk.f32.mxu0 %vm508_vm0, %v5469_v1  ;;  %v8418_v61 = vpop.f32.mrb[120].mxu1 }
 0xf80   :  { %8999 = vmatprep.subr.bf16.mxu0 %v8998_v5  ;;  %v5489_v17 = vpop.f32.mrb[121].mxu1 }
 0xf82   :  { %8513 = vmatmul.mubr.msk.f32.vlgmr.msra.gmra.mrb[60].mxu0 %vm508_vm0, %v8412_v15 }
 0xf83   :  { %9001 = vmatpush3.bf16.msra.mxu0 %v8998_v5  ;;  %8515 = vmatprep.mubr.msk.f32.mxu0 %vm508_vm0, %v5479_v2  ;;  %v8421_v28 = vpop.f32.mrb[122].mxu1 }
 0xf84   :  { %9003 = vmatprep.subr.bf16.mxu0 %v9002_v7  ;;  %v5499_v30 = vpop.f32.mrb[123].mxu1 }
 0xf86   :  { %8516 = vmatmul.mubr.msk.f32.gmra.mrb[62].mxu0 %vm508_vm0, %v8415_v24 }
 0xf87   :  { %9005 = vmatpush3.bf16.msra.mxu0 %v9002_v7  ;;  %8526 = vmatprep.mubr.msk.f32.mxu0 %vm508_vm0, %v5489_v17  ;;  %v8424_v33 = vpop.f32.mrb[124].mxu1 }
 0xf88   :  { %9007 = vmatprep.subr.bf16.mxu0 %v9006_v29  ;;  %v5509_v35 = vpop.f32.mrb[125].mxu1 }
 0xf8a   :  { %8527 = vmatmul.mubr.msk.f32.vlgmr.msra.gmra.mrb[60].mxu0 %vm508_vm0, %v8418_v61 }
 0xf8b   :  { %9009 = vmatpush3.bf16.msra.mxu0 %v9006_v29  ;;  %8529 = vmatprep.mubr.msk.f32.mxu0 %vm508_vm0, %v5499_v30  ;;  %v8427_v38 = vpop.f32.mrb[126].mxu1 }
 0xf8c   :  { %9011 = vmatprep.subr.bf16.mxu0 %v9010_v34  ;;  %v5519_v42 = vpop.f32.mrb[127].mxu1 }
 0xf8e   :  { %8530 = vmatmul.mubr.msk.f32.gmra.mrb[62].mxu0 %vm508_vm0, %v8421_v28 }
 0xf8f   :  { %9013 = vmatpush3.bf16.msra.mxu0 %v9010_v34  ;;  %8540 = vmatprep.mubr.msk.f32.mxu0 %vm508_vm0, %v5509_v35  ;;  %v8430_v44 = vpop.f32.mrb[128].mxu1 }
 0xf90   :  { %9015 = vmatprep.subr.bf16.mxu0 %v9014_v40  ;;  %v5529_v0 = vpop.f32.mrb[129].mxu1 }
 0xf92   :  { %8541 = vmatmul.mubr.msk.f32.vlgmr.msra.gmra.mrb[60].mxu0 %vm508_vm0, %v8424_v33 }
 0xf93   :  { %9017 = vmatpush3.bf16.msra.mxu0 %v9014_v40  ;;  %8543 = vmatprep.mubr.msk.f32.mxu0 %vm508_vm0, %v5519_v42  ;;  %v8433_v63 = vpop.f32.mrb[130].mxu1 }
 0xf94   :  { %9019 = vmatprep.subr.bf16.mxu0 %v9018_v20  ;;  %v5539_v25 = vpop.f32.mrb[131].mxu1 }
 0xf96   :  { %8544 = vmatmul.mubr.msk.f32.gmra.mrb[62].mxu0 %vm508_vm0, %v8427_v38 }
 0xf97   :  { %9021 = vmatpush3.bf16.msra.mxu0 %v9018_v20  ;;  %8554 = vmatprep.mubr.msk.f32.mxu0 %vm508_vm0, %v5529_v0  ;;  %v7121_v0 = vld [vmem:[%s10836_s10] ss:$0 sm:$0xff] }
 0xf9a   :  { %8555 = vmatmul.mubr.msk.f32.vlgmr.msra.gmra.mrb[60].mxu0 %vm508_vm0, %v8430_v44 }
 0xf9b   :  { %8557 = vmatprep.mubr.msk.f32.mxu0 %vm508_vm0, %v5539_v25 }
 0xf9e   :  { %8558 = vmatmul.mubr.msk.f32.gmra.mrb[62].mxu0 %vm508_vm0, %v8433_v63 }
0x106d   :  { %v8556_v60 = vpop.f32.mrb[60].mxu0 }
0x106e   :  { %v6456_v55 = vadd.f32 %v8556_v60, %v7120_v13  ;;  %v6426_v6 = vpop.f32.mrb[61].mxu0 }
0x106f   :  { %v6455_v47 = vadd.f32 %v7120_v13, %v6426_v6 }
0x1070   :  { %v6460_v54 = vsel %vm508_vm0, %v6456_v55, 0.0  ;;  %v6474_v58 = vmul.f32 %v6456_v55, %v6456_v55 }
0x1071   :  { %v6459_v62 = vsel %vm508_vm0, %v6455_v47, 0.0  ;;  %v6473_v18 = vmul.f32 %v6455_v47, %v6455_v47  ;;  %v8559_v57 = vpop.f32.mrb[62].mxu0 }
0x1072   :  { %v6478_v26 = vsel %vm508_vm0, %v6474_v58, 0.0  ;;  %v6461_v46 = vadd.f32 %v6460_v54, %v6459_v62  ;;  %v6458_v48 = vadd.f32 %v8559_v57, %v7120_v13  ;;  %v6436_v3 = vpop.f32.mrb[63].mxu0 }
0x1073   :  { %v6477_v59 = vsel %vm508_vm0, %v6473_v18, 0.0  ;;  %v6457_v22 = vadd.f32 %v7120_v13, %v6436_v3 }
0x1074   :  { %v6479_v10 = vadd.f32 %v6478_v26, %v6477_v59  ;;  %v6476_v12 = vmul.f32 %v6458_v48, %v6458_v48  ;;  %v6464_v8 = vsel %vm508_vm0, %v6458_v48, 0.0 }
0x1075   :  { %v6462_v15 = vsel %vm508_vm0, %v6457_v22, 0.0  ;;  %v6475_v14 = vmul.f32 %v6457_v22, %v6457_v22 }
0x1076   :  { %v6463_v1 = vadd.f32 %v6462_v15, %v6461_v46  ;;  %v6482_v2 = vsel %vm508_vm0, %v6476_v12, 0.0 }
0x1077   :  { %v6480_v21 = vsel %vm508_vm0, %v6475_v14, 0.0 }
0x1078   :  { %v6465_v24 = vadd.f32 %v6464_v8, %v6463_v1  ;;  %v6481_v5 = vadd.f32 %v6480_v21, %v6479_v10 }
0x107a   :  { %v6466_v9 = vrot.slane %v6465_v24, 4  ;;  %v6483_v11 = vadd.f32 %v6482_v2, %v6481_v5 }
0x107c   :  { %v6467_v61 = vadd.f32 %v6466_v9, %v6465_v24  ;;  %v6484_v7 = vrot.slane %v6483_v11, 4 }
0x107e   :  { %v6468_v17 = vrot.slane %v6467_v61, 2  ;;  %v6485_v23 = vadd.f32 %v6484_v7, %v6483_v11 }
0x1080   :  { %v6469_v27 = vadd.f32 %v6468_v17, %v6467_v61  ;;  %v6486_v28 = vrot.slane %v6485_v23, 2 }
0x1082   :  { %v6470_v29 = vrot.slane %v6469_v27, 1  ;;  %v6487_v30 = vadd.f32 %v6486_v28, %v6485_v23 }
0x1084   :  { %v6471_v31 = vadd.f32 %v6470_v29, %v6469_v27  ;;  %v6488_v32 = vrot.slane %v6487_v30, 1 }
0x1086   :  { %v6472_v33 = vmul.f32 0.03125, %v6471_v31  ;;  %v6489_v34 = vadd.f32 %v6488_v32, %v6487_v30 }
0x1088   :  { %v6490_v35 = vmul.f32 0.03125, %v6489_v34  ;;  %v6491_v36 = vmul.f32 %v6472_v33, %v6472_v33  ;;  %v6495_v37 = vsub.f32 %v6456_v55, %v6472_v33  ;;  %v6496_v38 = vsub.f32 %v6457_v22, %v6472_v33 }
0x1089   :  { %v6494_v40 = vsub.f32 %v6455_v47, %v6472_v33  ;;  %v6497_v42 = vsub.f32 %v6458_v48, %v6472_v33 }
0x108a   :  { %v6492_v43 = vsub.f32 %v6490_v35, %v6491_v36 }
0x108c   :  { %v6493_v39 = vmax.f32 %v6492_v43, 0.0 }
0x108e   :  { %v6498_v44 = vadd.f32 1e-05, %v6493_v39 }
0x1090   :  { %9215 = vrsqrt.f32 %v6498_v44 }
0x109a   :  { %v9216_v20 = vpop.eup %9215 }
0x109b   :  { %v6501_v63 = vmul.f32 %v9216_v20, %v6495_v37  ;;  %v6502_v25 = vmul.f32 %v9216_v20, %v6496_v38  ;;  %v6500_v49 = vmul.f32 %v9216_v20, %v6494_v40  ;;  %v6503_v16 = vmul.f32 %v9216_v20, %v6497_v42 }
0x109d   :  { %v6511_v13 = vmul.f32 %v7121_v0, %v6501_v63  ;;  %v6512_v60 = vmul.f32 %v7121_v0, %v6502_v25  ;;  %v6510_v6 = vmul.f32 %v7121_v0, %v6500_v49  ;;  %v6513_v54 = vmul.f32 %v7121_v0, %v6503_v16 }
0x109f   :  { %v6520_v58 = vadd.f32 %v7122_v52, %v6510_v6  ;;  %v6521_v55 = vadd.f32 %v7122_v52, %v6511_v13  ;;  %v6522_v62 = vadd.f32 %v7122_v52, %v6512_v60  ;;  %v6523_v57 = vadd.f32 %v7122_v52, %v6513_v54 }
0x10a1   :  { %v6524_v47 = vmax.f32 %v6520_v58, 0.0  ;;  %v6525_v18 = vmax.f32 %v6521_v55, 0.0  ;;  %v6526_v26 = vmax.f32 %v6522_v62, 0.0  ;;  %v6527_v46 = vmax.f32 %v6523_v57, 0.0 }
0x10a3   :  { %8568 = vmatprep.mubr.msk.f32.mxu1 %vm508_vm0, %v6524_v47 }
0x10a4   :  { %8569 = vmatmul.mubr.msk.f32.vlgmr.msra.gmra.mrb[132].mxu1 %vm508_vm0, %v6525_v18 }
0x10a5   :  { %8571 = vmatprep.mubr.msk.f32.mxu1 %vm508_vm0, %v6526_v26 }
0x10a8   :  { %8572 = vmatmul.mubr.msk.f32.gmra.mrb[134].mxu1 %vm508_vm0, %v6527_v46 }
0x10a9   :  { %9266 = shalt.err (!%p9263_p4)
}
0x10aa   :  { %s9267_s26 = scalar_lea.hbm %s9546_s20, 512 }
0x10ab   :  { %p9268_p5 = scmp.ne.s32.totalorder %s9546_s20, %s9267_s26  ;;  %p9271_p6 = scmp.lt.u32.totalorder %s9267_s26, %s9546_s20 }
0x10ad   :  { %p9273_p7 = pnand %p9271_p6, %p9268_p5 }
0x10af   :  { %9276 = shalt.err (!%p9273_p7)
}
0x10b0   :  { %s9346_s0 = smov 128   ;;  %s9347_s5 = smov 8  }
0x10b1   :  { %6715 = dma.vmem_to_hbm [thread:$0]  %s6710_s16, 512, %s9546_s20, [#allocation3], %s9346_s0, %s9346_s0, %s9347_s5  }
0x10b2   :  { %s9277_s9 = scalar_lea.vmem %s10713_s22, 512  ;;  %p9282_p9 = scmp.lt.s32.totalorder %s10713_s22, %s10713_s22 }
0x10b3   :  { %p9278_p8 = scmp.ne.s32.totalorder %s10713_s22, %s9277_s9  ;;  %p9283_p10 = scmp.lt.s32.totalorder %s9277_s9, %s9277_s9 }
0x10b5   :  { %p9284_p11 = por %p9283_p10, %p9282_p9 }
0x10b7   :  { %p9285_p12 = pnand %p9284_p11, %p9278_p8 }
0x10b9   :  { %9288 = shalt.err (!%p9285_p12)
}
0x10ba   :  { %s9289_s13 = scalar_lea.hbm %s9551_s21, 512 }
0x10bb   :  { %p9290_p13 = scmp.ne.s32.totalorder %s9551_s21, %s9289_s13  ;;  %p9293_p0 = scmp.lt.u32.totalorder %s9289_s13, %s9551_s21 }
0x10bd   :  { %p9295_p1 = pnand %p9293_p0, %p9290_p13 }
0x10bf   :  { %9298 = shalt.err (!%p9295_p1)
}
0x10c0   :  { %s10838_s25 = sld [smem:[#allocation29_spill]]  ;;  %v7129_v46 = vld [vmem:[%s9541_s4] ss:$0 sm:$0xff] }
0x10c1   :  { %6727 = dma.vmem_to_hbm [thread:$0]  %s10713_s22, 512, %s9551_s21, [#allocation5], %s9346_s0, %s9346_s0, %s9347_s5  }
0x10c2   :  { %s10839_s21 = sld [smem:[#allocation30_spill]] }
0x10c6   :  { %v7123_v48 = vld [vmem:[%s10838_s25] ss:$0 sm:$0xff] }
0x10c8   :  { %v7128_v62 = vld [vmem:[%s10839_s21] ss:$0 sm:$0xff] }
0x1177   :  { %v8570_v3 = vpop.f32.mrb[132].mxu1 }
0x1178   :  { %v6618_v59 = vadd.f32 %v8570_v3, %v7123_v48  ;;  %v6612_v22 = vpop.f32.mrb[133].mxu1 }
0x1179   :  { %v6613_v10 = vadd.f32 %v7123_v48, %v6612_v22 }
0x117a   :  { %v6632_v12 = vsel %vm508_vm0, %v6618_v59, 0.0  ;;  %v6646_v15 = vmul.f32 %v6618_v59, %v6618_v59 }
0x117b   :  { %v6631_v14 = vsel %vm508_vm0, %v6613_v10, 0.0  ;;  %v6645_v1 = vmul.f32 %v6613_v10, %v6613_v10  ;;  %v8573_v8 = vpop.f32.mrb[134].mxu1 }
0x117c   :  { %v6650_v21 = vsel %vm508_vm0, %v6646_v15, 0.0  ;;  %v6633_v24 = vadd.f32 %v6632_v12, %v6631_v14  ;;  %v6628_v5 = vadd.f32 %v8573_v8, %v7123_v48  ;;  %v6622_v2 = vpop.f32.mrb[135].mxu1 }
0x117d   :  { %v6649_v9 = vsel %vm508_vm0, %v6645_v1, 0.0  ;;  %v6623_v11 = vadd.f32 %v7123_v48, %v6622_v2 }
0x117e   :  { %v6651_v61 = vadd.f32 %v6650_v21, %v6649_v9  ;;  %v6648_v7 = vmul.f32 %v6628_v5, %v6628_v5  ;;  %v6636_v28 = vsel %vm508_vm0, %v6628_v5, 0.0 }
0x117f   :  { %v6634_v17 = vsel %vm508_vm0, %v6623_v11, 0.0  ;;  %v6647_v23 = vmul.f32 %v6623_v11, %v6623_v11 }
0x1180   :  { %v6635_v27 = vadd.f32 %v6634_v17, %v6633_v24  ;;  %v6654_v32 = vsel %vm508_vm0, %v6648_v7, 0.0 }
0x1181   :  { %v6652_v29 = vsel %vm508_vm0, %v6647_v23, 0.0 }
0x1182   :  { %v6637_v30 = vadd.f32 %v6636_v28, %v6635_v27  ;;  %v6653_v31 = vadd.f32 %v6652_v29, %v6651_v61 }
0x1184   :  { %v6638_v33 = vrot.slane %v6637_v30, 4  ;;  %v6655_v34 = vadd.f32 %v6654_v32, %v6653_v31 }
0x1186   :  { %v6639_v35 = vadd.f32 %v6638_v33, %v6637_v30  ;;  %v6656_v36 = vrot.slane %v6655_v34, 4 }
0x1188   :  { %v6640_v37 = vrot.slane %v6639_v35, 2  ;;  %v6657_v38 = vadd.f32 %v6656_v36, %v6655_v34 }
0x118a   :  { %v6641_v40 = vadd.f32 %v6640_v37, %v6639_v35  ;;  %v6658_v42 = vrot.slane %v6657_v38, 2 }
0x118c   :  { %v6642_v43 = vrot.slane %v6641_v40, 1  ;;  %v6659_v39 = vadd.f32 %v6658_v42, %v6657_v38 }
0x118e   :  { %v6643_v44 = vadd.f32 %v6642_v43, %v6641_v40  ;;  %v6660_v20 = vrot.slane %v6659_v39, 1 }
0x1190   :  { %v6644_v0 = vmul.f32 0.03125, %v6643_v44  ;;  %v6661_v63 = vadd.f32 %v6660_v20, %v6659_v39 }
0x1192   :  { %v6662_v25 = vmul.f32 0.03125, %v6661_v63  ;;  %v6663_v49 = vmul.f32 %v6644_v0, %v6644_v0  ;;  %v6666_v16 = vsub.f32 %v6613_v10, %v6644_v0  ;;  %v6667_v52 = vsub.f32 %v6618_v59, %v6644_v0 }
0x1193   :  { %v6668_v13 = vsub.f32 %v6623_v11, %v6644_v0  ;;  %v6669_v60 = vsub.f32 %v6628_v5, %v6644_v0 }
0x1194   :  { %v6664_v6 = vsub.f32 %v6662_v25, %v6663_v49 }
0x1196   :  { %v6665_v54 = vmax.f32 %v6664_v6, 0.0 }
0x1198   :  { %v6670_v58 = vadd.f32 1e-05, %v6665_v54 }
0x119a   :  { %9217 = vrsqrt.f32 %v6670_v58 }
0x11a4   :  { %v9218_v55 = vpop.eup %9217 }
0x11a5   :  { %v6672_v47 = vmul.f32 %v9218_v55, %v6666_v16  ;;  %v6673_v18 = vmul.f32 %v9218_v55, %v6667_v52  ;;  %v6674_v57 = vmul.f32 %v9218_v55, %v6668_v13  ;;  %v6675_v26 = vmul.f32 %v9218_v55, %v6669_v60 }
0x11a7   :  { %v6682_v48 = vmul.f32 %v7128_v62, %v6672_v47  ;;  %v6683_v3 = vmul.f32 %v7128_v62, %v6673_v18  ;;  %v6684_v59 = vmul.f32 %v7128_v62, %v6674_v57  ;;  %v6685_v22 = vmul.f32 %v7128_v62, %v6675_v26 }
0x11a9   :  { %v6692_v10 = vadd.f32 %v7129_v46, %v6682_v48  ;;  %v6693_v12 = vadd.f32 %v7129_v46, %v6683_v3  ;;  %v6694_v15 = vadd.f32 %v7129_v46, %v6684_v59  ;;  %v6695_v14 = vadd.f32 %v7129_v46, %v6685_v22 }
0x11ab   :  { %v6696_v1 = vadd.f32 %v6692_v10, %v5299_v45  ;;  %v6697_v8 = vadd.f32 %v6693_v12, %v5300_v50  ;;  %v6698_v21 = vadd.f32 %v6694_v15, %v5301_v19  ;;  %v6699_v24 = vadd.f32 %v6695_v14, %v5302_v4 }
0x11ad   :  { %6700 = vst.msk [vmem:[%s9556_s27] sm:$0xff] %vm508_vm0, %v6696_v1  ;;  %6701 = vst.msk [vmem:[%s9556_s27 + $0x8] sm:$0xff] %vm508_vm0, %v6697_v8 }
0x11ae   :  { %6702 = vst.msk [vmem:[%s9556_s27 + $0x10] sm:$0xff] %vm508_vm0, %v6698_v21  ;;  %6703 = vst.msk [vmem:[%s9556_s27 + $0x18] sm:$0xff] %vm508_vm0, %v6699_v24 }
0x11af   :  { %9299 = dma.done.wait [#allocation3], 512  }
0x11b0   :  { %9300 = vsyncadd [#allocation3], 4294966784 }
0x11b1   :  { %9301 = dma.done.wait [#allocation5], 512  }
0x11b2   :  { %9302 = vsyncadd [#allocation5], 4294966784 }
0x11b3   :  { %6738 = vsyncpa [#allocation3], 1 }
0x11b4   :  { %6739 = vsyncpa [#allocation5], 1 }

// kernel: vqvae8_forward.10
= control target key start
LH: loop header
LB: loop body
LE: loop exit
PB: predicated region body
PF: predicated region fallthrough
CT: control target
= control target key end

     0   :  { %vm609_vm0 = vcmask 261120   ;;  %vm1801_vm2 = vmmov 0   ;;  %s2577_s1 = inlined_call_operand.vmem [shape: f32[512,128], index: 1, kind: input, shape index: {}]   ;;  %s2578_s0 = inlined_call_operand.vmem [shape: f32[128,512], index: 0, kind: input, shape index: {}]   ;;  %s2579_s3 = inlined_call_operand.vmem [shape: f32[128,32], index: 3, kind: input, shape index: {}]   ;;  %s2580_s2 = inlined_call_operand.vmem [shape: f32[1,128], index: 2, kind: input, shape index: {}]   ;;  %s2581_s4 = inlined_call_operand.vmem [shape: f32[1,32], index: 4, kind: input, shape index: {}]   ;;  %s2582_s5 = inlined_call_operand.vmem [shape: f32[1,32], index: 5, kind: input, shape index: {}]   ;;  %s2583_s6 = inlined_call_operand.vmem [shape: f32[128,128], index: 6, kind: output, shape index: {}]  }
   0x1   :  { %v103_v0 = vld [vmem:[%s2577_s1 + $0x80] sm:$0xff]  ;;  %v104_v1 = vld [vmem:[%s2577_s1 + $0x88] sm:$0xff]  ;;  %v105_v11 = vld [vmem:[%s2577_s1 + $0x90] sm:$0xff] }
   0x2   :  { %v87_v2 = vld [vmem:[%s2577_s1] sm:$0xff]  ;;  %v1603_v3 = vpack.c.bf16 %v104_v1, %v103_v0  ;;  %v88_v4 = vld [vmem:[%s2577_s1 + $0x8] sm:$0xff]  ;;  %v106_v13 = vld [vmem:[%s2577_s1 + $0x98] sm:$0xff] }
   0x3   :  { %v135_v5 = vld [vmem:[%s2577_s1 + $0x180] sm:$0xff]  ;;  %v136_v6 = vld [vmem:[%s2577_s1 + $0x188] sm:$0xff]  ;;  %v1605_v7 = vpack.c.bf16 %v88_v4, %v87_v2  ;;  %v89_v14 = vld [vmem:[%s2577_s1 + $0x10] sm:$0xff]  ;;  %v1607_v16 = vpack.c.bf16 %v106_v13, %v105_v11 }
   0x4   :  { %v1635_v8 = vpack.c.bf16 %v136_v6, %v135_v5  ;;  %v119_v9 = vld [vmem:[%s2577_s1 + $0x100] sm:$0xff]  ;;  %v120_v10 = vld [vmem:[%s2577_s1 + $0x108] sm:$0xff]  ;;  %1604 = vmatprep.subr.bf16.mxu0 %v1603_v3  ;;  %v90_v15 = vld [vmem:[%s2577_s1 + $0x18] sm:$0xff] }
   0x5   :  { %v1637_v12 = vpack.c.bf16 %v120_v10, %v119_v9  ;;  %1606 = vmatpush3.bf16.msra.mxu0 %v1605_v7  ;;  %v1609_v17 = vpack.c.bf16 %v90_v15, %v89_v14  ;;  %v137_v18 = vld [vmem:[%s2577_s1 + $0x190] sm:$0xff]  ;;  %v138_v19 = vld [vmem:[%s2577_s1 + $0x198] sm:$0xff]  ;;  %v107_v23 = vld [vmem:[%s2577_s1 + $0xa0] sm:$0xff] }
   0x6   :  { %1636 = vmatprep.subr.bf16.mxu1 %v1635_v8  ;;  %v121_v20 = vld [vmem:[%s2577_s1 + $0x110] sm:$0xff]  ;;  %v1639_v21 = vpack.c.bf16 %v138_v19, %v137_v18  ;;  %v122_v22 = vld [vmem:[%s2577_s1 + $0x118] sm:$0xff]  ;;  %v108_v24 = vld [vmem:[%s2577_s1 + $0xa8] sm:$0xff]  ;;  %1608 = vmatprep.subr.bf16.mxu0 %v1607_v16 }
   0x7   :  { %1638 = vmatpush3.bf16.msra.mxu1 %v1637_v12  ;;  %v1641_v25 = vpack.c.bf16 %v122_v22, %v121_v20  ;;  %v1611_v26 = vpack.c.bf16 %v108_v24, %v107_v23  ;;  %v91_v27 = vld [vmem:[%s2577_s1 + $0x20] sm:$0xff]  ;;  %v92_v28 = vld [vmem:[%s2577_s1 + $0x28] sm:$0xff]  ;;  %v109_v35 = vld [vmem:[%s2577_s1 + $0xb0] sm:$0xff] }
   0x8   :  { %v139_v29 = vld [vmem:[%s2577_s1 + $0x1a0] sm:$0xff]  ;;  %1640 = vmatprep.subr.bf16.mxu1 %v1639_v21  ;;  %v140_v30 = vld [vmem:[%s2577_s1 + $0x1a8] sm:$0xff]  ;;  %v1613_v33 = vpack.c.bf16 %v92_v28, %v91_v27  ;;  %v110_v36 = vld [vmem:[%s2577_s1 + $0xb8] sm:$0xff] }
   0x9   :  { %v123_v31 = vld [vmem:[%s2577_s1 + $0x120] sm:$0xff]  ;;  %v124_v32 = vld [vmem:[%s2577_s1 + $0x128] sm:$0xff]  ;;  %1610 = vmatpush3.bf16.msra.mxu0 %v1609_v17  ;;  %v1643_v34 = vpack.c.bf16 %v140_v30, %v139_v29  ;;  %v93_v37 = vld [vmem:[%s2577_s1 + $0x30] sm:$0xff]  ;;  %v1615_v39 = vpack.c.bf16 %v110_v36, %v109_v35 }
   0xa   :  { %1612 = vmatprep.subr.bf16.mxu0 %v1611_v26  ;;  %v1645_v38 = vpack.c.bf16 %v124_v32, %v123_v31  ;;  %v94_v40 = vld [vmem:[%s2577_s1 + $0x38] sm:$0xff]  ;;  %v141_v41 = vld [vmem:[%s2577_s1 + $0x1b0] sm:$0xff]  ;;  %v111_v46 = vld [vmem:[%s2577_s1 + $0xc0] sm:$0xff] }
   0xb   :  { %1642 = vmatpush3.bf16.msra.mxu1 %v1641_v25  ;;  %v142_v42 = vld [vmem:[%s2577_s1 + $0x1b8] sm:$0xff]  ;;  %v125_v44 = vld [vmem:[%s2577_s1 + $0x130] sm:$0xff]  ;;  %v112_v47 = vld [vmem:[%s2577_s1 + $0xc8] sm:$0xff]  ;;  %v1617_v48 = vpack.c.bf16 %v94_v40, %v93_v37 }
   0xc   :  { %1644 = vmatprep.subr.bf16.mxu1 %v1643_v34  ;;  %v1647_v43 = vpack.c.bf16 %v142_v42, %v141_v41  ;;  %v126_v45 = vld [vmem:[%s2577_s1 + $0x138] sm:$0xff]  ;;  %v143_v49 = vld [vmem:[%s2577_s1 + $0x1c0] sm:$0xff]  ;;  %v144_v50 = vld [vmem:[%s2577_s1 + $0x1c8] sm:$0xff]  ;;  %v1619_v52 = vpack.c.bf16 %v112_v47, %v111_v46 }
   0xd   :  { %1614 = vmatpush3.bf16.msra.mxu0 %v1613_v33  ;;  %v1649_v51 = vpack.c.bf16 %v126_v45, %v125_v44  ;;  %v95_v53 = vld [vmem:[%s2577_s1 + $0x40] sm:$0xff]  ;;  %v96_v54 = vld [vmem:[%s2577_s1 + $0x48] sm:$0xff]  ;;  %v1651_v56 = vpack.c.bf16 %v144_v50, %v143_v49  ;;  %v113_v58 = vld [vmem:[%s2577_s1 + $0xd0] sm:$0xff] }
   0xe   :  { %1616 = vmatprep.subr.bf16.mxu0 %v1615_v39  ;;  %v127_v55 = vld [vmem:[%s2577_s1 + $0x140] sm:$0xff]  ;;  %v128_v57 = vld [vmem:[%s2577_s1 + $0x148] sm:$0xff]  ;;  %v114_v59 = vld [vmem:[%s2577_s1 + $0xd8] sm:$0xff]  ;;  %v1621_v62 = vpack.c.bf16 %v96_v54, %v95_v53 }
   0xf   :  { %1646 = vmatpush3.bf16.msra.mxu1 %v1645_v38  ;;  %v145_v60 = vld [vmem:[%s2577_s1 + $0x1d0] sm:$0xff]  ;;  %v146_v61 = vld [vmem:[%s2577_s1 + $0x1d8] sm:$0xff]  ;;  %v1653_v63 = vpack.c.bf16 %v128_v57, %v127_v55  ;;  %v1623_v0 = vpack.c.bf16 %v114_v59, %v113_v58  ;;  %v115_v6 = vld [vmem:[%s2577_s1 + $0xe0] sm:$0xff] }
  0x10   :  { %1648 = vmatprep.subr.bf16.mxu1 %v1647_v43  ;;  %v97_v1 = vld [vmem:[%s2577_s1 + $0x50] sm:$0xff]  ;;  %v98_v2 = vld [vmem:[%s2577_s1 + $0x58] sm:$0xff]  ;;  %v1655_v4 = vpack.c.bf16 %v146_v61, %v145_v60  ;;  %v116_v7 = vld [vmem:[%s2577_s1 + $0xe8] sm:$0xff] }
  0x11   :  { %1618 = vmatpush3.bf16.msra.mxu0 %v1617_v48  ;;  %v129_v3 = vld [vmem:[%s2577_s1 + $0x150] sm:$0xff]  ;;  %v130_v5 = vld [vmem:[%s2577_s1 + $0x158] sm:$0xff]  ;;  %v147_v8 = vld [vmem:[%s2577_s1 + $0x1e0] sm:$0xff]  ;;  %v1625_v10 = vpack.c.bf16 %v98_v2, %v97_v1  ;;  %v1627_v14 = vpack.c.bf16 %v116_v7, %v115_v6 }
  0x12   :  { %1620 = vmatprep.subr.bf16.mxu0 %v1619_v52  ;;  %v148_v9 = vld [vmem:[%s2577_s1 + $0x1e8] sm:$0xff]  ;;  %v99_v11 = vld [vmem:[%s2577_s1 + $0x60] sm:$0xff]  ;;  %v1657_v13 = vpack.c.bf16 %v130_v5, %v129_v3  ;;  %v117_v19 = vld [vmem:[%s2577_s1 + $0xf0] sm:$0xff] }
  0x13   :  { %1650 = vmatpush3.bf16.msra.mxu1 %v1649_v51  ;;  %v100_v12 = vld [vmem:[%s2577_s1 + $0x68] sm:$0xff]  ;;  %v131_v15 = vld [vmem:[%s2577_s1 + $0x160] sm:$0xff]  ;;  %v1659_v18 = vpack.c.bf16 %v148_v9, %v147_v8  ;;  %v118_v20 = vld [vmem:[%s2577_s1 + $0xf8] sm:$0xff] }
  0x14   :  { %1652 = vmatprep.subr.bf16.mxu1 %v1651_v56  ;;  %v132_v16 = vld [vmem:[%s2577_s1 + $0x168] sm:$0xff]  ;;  %v26_v21 = vld [vmem:[%s2578_s0 + $0x18] sm:$0xff]  ;;  %v149_v22 = vld [vmem:[%s2577_s1 + $0x1f0] sm:$0xff]  ;;  %v1629_v24 = vpack.c.bf16 %v100_v12, %v99_v11  ;;  %v1631_v26 = vpack.c.bf16 %v118_v20, %v117_v19 }
  0x15   :  { %1622 = vmatpush3.bf16.msra.mxu0 %v1621_v62  ;;  %v24_v17 = vld [vmem:[%s2578_s0 + $0x8] sm:$0xff]  ;;  %v150_v23 = vld [vmem:[%s2577_s1 + $0x1f8] sm:$0xff]  ;;  %367 = vmatprep.mubr.f32.mxu1 %v26_v21  ;;  %v1661_v25 = vpack.c.bf16 %v132_v16, %v131_v15  ;;  %v101_v27 = vld [vmem:[%s2577_s1 + $0x70] sm:$0xff] }
  0x16   :  { %1624 = vmatprep.subr.bf16.mxu0 %v1623_v0  ;;  %222 = vmatprep.mubr.f32.mxu0 %v24_v17  ;;  %v102_v28 = vld [vmem:[%s2577_s1 + $0x78] sm:$0xff]  ;;  %v1663_v29 = vpack.c.bf16 %v150_v23, %v149_v22  ;;  %v133_v30 = vld [vmem:[%s2577_s1 + $0x170] sm:$0xff]  ;;  %v23_v34 = vld [vmem:[%s2578_s0] sm:$0xff] }
  0x17   :  { %1654 = vmatpush3.bf16.msra.mxu1 %v1653_v63  ;;  %v134_v31 = vld [vmem:[%s2577_s1 + $0x178] sm:$0xff]  ;;  %v1633_v32 = vpack.c.bf16 %v102_v28, %v101_v27  ;;  %v25_v35 = vld [vmem:[%s2578_s0 + $0x10] sm:$0xff]  ;;  %v28_v36 = vld [vmem:[%s2578_s0 + $0x28] sm:$0xff] }
  0x18   :  { %1656 = vmatprep.subr.bf16.mxu1 %v1655_v4  ;;  %v1665_v33 = vpack.c.bf16 %v134_v31, %v133_v30  ;;  %v30_v37 = vld [vmem:[%s2578_s0 + $0x38] sm:$0xff]  ;;  %v27_v38 = vld [vmem:[%s2578_s0 + $0x20] sm:$0xff]  ;;  %v29_v39 = vld [vmem:[%s2578_s0 + $0x30] sm:$0xff] }
  0x19   :  { %1626 = vmatpush3.bf16.msra.mxu0 %v1625_v10  ;;  %v32_v40 = vld [vmem:[%s2578_s0 + $0x48] sm:$0xff]  ;;  %v34_v41 = vld [vmem:[%s2578_s0 + $0x58] sm:$0xff]  ;;  %v31_v42 = vld [vmem:[%s2578_s0 + $0x40] sm:$0xff] }
  0x1a   :  { %1628 = vmatprep.subr.bf16.mxu0 %v1627_v14  ;;  %v33_v43 = vld [vmem:[%s2578_s0 + $0x50] sm:$0xff]  ;;  %v36_v44 = vld [vmem:[%s2578_s0 + $0x68] sm:$0xff]  ;;  %v38_v45 = vld [vmem:[%s2578_s0 + $0x78] sm:$0xff] }
  0x1b   :  { %1658 = vmatpush3.bf16.msra.mxu1 %v1657_v13  ;;  %v448_v46 = vld [vmem:[%s2579_s3] sm:$0xff]  ;;  %v449_v47 = vld [vmem:[%s2579_s3 + $0x8] sm:$0xff]  ;;  %v450_v48 = vld [vmem:[%s2579_s3 + $0x10] sm:$0xff] }
  0x1c   :  { %1660 = vmatprep.subr.bf16.mxu1 %v1659_v18  ;;  %v451_v49 = vld [vmem:[%s2579_s3 + $0x18] sm:$0xff]  ;;  %v35_v50 = vld [vmem:[%s2578_s0 + $0x60] sm:$0xff]  ;;  %v2087_v51 = vpack.c.bf16 %v449_v47, %v448_v46  ;;  %v37_v52 = vld [vmem:[%s2578_s0 + $0x70] sm:$0xff] }
  0x1d   :  { %1630 = vmatpush3.bf16.msra.mxu0 %v1629_v24  ;;  %v40_v53 = vld [vmem:[%s2578_s0 + $0x88] sm:$0xff]  ;;  %v42_v54 = vld [vmem:[%s2578_s0 + $0x98] sm:$0xff]  ;;  %v2100_v55 = vpack.c.bf16 %v451_v49, %v450_v48  ;;  %v452_v56 = vld [vmem:[%s2579_s3 + $0x20] sm:$0xff] }
  0x1e   :  { %1632 = vmatprep.subr.bf16.mxu0 %v1631_v26  ;;  %v453_v57 = vld [vmem:[%s2579_s3 + $0x28] sm:$0xff]  ;;  %v39_v58 = vld [vmem:[%s2578_s0 + $0x80] sm:$0xff]  ;;  %v41_v59 = vld [vmem:[%s2578_s0 + $0x90] sm:$0xff] }
  0x1f   :  { %1662 = vmatpush3.bf16.msra.mxu1 %v1661_v25  ;;  %v44_v60 = vld [vmem:[%s2578_s0 + $0xa8] sm:$0xff]  ;;  %v46_v61 = vld [vmem:[%s2578_s0 + $0xb8] sm:$0xff]  ;;  %v2124_v62 = vpack.c.bf16 %v453_v57, %v452_v56  ;;  %v454_v63 = vld [vmem:[%s2579_s3 + $0x30] sm:$0xff] }
  0x20   :  { %1664 = vmatprep.subr.bf16.mxu1 %v1663_v29  ;;  %v455_v0 = vld [vmem:[%s2579_s3 + $0x38] sm:$0xff]  ;;  %v43_v1 = vld [vmem:[%s2578_s0 + $0xa0] sm:$0xff]  ;;  %v45_v2 = vld [vmem:[%s2578_s0 + $0xb0] sm:$0xff] }
  0x21   :  { %1634 = vmatpush3.bf16.msra.mxu0 %v1633_v32  ;;  %v48_v3 = vld [vmem:[%s2578_s0 + $0xc8] sm:$0xff]  ;;  %v50_v4 = vld [vmem:[%s2578_s0 + $0xd8] sm:$0xff]  ;;  %v2148_v5 = vpack.c.bf16 %v455_v0, %v454_v63  ;;  %v456_v6 = vld [vmem:[%s2579_s3 + $0x40] sm:$0xff] }
  0x22   :  { %1668 = vmatprep.subr.bf16.mxu0 %v2087_v51  ;;  %v457_v7 = vld [vmem:[%s2579_s3 + $0x48] sm:$0xff]  ;;  %v47_v8 = vld [vmem:[%s2578_s0 + $0xc0] sm:$0xff]  ;;  %v49_v9 = vld [vmem:[%s2578_s0 + $0xd0] sm:$0xff] }
  0x23   :  { %1666 = vmatpush3.bf16.msra.mxu1 %v1665_v33  ;;  %v52_v10 = vld [vmem:[%s2578_s0 + $0xe8] sm:$0xff]  ;;  %v54_v11 = vld [vmem:[%s2578_s0 + $0xf8] sm:$0xff]  ;;  %v2172_v12 = vpack.c.bf16 %v457_v7, %v456_v6  ;;  %v51_v13 = vld [vmem:[%s2578_s0 + $0xe0] sm:$0xff] }
  0x24   :  { %223 = vmatmul.mubr.f32.vlgmr.msra.gmra.mrb[0].mxu0 %v23_v34  ;;  %1700 = vmatprep.subr.bf16.mxu1 %v2087_v51  ;;  %v53_v14 = vld [vmem:[%s2578_s0 + $0xf0] sm:$0xff]  ;;  %v56_v15 = vld [vmem:[%s2578_s0 + $0x108] sm:$0xff]  ;;  %v58_v16 = vld [vmem:[%s2578_s0 + $0x118] sm:$0xff] }
  0x25   :  { %227 = vmatprep.mubr.f32.mxu0 %v28_v36  ;;  %1670 = vmatpush3.bf16.msra.mxu0 %v2087_v51  ;;  %v55_v17 = vld [vmem:[%s2578_s0 + $0x100] sm:$0xff]  ;;  %v57_v18 = vld [vmem:[%s2578_s0 + $0x110] sm:$0xff]  ;;  %v60_v19 = vld [vmem:[%s2578_s0 + $0x128] sm:$0xff] }
  0x26   :  { %368 = vmatmul.mubr.f32.vlgmr.msra.gmra.mrb[0].mxu1 %v25_v35  ;;  %1672 = vmatprep.subr.bf16.mxu0 %v2100_v55  ;;  %v62_v20 = vld [vmem:[%s2578_s0 + $0x138] sm:$0xff]  ;;  %v59_v21 = vld [vmem:[%s2578_s0 + $0x120] sm:$0xff]  ;;  %v61_v22 = vld [vmem:[%s2578_s0 + $0x130] sm:$0xff] }
  0x27   :  { %372 = vmatprep.mubr.f32.mxu1 %v30_v37  ;;  %1702 = vmatpush3.bf16.msra.mxu1 %v2087_v51  ;;  %v64_v23 = vld [vmem:[%s2578_s0 + $0x148] sm:$0xff]  ;;  %v66_v24 = vld [vmem:[%s2578_s0 + $0x158] sm:$0xff]  ;;  %v63_v25 = vld [vmem:[%s2578_s0 + $0x140] sm:$0xff] }
  0x28   :  { %228 = vmatmul.mubr.f32.gmra.mrb[2].mxu0 %v27_v38  ;;  %1704 = vmatprep.subr.bf16.mxu1 %v2100_v55  ;;  %v65_v26 = vld [vmem:[%s2578_s0 + $0x150] sm:$0xff]  ;;  %v68_v27 = vld [vmem:[%s2578_s0 + $0x168] sm:$0xff]  ;;  %v70_v28 = vld [vmem:[%s2578_s0 + $0x178] sm:$0xff] }
  0x29   :  { %232 = vmatprep.mubr.f32.mxu0 %v32_v40  ;;  %1674 = vmatpush3.bf16.msra.mxu0 %v2100_v55  ;;  %v67_v29 = vld [vmem:[%s2578_s0 + $0x160] sm:$0xff]  ;;  %v69_v30 = vld [vmem:[%s2578_s0 + $0x170] sm:$0xff]  ;;  %v72_v31 = vld [vmem:[%s2578_s0 + $0x188] sm:$0xff] }
  0x2a   :  { %373 = vmatmul.mubr.f32.gmra.mrb[2].mxu1 %v29_v39  ;;  %1676 = vmatprep.subr.bf16.mxu0 %v2124_v62  ;;  %v74_v32 = vld [vmem:[%s2578_s0 + $0x198] sm:$0xff]  ;;  %v71_v33 = vld [vmem:[%s2578_s0 + $0x180] sm:$0xff]  ;;  %v73_v34 = vld [vmem:[%s2578_s0 + $0x190] sm:$0xff] }
  0x2b   :  { %377 = vmatprep.mubr.f32.mxu1 %v34_v41  ;;  %1706 = vmatpush3.bf16.msra.mxu1 %v2100_v55  ;;  %v76_v35 = vld [vmem:[%s2578_s0 + $0x1a8] sm:$0xff]  ;;  %v78_v36 = vld [vmem:[%s2578_s0 + $0x1b8] sm:$0xff]  ;;  %v75_v37 = vld [vmem:[%s2578_s0 + $0x1a0] sm:$0xff] }
  0x2c   :  { %233 = vmatmul.mubr.f32.gmra.mrb[4].mxu0 %v31_v42  ;;  %1708 = vmatprep.subr.bf16.mxu1 %v2124_v62  ;;  %v77_v38 = vld [vmem:[%s2578_s0 + $0x1b0] sm:$0xff]  ;;  %v80_v39 = vld [vmem:[%s2578_s0 + $0x1c8] sm:$0xff]  ;;  %v82_v40 = vld [vmem:[%s2578_s0 + $0x1d8] sm:$0xff] }
  0x2d   :  { %237 = vmatprep.mubr.f32.mxu0 %v36_v44  ;;  %1678 = vmatpush3.bf16.msra.mxu0 %v2124_v62  ;;  %v79_v41 = vld [vmem:[%s2578_s0 + $0x1c0] sm:$0xff]  ;;  %v81_v42 = vld [vmem:[%s2578_s0 + $0x1d0] sm:$0xff]  ;;  %v86_v44 = vld [vmem:[%s2578_s0 + $0x1f8] sm:$0xff] }
  0x2e   :  { %378 = vmatmul.mubr.f32.gmra.mrb[4].mxu1 %v33_v43  ;;  %1680 = vmatprep.subr.bf16.mxu0 %v2148_v5  ;;  %v84_v43 = vld [vmem:[%s2578_s0 + $0x1e8] sm:$0xff]  ;;  %v85_v46 = vld [vmem:[%s2578_s0 + $0x1f0] sm:$0xff]  ;;  %v459_v48 = vld [vmem:[%s2579_s3 + $0x58] sm:$0xff] }
  0x2f   :  { %382 = vmatprep.mubr.f32.mxu1 %v38_v45  ;;  %1710 = vmatpush3.bf16.msra.mxu1 %v2124_v62  ;;  %v83_v45 = vld [vmem:[%s2578_s0 + $0x1e0] sm:$0xff]  ;;  %v458_v47 = vld [vmem:[%s2579_s3 + $0x50] sm:$0xff]  ;;  %v463_v56 = vld [vmem:[%s2579_s3 + $0x78] sm:$0xff] }
  0x30   :  { %238 = vmatmul.mubr.f32.gmra.mrb[6].mxu0 %v35_v50  ;;  %1712 = vmatprep.subr.bf16.mxu1 %v2148_v5  ;;  %v2288_v49 = vpack.c.bf16 %v459_v48, %v458_v47  ;;  %v460_v50 = vld [vmem:[%s2579_s3 + $0x60] sm:$0xff]  ;;  %vm2421_vm1 = vmpackc.low %vm609_vm0, %vm609_vm0 }
  0x31   :  { %242 = vmatprep.mubr.f32.mxu0 %v40_v53  ;;  %1682 = vmatpush3.bf16.msra.mxu0 %v2148_v5 }
  0x32   :  { %383 = vmatmul.mubr.f32.gmra.mrb[6].mxu1 %v37_v52  ;;  %1684 = vmatprep.subr.bf16.mxu0 %v2172_v12  ;;  %v461_v52 = vld [vmem:[%s2579_s3 + $0x68] sm:$0xff] }
  0x33   :  { %387 = vmatprep.mubr.f32.mxu1 %v42_v54  ;;  %1714 = vmatpush3.bf16.msra.mxu1 %v2148_v5  ;;  %v2300_v53 = vpack.c.bf16 %v461_v52, %v460_v50  ;;  %v462_v54 = vld [vmem:[%s2579_s3 + $0x70] sm:$0xff] }
  0x34   :  { %243 = vmatmul.mubr.f32.gmra.mrb[8].mxu0 %v39_v58  ;;  %1716 = vmatprep.subr.bf16.mxu1 %v2172_v12  ;;  %v2312_v57 = vpack.c.bf16 %v463_v56, %v462_v54 }
  0x35   :  { %247 = vmatprep.mubr.f32.mxu0 %v44_v60  ;;  %1686 = vmatpush3.bf16.msra.mxu0 %v2172_v12 }
  0x36   :  { %388 = vmatmul.mubr.f32.gmra.mrb[8].mxu1 %v41_v59  ;;  %1688 = vmatprep.subr.bf16.mxu0 %v2288_v49  ;;  %v2321_v59 = vld [vmem:[%s2580_s2] ss:$0 sm:$0xff] }
  0x37   :  { %392 = vmatprep.mubr.f32.mxu1 %v46_v61  ;;  %1718 = vmatpush3.bf16.msra.mxu1 %v2172_v12 }
  0x38   :  { %248 = vmatmul.mubr.f32.gmra.mrb[10].mxu0 %v43_v1  ;;  %1720 = vmatprep.subr.bf16.mxu1 %v2288_v49 }
  0x39   :  { %252 = vmatprep.mubr.f32.mxu0 %v48_v3  ;;  %1690 = vmatpush3.bf16.msra.mxu0 %v2288_v49 }
  0x3a   :  { %393 = vmatmul.mubr.f32.gmra.mrb[10].mxu1 %v45_v2  ;;  %1692 = vmatprep.subr.bf16.mxu0 %v2300_v53 }
  0x3b   :  { %397 = vmatprep.mubr.f32.mxu1 %v50_v4  ;;  %1722 = vmatpush3.bf16.msra.mxu1 %v2288_v49 }
  0x3c   :  { %253 = vmatmul.mubr.f32.gmra.mrb[12].mxu0 %v47_v8  ;;  %1724 = vmatprep.subr.bf16.mxu1 %v2300_v53 }
  0x3d   :  { %257 = vmatprep.mubr.f32.mxu0 %v52_v10  ;;  %1694 = vmatpush3.bf16.msra.mxu0 %v2300_v53 }
  0x3e   :  { %398 = vmatmul.mubr.f32.gmra.mrb[12].mxu1 %v49_v9  ;;  %1696 = vmatprep.subr.bf16.mxu0 %v2312_v57 }
  0x3f   :  { %402 = vmatprep.mubr.f32.mxu1 %v54_v11  ;;  %1726 = vmatpush3.bf16.msra.mxu1 %v2300_v53 }
  0x40   :  { %258 = vmatmul.mubr.f32.gmra.mrb[14].mxu0 %v51_v13  ;;  %1728 = vmatprep.subr.bf16.mxu1 %v2312_v57 }
  0x41   :  { %262 = vmatprep.mubr.f32.mxu0 %v56_v15  ;;  %1698 = vmatpush3.bf16.msra.mxu0 %v2312_v57 }
  0x42   :  { %403 = vmatmul.mubr.f32.gmra.mrb[14].mxu1 %v53_v14 }
  0x43   :  { %407 = vmatprep.mubr.f32.mxu1 %v58_v16  ;;  %1730 = vmatpush3.bf16.msra.mxu1 %v2312_v57 }
  0x44   :  { %263 = vmatmul.mubr.f32.gmra.mrb[16].mxu0 %v55_v17 }
  0x45   :  { %267 = vmatprep.mubr.f32.mxu0 %v60_v19 }
  0x46   :  { %408 = vmatmul.mubr.f32.gmra.mrb[16].mxu1 %v57_v18 }
  0x47   :  { %412 = vmatprep.mubr.f32.mxu1 %v62_v20 }
  0x48   :  { %268 = vmatmul.mubr.f32.gmra.mrb[18].mxu0 %v59_v21 }
  0x49   :  { %272 = vmatprep.mubr.f32.mxu0 %v64_v23 }
  0x4a   :  { %413 = vmatmul.mubr.f32.gmra.mrb[18].mxu1 %v61_v22 }
  0x4b   :  { %417 = vmatprep.mubr.f32.mxu1 %v66_v24 }
  0x4c   :  { %273 = vmatmul.mubr.f32.gmra.mrb[20].mxu0 %v63_v25 }
  0x4d   :  { %277 = vmatprep.mubr.f32.mxu0 %v68_v27 }
  0x4e   :  { %418 = vmatmul.mubr.f32.gmra.mrb[20].mxu1 %v65_v26 }
  0x4f   :  { %422 = vmatprep.mubr.f32.mxu1 %v70_v28 }
  0x50   :  { %278 = vmatmul.mubr.f32.gmra.mrb[22].mxu0 %v67_v29 }
  0x51   :  { %282 = vmatprep.mubr.f32.mxu0 %v72_v31 }
  0x52   :  { %423 = vmatmul.mubr.f32.gmra.mrb[22].mxu1 %v69_v30 }
  0x53   :  { %427 = vmatprep.mubr.f32.mxu1 %v74_v32 }
  0x54   :  { %283 = vmatmul.mubr.f32.gmra.mrb[24].mxu0 %v71_v33 }
  0x55   :  { %287 = vmatprep.mubr.f32.mxu0 %v76_v35 }
  0x56   :  { %428 = vmatmul.mubr.f32.gmra.mrb[24].mxu1 %v73_v34 }
  0x57   :  { %432 = vmatprep.mubr.f32.mxu1 %v78_v36 }
  0x58   :  { %288 = vmatmul.mubr.f32.gmra.mrb[26].mxu0 %v75_v37 }
  0x59   :  { %292 = vmatprep.mubr.f32.mxu0 %v80_v39 }
  0x5a   :  { %433 = vmatmul.mubr.f32.gmra.mrb[26].mxu1 %v77_v38 }
  0x5b   :  { %437 = vmatprep.mubr.f32.mxu1 %v82_v40 }
  0x5c   :  { %293 = vmatmul.mubr.f32.gmra.mrb[28].mxu0 %v79_v41 }
  0x5d   :  { %297 = vmatprep.mubr.f32.mxu0 %v84_v43 }
  0x5e   :  { %438 = vmatmul.mubr.f32.gmra.mrb[28].mxu1 %v81_v42 }
  0x5f   :  { %442 = vmatprep.mubr.f32.mxu1 %v86_v44 }
  0x60   :  { %298 = vmatmul.mubr.f32.gmra.mrb[30].mxu0 %v83_v45 }
  0x62   :  { %443 = vmatmul.mubr.f32.gmra.mrb[30].mxu1 %v85_v46 }
  0xf7   :  { %v1195_v58 = vpop.f32.mrb[0].mxu0 }
  0xf8   :  { %v1196_v60 = vpop.f32.mrb[1].mxu0 }
  0xf9   :  { %v1275_v61 = vpop.f32.mrb[0].mxu1  ;;  %v1197_v63 = vadd.f32 %v1196_v60, %v1195_v58 }
  0xfa   :  { %v1276_v0 = vpop.f32.mrb[1].mxu1 }
  0xfb   :  { %v1277_v1 = vadd.f32 %v1276_v0, %v1275_v61  ;;  %v225_v2 = vadd.f32 %v1197_v63, %v2321_v59  ;;  %v1198_v3 = vpop.f32.mrb[2].mxu0 }
  0xfc   :  { %v1199_v4 = vpop.f32.mrb[3].mxu0 }
  0xfd   :  { %v1278_v6 = vpop.f32.mrb[2].mxu1  ;;  %v2324_v7 = vadd.f32 %v1277_v1, %v225_v2  ;;  %v1200_v8 = vadd.f32 %v1199_v4, %v1198_v3 }
  0xfe   :  { %v1279_v9 = vpop.f32.mrb[3].mxu1 }
  0xff   :  { %v1280_v10 = vadd.f32 %v1279_v9, %v1278_v6  ;;  %v230_v11 = vadd.f32 %v1200_v8, %v2321_v59  ;;  %v1201_v13 = vpop.f32.mrb[4].mxu0  ;;  %1453 = vmatprep.mubr.f32.mxu0 %v2324_v7  ;;  %v647_v14 = vmul.f32 %v2324_v7, %v2324_v7 }
 0x100   :  { %v1202_v15 = vpop.f32.mrb[5].mxu0 }
 0x101   :  { %v1281_v16 = vpop.f32.mrb[4].mxu1  ;;  %v2330_v17 = vadd.f32 %v1280_v10, %v230_v11  ;;  %v1203_v18 = vadd.f32 %v1202_v15, %v1201_v13  ;;  %1509 = vmatprep.mubr.f32.mxu1 %v647_v14 }
 0x102   :  { %v1282_v19 = vpop.f32.mrb[5].mxu1 }
 0x103   :  { %v1283_v20 = vadd.f32 %v1282_v19, %v1281_v16  ;;  %v648_v21 = vmul.f32 %v2330_v17, %v2330_v17  ;;  %v235_v22 = vadd.f32 %v1203_v18, %v2321_v59  ;;  %v1204_v23 = vpop.f32.mrb[6].mxu0  ;;  %1454 = vmatmul.mubr.f32.vlgmr.msra.gmra.mrb[32].mxu0 %v2330_v17 }
 0x104   :  { %v1205_v24 = vpop.f32.mrb[7].mxu0 }
 0x105   :  { %v1284_v25 = vpop.f32.mrb[6].mxu1  ;;  %v2336_v26 = vadd.f32 %v1283_v20, %v235_v22  ;;  %v1206_v27 = vadd.f32 %v1205_v24, %v1204_v23  ;;  %1510 = vmatmul.mubr.f32.vlgmr.msra.gmra.mrb[32].mxu1 %v648_v21 }
 0x106   :  { %v1285_v28 = vpop.f32.mrb[7].mxu1 }
 0x107   :  { %v1286_v29 = vadd.f32 %v1285_v28, %v1284_v25  ;;  %v240_v30 = vadd.f32 %v1206_v27, %v2321_v59  ;;  %v1207_v31 = vpop.f32.mrb[8].mxu0  ;;  %1456 = vmatprep.mubr.f32.mxu0 %v2336_v26  ;;  %v649_v32 = vmul.f32 %v2336_v26, %v2336_v26 }
 0x108   :  { %v1208_v33 = vpop.f32.mrb[9].mxu0 }
 0x109   :  { %v1287_v34 = vpop.f32.mrb[8].mxu1  ;;  %v2342_v35 = vadd.f32 %v1286_v29, %v240_v30  ;;  %v1209_v36 = vadd.f32 %v1208_v33, %v1207_v31  ;;  %1512 = vmatprep.mubr.f32.mxu1 %v649_v32 }
 0x10a   :  { %v1288_v37 = vpop.f32.mrb[9].mxu1 }
 0x10b   :  { %v1289_v38 = vadd.f32 %v1288_v37, %v1287_v34  ;;  %v245_v39 = vadd.f32 %v1209_v36, %v2321_v59  ;;  %v1210_v40 = vpop.f32.mrb[10].mxu0  ;;  %1457 = vmatmul.mubr.f32.gmra.mrb[34].mxu0 %v2342_v35  ;;  %v650_v41 = vmul.f32 %v2342_v35, %v2342_v35 }
 0x10c   :  { %v1211_v42 = vpop.f32.mrb[11].mxu0 }
 0x10d   :  { %v1290_v43 = vpop.f32.mrb[10].mxu1  ;;  %v2348_v44 = vadd.f32 %v1289_v38, %v245_v39  ;;  %v1212_v45 = vadd.f32 %v1211_v42, %v1210_v40  ;;  %1513 = vmatmul.mubr.f32.gmra.mrb[34].mxu1 %v650_v41 }
 0x10e   :  { %v1291_v46 = vpop.f32.mrb[11].mxu1 }
 0x10f   :  { %v1292_v47 = vadd.f32 %v1291_v46, %v1290_v43  ;;  %v250_v48 = vadd.f32 %v1212_v45, %v2321_v59  ;;  %v1213_v50 = vpop.f32.mrb[12].mxu0  ;;  %1459 = vmatprep.mubr.f32.mxu0 %v2348_v44  ;;  %v651_v52 = vmul.f32 %v2348_v44, %v2348_v44 }
 0x110   :  { %v1214_v54 = vpop.f32.mrb[13].mxu0 }
 0x111   :  { %v1293_v56 = vpop.f32.mrb[12].mxu1  ;;  %v2354_v58 = vadd.f32 %v1292_v47, %v250_v48  ;;  %v1215_v60 = vadd.f32 %v1214_v54, %v1213_v50  ;;  %1515 = vmatprep.mubr.f32.mxu1 %v651_v52 }
 0x112   :  { %v1294_v61 = vpop.f32.mrb[13].mxu1 }
 0x113   :  { %v1295_v63 = vadd.f32 %v1294_v61, %v1293_v56  ;;  %v255_v0 = vadd.f32 %v1215_v60, %v2321_v59  ;;  %v1216_v1 = vpop.f32.mrb[14].mxu0  ;;  %1460 = vmatmul.mubr.f32.gmra.mrb[36].mxu0 %v2354_v58  ;;  %v652_v2 = vmul.f32 %v2354_v58, %v2354_v58 }
 0x114   :  { %v1217_v3 = vpop.f32.mrb[15].mxu0 }
 0x115   :  { %v1296_v4 = vpop.f32.mrb[14].mxu1  ;;  %v2360_v6 = vadd.f32 %v1295_v63, %v255_v0  ;;  %v1218_v8 = vadd.f32 %v1217_v3, %v1216_v1  ;;  %1516 = vmatmul.mubr.f32.gmra.mrb[36].mxu1 %v652_v2 }
 0x116   :  { %v1297_v9 = vpop.f32.mrb[15].mxu1 }
 0x117   :  { %v1298_v10 = vadd.f32 %v1297_v9, %v1296_v4  ;;  %v260_v11 = vadd.f32 %v1218_v8, %v2321_v59  ;;  %v1219_v13 = vpop.f32.mrb[16].mxu0  ;;  %1462 = vmatprep.mubr.f32.mxu0 %v2360_v6  ;;  %v653_v14 = vmul.f32 %v2360_v6, %v2360_v6 }
 0x118   :  { %v1220_v15 = vpop.f32.mrb[17].mxu0 }
 0x119   :  { %v1299_v16 = vpop.f32.mrb[16].mxu1  ;;  %v2366_v18 = vadd.f32 %v1298_v10, %v260_v11  ;;  %v1221_v19 = vadd.f32 %v1220_v15, %v1219_v13  ;;  %1518 = vmatprep.mubr.f32.mxu1 %v653_v14 }
 0x11a   :  { %v1300_v20 = vpop.f32.mrb[17].mxu1 }
 0x11b   :  { %v1301_v21 = vadd.f32 %v1300_v20, %v1299_v16  ;;  %v265_v22 = vadd.f32 %v1221_v19, %v2321_v59  ;;  %v1222_v23 = vpop.f32.mrb[18].mxu0  ;;  %1463 = vmatmul.mubr.f32.gmra.mrb[38].mxu0 %v2366_v18  ;;  %v654_v24 = vmul.f32 %v2366_v18, %v2366_v18 }
 0x11c   :  { %v1223_v25 = vpop.f32.mrb[19].mxu0 }
 0x11d   :  { %v1302_v27 = vpop.f32.mrb[18].mxu1  ;;  %v2372_v28 = vadd.f32 %v1301_v21, %v265_v22  ;;  %v1224_v29 = vadd.f32 %v1223_v25, %v1222_v23  ;;  %1519 = vmatmul.mubr.f32.gmra.mrb[38].mxu1 %v654_v24 }
 0x11e   :  { %v1303_v30 = vpop.f32.mrb[19].mxu1 }
 0x11f   :  { %v1304_v31 = vadd.f32 %v1303_v30, %v1302_v27  ;;  %v270_v32 = vadd.f32 %v1224_v29, %v2321_v59  ;;  %v1225_v33 = vpop.f32.mrb[20].mxu0  ;;  %1465 = vmatprep.mubr.f32.mxu0 %v2372_v28  ;;  %v655_v34 = vmul.f32 %v2372_v28, %v2372_v28 }
 0x120   :  { %v1226_v36 = vpop.f32.mrb[21].mxu0 }
 0x121   :  { %v1305_v37 = vpop.f32.mrb[20].mxu1  ;;  %v2378_v38 = vadd.f32 %v1304_v31, %v270_v32  ;;  %v1227_v39 = vadd.f32 %v1226_v36, %v1225_v33  ;;  %1521 = vmatprep.mubr.f32.mxu1 %v655_v34 }
 0x122   :  { %v1306_v40 = vpop.f32.mrb[21].mxu1 }
 0x123   :  { %v1307_v41 = vadd.f32 %v1306_v40, %v1305_v37  ;;  %v275_v42 = vadd.f32 %v1227_v39, %v2321_v59  ;;  %v1228_v43 = vpop.f32.mrb[22].mxu0  ;;  %1466 = vmatmul.mubr.f32.gmra.mrb[40].mxu0 %v2378_v38  ;;  %v656_v45 = vmul.f32 %v2378_v38, %v2378_v38 }
 0x124   :  { %v1229_v46 = vpop.f32.mrb[23].mxu0 }
 0x125   :  { %v1308_v47 = vpop.f32.mrb[22].mxu1  ;;  %v2384_v48 = vadd.f32 %v1307_v41, %v275_v42  ;;  %v1230_v50 = vadd.f32 %v1229_v46, %v1228_v43  ;;  %1522 = vmatmul.mubr.f32.gmra.mrb[40].mxu1 %v656_v45 }
 0x126   :  { %v1309_v52 = vpop.f32.mrb[23].mxu1 }
 0x127   :  { %v1310_v54 = vadd.f32 %v1309_v52, %v1308_v47  ;;  %v280_v56 = vadd.f32 %v1230_v50, %v2321_v59  ;;  %v1231_v60 = vpop.f32.mrb[24].mxu0  ;;  %1468 = vmatprep.mubr.f32.mxu0 %v2384_v48  ;;  %v657_v61 = vmul.f32 %v2384_v48, %v2384_v48  ;;  %v1800_v47 = vmov 0.0|0.0  }
 0x128   :  { %v1232_v63 = vpop.f32.mrb[25].mxu0  ;;  %1731 = vmatprep.subr.bf16.mxu0 %v1800_v47  ;;  %1763 = vmatprep.subr.bf16.mxu1 %v1800_v47 }
 0x129   :  { %v1311_v0 = vpop.f32.mrb[24].mxu1  ;;  %v2390_v1 = vadd.f32 %v1310_v54, %v280_v56  ;;  %v1233_v2 = vadd.f32 %v1232_v63, %v1231_v60  ;;  %1524 = vmatprep.mubr.f32.mxu1 %v657_v61  ;;  %1734 = vmatpush3.bf16.xpose.msk.msra.mxu0 %vm2421_vm1, %v2087_v51 }
 0x12a   :  { %v1312_v3 = vpop.f32.mrb[25].mxu1  ;;  %1766 = vmatpush3.bf16.xpose.msk.msra.mxu1 %vm2421_vm1, %v2087_v51  ;;  %1735 = vmatprep.subr.bf16.mxu0 %v1800_v47  ;;  %v1802_v51 = vmov 0.0  }
 0x12b   :  { %v1313_v4 = vadd.f32 %v1312_v3, %v1311_v0  ;;  %v285_v8 = vadd.f32 %v1233_v2, %v2321_v59  ;;  %v1234_v9 = vpop.f32.mrb[26].mxu0  ;;  %1469 = vmatmul.mubr.f32.gmra.mrb[42].mxu0 %v2390_v1  ;;  %v658_v10 = vmul.f32 %v2390_v1, %v2390_v1  ;;  %1767 = vmatprep.subr.bf16.mxu1 %v1800_v47 }
 0x12c   :  { %v1235_v11 = vpop.f32.mrb[27].mxu0 }
 0x12d   :  { %v1314_v13 = vpop.f32.mrb[26].mxu1  ;;  %v2396_v14 = vadd.f32 %v1313_v4, %v285_v8  ;;  %v1236_v15 = vadd.f32 %v1235_v11, %v1234_v9  ;;  %1525 = vmatmul.mubr.f32.gmra.mrb[42].mxu1 %v658_v10 }
 0x12e   :  { %v1315_v16 = vpop.f32.mrb[27].mxu1 }
 0x12f   :  { %v1316_v19 = vadd.f32 %v1315_v16, %v1314_v13  ;;  %v290_v20 = vadd.f32 %v1236_v15, %v2321_v59  ;;  %v1237_v21 = vpop.f32.mrb[28].mxu0  ;;  %1471 = vmatprep.mubr.f32.mxu0 %v2396_v14  ;;  %v659_v22 = vmul.f32 %v2396_v14, %v2396_v14 }
 0x130   :  { %v1238_v23 = vpop.f32.mrb[29].mxu0 }
 0x131   :  { %v1317_v24 = vpop.f32.mrb[28].mxu1  ;;  %v2402_v25 = vadd.f32 %v1316_v19, %v290_v20  ;;  %v1239_v27 = vadd.f32 %v1238_v23, %v1237_v21  ;;  %1527 = vmatprep.mubr.f32.mxu1 %v659_v22  ;;  %1738 = vmatpush3.bf16.xpose.msk.msra.mxu0 %vm2421_vm1, %v2100_v55 }
 0x132   :  { %v1318_v29 = vpop.f32.mrb[29].mxu1  ;;  %1770 = vmatpush3.bf16.xpose.msk.msra.mxu1 %vm2421_vm1, %v2100_v55  ;;  %1739 = vmatprep.subr.bf16.mxu0 %v1800_v47 }
 0x133   :  { %v1319_v30 = vadd.f32 %v1318_v29, %v1317_v24  ;;  %v295_v31 = vadd.f32 %v1239_v27, %v2321_v59  ;;  %v1240_v32 = vpop.f32.mrb[30].mxu0  ;;  %1472 = vmatmul.mubr.f32.gmra.mrb[44].mxu0 %v2402_v25  ;;  %v660_v33 = vmul.f32 %v2402_v25, %v2402_v25  ;;  %1771 = vmatprep.subr.bf16.mxu1 %v1800_v47 }
 0x134   :  { %v1241_v34 = vpop.f32.mrb[31].mxu0 }
 0x135   :  { %v1320_v36 = vpop.f32.mrb[30].mxu1  ;;  %v2408_v37 = vadd.f32 %v1319_v30, %v295_v31  ;;  %v1242_v39 = vadd.f32 %v1241_v34, %v1240_v32  ;;  %1528 = vmatmul.mubr.f32.gmra.mrb[44].mxu1 %v660_v33 }
 0x136   :  { %v1321_v40 = vpop.f32.mrb[31].mxu1 }
 0x137   :  { %v1322_v41 = vadd.f32 %v1321_v40, %v1320_v36  ;;  %v300_v42 = vadd.f32 %v1242_v39, %v2321_v59  ;;  %1474 = vmatprep.mubr.f32.mxu0 %v2408_v37  ;;  %v661_v43 = vmul.f32 %v2408_v37, %v2408_v37 }
 0x139   :  { %v2414_v45 = vadd.f32 %v1322_v41, %v300_v42  ;;  %1530 = vmatprep.mubr.f32.mxu1 %v661_v43  ;;  %1742 = vmatpush3.bf16.xpose.msk.msra.mxu0 %vm2421_vm1, %v2124_v62 }
 0x13a   :  { %1774 = vmatpush3.bf16.xpose.msk.msra.mxu1 %vm2421_vm1, %v2124_v62  ;;  %1743 = vmatprep.subr.bf16.mxu0 %v1800_v47 }
 0x13b   :  { %1475 = vmatmul.mubr.f32.gmra.mrb[46].mxu0 %v2414_v45  ;;  %v662_v46 = vmul.f32 %v2414_v45, %v2414_v45  ;;  %1775 = vmatprep.subr.bf16.mxu1 %v1800_v47 }
 0x13c   :  { %1565 = vmatprep.mubr.msk.f32.mxu0 %vm1801_vm2, %v1802_v51 }
 0x13d   :  { %1531 = vmatmul.mubr.f32.gmra.mrb[46].mxu1 %v662_v46 }
 0x13e   :  { %1600 = vmatprep.mubr.msk.f32.mxu1 %vm1801_vm2, %v1802_v51 }
 0x141   :  { %1746 = vmatpush3.bf16.xpose.msk.msra.mxu0 %vm2421_vm1, %v2148_v5 }
 0x142   :  { %1778 = vmatpush3.bf16.xpose.msk.msra.mxu1 %vm2421_vm1, %v2148_v5  ;;  %1747 = vmatprep.subr.bf16.mxu0 %v1800_v47 }
 0x143   :  { %1779 = vmatprep.subr.bf16.mxu1 %v1800_v47 }
 0x149   :  { %1750 = vmatpush3.bf16.xpose.msk.msra.mxu0 %vm2421_vm1, %v2172_v12 }
 0x14a   :  { %1782 = vmatpush3.bf16.xpose.msk.msra.mxu1 %vm2421_vm1, %v2172_v12  ;;  %1751 = vmatprep.subr.bf16.mxu0 %v1800_v47 }
 0x14b   :  { %1783 = vmatprep.subr.bf16.mxu1 %v1800_v47 }
 0x151   :  { %1754 = vmatpush3.bf16.xpose.msk.msra.mxu0 %vm2421_vm1, %v2288_v49 }
 0x152   :  { %1786 = vmatpush3.bf16.xpose.msk.msra.mxu1 %vm2421_vm1, %v2288_v49  ;;  %1755 = vmatprep.subr.bf16.mxu0 %v1800_v47 }
 0x153   :  { %1787 = vmatprep.subr.bf16.mxu1 %v1800_v47 }
 0x159   :  { %1758 = vmatpush3.bf16.xpose.msk.msra.mxu0 %vm2421_vm1, %v2300_v53 }
 0x15a   :  { %1790 = vmatpush3.bf16.xpose.msk.msra.mxu1 %vm2421_vm1, %v2300_v53  ;;  %1759 = vmatprep.subr.bf16.mxu0 %v1800_v47 }
 0x15b   :  { %1791 = vmatprep.subr.bf16.mxu1 %v1800_v47 }
 0x161   :  { %1762 = vmatpush3.bf16.xpose.msk.msra.mxu0 %vm2421_vm1, %v2312_v57 }
 0x162   :  { %1794 = vmatpush3.bf16.xpose.msk.msra.mxu1 %vm2421_vm1, %v2312_v57 }
 0x1d6   :  { %v1455_v55 = vpop.f32.mrb[32].mxu0 }
 0x1d7   :  { %v611_v62 = vsel %vm609_vm0, %v1455_v55, 0.0  ;;  %v530_v5 = vpop.f32.mrb[33].mxu0 }
 0x1d8   :  { %v610_v12 = vsel %vm609_vm0, %v530_v5, 0.0  ;;  %v1511_v49 = vpop.f32.mrb[32].mxu1 }
 0x1d9   :  { %v612_v53 = vadd.f32 %v611_v62, %v610_v12  ;;  %v809_v50 = vsel %vm609_vm0, %v1511_v49, 0.0  ;;  %v729_v52 = vpop.f32.mrb[33].mxu1 }
 0x1da   :  { %v808_v54 = vsel %vm609_vm0, %v729_v52, 0.0 }
 0x1db   :  { %v810_v56 = vadd.f32 %v809_v50, %v808_v54 }
 0x1de   :  { %v1458_v60 = vpop.f32.mrb[34].mxu0 }
 0x1df   :  { %v540_v61 = vpop.f32.mrb[35].mxu0  ;;  %v615_v3 = vsel %vm609_vm0, %v1458_v60, 0.0 }
 0x1e0   :  { %v613_v63 = vsel %vm609_vm0, %v540_v61, 0.0  ;;  %v1514_v0 = vpop.f32.mrb[34].mxu1 }
 0x1e1   :  { %v614_v57 = vadd.f32 %v613_v63, %v612_v53  ;;  %v739_v2 = vpop.f32.mrb[35].mxu1  ;;  %v813_v10 = vsel %vm609_vm0, %v1514_v0, 0.0 }
 0x1e2   :  { %v811_v4 = vsel %vm609_vm0, %v739_v2, 0.0 }
 0x1e3   :  { %v812_v8 = vadd.f32 %v811_v4, %v810_v56  ;;  %v616_v9 = vadd.f32 %v615_v3, %v614_v57 }
 0x1e5   :  { %v814_v11 = vadd.f32 %v813_v10, %v812_v8 }
 0x1e6   :  { %v1461_v13 = vpop.f32.mrb[36].mxu0 }
 0x1e7   :  { %v550_v15 = vpop.f32.mrb[37].mxu0  ;;  %v619_v22 = vsel %vm609_vm0, %v1461_v13, 0.0 }
 0x1e8   :  { %v617_v16 = vsel %vm609_vm0, %v550_v15, 0.0  ;;  %v1517_v19 = vpop.f32.mrb[36].mxu1 }
 0x1e9   :  { %v618_v20 = vadd.f32 %v617_v16, %v616_v9  ;;  %v749_v21 = vpop.f32.mrb[37].mxu1  ;;  %v817_v29 = vsel %vm609_vm0, %v1517_v19, 0.0 }
 0x1ea   :  { %v815_v23 = vsel %vm609_vm0, %v749_v21, 0.0 }
 0x1eb   :  { %v816_v24 = vadd.f32 %v815_v23, %v814_v11  ;;  %v620_v27 = vadd.f32 %v619_v22, %v618_v20 }
 0x1ed   :  { %v818_v30 = vadd.f32 %v817_v29, %v816_v24 }
 0x1ee   :  { %v1464_v31 = vpop.f32.mrb[38].mxu0 }
 0x1ef   :  { %v560_v32 = vpop.f32.mrb[39].mxu0  ;;  %v623_v40 = vsel %vm609_vm0, %v1464_v31, 0.0 }
 0x1f0   :  { %v621_v33 = vsel %vm609_vm0, %v560_v32, 0.0  ;;  %v1520_v34 = vpop.f32.mrb[38].mxu1 }
 0x1f1   :  { %v622_v36 = vadd.f32 %v621_v33, %v620_v27  ;;  %v759_v39 = vpop.f32.mrb[39].mxu1  ;;  %v821_v46 = vsel %vm609_vm0, %v1520_v34, 0.0 }
 0x1f2   :  { %v819_v41 = vsel %vm609_vm0, %v759_v39, 0.0 }
 0x1f3   :  { %v820_v42 = vadd.f32 %v819_v41, %v818_v30  ;;  %v624_v43 = vadd.f32 %v623_v40, %v622_v36 }
 0x1f5   :  { %v822_v47 = vadd.f32 %v821_v46, %v820_v42 }
 0x1f6   :  { %v1467_v59 = vpop.f32.mrb[40].mxu0 }
 0x1f7   :  { %v570_v51 = vpop.f32.mrb[41].mxu0  ;;  %v627_v49 = vsel %vm609_vm0, %v1467_v59, 0.0 }
 0x1f8   :  { %v625_v55 = vsel %vm609_vm0, %v570_v51, 0.0  ;;  %v1523_v62 = vpop.f32.mrb[40].mxu1 }
 0x1f9   :  { %v626_v5 = vadd.f32 %v625_v55, %v624_v43  ;;  %v769_v12 = vpop.f32.mrb[41].mxu1  ;;  %v825_v54 = vsel %vm609_vm0, %v1523_v62, 0.0 }
 0x1fa   :  { %v823_v53 = vsel %vm609_vm0, %v769_v12, 0.0 }
 0x1fb   :  { %v824_v50 = vadd.f32 %v823_v53, %v822_v47  ;;  %v628_v52 = vadd.f32 %v627_v49, %v626_v5 }
 0x1fd   :  { %v826_v56 = vadd.f32 %v825_v54, %v824_v50 }
 0x1fe   :  { %v1470_v60 = vpop.f32.mrb[42].mxu0 }
 0x1ff   :  { %v580_v61 = vpop.f32.mrb[43].mxu0  ;;  %v631_v3 = vsel %vm609_vm0, %v1470_v60, 0.0 }
 0x200   :  { %v629_v63 = vsel %vm609_vm0, %v580_v61, 0.0  ;;  %v1526_v0 = vpop.f32.mrb[42].mxu1 }
 0x201   :  { %v630_v57 = vadd.f32 %v629_v63, %v628_v52  ;;  %v779_v2 = vpop.f32.mrb[43].mxu1  ;;  %v829_v10 = vsel %vm609_vm0, %v1526_v0, 0.0 }
 0x202   :  { %v827_v4 = vsel %vm609_vm0, %v779_v2, 0.0 }
 0x203   :  { %v828_v8 = vadd.f32 %v827_v4, %v826_v56  ;;  %v632_v9 = vadd.f32 %v631_v3, %v630_v57  ;;  %v853_v3 = vld [vmem:[%s2581_s4] sm:$0x1] }
 0x205   :  { %v830_v11 = vadd.f32 %v829_v10, %v828_v8 }
 0x206   :  { %v1473_v13 = vpop.f32.mrb[44].mxu0 }
 0x207   :  { %v590_v15 = vpop.f32.mrb[45].mxu0  ;;  %v635_v22 = vsel %vm609_vm0, %v1473_v13, 0.0  ;;  %v979_v13 = vlaneseq }
 0x208   :  { %v633_v16 = vsel %vm609_vm0, %v590_v15, 0.0  ;;  %v1529_v19 = vpop.f32.mrb[44].mxu1 }
 0x209   :  { %v634_v20 = vadd.f32 %v633_v16, %v632_v9  ;;  %v789_v21 = vpop.f32.mrb[45].mxu1  ;;  %v833_v29 = vsel %vm609_vm0, %v1529_v19, 0.0  ;;  %v855_v9 = vld [vmem:[%s2582_s5] sm:$0x1]  ;;  %v980_v15 = vshrl.u32 %v979_v13, 7 }
 0x20a   :  { %v831_v23 = vsel %vm609_vm0, %v789_v21, 0.0 }
 0x20b   :  { %v832_v24 = vadd.f32 %v831_v23, %v830_v11  ;;  %v636_v27 = vadd.f32 %v635_v22, %v634_v20  ;;  %v981_v16 = vsub.s32 0, %v980_v15 }
 0x20d   :  { %v834_v30 = vadd.f32 %v833_v29, %v832_v24 }
 0x20e   :  { %v1476_v31 = vpop.f32.mrb[46].mxu0 }
 0x20f   :  { %v600_v32 = vpop.f32.mrb[47].mxu0  ;;  %v639_v40 = vsel %vm609_vm0, %v1476_v31, 0.0 }
 0x210   :  { %v637_v33 = vsel %vm609_vm0, %v600_v32, 0.0  ;;  %v1532_v34 = vpop.f32.mrb[46].mxu1 }
 0x211   :  { %v638_v36 = vadd.f32 %v637_v33, %v636_v27  ;;  %v799_v39 = vpop.f32.mrb[47].mxu1  ;;  %v837_v46 = vsel %vm609_vm0, %v1532_v34, 0.0 }
 0x212   :  { %v835_v41 = vsel %vm609_vm0, %v799_v39, 0.0 }
 0x213   :  { %v640_v42 = vadd.f32 %v639_v40, %v638_v36  ;;  %v836_v43 = vadd.f32 %v835_v41, %v834_v30 }
 0x215   :  { %v641_v47 = vrot.slane %v640_v42, 4  ;;  %v838_v59 = vadd.f32 %v837_v46, %v836_v43 }
 0x217   :  { %v642_v51 = vadd.f32 %v641_v47, %v640_v42  ;;  %v839_v55 = vrot.slane %v838_v59, 4 }
 0x219   :  { %v643_v62 = vrot.slane %v642_v51, 2  ;;  %v840_v5 = vadd.f32 %v839_v55, %v838_v59 }
 0x21b   :  { %v644_v12 = vadd.f32 %v643_v62, %v642_v51  ;;  %v841_v49 = vrot.slane %v840_v5, 2 }
 0x21d   :  { %v645_v53 = vrot.slane %v644_v12, 1  ;;  %v842_v50 = vadd.f32 %v841_v49, %v840_v5 }
 0x21f   :  { %v646_v52 = vadd.f32 %v645_v53, %v644_v12  ;;  %v843_v54 = vrot.slane %v842_v50, 1 }
 0x221   :  { %v846_v56 = vmul.f32 0.001953125, %v646_v52  ;;  %v844_v60 = vadd.f32 %v843_v54, %v842_v50 }
 0x223   :  { %v848_v61 = vmul.f32 %v846_v56, %v846_v56  ;;  %v847_v63 = vmul.f32 0.001953125, %v844_v60 }
 0x225   :  { %v849_v0 = vsub.f32 %v847_v63, %v848_v61 }
 0x227   :  { %v850_v57 = vmax.f32 %v849_v0, 0.0 }
 0x229   :  { %v851_v2 = vadd.f32 1e-05, %v850_v57 }
 0x22b   :  { %1798 = vrsqrt.f32 %v851_v2 }
 0x235   :  { %v1799_v4 = vpop.eup %1798 }
 0x236   :  { %v854_v8 = vmul.f32 %v1799_v4, %v853_v3 }
 0x238   :  { %1566 = vmatmul.mubr.msk.f32.vlgmr.msra.gmra.mrb[48].mxu0 %vm609_vm0, %v854_v8  ;;  %v856_v10 = vmul.f32 %v854_v8, %v846_v56 }
 0x23a   :  { %v857_v11 = vsub.f32 %v855_v9, %v856_v10 }
 0x23c   :  { %1601 = vmatmul.mubr.msk.f32.vlgmr.msra.gmra.mrb[48].mxu1 %vm609_vm0, %v857_v11 }
 0x30b   :  { %v975_v19 = vpop.f32.mrb[48].mxu0 }
 0x30c   :  { %v982_v20 = vrot.slane %v975_v19, %v981_v16  ;;  %v1567_v21 = vpop.f32.mrb[49].mxu0 }
 0x30e   :  { %v983_v22 = vmul.f32 %v982_v20, %v2324_v7  ;;  %v984_v24 = vmul.f32 %v982_v20, %v2330_v17  ;;  %v985_v27 = vmul.f32 %v982_v20, %v2336_v26  ;;  %v986_v29 = vmul.f32 %v982_v20, %v2342_v35 }
 0x30f   :  { %v1068_v23 = vpop.f32.mrb[48].mxu1  ;;  %v987_v30 = vmul.f32 %v982_v20, %v2348_v44  ;;  %v988_v32 = vmul.f32 %v982_v20, %v2354_v58  ;;  %v989_v33 = vmul.f32 %v982_v20, %v2360_v6  ;;  %v990_v34 = vmul.f32 %v982_v20, %v2366_v18 }
 0x310   :  { %v1602_v31 = vpop.f32.mrb[49].mxu1  ;;  %v991_v36 = vmul.f32 %v982_v20, %v2372_v28  ;;  %v992_v7 = vmul.f32 %v982_v20, %v2378_v38  ;;  %v993_v39 = vmul.f32 %v982_v20, %v2384_v48  ;;  %v994_v17 = vmul.f32 %v982_v20, %v2390_v1 }
 0x311   :  { %v1075_v26 = vrot.slane %v1068_v23, %v981_v16  ;;  %v995_v35 = vmul.f32 %v982_v20, %v2396_v14  ;;  %v996_v44 = vmul.f32 %v982_v20, %v2402_v25  ;;  %v997_v40 = vmul.f32 %v982_v20, %v2408_v37 }
 0x312   :  { %v998_v58 = vmul.f32 %v982_v20, %v2414_v45 }
 0x313   :  { %v1076_v6 = vadd.f32 %v1075_v26, %v983_v22  ;;  %v1077_v41 = vadd.f32 %v1075_v26, %v984_v24  ;;  %v1078_v18 = vadd.f32 %v1075_v26, %v985_v27  ;;  %v1079_v42 = vadd.f32 %v1075_v26, %v986_v29 }
 0x314   :  { %v1080_v28 = vadd.f32 %v1075_v26, %v987_v30  ;;  %v1081_v43 = vadd.f32 %v1075_v26, %v988_v32  ;;  %v1082_v38 = vadd.f32 %v1075_v26, %v989_v33  ;;  %v1083_v46 = vadd.f32 %v1075_v26, %v990_v34 }
 0x315   :  { %v1084_v48 = vadd.f32 %v1075_v26, %v991_v36  ;;  %v1085_v47 = vadd.f32 %v1075_v26, %v992_v7  ;;  %v1086_v1 = vadd.f32 %v1075_v26, %v993_v39  ;;  %v1087_v59 = vadd.f32 %v1075_v26, %v994_v17 }
 0x316   :  { %v1088_v51 = vadd.f32 %v1075_v26, %v995_v35  ;;  %v1089_v14 = vadd.f32 %v1075_v26, %v996_v44  ;;  %v1090_v55 = vadd.f32 %v1075_v26, %v997_v40  ;;  %v1091_v25 = vadd.f32 %v1075_v26, %v998_v58 }
 0x317   :  { %v1092_v62 = vmax.f32 %v1076_v6, 0.0  ;;  %v1093_v37 = vmax.f32 %v1077_v41, 0.0  ;;  %v1094_v5 = vmax.f32 %v1078_v18, 0.0  ;;  %v1095_v45 = vmax.f32 %v1079_v42, 0.0 }
 0x318   :  { %v1096_v12 = vmax.f32 %v1080_v28, 0.0  ;;  %v1097_v49 = vmax.f32 %v1081_v43, 0.0  ;;  %v1098_v53 = vmax.f32 %v1082_v38, 0.0  ;;  %v1099_v50 = vmax.f32 %v1083_v46, 0.0 }
 0x319   :  { %v1100_v52 = vmax.f32 %v1084_v48, 0.0  ;;  %v1101_v54 = vmax.f32 %v1085_v47, 0.0  ;;  %v1102_v56 = vmax.f32 %v1086_v1, 0.0  ;;  %v1103_v60 = vmax.f32 %v1087_v59, 0.0  ;;  %1108 = vst [vmem:[%s2583_s6] sm:$0xff] %v1092_v62  ;;  %1109 = vst [vmem:[%s2583_s6 + $0x8] sm:$0xff] %v1093_v37 }
 0x31a   :  { %1110 = vst [vmem:[%s2583_s6 + $0x10] sm:$0xff] %v1094_v5  ;;  %1111 = vst [vmem:[%s2583_s6 + $0x18] sm:$0xff] %v1095_v45  ;;  %v1104_v61 = vmax.f32 %v1088_v51, 0.0  ;;  %v1105_v63 = vmax.f32 %v1089_v14, 0.0  ;;  %v1106_v0 = vmax.f32 %v1090_v55, 0.0  ;;  %v1107_v57 = vmax.f32 %v1091_v25, 0.0 }
 0x31b   :  { %1112 = vst [vmem:[%s2583_s6 + $0x20] sm:$0xff] %v1096_v12  ;;  %1113 = vst [vmem:[%s2583_s6 + $0x28] sm:$0xff] %v1097_v49 }
 0x31c   :  { %1114 = vst [vmem:[%s2583_s6 + $0x30] sm:$0xff] %v1098_v53  ;;  %1115 = vst [vmem:[%s2583_s6 + $0x38] sm:$0xff] %v1099_v50 }
 0x31d   :  { %1116 = vst [vmem:[%s2583_s6 + $0x40] sm:$0xff] %v1100_v52  ;;  %1117 = vst [vmem:[%s2583_s6 + $0x48] sm:$0xff] %v1101_v54 }
 0x31e   :  { %1118 = vst [vmem:[%s2583_s6 + $0x50] sm:$0xff] %v1102_v56  ;;  %1119 = vst [vmem:[%s2583_s6 + $0x58] sm:$0xff] %v1103_v60 }
 0x31f   :  { %1120 = vst [vmem:[%s2583_s6 + $0x60] sm:$0xff] %v1104_v61  ;;  %1121 = vst [vmem:[%s2583_s6 + $0x68] sm:$0xff] %v1105_v63 }
 0x320   :  { %1122 = vst [vmem:[%s2583_s6 + $0x70] sm:$0xff] %v1106_v0  ;;  %1123 = vst [vmem:[%s2583_s6 + $0x78] sm:$0xff] %v1107_v57 }

// kernel: vqvae8_forward.11
= control target key start
LH: loop header
LB: loop body
LE: loop exit
PB: predicated region body
PF: predicated region fallthrough
CT: control target
= control target key end

     0   :  { %v1598_v0 = vmov 0.0|0.0   ;;  %s2877_s1 = inlined_call_operand.vmem [shape: f32[512,128], index: 1, kind: input, shape index: {}]   ;;  %s2878_s0 = inlined_call_operand.vmem [shape: f32[512,512], index: 0, kind: input, shape index: {}]   ;;  %s2879_s2 = inlined_call_operand.vmem [shape: f32[1,128], index: 2, kind: input, shape index: {}]   ;;  %s2880_s3 = inlined_call_operand.vmem [shape: f32[512,128], index: 3, kind: output, shape index: {}]  }
   0x1   :  { %1244 = vmatprep.subr.bf16.mxu1 %v1598_v0  ;;  %v270_v1 = vld [vmem:[%s2877_s1] sm:$0xff]  ;;  %v271_v2 = vld [vmem:[%s2877_s1 + $0x8] sm:$0xff]  ;;  %1292 = vmatprep.subr.bf16.mxu0 %v1598_v0  ;;  %v272_v6 = vld [vmem:[%s2877_s1 + $0x10] sm:$0xff] }
   0x2   :  { %v302_v3 = vld [vmem:[%s2877_s1 + $0x100] sm:$0xff]  ;;  %v1245_v4 = vpack.c.bf16 %v271_v2, %v270_v1  ;;  %v303_v5 = vld [vmem:[%s2877_s1 + $0x108] sm:$0xff]  ;;  %v273_v7 = vld [vmem:[%s2877_s1 + $0x18] sm:$0xff] }
   0x3   :  { %v1293_v8 = vpack.c.bf16 %v303_v5, %v302_v3  ;;  %v304_v9 = vld [vmem:[%s2877_s1 + $0x110] sm:$0xff]  ;;  %v305_v10 = vld [vmem:[%s2877_s1 + $0x118] sm:$0xff]  ;;  %v1248_v11 = vpack.c.bf16 %v273_v7, %v272_v6  ;;  %v274_v13 = vld [vmem:[%s2877_s1 + $0x20] sm:$0xff] }
   0x4   :  { %1246 = vmatpush1.bf16.msra.mxu1 %v1245_v4  ;;  %v1296_v12 = vpack.c.bf16 %v305_v10, %v304_v9  ;;  %v275_v14 = vld [vmem:[%s2877_s1 + $0x28] sm:$0xff]  ;;  %v306_v15 = vld [vmem:[%s2877_s1 + $0x120] sm:$0xff]  ;;  %v276_v19 = vld [vmem:[%s2877_s1 + $0x30] sm:$0xff] }
   0x5   :  { %1294 = vmatpush1.bf16.msra.mxu0 %v1293_v8  ;;  %1247 = vmatprep.subr.bf16.mxu1 %v1598_v0  ;;  %v307_v16 = vld [vmem:[%s2877_s1 + $0x128] sm:$0xff]  ;;  %v1251_v17 = vpack.c.bf16 %v275_v14, %v274_v13  ;;  %v277_v20 = vld [vmem:[%s2877_s1 + $0x38] sm:$0xff]  ;;  %v308_v21 = vld [vmem:[%s2877_s1 + $0x130] sm:$0xff] }
   0x6   :  { %1295 = vmatprep.subr.bf16.mxu0 %v1598_v0  ;;  %v1299_v18 = vpack.c.bf16 %v307_v16, %v306_v15  ;;  %v309_v22 = vld [vmem:[%s2877_s1 + $0x138] sm:$0xff]  ;;  %v1254_v23 = vpack.c.bf16 %v277_v20, %v276_v19  ;;  %v278_v25 = vld [vmem:[%s2877_s1 + $0x40] sm:$0xff]  ;;  %v279_v26 = vld [vmem:[%s2877_s1 + $0x48] sm:$0xff] }
   0x7   :  { %v1302_v24 = vpack.c.bf16 %v309_v22, %v308_v21  ;;  %v310_v27 = vld [vmem:[%s2877_s1 + $0x140] sm:$0xff]  ;;  %v311_v28 = vld [vmem:[%s2877_s1 + $0x148] sm:$0xff]  ;;  %v1257_v29 = vpack.c.bf16 %v279_v26, %v278_v25  ;;  %v280_v31 = vld [vmem:[%s2877_s1 + $0x50] sm:$0xff] }
   0x8   :  { %1249 = vmatpush1.bf16.msra.mxu1 %v1248_v11  ;;  %v1305_v30 = vpack.c.bf16 %v311_v28, %v310_v27  ;;  %v281_v32 = vld [vmem:[%s2877_s1 + $0x58] sm:$0xff]  ;;  %v312_v33 = vld [vmem:[%s2877_s1 + $0x150] sm:$0xff]  ;;  %v282_v37 = vld [vmem:[%s2877_s1 + $0x60] sm:$0xff] }
   0x9   :  { %1297 = vmatpush1.bf16.msra.mxu0 %v1296_v12  ;;  %1250 = vmatprep.subr.bf16.mxu1 %v1598_v0  ;;  %v313_v34 = vld [vmem:[%s2877_s1 + $0x158] sm:$0xff]  ;;  %v1260_v35 = vpack.c.bf16 %v281_v32, %v280_v31  ;;  %v283_v38 = vld [vmem:[%s2877_s1 + $0x68] sm:$0xff]  ;;  %v314_v39 = vld [vmem:[%s2877_s1 + $0x160] sm:$0xff] }
   0xa   :  { %1298 = vmatprep.subr.bf16.mxu0 %v1598_v0  ;;  %v1308_v36 = vpack.c.bf16 %v313_v34, %v312_v33  ;;  %v315_v40 = vld [vmem:[%s2877_s1 + $0x168] sm:$0xff]  ;;  %v17_v42 = vld [vmem:[%s2878_s0 + $0x18] sm:$0xff]  ;;  %v1263_v43 = vpack.c.bf16 %v283_v38, %v282_v37  ;;  %v284_v45 = vld [vmem:[%s2877_s1 + $0x70] sm:$0xff] }
   0xb   :  { %v15_v41 = vld [vmem:[%s2878_s0 + $0x8] sm:$0xff]  ;;  %790 = vmatprep.mubr.f32.mxu0 %v17_v42  ;;  %v1311_v44 = vpack.c.bf16 %v315_v40, %v314_v39  ;;  %v285_v46 = vld [vmem:[%s2877_s1 + $0x78] sm:$0xff]  ;;  %v316_v47 = vld [vmem:[%s2877_s1 + $0x170] sm:$0xff] }
   0xc   :  { %1252 = vmatpush1.bf16.msra.mxu1 %v1251_v17  ;;  %405 = vmatprep.mubr.f32.mxu1 %v15_v41  ;;  %v317_v48 = vld [vmem:[%s2877_s1 + $0x178] sm:$0xff]  ;;  %v1266_v49 = vpack.c.bf16 %v285_v46, %v284_v45  ;;  %v286_v51 = vld [vmem:[%s2877_s1 + $0x80] sm:$0xff]  ;;  %v287_v52 = vld [vmem:[%s2877_s1 + $0x88] sm:$0xff] }
   0xd   :  { %1300 = vmatpush1.bf16.msra.mxu0 %v1299_v18  ;;  %1253 = vmatprep.subr.bf16.mxu1 %v1598_v0  ;;  %v1314_v50 = vpack.c.bf16 %v317_v48, %v316_v47  ;;  %v318_v53 = vld [vmem:[%s2877_s1 + $0x180] sm:$0xff]  ;;  %v319_v54 = vld [vmem:[%s2877_s1 + $0x188] sm:$0xff]  ;;  %v1269_v55 = vpack.c.bf16 %v287_v52, %v286_v51  ;;  %v288_v57 = vld [vmem:[%s2877_s1 + $0x90] sm:$0xff] }
   0xe   :  { %1301 = vmatprep.subr.bf16.mxu0 %v1598_v0  ;;  %v1317_v56 = vpack.c.bf16 %v319_v54, %v318_v53  ;;  %v289_v58 = vld [vmem:[%s2877_s1 + $0x98] sm:$0xff]  ;;  %v320_v59 = vld [vmem:[%s2877_s1 + $0x190] sm:$0xff]  ;;  %v290_v63 = vld [vmem:[%s2877_s1 + $0xa0] sm:$0xff] }
   0xf   :  { %v321_v60 = vld [vmem:[%s2877_s1 + $0x198] sm:$0xff]  ;;  %v1272_v61 = vpack.c.bf16 %v289_v58, %v288_v57  ;;  %v291_v1 = vld [vmem:[%s2877_s1 + $0xa8] sm:$0xff]  ;;  %v322_v2 = vld [vmem:[%s2877_s1 + $0x1a0] sm:$0xff] }
  0x10   :  { %1255 = vmatpush1.bf16.msra.mxu1 %v1254_v23  ;;  %v1320_v62 = vpack.c.bf16 %v321_v60, %v320_v59  ;;  %v323_v3 = vld [vmem:[%s2877_s1 + $0x1a8] sm:$0xff]  ;;  %v1275_v4 = vpack.c.bf16 %v291_v1, %v290_v63  ;;  %v292_v6 = vld [vmem:[%s2877_s1 + $0xb0] sm:$0xff]  ;;  %v293_v7 = vld [vmem:[%s2877_s1 + $0xb8] sm:$0xff] }
  0x11   :  { %1303 = vmatpush1.bf16.msra.mxu0 %v1302_v24  ;;  %1256 = vmatprep.subr.bf16.mxu1 %v1598_v0  ;;  %v1323_v5 = vpack.c.bf16 %v323_v3, %v322_v2  ;;  %v324_v8 = vld [vmem:[%s2877_s1 + $0x1b0] sm:$0xff]  ;;  %v325_v9 = vld [vmem:[%s2877_s1 + $0x1b8] sm:$0xff]  ;;  %v1278_v10 = vpack.c.bf16 %v293_v7, %v292_v6  ;;  %v294_v12 = vld [vmem:[%s2877_s1 + $0xc0] sm:$0xff] }
  0x12   :  { %1304 = vmatprep.subr.bf16.mxu0 %v1598_v0  ;;  %v1326_v11 = vpack.c.bf16 %v325_v9, %v324_v8  ;;  %v295_v13 = vld [vmem:[%s2877_s1 + $0xc8] sm:$0xff]  ;;  %v326_v14 = vld [vmem:[%s2877_s1 + $0x1c0] sm:$0xff]  ;;  %v296_v18 = vld [vmem:[%s2877_s1 + $0xd0] sm:$0xff] }
  0x13   :  { %v327_v15 = vld [vmem:[%s2877_s1 + $0x1c8] sm:$0xff]  ;;  %v1281_v16 = vpack.c.bf16 %v295_v13, %v294_v12  ;;  %v297_v19 = vld [vmem:[%s2877_s1 + $0xd8] sm:$0xff]  ;;  %v328_v20 = vld [vmem:[%s2877_s1 + $0x1d0] sm:$0xff] }
  0x14   :  { %1258 = vmatpush1.bf16.msra.mxu1 %v1257_v29  ;;  %v1329_v17 = vpack.c.bf16 %v327_v15, %v326_v14  ;;  %v329_v21 = vld [vmem:[%s2877_s1 + $0x1d8] sm:$0xff]  ;;  %v1284_v22 = vpack.c.bf16 %v297_v19, %v296_v18  ;;  %v298_v24 = vld [vmem:[%s2877_s1 + $0xe0] sm:$0xff]  ;;  %v299_v25 = vld [vmem:[%s2877_s1 + $0xe8] sm:$0xff] }
  0x15   :  { %1306 = vmatpush1.bf16.msra.mxu0 %v1305_v30  ;;  %1259 = vmatprep.subr.bf16.mxu1 %v1598_v0  ;;  %v1332_v23 = vpack.c.bf16 %v329_v21, %v328_v20  ;;  %v330_v26 = vld [vmem:[%s2877_s1 + $0x1e0] sm:$0xff]  ;;  %v331_v27 = vld [vmem:[%s2877_s1 + $0x1e8] sm:$0xff]  ;;  %v1287_v28 = vpack.c.bf16 %v299_v25, %v298_v24  ;;  %v300_v30 = vld [vmem:[%s2877_s1 + $0xf0] sm:$0xff] }
  0x16   :  { %1307 = vmatprep.subr.bf16.mxu0 %v1598_v0  ;;  %v1335_v29 = vpack.c.bf16 %v331_v27, %v330_v26  ;;  %v301_v31 = vld [vmem:[%s2877_s1 + $0xf8] sm:$0xff]  ;;  %v332_v32 = vld [vmem:[%s2877_s1 + $0x1f0] sm:$0xff]  ;;  %v19_v38 = vld [vmem:[%s2878_s0 + $0x28] sm:$0xff] }
  0x17   :  { %v333_v33 = vld [vmem:[%s2877_s1 + $0x1f8] sm:$0xff]  ;;  %v1290_v34 = vpack.c.bf16 %v301_v31, %v300_v30  ;;  %v16_v37 = vld [vmem:[%s2878_s0 + $0x10] sm:$0xff]  ;;  %v23_v41 = vld [vmem:[%s2878_s0 + $0x48] sm:$0xff] }
  0x18   :  { %1261 = vmatpush1.bf16.msra.mxu1 %v1260_v35  ;;  %v1338_v35 = vpack.c.bf16 %v333_v33, %v332_v32  ;;  %v21_v39 = vld [vmem:[%s2878_s0 + $0x38] sm:$0xff]  ;;  %v20_v40 = vld [vmem:[%s2878_s0 + $0x30] sm:$0xff]  ;;  %v27_v45 = vld [vmem:[%s2878_s0 + $0x68] sm:$0xff] }
  0x19   :  { %1309 = vmatpush1.bf16.msra.mxu0 %v1308_v36  ;;  %1262 = vmatprep.subr.bf16.mxu1 %v1598_v0  ;;  %v14_v36 = vld [vmem:[%s2878_s0] sm:$0xff]  ;;  %v25_v42 = vld [vmem:[%s2878_s0 + $0x58] sm:$0xff]  ;;  %v28_v48 = vld [vmem:[%s2878_s0 + $0x70] sm:$0xff] }
  0x1a   :  { %1310 = vmatprep.subr.bf16.mxu0 %v1598_v0  ;;  %v29_v46 = vld [vmem:[%s2878_s0 + $0x78] sm:$0xff]  ;;  %v26_v47 = vld [vmem:[%s2878_s0 + $0x60] sm:$0xff]  ;;  %v32_v52 = vld [vmem:[%s2878_s0 + $0x90] sm:$0xff] }
  0x1b   :  { %v30_v51 = vld [vmem:[%s2878_s0 + $0x80] sm:$0xff]  ;;  %v35_v53 = vld [vmem:[%s2878_s0 + $0xa8] sm:$0xff]  ;;  %v37_v54 = vld [vmem:[%s2878_s0 + $0xb8] sm:$0xff] }
  0x1c   :  { %1264 = vmatpush1.bf16.msra.mxu1 %v1263_v43  ;;  %v22_v43 = vld [vmem:[%s2878_s0 + $0x40] sm:$0xff]  ;;  %v39_v57 = vld [vmem:[%s2878_s0 + $0xc8] sm:$0xff]  ;;  %v41_v58 = vld [vmem:[%s2878_s0 + $0xd8] sm:$0xff] }
  0x1d   :  { %1312 = vmatpush1.bf16.msra.mxu0 %v1311_v44  ;;  %1265 = vmatprep.subr.bf16.mxu1 %v1598_v0  ;;  %v24_v44 = vld [vmem:[%s2878_s0 + $0x50] sm:$0xff]  ;;  %v38_v59 = vld [vmem:[%s2878_s0 + $0xc0] sm:$0xff]  ;;  %v47_v2 = vld [vmem:[%s2878_s0 + $0x108] sm:$0xff] }
  0x1e   :  { %1313 = vmatprep.subr.bf16.mxu0 %v1598_v0  ;;  %v40_v60 = vld [vmem:[%s2878_s0 + $0xd0] sm:$0xff]  ;;  %v42_v63 = vld [vmem:[%s2878_s0 + $0xe0] sm:$0xff]  ;;  %v49_v3 = vld [vmem:[%s2878_s0 + $0x118] sm:$0xff] }
  0x1f   :  { %v44_v1 = vld [vmem:[%s2878_s0 + $0xf0] sm:$0xff]  ;;  %v51_v6 = vld [vmem:[%s2878_s0 + $0x128] sm:$0xff]  ;;  %v53_v7 = vld [vmem:[%s2878_s0 + $0x138] sm:$0xff] }
  0x20   :  { %1267 = vmatpush1.bf16.msra.mxu1 %v1266_v49  ;;  %v31_v49 = vld [vmem:[%s2878_s0 + $0x88] sm:$0xff]  ;;  %v50_v8 = vld [vmem:[%s2878_s0 + $0x120] sm:$0xff]  ;;  %v52_v9 = vld [vmem:[%s2878_s0 + $0x130] sm:$0xff] }
  0x21   :  { %1315 = vmatpush1.bf16.msra.mxu0 %v1314_v50  ;;  %1268 = vmatprep.subr.bf16.mxu1 %v1598_v0  ;;  %v33_v50 = vld [vmem:[%s2878_s0 + $0x98] sm:$0xff]  ;;  %v54_v12 = vld [vmem:[%s2878_s0 + $0x140] sm:$0xff]  ;;  %v56_v13 = vld [vmem:[%s2878_s0 + $0x150] sm:$0xff] }
  0x22   :  { %1316 = vmatprep.subr.bf16.mxu0 %v1598_v0  ;;  %v59_v14 = vld [vmem:[%s2878_s0 + $0x168] sm:$0xff]  ;;  %v61_v15 = vld [vmem:[%s2878_s0 + $0x178] sm:$0xff]  ;;  %v62_v20 = vld [vmem:[%s2878_s0 + $0x180] sm:$0xff] }
  0x23   :  { %v63_v18 = vld [vmem:[%s2878_s0 + $0x188] sm:$0xff]  ;;  %v65_v19 = vld [vmem:[%s2878_s0 + $0x198] sm:$0xff]  ;;  %v64_v21 = vld [vmem:[%s2878_s0 + $0x190] sm:$0xff] }
  0x24   :  { %1270 = vmatpush1.bf16.msra.mxu1 %v1269_v55  ;;  %v34_v55 = vld [vmem:[%s2878_s0 + $0xa0] sm:$0xff]  ;;  %v68_v25 = vld [vmem:[%s2878_s0 + $0x1b0] sm:$0xff]  ;;  %v71_v26 = vld [vmem:[%s2878_s0 + $0x1c8] sm:$0xff] }
  0x25   :  { %1318 = vmatpush1.bf16.msra.mxu0 %v1317_v56  ;;  %1271 = vmatprep.subr.bf16.mxu1 %v1598_v0  ;;  %v36_v56 = vld [vmem:[%s2878_s0 + $0xb0] sm:$0xff]  ;;  %v66_v24 = vld [vmem:[%s2878_s0 + $0x1a0] sm:$0xff]  ;;  %v73_v27 = vld [vmem:[%s2878_s0 + $0x1d8] sm:$0xff] }
  0x26   :  { %1319 = vmatprep.subr.bf16.mxu0 %v1598_v0  ;;  %v75_v30 = vld [vmem:[%s2878_s0 + $0x1e8] sm:$0xff]  ;;  %v77_v31 = vld [vmem:[%s2878_s0 + $0x1f8] sm:$0xff]  ;;  %v74_v32 = vld [vmem:[%s2878_s0 + $0x1e0] sm:$0xff] }
  0x27   :  { %v76_v33 = vld [vmem:[%s2878_s0 + $0x1f0] sm:$0xff] }
  0x28   :  { %1273 = vmatpush1.bf16.msra.mxu1 %v1272_v61  ;;  %v43_v61 = vld [vmem:[%s2878_s0 + $0xe8] sm:$0xff] }
  0x29   :  { %1321 = vmatpush1.bf16.msra.mxu0 %v1320_v62  ;;  %1274 = vmatprep.subr.bf16.mxu1 %v1598_v0  ;;  %v45_v62 = vld [vmem:[%s2878_s0 + $0xf8] sm:$0xff] }
  0x2a   :  { %1322 = vmatprep.subr.bf16.mxu0 %v1598_v0 }
  0x2c   :  { %1276 = vmatpush1.bf16.msra.mxu1 %v1275_v4  ;;  %v46_v4 = vld [vmem:[%s2878_s0 + $0x100] sm:$0xff] }
  0x2d   :  { %1324 = vmatpush1.bf16.msra.mxu0 %v1323_v5  ;;  %1277 = vmatprep.subr.bf16.mxu1 %v1598_v0  ;;  %v48_v5 = vld [vmem:[%s2878_s0 + $0x110] sm:$0xff] }
  0x2e   :  { %1325 = vmatprep.subr.bf16.mxu0 %v1598_v0 }
  0x30   :  { %1279 = vmatpush1.bf16.msra.mxu1 %v1278_v10  ;;  %v55_v10 = vld [vmem:[%s2878_s0 + $0x148] sm:$0xff] }
  0x31   :  { %1327 = vmatpush1.bf16.msra.mxu0 %v1326_v11  ;;  %1280 = vmatprep.subr.bf16.mxu1 %v1598_v0  ;;  %v57_v11 = vld [vmem:[%s2878_s0 + $0x158] sm:$0xff] }
  0x32   :  { %1328 = vmatprep.subr.bf16.mxu0 %v1598_v0 }
  0x34   :  { %1282 = vmatpush1.bf16.msra.mxu1 %v1281_v16  ;;  %v58_v16 = vld [vmem:[%s2878_s0 + $0x160] sm:$0xff] }
  0x35   :  { %1330 = vmatpush1.bf16.msra.mxu0 %v1329_v17  ;;  %1283 = vmatprep.subr.bf16.mxu1 %v1598_v0  ;;  %v60_v17 = vld [vmem:[%s2878_s0 + $0x170] sm:$0xff] }
  0x36   :  { %1331 = vmatprep.subr.bf16.mxu0 %v1598_v0 }
  0x38   :  { %1285 = vmatpush1.bf16.msra.mxu1 %v1284_v22  ;;  %v67_v22 = vld [vmem:[%s2878_s0 + $0x1a8] sm:$0xff] }
  0x39   :  { %1333 = vmatpush1.bf16.msra.mxu0 %v1332_v23  ;;  %1286 = vmatprep.subr.bf16.mxu1 %v1598_v0  ;;  %v69_v23 = vld [vmem:[%s2878_s0 + $0x1b8] sm:$0xff] }
  0x3a   :  { %1334 = vmatprep.subr.bf16.mxu0 %v1598_v0 }
  0x3c   :  { %1288 = vmatpush1.bf16.msra.mxu1 %v1287_v28  ;;  %v70_v28 = vld [vmem:[%s2878_s0 + $0x1c0] sm:$0xff] }
  0x3d   :  { %1336 = vmatpush1.bf16.msra.mxu0 %v1335_v29  ;;  %1289 = vmatprep.subr.bf16.mxu1 %v1598_v0  ;;  %v72_v29 = vld [vmem:[%s2878_s0 + $0x1d0] sm:$0xff] }
  0x3e   :  { %1337 = vmatprep.subr.bf16.mxu0 %v1598_v0  ;;  %v18_v0 = vld [vmem:[%s2878_s0 + $0x20] sm:$0xff] }
  0x40   :  { %1291 = vmatpush1.bf16.msra.mxu1 %v1290_v34  ;;  %v79_v34 = vld [vmem:[%s2878_s0 + $0x208] sm:$0xff] }
  0x41   :  { %1339 = vmatpush1.bf16.msra.mxu0 %v1338_v35  ;;  %v81_v35 = vld [vmem:[%s2878_s0 + $0x218] sm:$0xff] }
  0x43   :  { %406 = vmatmul.mubr.f32.vlgmr.msra.gmra.mrb[0].mxu1 %v14_v36  ;;  %v78_v36 = vld [vmem:[%s2878_s0 + $0x200] sm:$0xff] }
  0x44   :  { %791 = vmatmul.mubr.f32.vlgmr.msra.gmra.mrb[0].mxu0 %v16_v37  ;;  %410 = vmatprep.mubr.f32.mxu1 %v19_v38  ;;  %v80_v37 = vld [vmem:[%s2878_s0 + $0x210] sm:$0xff]  ;;  %v83_v38 = vld [vmem:[%s2878_s0 + $0x228] sm:$0xff] }
  0x45   :  { %795 = vmatprep.mubr.f32.mxu0 %v21_v39  ;;  %v85_v39 = vld [vmem:[%s2878_s0 + $0x238] sm:$0xff] }
  0x47   :  { %411 = vmatmul.mubr.f32.gmra.mrb[2].mxu1 %v18_v0  ;;  %v82_v0 = vld [vmem:[%s2878_s0 + $0x220] sm:$0xff] }
  0x48   :  { %796 = vmatmul.mubr.f32.gmra.mrb[2].mxu0 %v20_v40  ;;  %415 = vmatprep.mubr.f32.mxu1 %v23_v41  ;;  %v84_v40 = vld [vmem:[%s2878_s0 + $0x230] sm:$0xff]  ;;  %v87_v41 = vld [vmem:[%s2878_s0 + $0x248] sm:$0xff] }
  0x49   :  { %800 = vmatprep.mubr.f32.mxu0 %v25_v42  ;;  %v89_v42 = vld [vmem:[%s2878_s0 + $0x258] sm:$0xff] }
  0x4b   :  { %416 = vmatmul.mubr.f32.gmra.mrb[4].mxu1 %v22_v43  ;;  %v86_v43 = vld [vmem:[%s2878_s0 + $0x240] sm:$0xff] }
  0x4c   :  { %801 = vmatmul.mubr.f32.gmra.mrb[4].mxu0 %v24_v44  ;;  %420 = vmatprep.mubr.f32.mxu1 %v27_v45  ;;  %v88_v44 = vld [vmem:[%s2878_s0 + $0x250] sm:$0xff]  ;;  %v91_v45 = vld [vmem:[%s2878_s0 + $0x268] sm:$0xff] }
  0x4d   :  { %805 = vmatprep.mubr.f32.mxu0 %v29_v46  ;;  %v93_v46 = vld [vmem:[%s2878_s0 + $0x278] sm:$0xff] }
  0x4f   :  { %421 = vmatmul.mubr.f32.gmra.mrb[6].mxu1 %v26_v47  ;;  %v90_v47 = vld [vmem:[%s2878_s0 + $0x260] sm:$0xff] }
  0x50   :  { %806 = vmatmul.mubr.f32.gmra.mrb[6].mxu0 %v28_v48  ;;  %425 = vmatprep.mubr.f32.mxu1 %v31_v49  ;;  %v92_v48 = vld [vmem:[%s2878_s0 + $0x270] sm:$0xff]  ;;  %v95_v49 = vld [vmem:[%s2878_s0 + $0x288] sm:$0xff] }
  0x51   :  { %810 = vmatprep.mubr.f32.mxu0 %v33_v50  ;;  %v97_v50 = vld [vmem:[%s2878_s0 + $0x298] sm:$0xff] }
  0x53   :  { %426 = vmatmul.mubr.f32.gmra.mrb[8].mxu1 %v30_v51  ;;  %v94_v51 = vld [vmem:[%s2878_s0 + $0x280] sm:$0xff] }
  0x54   :  { %811 = vmatmul.mubr.f32.gmra.mrb[8].mxu0 %v32_v52  ;;  %430 = vmatprep.mubr.f32.mxu1 %v35_v53  ;;  %v96_v52 = vld [vmem:[%s2878_s0 + $0x290] sm:$0xff]  ;;  %v99_v53 = vld [vmem:[%s2878_s0 + $0x2a8] sm:$0xff] }
  0x55   :  { %815 = vmatprep.mubr.f32.mxu0 %v37_v54  ;;  %v101_v54 = vld [vmem:[%s2878_s0 + $0x2b8] sm:$0xff] }
  0x57   :  { %431 = vmatmul.mubr.f32.gmra.mrb[10].mxu1 %v34_v55  ;;  %v98_v55 = vld [vmem:[%s2878_s0 + $0x2a0] sm:$0xff] }
  0x58   :  { %816 = vmatmul.mubr.f32.gmra.mrb[10].mxu0 %v36_v56  ;;  %435 = vmatprep.mubr.f32.mxu1 %v39_v57  ;;  %v100_v56 = vld [vmem:[%s2878_s0 + $0x2b0] sm:$0xff]  ;;  %v103_v57 = vld [vmem:[%s2878_s0 + $0x2c8] sm:$0xff] }
  0x59   :  { %820 = vmatprep.mubr.f32.mxu0 %v41_v58  ;;  %v105_v58 = vld [vmem:[%s2878_s0 + $0x2d8] sm:$0xff] }
  0x5b   :  { %436 = vmatmul.mubr.f32.gmra.mrb[12].mxu1 %v38_v59  ;;  %v102_v59 = vld [vmem:[%s2878_s0 + $0x2c0] sm:$0xff] }
  0x5c   :  { %821 = vmatmul.mubr.f32.gmra.mrb[12].mxu0 %v40_v60  ;;  %440 = vmatprep.mubr.f32.mxu1 %v43_v61  ;;  %v104_v60 = vld [vmem:[%s2878_s0 + $0x2d0] sm:$0xff]  ;;  %v107_v61 = vld [vmem:[%s2878_s0 + $0x2e8] sm:$0xff] }
  0x5d   :  { %825 = vmatprep.mubr.f32.mxu0 %v45_v62  ;;  %v109_v62 = vld [vmem:[%s2878_s0 + $0x2f8] sm:$0xff] }
  0x5f   :  { %441 = vmatmul.mubr.f32.gmra.mrb[14].mxu1 %v42_v63  ;;  %v106_v63 = vld [vmem:[%s2878_s0 + $0x2e0] sm:$0xff] }
  0x60   :  { %826 = vmatmul.mubr.f32.gmra.mrb[14].mxu0 %v44_v1  ;;  %445 = vmatprep.mubr.f32.mxu1 %v47_v2  ;;  %v108_v1 = vld [vmem:[%s2878_s0 + $0x2f0] sm:$0xff]  ;;  %v111_v2 = vld [vmem:[%s2878_s0 + $0x308] sm:$0xff] }
  0x61   :  { %830 = vmatprep.mubr.f32.mxu0 %v49_v3  ;;  %v113_v3 = vld [vmem:[%s2878_s0 + $0x318] sm:$0xff] }
  0x63   :  { %446 = vmatmul.mubr.f32.gmra.mrb[16].mxu1 %v46_v4  ;;  %v110_v4 = vld [vmem:[%s2878_s0 + $0x300] sm:$0xff] }
  0x64   :  { %831 = vmatmul.mubr.f32.gmra.mrb[16].mxu0 %v48_v5  ;;  %450 = vmatprep.mubr.f32.mxu1 %v51_v6  ;;  %v112_v5 = vld [vmem:[%s2878_s0 + $0x310] sm:$0xff]  ;;  %v115_v6 = vld [vmem:[%s2878_s0 + $0x328] sm:$0xff] }
  0x65   :  { %835 = vmatprep.mubr.f32.mxu0 %v53_v7  ;;  %v117_v7 = vld [vmem:[%s2878_s0 + $0x338] sm:$0xff] }
  0x67   :  { %451 = vmatmul.mubr.f32.gmra.mrb[18].mxu1 %v50_v8  ;;  %v114_v8 = vld [vmem:[%s2878_s0 + $0x320] sm:$0xff] }
  0x68   :  { %836 = vmatmul.mubr.f32.gmra.mrb[18].mxu0 %v52_v9  ;;  %455 = vmatprep.mubr.f32.mxu1 %v55_v10  ;;  %v116_v9 = vld [vmem:[%s2878_s0 + $0x330] sm:$0xff]  ;;  %v119_v10 = vld [vmem:[%s2878_s0 + $0x348] sm:$0xff] }
  0x69   :  { %840 = vmatprep.mubr.f32.mxu0 %v57_v11  ;;  %v121_v11 = vld [vmem:[%s2878_s0 + $0x358] sm:$0xff] }
  0x6b   :  { %456 = vmatmul.mubr.f32.gmra.mrb[20].mxu1 %v54_v12  ;;  %v118_v12 = vld [vmem:[%s2878_s0 + $0x340] sm:$0xff] }
  0x6c   :  { %841 = vmatmul.mubr.f32.gmra.mrb[20].mxu0 %v56_v13  ;;  %460 = vmatprep.mubr.f32.mxu1 %v59_v14  ;;  %v120_v13 = vld [vmem:[%s2878_s0 + $0x350] sm:$0xff]  ;;  %v123_v14 = vld [vmem:[%s2878_s0 + $0x368] sm:$0xff] }
  0x6d   :  { %845 = vmatprep.mubr.f32.mxu0 %v61_v15  ;;  %v125_v15 = vld [vmem:[%s2878_s0 + $0x378] sm:$0xff] }
  0x6f   :  { %461 = vmatmul.mubr.f32.gmra.mrb[22].mxu1 %v58_v16  ;;  %v122_v16 = vld [vmem:[%s2878_s0 + $0x360] sm:$0xff] }
  0x70   :  { %846 = vmatmul.mubr.f32.gmra.mrb[22].mxu0 %v60_v17  ;;  %465 = vmatprep.mubr.f32.mxu1 %v63_v18  ;;  %v124_v17 = vld [vmem:[%s2878_s0 + $0x370] sm:$0xff]  ;;  %v127_v18 = vld [vmem:[%s2878_s0 + $0x388] sm:$0xff] }
  0x71   :  { %850 = vmatprep.mubr.f32.mxu0 %v65_v19  ;;  %v129_v19 = vld [vmem:[%s2878_s0 + $0x398] sm:$0xff] }
  0x73   :  { %466 = vmatmul.mubr.f32.gmra.mrb[24].mxu1 %v62_v20  ;;  %v126_v20 = vld [vmem:[%s2878_s0 + $0x380] sm:$0xff] }
  0x74   :  { %851 = vmatmul.mubr.f32.gmra.mrb[24].mxu0 %v64_v21  ;;  %470 = vmatprep.mubr.f32.mxu1 %v67_v22  ;;  %v128_v21 = vld [vmem:[%s2878_s0 + $0x390] sm:$0xff]  ;;  %v131_v22 = vld [vmem:[%s2878_s0 + $0x3a8] sm:$0xff] }
  0x75   :  { %855 = vmatprep.mubr.f32.mxu0 %v69_v23  ;;  %v133_v23 = vld [vmem:[%s2878_s0 + $0x3b8] sm:$0xff] }
  0x77   :  { %471 = vmatmul.mubr.f32.gmra.mrb[26].mxu1 %v66_v24  ;;  %v130_v24 = vld [vmem:[%s2878_s0 + $0x3a0] sm:$0xff] }
  0x78   :  { %856 = vmatmul.mubr.f32.gmra.mrb[26].mxu0 %v68_v25  ;;  %475 = vmatprep.mubr.f32.mxu1 %v71_v26  ;;  %v132_v25 = vld [vmem:[%s2878_s0 + $0x3b0] sm:$0xff]  ;;  %v135_v26 = vld [vmem:[%s2878_s0 + $0x3c8] sm:$0xff] }
  0x79   :  { %860 = vmatprep.mubr.f32.mxu0 %v73_v27  ;;  %v137_v27 = vld [vmem:[%s2878_s0 + $0x3d8] sm:$0xff] }
  0x7b   :  { %476 = vmatmul.mubr.f32.gmra.mrb[28].mxu1 %v70_v28  ;;  %v134_v28 = vld [vmem:[%s2878_s0 + $0x3c0] sm:$0xff] }
  0x7c   :  { %861 = vmatmul.mubr.f32.gmra.mrb[28].mxu0 %v72_v29  ;;  %480 = vmatprep.mubr.f32.mxu1 %v75_v30  ;;  %v136_v29 = vld [vmem:[%s2878_s0 + $0x3d0] sm:$0xff]  ;;  %v139_v30 = vld [vmem:[%s2878_s0 + $0x3e8] sm:$0xff] }
  0x7d   :  { %865 = vmatprep.mubr.f32.mxu0 %v77_v31  ;;  %v141_v31 = vld [vmem:[%s2878_s0 + $0x3f8] sm:$0xff] }
  0x7f   :  { %481 = vmatmul.mubr.f32.gmra.mrb[30].mxu1 %v74_v32  ;;  %v138_v32 = vld [vmem:[%s2878_s0 + $0x3e0] sm:$0xff] }
  0x80   :  { %866 = vmatmul.mubr.f32.gmra.mrb[30].mxu0 %v76_v33  ;;  %485 = vmatprep.mubr.f32.mxu1 %v79_v34  ;;  %v140_v33 = vld [vmem:[%s2878_s0 + $0x3f0] sm:$0xff]  ;;  %v143_v34 = vld [vmem:[%s2878_s0 + $0x408] sm:$0xff] }
  0x81   :  { %870 = vmatprep.mubr.f32.mxu0 %v81_v35  ;;  %v145_v35 = vld [vmem:[%s2878_s0 + $0x418] sm:$0xff] }
  0x83   :  { %486 = vmatmul.mubr.f32.gmra.mrb[32].mxu1 %v78_v36  ;;  %v142_v36 = vld [vmem:[%s2878_s0 + $0x400] sm:$0xff] }
  0x84   :  { %871 = vmatmul.mubr.f32.gmra.mrb[32].mxu0 %v80_v37  ;;  %490 = vmatprep.mubr.f32.mxu1 %v83_v38  ;;  %v144_v37 = vld [vmem:[%s2878_s0 + $0x410] sm:$0xff]  ;;  %v147_v38 = vld [vmem:[%s2878_s0 + $0x428] sm:$0xff] }
  0x85   :  { %875 = vmatprep.mubr.f32.mxu0 %v85_v39  ;;  %v149_v39 = vld [vmem:[%s2878_s0 + $0x438] sm:$0xff] }
  0x87   :  { %491 = vmatmul.mubr.f32.gmra.mrb[34].mxu1 %v82_v0  ;;  %v146_v0 = vld [vmem:[%s2878_s0 + $0x420] sm:$0xff] }
  0x88   :  { %876 = vmatmul.mubr.f32.gmra.mrb[34].mxu0 %v84_v40  ;;  %495 = vmatprep.mubr.f32.mxu1 %v87_v41  ;;  %v148_v40 = vld [vmem:[%s2878_s0 + $0x430] sm:$0xff]  ;;  %v151_v41 = vld [vmem:[%s2878_s0 + $0x448] sm:$0xff] }
  0x89   :  { %880 = vmatprep.mubr.f32.mxu0 %v89_v42  ;;  %v153_v42 = vld [vmem:[%s2878_s0 + $0x458] sm:$0xff] }
  0x8b   :  { %496 = vmatmul.mubr.f32.gmra.mrb[36].mxu1 %v86_v43  ;;  %v150_v43 = vld [vmem:[%s2878_s0 + $0x440] sm:$0xff] }
  0x8c   :  { %881 = vmatmul.mubr.f32.gmra.mrb[36].mxu0 %v88_v44  ;;  %500 = vmatprep.mubr.f32.mxu1 %v91_v45  ;;  %v152_v44 = vld [vmem:[%s2878_s0 + $0x450] sm:$0xff]  ;;  %v155_v45 = vld [vmem:[%s2878_s0 + $0x468] sm:$0xff] }
  0x8d   :  { %885 = vmatprep.mubr.f32.mxu0 %v93_v46  ;;  %v157_v46 = vld [vmem:[%s2878_s0 + $0x478] sm:$0xff] }
  0x8f   :  { %501 = vmatmul.mubr.f32.gmra.mrb[38].mxu1 %v90_v47  ;;  %v154_v47 = vld [vmem:[%s2878_s0 + $0x460] sm:$0xff] }
  0x90   :  { %886 = vmatmul.mubr.f32.gmra.mrb[38].mxu0 %v92_v48  ;;  %505 = vmatprep.mubr.f32.mxu1 %v95_v49  ;;  %v156_v48 = vld [vmem:[%s2878_s0 + $0x470] sm:$0xff]  ;;  %v159_v49 = vld [vmem:[%s2878_s0 + $0x488] sm:$0xff] }
  0x91   :  { %890 = vmatprep.mubr.f32.mxu0 %v97_v50  ;;  %v161_v50 = vld [vmem:[%s2878_s0 + $0x498] sm:$0xff] }
  0x93   :  { %506 = vmatmul.mubr.f32.gmra.mrb[40].mxu1 %v94_v51  ;;  %v158_v51 = vld [vmem:[%s2878_s0 + $0x480] sm:$0xff] }
  0x94   :  { %891 = vmatmul.mubr.f32.gmra.mrb[40].mxu0 %v96_v52  ;;  %510 = vmatprep.mubr.f32.mxu1 %v99_v53  ;;  %v160_v52 = vld [vmem:[%s2878_s0 + $0x490] sm:$0xff]  ;;  %v163_v53 = vld [vmem:[%s2878_s0 + $0x4a8] sm:$0xff] }
  0x95   :  { %895 = vmatprep.mubr.f32.mxu0 %v101_v54  ;;  %v165_v54 = vld [vmem:[%s2878_s0 + $0x4b8] sm:$0xff] }
  0x97   :  { %511 = vmatmul.mubr.f32.gmra.mrb[42].mxu1 %v98_v55  ;;  %v162_v55 = vld [vmem:[%s2878_s0 + $0x4a0] sm:$0xff] }
  0x98   :  { %896 = vmatmul.mubr.f32.gmra.mrb[42].mxu0 %v100_v56  ;;  %515 = vmatprep.mubr.f32.mxu1 %v103_v57  ;;  %v164_v56 = vld [vmem:[%s2878_s0 + $0x4b0] sm:$0xff]  ;;  %v167_v57 = vld [vmem:[%s2878_s0 + $0x4c8] sm:$0xff] }
  0x99   :  { %900 = vmatprep.mubr.f32.mxu0 %v105_v58  ;;  %v169_v58 = vld [vmem:[%s2878_s0 + $0x4d8] sm:$0xff] }
  0x9b   :  { %516 = vmatmul.mubr.f32.gmra.mrb[44].mxu1 %v102_v59  ;;  %v166_v59 = vld [vmem:[%s2878_s0 + $0x4c0] sm:$0xff] }
  0x9c   :  { %901 = vmatmul.mubr.f32.gmra.mrb[44].mxu0 %v104_v60  ;;  %520 = vmatprep.mubr.f32.mxu1 %v107_v61  ;;  %v168_v60 = vld [vmem:[%s2878_s0 + $0x4d0] sm:$0xff]  ;;  %v171_v61 = vld [vmem:[%s2878_s0 + $0x4e8] sm:$0xff] }
  0x9d   :  { %905 = vmatprep.mubr.f32.mxu0 %v109_v62  ;;  %v173_v62 = vld [vmem:[%s2878_s0 + $0x4f8] sm:$0xff] }
  0x9f   :  { %521 = vmatmul.mubr.f32.gmra.mrb[46].mxu1 %v106_v63  ;;  %v170_v63 = vld [vmem:[%s2878_s0 + $0x4e0] sm:$0xff] }
  0xa0   :  { %906 = vmatmul.mubr.f32.gmra.mrb[46].mxu0 %v108_v1  ;;  %525 = vmatprep.mubr.f32.mxu1 %v111_v2  ;;  %v172_v1 = vld [vmem:[%s2878_s0 + $0x4f0] sm:$0xff]  ;;  %v175_v2 = vld [vmem:[%s2878_s0 + $0x508] sm:$0xff] }
  0xa1   :  { %910 = vmatprep.mubr.f32.mxu0 %v113_v3  ;;  %v177_v3 = vld [vmem:[%s2878_s0 + $0x518] sm:$0xff] }
  0xa3   :  { %526 = vmatmul.mubr.f32.gmra.mrb[48].mxu1 %v110_v4  ;;  %v174_v4 = vld [vmem:[%s2878_s0 + $0x500] sm:$0xff] }
  0xa4   :  { %911 = vmatmul.mubr.f32.gmra.mrb[48].mxu0 %v112_v5  ;;  %530 = vmatprep.mubr.f32.mxu1 %v115_v6  ;;  %v176_v5 = vld [vmem:[%s2878_s0 + $0x510] sm:$0xff]  ;;  %v179_v6 = vld [vmem:[%s2878_s0 + $0x528] sm:$0xff] }
  0xa5   :  { %915 = vmatprep.mubr.f32.mxu0 %v117_v7  ;;  %v181_v7 = vld [vmem:[%s2878_s0 + $0x538] sm:$0xff] }
  0xa7   :  { %531 = vmatmul.mubr.f32.gmra.mrb[50].mxu1 %v114_v8  ;;  %v178_v8 = vld [vmem:[%s2878_s0 + $0x520] sm:$0xff] }
  0xa8   :  { %916 = vmatmul.mubr.f32.gmra.mrb[50].mxu0 %v116_v9  ;;  %535 = vmatprep.mubr.f32.mxu1 %v119_v10  ;;  %v180_v9 = vld [vmem:[%s2878_s0 + $0x530] sm:$0xff]  ;;  %v183_v10 = vld [vmem:[%s2878_s0 + $0x548] sm:$0xff] }
  0xa9   :  { %920 = vmatprep.mubr.f32.mxu0 %v121_v11  ;;  %v185_v11 = vld [vmem:[%s2878_s0 + $0x558] sm:$0xff] }
  0xab   :  { %536 = vmatmul.mubr.f32.gmra.mrb[52].mxu1 %v118_v12  ;;  %v182_v12 = vld [vmem:[%s2878_s0 + $0x540] sm:$0xff] }
  0xac   :  { %921 = vmatmul.mubr.f32.gmra.mrb[52].mxu0 %v120_v13  ;;  %540 = vmatprep.mubr.f32.mxu1 %v123_v14  ;;  %v184_v13 = vld [vmem:[%s2878_s0 + $0x550] sm:$0xff]  ;;  %v187_v14 = vld [vmem:[%s2878_s0 + $0x568] sm:$0xff] }
  0xad   :  { %925 = vmatprep.mubr.f32.mxu0 %v125_v15  ;;  %v189_v15 = vld [vmem:[%s2878_s0 + $0x578] sm:$0xff] }
  0xaf   :  { %541 = vmatmul.mubr.f32.gmra.mrb[54].mxu1 %v122_v16  ;;  %v186_v16 = vld [vmem:[%s2878_s0 + $0x560] sm:$0xff] }
  0xb0   :  { %926 = vmatmul.mubr.f32.gmra.mrb[54].mxu0 %v124_v17  ;;  %545 = vmatprep.mubr.f32.mxu1 %v127_v18  ;;  %v188_v17 = vld [vmem:[%s2878_s0 + $0x570] sm:$0xff]  ;;  %v191_v18 = vld [vmem:[%s2878_s0 + $0x588] sm:$0xff] }
  0xb1   :  { %930 = vmatprep.mubr.f32.mxu0 %v129_v19  ;;  %v193_v19 = vld [vmem:[%s2878_s0 + $0x598] sm:$0xff] }
  0xb3   :  { %546 = vmatmul.mubr.f32.gmra.mrb[56].mxu1 %v126_v20  ;;  %v190_v20 = vld [vmem:[%s2878_s0 + $0x580] sm:$0xff] }
  0xb4   :  { %931 = vmatmul.mubr.f32.gmra.mrb[56].mxu0 %v128_v21  ;;  %550 = vmatprep.mubr.f32.mxu1 %v131_v22  ;;  %v192_v21 = vld [vmem:[%s2878_s0 + $0x590] sm:$0xff]  ;;  %v195_v22 = vld [vmem:[%s2878_s0 + $0x5a8] sm:$0xff] }
  0xb5   :  { %935 = vmatprep.mubr.f32.mxu0 %v133_v23  ;;  %v197_v23 = vld [vmem:[%s2878_s0 + $0x5b8] sm:$0xff] }
  0xb7   :  { %551 = vmatmul.mubr.f32.gmra.mrb[58].mxu1 %v130_v24  ;;  %v194_v24 = vld [vmem:[%s2878_s0 + $0x5a0] sm:$0xff] }
  0xb8   :  { %936 = vmatmul.mubr.f32.gmra.mrb[58].mxu0 %v132_v25  ;;  %555 = vmatprep.mubr.f32.mxu1 %v135_v26  ;;  %v196_v25 = vld [vmem:[%s2878_s0 + $0x5b0] sm:$0xff]  ;;  %v199_v26 = vld [vmem:[%s2878_s0 + $0x5c8] sm:$0xff] }
  0xb9   :  { %940 = vmatprep.mubr.f32.mxu0 %v137_v27  ;;  %v201_v27 = vld [vmem:[%s2878_s0 + $0x5d8] sm:$0xff] }
  0xbb   :  { %556 = vmatmul.mubr.f32.gmra.mrb[60].mxu1 %v134_v28  ;;  %v198_v28 = vld [vmem:[%s2878_s0 + $0x5c0] sm:$0xff] }
  0xbc   :  { %941 = vmatmul.mubr.f32.gmra.mrb[60].mxu0 %v136_v29  ;;  %560 = vmatprep.mubr.f32.mxu1 %v139_v30  ;;  %v200_v29 = vld [vmem:[%s2878_s0 + $0x5d0] sm:$0xff]  ;;  %v203_v30 = vld [vmem:[%s2878_s0 + $0x5e8] sm:$0xff] }
  0xbd   :  { %945 = vmatprep.mubr.f32.mxu0 %v141_v31  ;;  %v205_v31 = vld [vmem:[%s2878_s0 + $0x5f8] sm:$0xff] }
  0xbf   :  { %561 = vmatmul.mubr.f32.gmra.mrb[62].mxu1 %v138_v32  ;;  %v202_v32 = vld [vmem:[%s2878_s0 + $0x5e0] sm:$0xff] }
  0xc0   :  { %946 = vmatmul.mubr.f32.gmra.mrb[62].mxu0 %v140_v33  ;;  %565 = vmatprep.mubr.f32.mxu1 %v143_v34  ;;  %v204_v33 = vld [vmem:[%s2878_s0 + $0x5f0] sm:$0xff]  ;;  %v207_v34 = vld [vmem:[%s2878_s0 + $0x608] sm:$0xff] }
  0xc1   :  { %950 = vmatprep.mubr.f32.mxu0 %v145_v35  ;;  %v209_v35 = vld [vmem:[%s2878_s0 + $0x618] sm:$0xff] }
  0xc3   :  { %566 = vmatmul.mubr.f32.gmra.mrb[64].mxu1 %v142_v36  ;;  %v206_v36 = vld [vmem:[%s2878_s0 + $0x600] sm:$0xff] }
  0xc4   :  { %951 = vmatmul.mubr.f32.gmra.mrb[64].mxu0 %v144_v37  ;;  %570 = vmatprep.mubr.f32.mxu1 %v147_v38  ;;  %v208_v37 = vld [vmem:[%s2878_s0 + $0x610] sm:$0xff]  ;;  %v211_v38 = vld [vmem:[%s2878_s0 + $0x628] sm:$0xff] }
  0xc5   :  { %955 = vmatprep.mubr.f32.mxu0 %v149_v39  ;;  %v213_v39 = vld [vmem:[%s2878_s0 + $0x638] sm:$0xff] }
  0xc7   :  { %571 = vmatmul.mubr.f32.gmra.mrb[66].mxu1 %v146_v0  ;;  %v210_v0 = vld [vmem:[%s2878_s0 + $0x620] sm:$0xff] }
  0xc8   :  { %956 = vmatmul.mubr.f32.gmra.mrb[66].mxu0 %v148_v40  ;;  %575 = vmatprep.mubr.f32.mxu1 %v151_v41  ;;  %v212_v40 = vld [vmem:[%s2878_s0 + $0x630] sm:$0xff]  ;;  %v215_v41 = vld [vmem:[%s2878_s0 + $0x648] sm:$0xff] }
  0xc9   :  { %960 = vmatprep.mubr.f32.mxu0 %v153_v42  ;;  %v217_v42 = vld [vmem:[%s2878_s0 + $0x658] sm:$0xff] }
  0xcb   :  { %576 = vmatmul.mubr.f32.gmra.mrb[68].mxu1 %v150_v43  ;;  %v214_v43 = vld [vmem:[%s2878_s0 + $0x640] sm:$0xff] }
  0xcc   :  { %961 = vmatmul.mubr.f32.gmra.mrb[68].mxu0 %v152_v44  ;;  %580 = vmatprep.mubr.f32.mxu1 %v155_v45  ;;  %v216_v44 = vld [vmem:[%s2878_s0 + $0x650] sm:$0xff]  ;;  %v219_v45 = vld [vmem:[%s2878_s0 + $0x668] sm:$0xff] }
  0xcd   :  { %965 = vmatprep.mubr.f32.mxu0 %v157_v46  ;;  %v221_v46 = vld [vmem:[%s2878_s0 + $0x678] sm:$0xff] }
  0xcf   :  { %581 = vmatmul.mubr.f32.gmra.mrb[70].mxu1 %v154_v47  ;;  %v218_v47 = vld [vmem:[%s2878_s0 + $0x660] sm:$0xff] }
  0xd0   :  { %966 = vmatmul.mubr.f32.gmra.mrb[70].mxu0 %v156_v48  ;;  %585 = vmatprep.mubr.f32.mxu1 %v159_v49  ;;  %v220_v48 = vld [vmem:[%s2878_s0 + $0x670] sm:$0xff]  ;;  %v223_v49 = vld [vmem:[%s2878_s0 + $0x688] sm:$0xff] }
  0xd1   :  { %970 = vmatprep.mubr.f32.mxu0 %v161_v50  ;;  %v225_v50 = vld [vmem:[%s2878_s0 + $0x698] sm:$0xff] }
  0xd3   :  { %586 = vmatmul.mubr.f32.gmra.mrb[72].mxu1 %v158_v51  ;;  %v222_v51 = vld [vmem:[%s2878_s0 + $0x680] sm:$0xff] }
  0xd4   :  { %971 = vmatmul.mubr.f32.gmra.mrb[72].mxu0 %v160_v52  ;;  %590 = vmatprep.mubr.f32.mxu1 %v163_v53  ;;  %v224_v52 = vld [vmem:[%s2878_s0 + $0x690] sm:$0xff]  ;;  %v227_v53 = vld [vmem:[%s2878_s0 + $0x6a8] sm:$0xff] }
  0xd5   :  { %975 = vmatprep.mubr.f32.mxu0 %v165_v54  ;;  %v229_v54 = vld [vmem:[%s2878_s0 + $0x6b8] sm:$0xff] }
  0xd7   :  { %591 = vmatmul.mubr.f32.gmra.mrb[74].mxu1 %v162_v55  ;;  %v2488_v55 = vld [vmem:[%s2879_s2] ss:$0 sm:$0xff] }
  0xd8   :  { %976 = vmatmul.mubr.f32.gmra.mrb[74].mxu0 %v164_v56  ;;  %595 = vmatprep.mubr.f32.mxu1 %v167_v57  ;;  %v226_v56 = vld [vmem:[%s2878_s0 + $0x6a0] sm:$0xff]  ;;  %v228_v57 = vld [vmem:[%s2878_s0 + $0x6b0] sm:$0xff] }
  0xd9   :  { %980 = vmatprep.mubr.f32.mxu0 %v169_v58  ;;  %v231_v58 = vld [vmem:[%s2878_s0 + $0x6c8] sm:$0xff] }
  0xdb   :  { %596 = vmatmul.mubr.f32.gmra.mrb[76].mxu1 %v166_v59 }
  0xdc   :  { %981 = vmatmul.mubr.f32.gmra.mrb[76].mxu0 %v168_v60  ;;  %600 = vmatprep.mubr.f32.mxu1 %v171_v61  ;;  %v233_v60 = vld [vmem:[%s2878_s0 + $0x6d8] sm:$0xff] }
  0xdd   :  { %985 = vmatprep.mubr.f32.mxu0 %v173_v62 }
  0xdf   :  { %601 = vmatmul.mubr.f32.gmra.mrb[78].mxu1 %v170_v63 }
  0xe0   :  { %986 = vmatmul.mubr.f32.gmra.mrb[78].mxu0 %v172_v1  ;;  %605 = vmatprep.mubr.f32.mxu1 %v175_v2  ;;  %v230_v2 = vld [vmem:[%s2878_s0 + $0x6c0] sm:$0xff] }
  0xe1   :  { %990 = vmatprep.mubr.f32.mxu0 %v177_v3 }
  0xe3   :  { %606 = vmatmul.mubr.f32.gmra.mrb[80].mxu1 %v174_v4  ;;  %v232_v4 = vld [vmem:[%s2878_s0 + $0x6d0] sm:$0xff] }
  0xe4   :  { %991 = vmatmul.mubr.f32.gmra.mrb[80].mxu0 %v176_v5  ;;  %610 = vmatprep.mubr.f32.mxu1 %v179_v6  ;;  %v235_v5 = vld [vmem:[%s2878_s0 + $0x6e8] sm:$0xff] }
  0xe5   :  { %995 = vmatprep.mubr.f32.mxu0 %v181_v7  ;;  %v237_v7 = vld [vmem:[%s2878_s0 + $0x6f8] sm:$0xff] }
  0xe7   :  { %611 = vmatmul.mubr.f32.gmra.mrb[82].mxu1 %v178_v8 }
  0xe8   :  { %996 = vmatmul.mubr.f32.gmra.mrb[82].mxu0 %v180_v9  ;;  %615 = vmatprep.mubr.f32.mxu1 %v183_v10 }
  0xe9   :  { %1000 = vmatprep.mubr.f32.mxu0 %v185_v11 }
  0xeb   :  { %616 = vmatmul.mubr.f32.gmra.mrb[84].mxu1 %v182_v12  ;;  %v234_v12 = vld [vmem:[%s2878_s0 + $0x6e0] sm:$0xff] }
  0xec   :  { %1001 = vmatmul.mubr.f32.gmra.mrb[84].mxu0 %v184_v13  ;;  %620 = vmatprep.mubr.f32.mxu1 %v187_v14  ;;  %v236_v14 = vld [vmem:[%s2878_s0 + $0x6f0] sm:$0xff] }
  0xed   :  { %1005 = vmatprep.mubr.f32.mxu0 %v189_v15  ;;  %v239_v15 = vld [vmem:[%s2878_s0 + $0x708] sm:$0xff] }
  0xef   :  { %621 = vmatmul.mubr.f32.gmra.mrb[86].mxu1 %v186_v16 }
  0xf0   :  { %1006 = vmatmul.mubr.f32.gmra.mrb[86].mxu0 %v188_v17  ;;  %625 = vmatprep.mubr.f32.mxu1 %v191_v18  ;;  %v241_v17 = vld [vmem:[%s2878_s0 + $0x718] sm:$0xff] }
  0xf1   :  { %1010 = vmatprep.mubr.f32.mxu0 %v193_v19 }
  0xf3   :  { %626 = vmatmul.mubr.f32.gmra.mrb[88].mxu1 %v190_v20 }
  0xf4   :  { %1011 = vmatmul.mubr.f32.gmra.mrb[88].mxu0 %v192_v21  ;;  %630 = vmatprep.mubr.f32.mxu1 %v195_v22  ;;  %v238_v22 = vld [vmem:[%s2878_s0 + $0x700] sm:$0xff] }
  0xf5   :  { %1015 = vmatprep.mubr.f32.mxu0 %v197_v23 }
  0xf7   :  { %631 = vmatmul.mubr.f32.gmra.mrb[90].mxu1 %v194_v24  ;;  %v240_v24 = vld [vmem:[%s2878_s0 + $0x710] sm:$0xff] }
  0xf8   :  { %1016 = vmatmul.mubr.f32.gmra.mrb[90].mxu0 %v196_v25  ;;  %635 = vmatprep.mubr.f32.mxu1 %v199_v26  ;;  %v243_v25 = vld [vmem:[%s2878_s0 + $0x728] sm:$0xff] }
  0xf9   :  { %1020 = vmatprep.mubr.f32.mxu0 %v201_v27  ;;  %v245_v27 = vld [vmem:[%s2878_s0 + $0x738] sm:$0xff] }
  0xfb   :  { %636 = vmatmul.mubr.f32.gmra.mrb[92].mxu1 %v198_v28 }
  0xfc   :  { %1021 = vmatmul.mubr.f32.gmra.mrb[92].mxu0 %v200_v29  ;;  %640 = vmatprep.mubr.f32.mxu1 %v203_v30 }
  0xfd   :  { %1025 = vmatprep.mubr.f32.mxu0 %v205_v31 }
  0xff   :  { %641 = vmatmul.mubr.f32.gmra.mrb[94].mxu1 %v202_v32  ;;  %v242_v32 = vld [vmem:[%s2878_s0 + $0x720] sm:$0xff] }
 0x100   :  { %1026 = vmatmul.mubr.f32.gmra.mrb[94].mxu0 %v204_v33  ;;  %645 = vmatprep.mubr.f32.mxu1 %v207_v34 }
 0x101   :  { %1030 = vmatprep.mubr.f32.mxu0 %v209_v35  ;;  %v244_v35 = vld [vmem:[%s2878_s0 + $0x730] sm:$0xff] }
 0x103   :  { %646 = vmatmul.mubr.f32.gmra.mrb[96].mxu1 %v206_v36  ;;  %v247_v36 = vld [vmem:[%s2878_s0 + $0x748] sm:$0xff] }
 0x104   :  { %1031 = vmatmul.mubr.f32.gmra.mrb[96].mxu0 %v208_v37  ;;  %650 = vmatprep.mubr.f32.mxu1 %v211_v38  ;;  %v249_v38 = vld [vmem:[%s2878_s0 + $0x758] sm:$0xff] }
 0x105   :  { %1035 = vmatprep.mubr.f32.mxu0 %v213_v39 }
 0x107   :  { %651 = vmatmul.mubr.f32.gmra.mrb[98].mxu1 %v210_v0 }
 0x108   :  { %1036 = vmatmul.mubr.f32.gmra.mrb[98].mxu0 %v212_v40  ;;  %655 = vmatprep.mubr.f32.mxu1 %v215_v41 }
 0x109   :  { %1040 = vmatprep.mubr.f32.mxu0 %v217_v42  ;;  %v246_v42 = vld [vmem:[%s2878_s0 + $0x740] sm:$0xff] }
 0x10b   :  { %656 = vmatmul.mubr.f32.gmra.mrb[100].mxu1 %v214_v43 }
 0x10c   :  { %1041 = vmatmul.mubr.f32.gmra.mrb[100].mxu0 %v216_v44  ;;  %660 = vmatprep.mubr.f32.mxu1 %v219_v45  ;;  %v248_v45 = vld [vmem:[%s2878_s0 + $0x750] sm:$0xff] }
 0x10d   :  { %1045 = vmatprep.mubr.f32.mxu0 %v221_v46  ;;  %v251_v46 = vld [vmem:[%s2878_s0 + $0x768] sm:$0xff] }
 0x10f   :  { %661 = vmatmul.mubr.f32.gmra.mrb[102].mxu1 %v218_v47 }
 0x110   :  { %1046 = vmatmul.mubr.f32.gmra.mrb[102].mxu0 %v220_v48  ;;  %665 = vmatprep.mubr.f32.mxu1 %v223_v49  ;;  %v253_v48 = vld [vmem:[%s2878_s0 + $0x778] sm:$0xff] }
 0x111   :  { %1050 = vmatprep.mubr.f32.mxu0 %v225_v50 }
 0x113   :  { %666 = vmatmul.mubr.f32.gmra.mrb[104].mxu1 %v222_v51 }
 0x114   :  { %1051 = vmatmul.mubr.f32.gmra.mrb[104].mxu0 %v224_v52  ;;  %670 = vmatprep.mubr.f32.mxu1 %v227_v53  ;;  %v250_v53 = vld [vmem:[%s2878_s0 + $0x760] sm:$0xff] }
 0x115   :  { %1055 = vmatprep.mubr.f32.mxu0 %v229_v54 }
 0x116   :  { %v407_v59 = vpop.f32.mrb[0].mxu1 }
 0x117   :  { %v408_v61 = vadd.f32 %v2488_v55, %v407_v59  ;;  %v409_v62 = vpop.f32.mrb[1].mxu1  ;;  %671 = vmatmul.mubr.f32.gmra.mrb[106].mxu1 %v226_v56  ;;  %v792_v63 = vpop.f32.mrb[0].mxu0 }
 0x118   :  { %v794_v1 = vpop.f32.mrb[1].mxu0  ;;  %1056 = vmatmul.mubr.f32.gmra.mrb[106].mxu0 %v228_v57  ;;  %675 = vmatprep.mubr.f32.mxu1 %v231_v58  ;;  %v252_v57 = vld [vmem:[%s2878_s0 + $0x770] sm:$0xff]  ;;  %v255_v58 = vld [vmem:[%s2878_s0 + $0x788] sm:$0xff] }
 0x119   :  { %v793_v3 = vadd.f32 %v792_v63, %v408_v61  ;;  %1060 = vmatprep.mubr.f32.mxu0 %v233_v60  ;;  %v257_v60 = vld [vmem:[%s2878_s0 + $0x798] sm:$0xff] }
 0x11a   :  { %v412_v6 = vpop.f32.mrb[2].mxu1 }
 0x11b   :  { %1469 = vtanh.f32 %v793_v3  ;;  %v413_v8 = vadd.f32 %v2488_v55, %v412_v6  ;;  %v414_v9 = vpop.f32.mrb[3].mxu1  ;;  %676 = vmatmul.mubr.f32.gmra.mrb[108].mxu1 %v230_v2  ;;  %v797_v10 = vpop.f32.mrb[2].mxu0  ;;  %v254_v2 = vld [vmem:[%s2878_s0 + $0x780] sm:$0xff]  ;;  %v259_v6 = vld [vmem:[%s2878_s0 + $0x7a8] sm:$0xff] }
 0x11c   :  { %v799_v11 = vpop.f32.mrb[3].mxu0  ;;  %1061 = vmatmul.mubr.f32.gmra.mrb[108].mxu0 %v232_v4  ;;  %680 = vmatprep.mubr.f32.mxu1 %v235_v5  ;;  %v256_v5 = vld [vmem:[%s2878_s0 + $0x790] sm:$0xff] }
 0x11d   :  { %v798_v13 = vadd.f32 %v797_v10, %v413_v8  ;;  %1065 = vmatprep.mubr.f32.mxu0 %v237_v7  ;;  %v261_v8 = vld [vmem:[%s2878_s0 + $0x7b8] sm:$0xff] }
 0x11e   :  { %v417_v16 = vpop.f32.mrb[4].mxu1 }
 0x11f   :  { %1471 = vtanh.f32 %v798_v13  ;;  %v418_v18 = vadd.f32 %v2488_v55, %v417_v16  ;;  %v419_v19 = vpop.f32.mrb[5].mxu1  ;;  %681 = vmatmul.mubr.f32.gmra.mrb[110].mxu1 %v234_v12  ;;  %v802_v20 = vpop.f32.mrb[4].mxu0  ;;  %v258_v13 = vld [vmem:[%s2878_s0 + $0x7a0] sm:$0xff]  ;;  %v260_v16 = vld [vmem:[%s2878_s0 + $0x7b0] sm:$0xff] }
 0x120   :  { %v804_v21 = vpop.f32.mrb[5].mxu0  ;;  %1066 = vmatmul.mubr.f32.gmra.mrb[110].mxu0 %v236_v14  ;;  %685 = vmatprep.mubr.f32.mxu1 %v239_v15  ;;  %v265_v19 = vld [vmem:[%s2878_s0 + $0x7d8] sm:$0xff] }
 0x121   :  { %v803_v23 = vadd.f32 %v802_v20, %v418_v18  ;;  %1070 = vmatprep.mubr.f32.mxu0 %v241_v17  ;;  %v263_v17 = vld [vmem:[%s2878_s0 + $0x7c8] sm:$0xff] }
 0x122   :  { %v422_v26 = vpop.f32.mrb[6].mxu1 }
 0x123   :  { %1473 = vtanh.f32 %v803_v23  ;;  %v423_v28 = vadd.f32 %v2488_v55, %v422_v26  ;;  %v424_v29 = vpop.f32.mrb[7].mxu1  ;;  %686 = vmatmul.mubr.f32.gmra.mrb[112].mxu1 %v238_v22  ;;  %v807_v30 = vpop.f32.mrb[6].mxu0 }
 0x124   :  { %v809_v31 = vpop.f32.mrb[7].mxu0  ;;  %1071 = vmatmul.mubr.f32.gmra.mrb[112].mxu0 %v240_v24  ;;  %690 = vmatprep.mubr.f32.mxu1 %v243_v25  ;;  %v262_v24 = vld [vmem:[%s2878_s0 + $0x7c0] sm:$0xff] }
 0x125   :  { %v1470_v33 = vpop.eup %1469  ;;  %v808_v34 = vadd.f32 %v807_v30, %v423_v28  ;;  %1075 = vmatprep.mubr.f32.mxu0 %v245_v27  ;;  %v264_v27 = vld [vmem:[%s2878_s0 + $0x7d0] sm:$0xff]  ;;  %v267_v28 = vld [vmem:[%s2878_s0 + $0x7e8] sm:$0xff]  ;;  %v269_v30 = vld [vmem:[%s2878_s0 + $0x7f8] sm:$0xff] }
 0x126   :  { %1175 = vst [vmem:[%s2880_s3] sm:$0xff] %v1470_v33  ;;  %v427_v37 = vpop.f32.mrb[8].mxu1 }
 0x127   :  { %1475 = vtanh.f32 %v808_v34  ;;  %v428_v39 = vadd.f32 %v2488_v55, %v427_v37  ;;  %v429_v0 = vpop.f32.mrb[9].mxu1  ;;  %691 = vmatmul.mubr.f32.gmra.mrb[114].mxu1 %v242_v32  ;;  %v812_v40 = vpop.f32.mrb[8].mxu0 }
 0x128   :  { %v814_v41 = vpop.f32.mrb[9].mxu0  ;;  %1076 = vmatmul.mubr.f32.gmra.mrb[114].mxu0 %v244_v35  ;;  %695 = vmatprep.mubr.f32.mxu1 %v247_v36  ;;  %v266_v35 = vld [vmem:[%s2878_s0 + $0x7e0] sm:$0xff] }
 0x129   :  { %v1472_v43 = vpop.eup %1471  ;;  %v813_v44 = vadd.f32 %v812_v40, %v428_v39  ;;  %1080 = vmatprep.mubr.f32.mxu0 %v249_v38  ;;  %v268_v38 = vld [vmem:[%s2878_s0 + $0x7f0] sm:$0xff] }
 0x12a   :  { %1176 = vst [vmem:[%s2880_s3 + $0x8] sm:$0xff] %v1472_v43  ;;  %v432_v47 = vpop.f32.mrb[10].mxu1 }
 0x12b   :  { %1477 = vtanh.f32 %v813_v44  ;;  %v433_v49 = vadd.f32 %v2488_v55, %v432_v47  ;;  %v434_v50 = vpop.f32.mrb[11].mxu1  ;;  %696 = vmatmul.mubr.f32.gmra.mrb[116].mxu1 %v246_v42  ;;  %v817_v51 = vpop.f32.mrb[10].mxu0 }
 0x12c   :  { %v819_v52 = vpop.f32.mrb[11].mxu0  ;;  %1081 = vmatmul.mubr.f32.gmra.mrb[116].mxu0 %v248_v45  ;;  %700 = vmatprep.mubr.f32.mxu1 %v251_v46 }
 0x12d   :  { %v1474_v54 = vpop.eup %1473  ;;  %v818_v56 = vadd.f32 %v817_v51, %v433_v49  ;;  %1085 = vmatprep.mubr.f32.mxu0 %v253_v48 }
 0x12e   :  { %1177 = vst [vmem:[%s2880_s3 + $0x10] sm:$0xff] %v1474_v54  ;;  %v437_v59 = vpop.f32.mrb[12].mxu1 }
 0x12f   :  { %1479 = vtanh.f32 %v818_v56  ;;  %v438_v61 = vadd.f32 %v2488_v55, %v437_v59  ;;  %v439_v62 = vpop.f32.mrb[13].mxu1  ;;  %701 = vmatmul.mubr.f32.gmra.mrb[118].mxu1 %v250_v53  ;;  %v822_v63 = vpop.f32.mrb[12].mxu0 }
 0x130   :  { %v824_v1 = vpop.f32.mrb[13].mxu0  ;;  %1086 = vmatmul.mubr.f32.gmra.mrb[118].mxu0 %v252_v57  ;;  %705 = vmatprep.mubr.f32.mxu1 %v255_v58 }
 0x131   :  { %v1476_v3 = vpop.eup %1475  ;;  %v823_v4 = vadd.f32 %v822_v63, %v438_v61  ;;  %1090 = vmatprep.mubr.f32.mxu0 %v257_v60 }
 0x132   :  { %1178 = vst [vmem:[%s2880_s3 + $0x18] sm:$0xff] %v1476_v3  ;;  %v442_v7 = vpop.f32.mrb[14].mxu1 }
 0x133   :  { %1481 = vtanh.f32 %v823_v4  ;;  %v443_v9 = vadd.f32 %v2488_v55, %v442_v7  ;;  %v444_v10 = vpop.f32.mrb[15].mxu1  ;;  %706 = vmatmul.mubr.f32.gmra.mrb[120].mxu1 %v254_v2  ;;  %v827_v11 = vpop.f32.mrb[14].mxu0 }
 0x134   :  { %v829_v12 = vpop.f32.mrb[15].mxu0  ;;  %1091 = vmatmul.mubr.f32.gmra.mrb[120].mxu0 %v256_v5  ;;  %710 = vmatprep.mubr.f32.mxu1 %v259_v6 }
 0x135   :  { %v1478_v14 = vpop.eup %1477  ;;  %v828_v15 = vadd.f32 %v827_v11, %v443_v9  ;;  %1095 = vmatprep.mubr.f32.mxu0 %v261_v8 }
 0x136   :  { %1179 = vst [vmem:[%s2880_s3 + $0x20] sm:$0xff] %v1478_v14  ;;  %v447_v18 = vpop.f32.mrb[16].mxu1 }
 0x137   :  { %1483 = vtanh.f32 %v828_v15  ;;  %v448_v20 = vadd.f32 %v2488_v55, %v447_v18  ;;  %v449_v21 = vpop.f32.mrb[17].mxu1  ;;  %711 = vmatmul.mubr.f32.gmra.mrb[122].mxu1 %v258_v13  ;;  %v832_v22 = vpop.f32.mrb[16].mxu0 }
 0x138   :  { %v834_v23 = vpop.f32.mrb[17].mxu0  ;;  %1096 = vmatmul.mubr.f32.gmra.mrb[122].mxu0 %v260_v16  ;;  %715 = vmatprep.mubr.f32.mxu1 %v263_v17 }
 0x139   :  { %v1480_v25 = vpop.eup %1479  ;;  %v833_v26 = vadd.f32 %v832_v22, %v448_v20  ;;  %1100 = vmatprep.mubr.f32.mxu0 %v265_v19 }
 0x13a   :  { %1180 = vst [vmem:[%s2880_s3 + $0x28] sm:$0xff] %v1480_v25  ;;  %v452_v29 = vpop.f32.mrb[18].mxu1 }
 0x13b   :  { %1485 = vtanh.f32 %v833_v26  ;;  %v453_v31 = vadd.f32 %v2488_v55, %v452_v29  ;;  %v454_v32 = vpop.f32.mrb[19].mxu1  ;;  %716 = vmatmul.mubr.f32.gmra.mrb[124].mxu1 %v262_v24  ;;  %v837_v33 = vpop.f32.mrb[18].mxu0 }
 0x13c   :  { %v839_v34 = vpop.f32.mrb[19].mxu0  ;;  %1101 = vmatmul.mubr.f32.gmra.mrb[124].mxu0 %v264_v27  ;;  %720 = vmatprep.mubr.f32.mxu1 %v267_v28 }
 0x13d   :  { %v1482_v36 = vpop.eup %1481  ;;  %v838_v37 = vadd.f32 %v837_v33, %v453_v31  ;;  %1105 = vmatprep.mubr.f32.mxu0 %v269_v30 }
 0x13e   :  { %1181 = vst [vmem:[%s2880_s3 + $0x30] sm:$0xff] %v1482_v36  ;;  %v457_v39 = vpop.f32.mrb[20].mxu1 }
 0x13f   :  { %1487 = vtanh.f32 %v838_v37  ;;  %v458_v0 = vadd.f32 %v2488_v55, %v457_v39  ;;  %v459_v40 = vpop.f32.mrb[21].mxu1  ;;  %721 = vmatmul.mubr.f32.gmra.mrb[126].mxu1 %v266_v35  ;;  %v842_v41 = vpop.f32.mrb[20].mxu0 }
 0x140   :  { %v844_v42 = vpop.f32.mrb[21].mxu0  ;;  %1106 = vmatmul.mubr.f32.gmra.mrb[126].mxu0 %v268_v38 }
 0x141   :  { %v1484_v43 = vpop.eup %1483  ;;  %v843_v44 = vadd.f32 %v842_v41, %v458_v0 }
 0x142   :  { %1182 = vst [vmem:[%s2880_s3 + $0x38] sm:$0xff] %v1484_v43  ;;  %v462_v45 = vpop.f32.mrb[22].mxu1 }
 0x143   :  { %1489 = vtanh.f32 %v843_v44  ;;  %v463_v46 = vadd.f32 %v2488_v55, %v462_v45  ;;  %v464_v47 = vpop.f32.mrb[23].mxu1  ;;  %v847_v48 = vpop.f32.mrb[22].mxu0 }
 0x144   :  { %v849_v49 = vpop.f32.mrb[23].mxu0 }
 0x145   :  { %v1486_v50 = vpop.eup %1485  ;;  %v848_v51 = vadd.f32 %v847_v48, %v463_v46 }
 0x146   :  { %1183 = vst [vmem:[%s2880_s3 + $0x40] sm:$0xff] %v1486_v50  ;;  %v467_v52 = vpop.f32.mrb[24].mxu1 }
 0x147   :  { %1491 = vtanh.f32 %v848_v51  ;;  %v468_v53 = vadd.f32 %v2488_v55, %v467_v52  ;;  %v469_v54 = vpop.f32.mrb[25].mxu1  ;;  %v852_v56 = vpop.f32.mrb[24].mxu0 }
 0x148   :  { %v854_v57 = vpop.f32.mrb[25].mxu0 }
 0x149   :  { %v1488_v58 = vpop.eup %1487  ;;  %v853_v59 = vadd.f32 %v852_v56, %v468_v53 }
 0x14a   :  { %1184 = vst [vmem:[%s2880_s3 + $0x48] sm:$0xff] %v1488_v58  ;;  %v472_v60 = vpop.f32.mrb[26].mxu1 }
 0x14b   :  { %1493 = vtanh.f32 %v853_v59  ;;  %v473_v61 = vadd.f32 %v2488_v55, %v472_v60  ;;  %v474_v62 = vpop.f32.mrb[27].mxu1  ;;  %v857_v63 = vpop.f32.mrb[26].mxu0 }
 0x14c   :  { %v859_v1 = vpop.f32.mrb[27].mxu0 }
 0x14d   :  { %v1490_v2 = vpop.eup %1489  ;;  %v858_v3 = vadd.f32 %v857_v63, %v473_v61 }
 0x14e   :  { %1185 = vst [vmem:[%s2880_s3 + $0x50] sm:$0xff] %v1490_v2  ;;  %v477_v4 = vpop.f32.mrb[28].mxu1 }
 0x14f   :  { %1495 = vtanh.f32 %v858_v3  ;;  %v478_v5 = vadd.f32 %v2488_v55, %v477_v4  ;;  %v479_v6 = vpop.f32.mrb[29].mxu1  ;;  %v862_v7 = vpop.f32.mrb[28].mxu0 }
 0x150   :  { %v864_v8 = vpop.f32.mrb[29].mxu0 }
 0x151   :  { %v1492_v9 = vpop.eup %1491  ;;  %v863_v10 = vadd.f32 %v862_v7, %v478_v5 }
 0x152   :  { %1186 = vst [vmem:[%s2880_s3 + $0x58] sm:$0xff] %v1492_v9  ;;  %v482_v11 = vpop.f32.mrb[30].mxu1 }
 0x153   :  { %1497 = vtanh.f32 %v863_v10  ;;  %v483_v12 = vadd.f32 %v2488_v55, %v482_v11  ;;  %v484_v13 = vpop.f32.mrb[31].mxu1  ;;  %v867_v14 = vpop.f32.mrb[30].mxu0 }
 0x154   :  { %v869_v15 = vpop.f32.mrb[31].mxu0 }
 0x155   :  { %v1494_v16 = vpop.eup %1493  ;;  %v868_v17 = vadd.f32 %v867_v14, %v483_v12 }
 0x156   :  { %1187 = vst [vmem:[%s2880_s3 + $0x60] sm:$0xff] %v1494_v16  ;;  %v487_v18 = vpop.f32.mrb[32].mxu1 }
 0x157   :  { %1499 = vtanh.f32 %v868_v17  ;;  %v488_v19 = vadd.f32 %v2488_v55, %v487_v18  ;;  %v489_v20 = vpop.f32.mrb[33].mxu1  ;;  %v872_v21 = vpop.f32.mrb[32].mxu0 }
 0x158   :  { %v874_v22 = vpop.f32.mrb[33].mxu0 }
 0x159   :  { %v1496_v23 = vpop.eup %1495  ;;  %v873_v24 = vadd.f32 %v872_v21, %v488_v19 }
 0x15a   :  { %1188 = vst [vmem:[%s2880_s3 + $0x68] sm:$0xff] %v1496_v23  ;;  %v492_v25 = vpop.f32.mrb[34].mxu1 }
 0x15b   :  { %1501 = vtanh.f32 %v873_v24  ;;  %v493_v26 = vadd.f32 %v2488_v55, %v492_v25  ;;  %v494_v27 = vpop.f32.mrb[35].mxu1  ;;  %v877_v28 = vpop.f32.mrb[34].mxu0 }
 0x15c   :  { %v879_v29 = vpop.f32.mrb[35].mxu0 }
 0x15d   :  { %v1498_v30 = vpop.eup %1497  ;;  %v878_v31 = vadd.f32 %v877_v28, %v493_v26 }
 0x15e   :  { %1189 = vst [vmem:[%s2880_s3 + $0x70] sm:$0xff] %v1498_v30  ;;  %v497_v32 = vpop.f32.mrb[36].mxu1 }
 0x15f   :  { %1503 = vtanh.f32 %v878_v31  ;;  %v498_v33 = vadd.f32 %v2488_v55, %v497_v32  ;;  %v499_v34 = vpop.f32.mrb[37].mxu1  ;;  %v882_v35 = vpop.f32.mrb[36].mxu0 }
 0x160   :  { %v884_v36 = vpop.f32.mrb[37].mxu0 }
 0x161   :  { %v1500_v37 = vpop.eup %1499  ;;  %v883_v38 = vadd.f32 %v882_v35, %v498_v33 }
 0x162   :  { %1190 = vst [vmem:[%s2880_s3 + $0x78] sm:$0xff] %v1500_v37  ;;  %v502_v39 = vpop.f32.mrb[38].mxu1 }
 0x163   :  { %1505 = vtanh.f32 %v883_v38  ;;  %v503_v0 = vadd.f32 %v2488_v55, %v502_v39  ;;  %v504_v40 = vpop.f32.mrb[39].mxu1  ;;  %v887_v41 = vpop.f32.mrb[38].mxu0 }
 0x164   :  { %v889_v42 = vpop.f32.mrb[39].mxu0 }
 0x165   :  { %v1502_v43 = vpop.eup %1501  ;;  %v888_v44 = vadd.f32 %v887_v41, %v503_v0 }
 0x166   :  { %1191 = vst [vmem:[%s2880_s3 + $0x80] sm:$0xff] %v1502_v43  ;;  %v507_v45 = vpop.f32.mrb[40].mxu1 }
 0x167   :  { %1507 = vtanh.f32 %v888_v44  ;;  %v508_v46 = vadd.f32 %v2488_v55, %v507_v45  ;;  %v509_v47 = vpop.f32.mrb[41].mxu1  ;;  %v892_v48 = vpop.f32.mrb[40].mxu0 }
 0x168   :  { %v894_v49 = vpop.f32.mrb[41].mxu0 }
 0x169   :  { %v1504_v50 = vpop.eup %1503  ;;  %v893_v51 = vadd.f32 %v892_v48, %v508_v46 }
 0x16a   :  { %1192 = vst [vmem:[%s2880_s3 + $0x88] sm:$0xff] %v1504_v50  ;;  %v512_v52 = vpop.f32.mrb[42].mxu1 }
 0x16b   :  { %1509 = vtanh.f32 %v893_v51  ;;  %v513_v53 = vadd.f32 %v2488_v55, %v512_v52  ;;  %v514_v54 = vpop.f32.mrb[43].mxu1  ;;  %v897_v56 = vpop.f32.mrb[42].mxu0 }
 0x16c   :  { %v899_v57 = vpop.f32.mrb[43].mxu0 }
 0x16d   :  { %v1506_v58 = vpop.eup %1505  ;;  %v898_v59 = vadd.f32 %v897_v56, %v513_v53 }
 0x16e   :  { %1193 = vst [vmem:[%s2880_s3 + $0x90] sm:$0xff] %v1506_v58  ;;  %v517_v60 = vpop.f32.mrb[44].mxu1 }
 0x16f   :  { %1511 = vtanh.f32 %v898_v59  ;;  %v518_v61 = vadd.f32 %v2488_v55, %v517_v60  ;;  %v519_v62 = vpop.f32.mrb[45].mxu1  ;;  %v902_v63 = vpop.f32.mrb[44].mxu0 }
 0x170   :  { %v904_v1 = vpop.f32.mrb[45].mxu0 }
 0x171   :  { %v1508_v2 = vpop.eup %1507  ;;  %v903_v3 = vadd.f32 %v902_v63, %v518_v61 }
 0x172   :  { %1194 = vst [vmem:[%s2880_s3 + $0x98] sm:$0xff] %v1508_v2  ;;  %v522_v4 = vpop.f32.mrb[46].mxu1 }
 0x173   :  { %1513 = vtanh.f32 %v903_v3  ;;  %v523_v5 = vadd.f32 %v2488_v55, %v522_v4  ;;  %v524_v6 = vpop.f32.mrb[47].mxu1  ;;  %v907_v7 = vpop.f32.mrb[46].mxu0 }
 0x174   :  { %v909_v8 = vpop.f32.mrb[47].mxu0 }
 0x175   :  { %v1510_v9 = vpop.eup %1509  ;;  %v908_v10 = vadd.f32 %v907_v7, %v523_v5 }
 0x176   :  { %1195 = vst [vmem:[%s2880_s3 + $0xa0] sm:$0xff] %v1510_v9  ;;  %v527_v11 = vpop.f32.mrb[48].mxu1 }
 0x177   :  { %1515 = vtanh.f32 %v908_v10  ;;  %v528_v12 = vadd.f32 %v2488_v55, %v527_v11  ;;  %v529_v13 = vpop.f32.mrb[49].mxu1  ;;  %v912_v14 = vpop.f32.mrb[48].mxu0 }
 0x178   :  { %v914_v15 = vpop.f32.mrb[49].mxu0 }
 0x179   :  { %v1512_v16 = vpop.eup %1511  ;;  %v913_v17 = vadd.f32 %v912_v14, %v528_v12 }
 0x17a   :  { %1196 = vst [vmem:[%s2880_s3 + $0xa8] sm:$0xff] %v1512_v16  ;;  %v532_v18 = vpop.f32.mrb[50].mxu1 }
 0x17b   :  { %1517 = vtanh.f32 %v913_v17  ;;  %v533_v19 = vadd.f32 %v2488_v55, %v532_v18  ;;  %v534_v20 = vpop.f32.mrb[51].mxu1  ;;  %v917_v21 = vpop.f32.mrb[50].mxu0 }
 0x17c   :  { %v919_v22 = vpop.f32.mrb[51].mxu0 }
 0x17d   :  { %v1514_v23 = vpop.eup %1513  ;;  %v918_v24 = vadd.f32 %v917_v21, %v533_v19 }
 0x17e   :  { %1197 = vst [vmem:[%s2880_s3 + $0xb0] sm:$0xff] %v1514_v23  ;;  %v537_v25 = vpop.f32.mrb[52].mxu1 }
 0x17f   :  { %1519 = vtanh.f32 %v918_v24  ;;  %v538_v26 = vadd.f32 %v2488_v55, %v537_v25  ;;  %v539_v27 = vpop.f32.mrb[53].mxu1  ;;  %v922_v28 = vpop.f32.mrb[52].mxu0 }
 0x180   :  { %v924_v29 = vpop.f32.mrb[53].mxu0 }
 0x181   :  { %v1516_v30 = vpop.eup %1515  ;;  %v923_v31 = vadd.f32 %v922_v28, %v538_v26 }
 0x182   :  { %1198 = vst [vmem:[%s2880_s3 + $0xb8] sm:$0xff] %v1516_v30  ;;  %v542_v32 = vpop.f32.mrb[54].mxu1 }
 0x183   :  { %1521 = vtanh.f32 %v923_v31  ;;  %v543_v33 = vadd.f32 %v2488_v55, %v542_v32  ;;  %v544_v34 = vpop.f32.mrb[55].mxu1  ;;  %v927_v35 = vpop.f32.mrb[54].mxu0 }
 0x184   :  { %v929_v36 = vpop.f32.mrb[55].mxu0 }
 0x185   :  { %v1518_v37 = vpop.eup %1517  ;;  %v928_v38 = vadd.f32 %v927_v35, %v543_v33 }
 0x186   :  { %1199 = vst [vmem:[%s2880_s3 + $0xc0] sm:$0xff] %v1518_v37  ;;  %v547_v39 = vpop.f32.mrb[56].mxu1 }
 0x187   :  { %1523 = vtanh.f32 %v928_v38  ;;  %v548_v0 = vadd.f32 %v2488_v55, %v547_v39  ;;  %v549_v40 = vpop.f32.mrb[57].mxu1  ;;  %v932_v41 = vpop.f32.mrb[56].mxu0 }
 0x188   :  { %v934_v42 = vpop.f32.mrb[57].mxu0 }
 0x189   :  { %v1520_v43 = vpop.eup %1519  ;;  %v933_v44 = vadd.f32 %v932_v41, %v548_v0 }
 0x18a   :  { %1200 = vst [vmem:[%s2880_s3 + $0xc8] sm:$0xff] %v1520_v43  ;;  %v552_v45 = vpop.f32.mrb[58].mxu1 }
 0x18b   :  { %1525 = vtanh.f32 %v933_v44  ;;  %v553_v46 = vadd.f32 %v2488_v55, %v552_v45  ;;  %v554_v47 = vpop.f32.mrb[59].mxu1  ;;  %v937_v48 = vpop.f32.mrb[58].mxu0 }
 0x18c   :  { %v939_v49 = vpop.f32.mrb[59].mxu0 }
 0x18d   :  { %v1522_v50 = vpop.eup %1521  ;;  %v938_v51 = vadd.f32 %v937_v48, %v553_v46 }
 0x18e   :  { %1201 = vst [vmem:[%s2880_s3 + $0xd0] sm:$0xff] %v1522_v50  ;;  %v557_v52 = vpop.f32.mrb[60].mxu1 }
 0x18f   :  { %1527 = vtanh.f32 %v938_v51  ;;  %v558_v53 = vadd.f32 %v2488_v55, %v557_v52  ;;  %v559_v54 = vpop.f32.mrb[61].mxu1  ;;  %v942_v56 = vpop.f32.mrb[60].mxu0 }
 0x190   :  { %v944_v57 = vpop.f32.mrb[61].mxu0 }
 0x191   :  { %v1524_v58 = vpop.eup %1523  ;;  %v943_v59 = vadd.f32 %v942_v56, %v558_v53 }
 0x192   :  { %1202 = vst [vmem:[%s2880_s3 + $0xd8] sm:$0xff] %v1524_v58  ;;  %v562_v60 = vpop.f32.mrb[62].mxu1 }
 0x193   :  { %1529 = vtanh.f32 %v943_v59  ;;  %v563_v61 = vadd.f32 %v2488_v55, %v562_v60  ;;  %v564_v62 = vpop.f32.mrb[63].mxu1  ;;  %v947_v63 = vpop.f32.mrb[62].mxu0 }
 0x194   :  { %v949_v1 = vpop.f32.mrb[63].mxu0 }
 0x195   :  { %v1526_v2 = vpop.eup %1525  ;;  %v948_v3 = vadd.f32 %v947_v63, %v563_v61 }
 0x196   :  { %1203 = vst [vmem:[%s2880_s3 + $0xe0] sm:$0xff] %v1526_v2  ;;  %v567_v4 = vpop.f32.mrb[64].mxu1 }
 0x197   :  { %1531 = vtanh.f32 %v948_v3  ;;  %v568_v5 = vadd.f32 %v2488_v55, %v567_v4  ;;  %v569_v6 = vpop.f32.mrb[65].mxu1  ;;  %v952_v7 = vpop.f32.mrb[64].mxu0 }
 0x198   :  { %v954_v8 = vpop.f32.mrb[65].mxu0 }
 0x199   :  { %v1528_v9 = vpop.eup %1527  ;;  %v953_v10 = vadd.f32 %v952_v7, %v568_v5 }
 0x19a   :  { %1204 = vst [vmem:[%s2880_s3 + $0xe8] sm:$0xff] %v1528_v9  ;;  %v572_v11 = vpop.f32.mrb[66].mxu1 }
 0x19b   :  { %1533 = vtanh.f32 %v953_v10  ;;  %v573_v12 = vadd.f32 %v2488_v55, %v572_v11  ;;  %v574_v13 = vpop.f32.mrb[67].mxu1  ;;  %v957_v14 = vpop.f32.mrb[66].mxu0 }
 0x19c   :  { %v959_v15 = vpop.f32.mrb[67].mxu0 }
 0x19d   :  { %v1530_v16 = vpop.eup %1529  ;;  %v958_v17 = vadd.f32 %v957_v14, %v573_v12 }
 0x19e   :  { %1205 = vst [vmem:[%s2880_s3 + $0xf0] sm:$0xff] %v1530_v16  ;;  %v577_v18 = vpop.f32.mrb[68].mxu1 }
 0x19f   :  { %1535 = vtanh.f32 %v958_v17  ;;  %v578_v19 = vadd.f32 %v2488_v55, %v577_v18  ;;  %v579_v20 = vpop.f32.mrb[69].mxu1  ;;  %v962_v21 = vpop.f32.mrb[68].mxu0 }
 0x1a0   :  { %v964_v22 = vpop.f32.mrb[69].mxu0 }
 0x1a1   :  { %v1532_v23 = vpop.eup %1531  ;;  %v963_v24 = vadd.f32 %v962_v21, %v578_v19 }
 0x1a2   :  { %1206 = vst [vmem:[%s2880_s3 + $0xf8] sm:$0xff] %v1532_v23  ;;  %v582_v25 = vpop.f32.mrb[70].mxu1 }
 0x1a3   :  { %1537 = vtanh.f32 %v963_v24  ;;  %v583_v26 = vadd.f32 %v2488_v55, %v582_v25  ;;  %v584_v27 = vpop.f32.mrb[71].mxu1  ;;  %v967_v28 = vpop.f32.mrb[70].mxu0 }
 0x1a4   :  { %v969_v29 = vpop.f32.mrb[71].mxu0 }
 0x1a5   :  { %v1534_v30 = vpop.eup %1533  ;;  %v968_v31 = vadd.f32 %v967_v28, %v583_v26 }
 0x1a6   :  { %1207 = vst [vmem:[%s2880_s3 + $0x100] sm:$0xff] %v1534_v30  ;;  %v587_v32 = vpop.f32.mrb[72].mxu1 }
 0x1a7   :  { %1539 = vtanh.f32 %v968_v31  ;;  %v588_v33 = vadd.f32 %v2488_v55, %v587_v32  ;;  %v589_v34 = vpop.f32.mrb[73].mxu1  ;;  %v972_v35 = vpop.f32.mrb[72].mxu0 }
 0x1a8   :  { %v974_v36 = vpop.f32.mrb[73].mxu0 }
 0x1a9   :  { %v1536_v37 = vpop.eup %1535  ;;  %v973_v38 = vadd.f32 %v972_v35, %v588_v33 }
 0x1aa   :  { %1208 = vst [vmem:[%s2880_s3 + $0x108] sm:$0xff] %v1536_v37  ;;  %v592_v39 = vpop.f32.mrb[74].mxu1 }
 0x1ab   :  { %1541 = vtanh.f32 %v973_v38  ;;  %v593_v0 = vadd.f32 %v2488_v55, %v592_v39  ;;  %v594_v40 = vpop.f32.mrb[75].mxu1  ;;  %v977_v41 = vpop.f32.mrb[74].mxu0 }
 0x1ac   :  { %v979_v42 = vpop.f32.mrb[75].mxu0 }
 0x1ad   :  { %v1538_v43 = vpop.eup %1537  ;;  %v978_v44 = vadd.f32 %v977_v41, %v593_v0 }
 0x1ae   :  { %1209 = vst [vmem:[%s2880_s3 + $0x110] sm:$0xff] %v1538_v43  ;;  %v597_v45 = vpop.f32.mrb[76].mxu1 }
 0x1af   :  { %1543 = vtanh.f32 %v978_v44  ;;  %v598_v46 = vadd.f32 %v2488_v55, %v597_v45  ;;  %v599_v47 = vpop.f32.mrb[77].mxu1  ;;  %v982_v48 = vpop.f32.mrb[76].mxu0 }
 0x1b0   :  { %v984_v49 = vpop.f32.mrb[77].mxu0 }
 0x1b1   :  { %v1540_v50 = vpop.eup %1539  ;;  %v983_v51 = vadd.f32 %v982_v48, %v598_v46 }
 0x1b2   :  { %1210 = vst [vmem:[%s2880_s3 + $0x118] sm:$0xff] %v1540_v50  ;;  %v602_v52 = vpop.f32.mrb[78].mxu1 }
 0x1b3   :  { %1545 = vtanh.f32 %v983_v51  ;;  %v603_v53 = vadd.f32 %v2488_v55, %v602_v52  ;;  %v604_v54 = vpop.f32.mrb[79].mxu1  ;;  %v987_v56 = vpop.f32.mrb[78].mxu0 }
 0x1b4   :  { %v989_v57 = vpop.f32.mrb[79].mxu0 }
 0x1b5   :  { %v1542_v58 = vpop.eup %1541  ;;  %v988_v59 = vadd.f32 %v987_v56, %v603_v53  ;;  %v2802_v53 = vld [vmem:[%s2879_s2] ss:$0 sm:$0xff] }
 0x1b6   :  { %1211 = vst [vmem:[%s2880_s3 + $0x120] sm:$0xff] %v1542_v58  ;;  %v607_v60 = vpop.f32.mrb[80].mxu1 }
 0x1b7   :  { %1547 = vtanh.f32 %v988_v59  ;;  %v608_v61 = vadd.f32 %v2488_v55, %v607_v60  ;;  %v609_v62 = vpop.f32.mrb[81].mxu1  ;;  %v992_v63 = vpop.f32.mrb[80].mxu0 }
 0x1b8   :  { %v994_v1 = vpop.f32.mrb[81].mxu0 }
 0x1b9   :  { %v1544_v2 = vpop.eup %1543  ;;  %v993_v3 = vadd.f32 %v992_v63, %v608_v61 }
 0x1ba   :  { %1212 = vst [vmem:[%s2880_s3 + $0x128] sm:$0xff] %v1544_v2  ;;  %v612_v4 = vpop.f32.mrb[82].mxu1 }
 0x1bb   :  { %1549 = vtanh.f32 %v993_v3  ;;  %v613_v5 = vadd.f32 %v2488_v55, %v612_v4  ;;  %v614_v6 = vpop.f32.mrb[83].mxu1  ;;  %v997_v7 = vpop.f32.mrb[82].mxu0 }
 0x1bc   :  { %v999_v8 = vpop.f32.mrb[83].mxu0 }
 0x1bd   :  { %v1546_v9 = vpop.eup %1545  ;;  %v998_v10 = vadd.f32 %v997_v7, %v613_v5 }
 0x1be   :  { %1213 = vst [vmem:[%s2880_s3 + $0x130] sm:$0xff] %v1546_v9  ;;  %v617_v11 = vpop.f32.mrb[84].mxu1 }
 0x1bf   :  { %1551 = vtanh.f32 %v998_v10  ;;  %v618_v12 = vadd.f32 %v2488_v55, %v617_v11  ;;  %v619_v13 = vpop.f32.mrb[85].mxu1  ;;  %v1002_v14 = vpop.f32.mrb[84].mxu0 }
 0x1c0   :  { %v1004_v15 = vpop.f32.mrb[85].mxu0 }
 0x1c1   :  { %v1548_v16 = vpop.eup %1547  ;;  %v1003_v17 = vadd.f32 %v1002_v14, %v618_v12 }
 0x1c2   :  { %1214 = vst [vmem:[%s2880_s3 + $0x138] sm:$0xff] %v1548_v16  ;;  %v622_v18 = vpop.f32.mrb[86].mxu1 }
 0x1c3   :  { %1553 = vtanh.f32 %v1003_v17  ;;  %v623_v19 = vadd.f32 %v2488_v55, %v622_v18  ;;  %v624_v20 = vpop.f32.mrb[87].mxu1  ;;  %v1007_v21 = vpop.f32.mrb[86].mxu0 }
 0x1c4   :  { %v1009_v22 = vpop.f32.mrb[87].mxu0 }
 0x1c5   :  { %v1550_v23 = vpop.eup %1549  ;;  %v1008_v24 = vadd.f32 %v1007_v21, %v623_v19 }
 0x1c6   :  { %1215 = vst [vmem:[%s2880_s3 + $0x140] sm:$0xff] %v1550_v23  ;;  %v627_v25 = vpop.f32.mrb[88].mxu1 }
 0x1c7   :  { %1555 = vtanh.f32 %v1008_v24  ;;  %v628_v26 = vadd.f32 %v2488_v55, %v627_v25  ;;  %v629_v27 = vpop.f32.mrb[89].mxu1  ;;  %v1012_v28 = vpop.f32.mrb[88].mxu0 }
 0x1c8   :  { %v1014_v29 = vpop.f32.mrb[89].mxu0 }
 0x1c9   :  { %v1552_v30 = vpop.eup %1551  ;;  %v1013_v31 = vadd.f32 %v1012_v28, %v628_v26 }
 0x1ca   :  { %1216 = vst [vmem:[%s2880_s3 + $0x148] sm:$0xff] %v1552_v30  ;;  %v632_v32 = vpop.f32.mrb[90].mxu1 }
 0x1cb   :  { %1557 = vtanh.f32 %v1013_v31  ;;  %v633_v33 = vadd.f32 %v2488_v55, %v632_v32  ;;  %v634_v34 = vpop.f32.mrb[91].mxu1  ;;  %v1017_v35 = vpop.f32.mrb[90].mxu0 }
 0x1cc   :  { %v1019_v36 = vpop.f32.mrb[91].mxu0 }
 0x1cd   :  { %v1554_v37 = vpop.eup %1553  ;;  %v1018_v38 = vadd.f32 %v1017_v35, %v633_v33 }
 0x1ce   :  { %1217 = vst [vmem:[%s2880_s3 + $0x150] sm:$0xff] %v1554_v37  ;;  %v637_v39 = vpop.f32.mrb[92].mxu1 }
 0x1cf   :  { %1559 = vtanh.f32 %v1018_v38  ;;  %v638_v0 = vadd.f32 %v2488_v55, %v637_v39  ;;  %v639_v40 = vpop.f32.mrb[93].mxu1  ;;  %v1022_v41 = vpop.f32.mrb[92].mxu0 }
 0x1d0   :  { %v1024_v42 = vpop.f32.mrb[93].mxu0 }
 0x1d1   :  { %v1556_v43 = vpop.eup %1555  ;;  %v1023_v44 = vadd.f32 %v1022_v41, %v638_v0 }
 0x1d2   :  { %1218 = vst [vmem:[%s2880_s3 + $0x158] sm:$0xff] %v1556_v43  ;;  %v642_v45 = vpop.f32.mrb[94].mxu1 }
 0x1d3   :  { %1561 = vtanh.f32 %v1023_v44  ;;  %v643_v46 = vadd.f32 %v2488_v55, %v642_v45  ;;  %v644_v47 = vpop.f32.mrb[95].mxu1  ;;  %v1027_v48 = vpop.f32.mrb[94].mxu0 }
 0x1d4   :  { %v1029_v49 = vpop.f32.mrb[95].mxu0 }
 0x1d5   :  { %v1558_v50 = vpop.eup %1557  ;;  %v1028_v51 = vadd.f32 %v1027_v48, %v643_v46 }
 0x1d6   :  { %1219 = vst [vmem:[%s2880_s3 + $0x160] sm:$0xff] %v1558_v50  ;;  %v647_v52 = vpop.f32.mrb[96].mxu1 }
 0x1d7   :  { %1563 = vtanh.f32 %v1028_v51  ;;  %v648_v54 = vadd.f32 %v2802_v53, %v647_v52  ;;  %v649_v56 = vpop.f32.mrb[97].mxu1  ;;  %v1032_v55 = vpop.f32.mrb[96].mxu0 }
 0x1d8   :  { %v1034_v57 = vpop.f32.mrb[97].mxu0 }
 0x1d9   :  { %v1560_v58 = vpop.eup %1559  ;;  %v1033_v59 = vadd.f32 %v1032_v55, %v648_v54 }
 0x1da   :  { %1220 = vst [vmem:[%s2880_s3 + $0x168] sm:$0xff] %v1560_v58  ;;  %v652_v60 = vpop.f32.mrb[98].mxu1 }
 0x1db   :  { %1565 = vtanh.f32 %v1033_v59  ;;  %v653_v61 = vadd.f32 %v2802_v53, %v652_v60  ;;  %v654_v62 = vpop.f32.mrb[99].mxu1  ;;  %v1037_v63 = vpop.f32.mrb[98].mxu0 }
 0x1dc   :  { %v1039_v1 = vpop.f32.mrb[99].mxu0 }
 0x1dd   :  { %v1562_v2 = vpop.eup %1561  ;;  %v1038_v3 = vadd.f32 %v1037_v63, %v653_v61 }
 0x1de   :  { %1221 = vst [vmem:[%s2880_s3 + $0x170] sm:$0xff] %v1562_v2  ;;  %v657_v4 = vpop.f32.mrb[100].mxu1 }
 0x1df   :  { %1567 = vtanh.f32 %v1038_v3  ;;  %v658_v5 = vadd.f32 %v2802_v53, %v657_v4  ;;  %v659_v6 = vpop.f32.mrb[101].mxu1  ;;  %v1042_v7 = vpop.f32.mrb[100].mxu0 }
 0x1e0   :  { %v1044_v8 = vpop.f32.mrb[101].mxu0 }
 0x1e1   :  { %v1564_v9 = vpop.eup %1563  ;;  %v1043_v10 = vadd.f32 %v1042_v7, %v658_v5 }
 0x1e2   :  { %1222 = vst [vmem:[%s2880_s3 + $0x178] sm:$0xff] %v1564_v9  ;;  %v662_v11 = vpop.f32.mrb[102].mxu1 }
 0x1e3   :  { %1569 = vtanh.f32 %v1043_v10  ;;  %v663_v12 = vadd.f32 %v2802_v53, %v662_v11  ;;  %v664_v13 = vpop.f32.mrb[103].mxu1  ;;  %v1047_v14 = vpop.f32.mrb[102].mxu0 }
 0x1e4   :  { %v1049_v15 = vpop.f32.mrb[103].mxu0 }
 0x1e5   :  { %v1566_v16 = vpop.eup %1565  ;;  %v1048_v17 = vadd.f32 %v1047_v14, %v663_v12 }
 0x1e6   :  { %1223 = vst [vmem:[%s2880_s3 + $0x180] sm:$0xff] %v1566_v16  ;;  %v667_v18 = vpop.f32.mrb[104].mxu1 }
 0x1e7   :  { %1571 = vtanh.f32 %v1048_v17  ;;  %v668_v19 = vadd.f32 %v2802_v53, %v667_v18  ;;  %v669_v20 = vpop.f32.mrb[105].mxu1  ;;  %v1052_v21 = vpop.f32.mrb[104].mxu0 }
 0x1e8   :  { %v1054_v22 = vpop.f32.mrb[105].mxu0 }
 0x1e9   :  { %v1568_v23 = vpop.eup %1567  ;;  %v1053_v24 = vadd.f32 %v1052_v21, %v668_v19 }
 0x1ea   :  { %1224 = vst [vmem:[%s2880_s3 + $0x188] sm:$0xff] %v1568_v23  ;;  %v672_v25 = vpop.f32.mrb[106].mxu1 }
 0x1eb   :  { %1573 = vtanh.f32 %v1053_v24  ;;  %v673_v26 = vadd.f32 %v2802_v53, %v672_v25  ;;  %v674_v27 = vpop.f32.mrb[107].mxu1  ;;  %v1057_v28 = vpop.f32.mrb[106].mxu0 }
 0x1ec   :  { %v1059_v29 = vpop.f32.mrb[107].mxu0 }
 0x1ed   :  { %v1570_v30 = vpop.eup %1569  ;;  %v1058_v31 = vadd.f32 %v1057_v28, %v673_v26 }
 0x1ee   :  { %1225 = vst [vmem:[%s2880_s3 + $0x190] sm:$0xff] %v1570_v30  ;;  %v677_v32 = vpop.f32.mrb[108].mxu1 }
 0x1ef   :  { %1575 = vtanh.f32 %v1058_v31  ;;  %v678_v33 = vadd.f32 %v2802_v53, %v677_v32  ;;  %v679_v34 = vpop.f32.mrb[109].mxu1  ;;  %v1062_v35 = vpop.f32.mrb[108].mxu0 }
 0x1f0   :  { %v1064_v36 = vpop.f32.mrb[109].mxu0 }
 0x1f1   :  { %v1572_v37 = vpop.eup %1571  ;;  %v1063_v38 = vadd.f32 %v1062_v35, %v678_v33 }
 0x1f2   :  { %1226 = vst [vmem:[%s2880_s3 + $0x198] sm:$0xff] %v1572_v37  ;;  %v682_v39 = vpop.f32.mrb[110].mxu1 }
 0x1f3   :  { %1577 = vtanh.f32 %v1063_v38  ;;  %v683_v0 = vadd.f32 %v2802_v53, %v682_v39  ;;  %v684_v40 = vpop.f32.mrb[111].mxu1  ;;  %v1067_v41 = vpop.f32.mrb[110].mxu0 }
 0x1f4   :  { %v1069_v42 = vpop.f32.mrb[111].mxu0 }
 0x1f5   :  { %v1574_v43 = vpop.eup %1573  ;;  %v1068_v44 = vadd.f32 %v1067_v41, %v683_v0 }
 0x1f6   :  { %1227 = vst [vmem:[%s2880_s3 + $0x1a0] sm:$0xff] %v1574_v43  ;;  %v687_v45 = vpop.f32.mrb[112].mxu1 }
 0x1f7   :  { %1579 = vtanh.f32 %v1068_v44  ;;  %v688_v46 = vadd.f32 %v2802_v53, %v687_v45  ;;  %v689_v47 = vpop.f32.mrb[113].mxu1  ;;  %v1072_v48 = vpop.f32.mrb[112].mxu0 }
 0x1f8   :  { %v1074_v49 = vpop.f32.mrb[113].mxu0 }
 0x1f9   :  { %v1576_v50 = vpop.eup %1575  ;;  %v1073_v51 = vadd.f32 %v1072_v48, %v688_v46 }
 0x1fa   :  { %1228 = vst [vmem:[%s2880_s3 + $0x1a8] sm:$0xff] %v1576_v50  ;;  %v692_v52 = vpop.f32.mrb[114].mxu1 }
 0x1fb   :  { %1581 = vtanh.f32 %v1073_v51  ;;  %v693_v54 = vadd.f32 %v2802_v53, %v692_v52  ;;  %v694_v56 = vpop.f32.mrb[115].mxu1  ;;  %v1077_v55 = vpop.f32.mrb[114].mxu0 }
 0x1fc   :  { %v1079_v57 = vpop.f32.mrb[115].mxu0 }
 0x1fd   :  { %v1578_v58 = vpop.eup %1577  ;;  %v1078_v59 = vadd.f32 %v1077_v55, %v693_v54 }
 0x1fe   :  { %1229 = vst [vmem:[%s2880_s3 + $0x1b0] sm:$0xff] %v1578_v58  ;;  %v697_v60 = vpop.f32.mrb[116].mxu1 }
 0x1ff   :  { %1583 = vtanh.f32 %v1078_v59  ;;  %v698_v61 = vadd.f32 %v2802_v53, %v697_v60  ;;  %v699_v62 = vpop.f32.mrb[117].mxu1  ;;  %v1082_v63 = vpop.f32.mrb[116].mxu0 }
 0x200   :  { %v1084_v1 = vpop.f32.mrb[117].mxu0 }
 0x201   :  { %v1580_v2 = vpop.eup %1579  ;;  %v1083_v3 = vadd.f32 %v1082_v63, %v698_v61 }
 0x202   :  { %1230 = vst [vmem:[%s2880_s3 + $0x1b8] sm:$0xff] %v1580_v2  ;;  %v702_v4 = vpop.f32.mrb[118].mxu1 }
 0x203   :  { %1585 = vtanh.f32 %v1083_v3  ;;  %v703_v5 = vadd.f32 %v2802_v53, %v702_v4  ;;  %v704_v6 = vpop.f32.mrb[119].mxu1  ;;  %v1087_v7 = vpop.f32.mrb[118].mxu0 }
 0x204   :  { %v1089_v8 = vpop.f32.mrb[119].mxu0 }
 0x205   :  { %v1582_v9 = vpop.eup %1581  ;;  %v1088_v10 = vadd.f32 %v1087_v7, %v703_v5 }
 0x206   :  { %1231 = vst [vmem:[%s2880_s3 + $0x1c0] sm:$0xff] %v1582_v9  ;;  %v707_v11 = vpop.f32.mrb[120].mxu1 }
 0x207   :  { %1587 = vtanh.f32 %v1088_v10  ;;  %v708_v12 = vadd.f32 %v2802_v53, %v707_v11  ;;  %v709_v13 = vpop.f32.mrb[121].mxu1  ;;  %v1092_v14 = vpop.f32.mrb[120].mxu0 }
 0x208   :  { %v1094_v15 = vpop.f32.mrb[121].mxu0 }
 0x209   :  { %v1584_v16 = vpop.eup %1583  ;;  %v1093_v17 = vadd.f32 %v1092_v14, %v708_v12 }
 0x20a   :  { %1232 = vst [vmem:[%s2880_s3 + $0x1c8] sm:$0xff] %v1584_v16  ;;  %v712_v18 = vpop.f32.mrb[122].mxu1 }
 0x20b   :  { %1589 = vtanh.f32 %v1093_v17  ;;  %v713_v19 = vadd.f32 %v2802_v53, %v712_v18  ;;  %v714_v20 = vpop.f32.mrb[123].mxu1  ;;  %v1097_v21 = vpop.f32.mrb[122].mxu0 }
 0x20c   :  { %v1099_v22 = vpop.f32.mrb[123].mxu0 }
 0x20d   :  { %v1586_v23 = vpop.eup %1585  ;;  %v1098_v24 = vadd.f32 %v1097_v21, %v713_v19 }
 0x20e   :  { %1233 = vst [vmem:[%s2880_s3 + $0x1d0] sm:$0xff] %v1586_v23  ;;  %v717_v25 = vpop.f32.mrb[124].mxu1 }
 0x20f   :  { %1591 = vtanh.f32 %v1098_v24  ;;  %v718_v26 = vadd.f32 %v2802_v53, %v717_v25  ;;  %v719_v27 = vpop.f32.mrb[125].mxu1  ;;  %v1102_v28 = vpop.f32.mrb[124].mxu0 }
 0x210   :  { %v1104_v29 = vpop.f32.mrb[125].mxu0 }
 0x211   :  { %v1588_v30 = vpop.eup %1587  ;;  %v1103_v31 = vadd.f32 %v1102_v28, %v718_v26 }
 0x212   :  { %1234 = vst [vmem:[%s2880_s3 + $0x1d8] sm:$0xff] %v1588_v30  ;;  %v722_v32 = vpop.f32.mrb[126].mxu1 }
 0x213   :  { %1593 = vtanh.f32 %v1103_v31  ;;  %v723_v33 = vadd.f32 %v2802_v53, %v722_v32  ;;  %v724_v34 = vpop.f32.mrb[127].mxu1  ;;  %v1107_v35 = vpop.f32.mrb[126].mxu0 }
 0x214   :  { %v1109_v36 = vpop.f32.mrb[127].mxu0 }
 0x215   :  { %v1590_v37 = vpop.eup %1589  ;;  %v1108_v38 = vadd.f32 %v1107_v35, %v723_v33 }
 0x216   :  { %1235 = vst [vmem:[%s2880_s3 + $0x1e0] sm:$0xff] %v1590_v37 }
 0x217   :  { %1595 = vtanh.f32 %v1108_v38 }
 0x219   :  { %v1592_v39 = vpop.eup %1591 }
 0x21a   :  { %1236 = vst [vmem:[%s2880_s3 + $0x1e8] sm:$0xff] %v1592_v39 }
 0x21d   :  { %v1594_v0 = vpop.eup %1593 }
 0x21e   :  { %1237 = vst [vmem:[%s2880_s3 + $0x1f0] sm:$0xff] %v1594_v0 }
 0x221   :  { %v1596_v53 = vpop.eup %1595 }
 0x222   :  { %1238 = vst [vmem:[%s2880_s3 + $0x1f8] sm:$0xff] %v1596_v53 }

</bundles_post_ra>
